<compile_context>
chip_gen: v5e
topology: v5e:2x2
jax: 0.10.0
libtpu: 0.0.40
codegen_flags: <defaults>
</compile_context>

<pallas_src>
import functools

import jax
import jax.numpy as jnp
import numpy as np
from jax import lax
from jax.experimental import pallas as pl
from jax.experimental.pallas import tpu as pltpu

EPS = 1e-5
_LANE = 128

# rows of the packed bias / LayerNorm slab `vecs` (R, 1, W)
_ROW_B1, _ROW_G, _ROW_BE, _ROW_B2 = 0, 1, 2, 3
_ROW_AG1, _ROW_AB1, _ROW_AB, _ROW_AG2, _ROW_AB2 = 4, 5, 6, 7, 8
_ROW_BEDGE, _ROW_FING, _ROW_FINB, _ROW_MHB = 9, 10, 11, 12
_LAYER_BASE, _ROWS_PER_LAYER = 13, 9
# per layer rows: +0 bnode(5D) +1 mb1(4D) +2 b_ih +3 b_out +4 mb2
#                 +5 g1 +6 beta1 +7 g2 +8 beta2


def _ln(v, g, b):
    mu = jnp.mean(v, axis=-1, keepdims=True)
    var = jnp.mean((v - mu) ** 2, axis=-1, keepdims=True)
    return (v - mu) * lax.rsqrt(var + EPS) * g + b


def _dot(a, b):
    return jnp.dot(a, b, preferred_element_type=jnp.float32)


# ------------------------------ fused kernel --------------------------------


def fused_forward_kernel(rel_ref, eic_ref, eir_ref, x0_ref,
                         wpack_ref, wnode_ref, wedge_ref, wpost_ref,
                         wmlp1_ref, wmlp2_ref, mhw_ref, vecs_ref, out_ref,
                         *, num_layers, num_heads):
    N, D = x0_ref.shape
    E = rel_ref.shape[0]
    H = num_heads
    Hp = -(-H // 8) * 8
    r0 = rel_ref.shape[1]                 # sublane rows used by the rel block
    D2, D3, D4, D5 = 2 * D, 3 * D, 4 * D, 5 * D

    def row(r, w):
        return vecs_ref[r][:, :w]         # (1, w) bias / LN row

    # -------- graph one-hots, built in-register from the int32 edge index ---
    src_col = eic_ref[:, 0:1]                                   # (E, 1)
    dst_col = eic_ref[:, 1:2]                                   # (E, 1)
    dst_row = eir_ref[1:2, :]                                   # (1, E)
    iota_en = lax.broadcasted_iota(jnp.int32, (E, N), 1)
    iota_ne = lax.broadcasted_iota(jnp.int32, (N, E), 0)
    soh = (iota_en == src_col).astype(jnp.float32)              # (E, N) gather src
    doh = (iota_en == dst_col).astype(jnp.float32)              # (E, N) gather dst
    dmask = iota_ne == dst_row                                  # (N, E) bool
    dohT = dmask.astype(jnp.float32)                            # (N, E) scatter-add

    # per-head reduce / broadcast maps (layer-invariant, loaded once;
    # 1/sqrt(head_dim) attention scale already folded into hs)
    hs = wpack_ref[r0 + D3:r0 + D4, :H]                         # (D, H)
    hsT = wpack_ref[r0 + D4:r0 + D4 + Hp, :D][:H, :]            # (H, D)

    # ---------------- rel_embed: both branches in one matmul ----------------
    u = _dot(rel_ref[...], wpack_ref[:r0, :]) + row(_ROW_B1, D2)     # (E, 2D)
    g, be = row(_ROW_G, D2), row(_ROW_BE, D2)
    ta = jnp.maximum(_ln(u[:, :D], g[:, :D], be[:, :D]), 0.0)
    tb = jnp.maximum(_ln(u[:, D:], g[:, D:], be[:, D:]), 0.0)
    ea = _dot(jnp.concatenate([ta, tb], axis=1),
              wpack_ref[r0:r0 + D2, :D]) + row(_ROW_B2, D)           # (E, D)
    ea = jnp.maximum(_ln(ea, row(_ROW_AG1, D), row(_ROW_AB1, D)), 0.0)
    ea = _dot(ea, wpack_ref[r0 + D2:r0 + D3, :D]) + row(_ROW_AB, D)
    ea = _ln(ea, row(_ROW_AG2, D), row(_ROW_AB2, D))                 # (E, D)

    # loop-invariant: edge K/V projections of EVERY layer in one wide matmul
    ekv = _dot(ea, wedge_ref[...]) + row(_ROW_BEDGE, num_layers * D2)  # (E, L*2D)

    # --------------------------- interactor layers --------------------------
    x = x0_ref[...]
    for l in range(num_layers):
        base = _LAYER_BASE + _ROWS_PER_LAYER * l
        h = _ln(x, row(base + 5, D), row(base + 6, D))               # norm1(x)

        # all node-level projections of this layer in ONE (N, 5D) matmul:
        #   [q | k_node | v_node | self | hh], biases folded in at node level
        # (gathering with the one-hot rows commutes with right-multiplication)
        proj = _dot(h, wnode_ref[l]) + row(base + 0, D5)             # (N, 5D)

        q = _dot(doh, proj[:, :D])                                   # (E, D)
        kv = _dot(soh, proj[:, D:D3]) + ekv[:, l * D2:(l + 1) * D2]  # (E, 2D)
        k, v = kv[:, :D], kv[:, D:]

        alpha = _dot(q * k, hs)                                      # (E, H)

        # segment softmax over edges sharing a destination node, with a true
        # per-destination max; E sits on the LANE axis for the masked max.
        alpha_t = jnp.transpose(alpha)                               # (H, E)
        masked = jnp.where(dmask[:, None, :], alpha_t[None, :, :], -1e30)
        amax = jnp.max(masked, axis=-1)                              # (N, H)
        ex = jnp.exp(alpha - _dot(doh, amax))                        # (E, H)
        denom = _dot(doh, _dot(dohT, ex))                            # (E, H)
        r = pl.reciprocal(denom, approx=True)                        # EUP rcp
        r = r * (2.0 - denom * r)                                    # Newton step
        attn = ex * r

        msg = v * _dot(attn, hsT)                                    # (E, D)
        agg = _dot(dohT, msg)                                        # (N, D) scatter-add

        # update(): gated mix of aggregated messages and lin_self(norm1(x))
        gate = jax.nn.sigmoid(_dot(agg, wpost_ref[2 * l]) + row(base + 2, D)
                              + proj[:, D4:])
        upd = agg + gate * (proj[:, D3:D4] - agg)
        x = x + _dot(upd, wpost_ref[2 * l + 1]) + row(base + 3, D)   # out_proj

        # feed-forward block
        h2 = _ln(x, row(base + 7, D), row(base + 8, D))
        ff = jnp.maximum(_dot(h2, wmlp1_ref[l]) + row(base + 1, D4), 0.0)
        x = x + _dot(ff, wmlp2_ref[l]) + row(base + 4, D)

    # --------------- final LayerNorm + multihead projection -----------------
    hfin = _ln(x, row(_ROW_FING, D), row(_ROW_FINB, D))
    out_ref[...] = _dot(hfin, mhw_ref[...]) + row(_ROW_MHB, out_ref.shape[1])


# --------------------------- host-side preparation ---------------------------

_LIN_NAMES = ['q', 'kn', 'ke', 'vn', 've', 'self', 'ih', 'hh', 'out']


def prepare_params(params, *, embed_dim, num_heads, num_modes):
    """One-time host-side packing: stack/transpose per-layer weights to
    (in, out), merge projections sharing an input, pack all bias/LN rows into
    one slab, pad the head projection to a lane-dense width."""
    D, H = embed_dim, num_heads
    hd = D // H
    L = len(params['layers'])
    D2, D4, D5 = 2 * D, 4 * D, 5 * D
    p = {}

    # ---- wpack: rel-embed weights + per-head maps, one (rows, 2D) slab ----
    rp = params['rel']
    br, ag = rp['branches'], rp['aggr']
    ein0 = np.asarray(br[0]['w1']).shape[1]
    ein1 = np.asarray(br[1]['w1']).shape[1]
    rel_rows = max(8, -(-(ein0 + ein1) // 8) * 8)
    Hp = -(-H // 8) * 8
    wpack = np.zeros((rel_rows + 4 * D + Hp, D2), np.float32)
    wpack[0:ein0, 0:D] = np.asarray(br[0]['w1']).T               # branch a
    wpack[ein0:ein0 + ein1, D:D2] = np.asarray(br[1]['w1']).T    # branch b
    r0 = rel_rows
    wpack[r0:r0 + D, 0:D] = np.asarray(br[0]['w2']).T
    wpack[r0 + D:r0 + D2, 0:D] = np.asarray(br[1]['w2']).T
    wpack[r0 + D2:r0 + 3 * D, 0:D] = np.asarray(ag['w']).T
    hsel = (np.arange(D)[:, None] // hd == np.arange(H)[None, :]).astype(np.float32)
    wpack[r0 + 3 * D:r0 + 4 * D, 0:H] = hsel / np.sqrt(hd)       # (D, H) scaled
    wpack[r0 + 4 * D:r0 + 4 * D + H, 0:D] = hsel.T               # (H, D)
    p['wpack'] = jnp.asarray(wpack)
    p['rel_rows'] = rel_rows

    # ---- per-layer stacked weights, all stored (in, out) ----
    wnode, wpost, wmlp1, wmlp2, wedge_cols, bedge = [], [], [], [], [], []
    for lp in params['layers']:
        wnode.append(np.concatenate(
            [np.asarray(lp['w_' + n]).T for n in ('q', 'kn', 'vn', 'self', 'hh')],
            axis=1))
        wedge_cols.append(np.concatenate(
            [np.asarray(lp['w_ke']).T, np.asarray(lp['w_ve']).T], axis=1))
        bedge.append(np.concatenate(
            [np.asarray(lp['b_ke']), np.asarray(lp['b_ve'])]))
        wpost.append(np.asarray(lp['w_ih']).T)
        wpost.append(np.asarray(lp['w_out']).T)
        wmlp1.append(np.asarray(lp['mw1']).T)
        wmlp2.append(np.asarray(lp['mw2']).T)
    p['wnode'] = jnp.asarray(np.stack(wnode))                    # (L, D, 5D)
    p['wedge'] = jnp.asarray(np.concatenate(wedge_cols, axis=1)) # (D, L*2D)
    p['wpost'] = jnp.asarray(np.stack(wpost))                    # (2L, D, D)
    p['wmlp1'] = jnp.asarray(np.stack(wmlp1))                    # (L, D, 4D)
    p['wmlp2'] = jnp.asarray(np.stack(wmlp2))                    # (L, 4D, D)

    MD = num_modes * D
    md_pad = -(-MD // _LANE) * _LANE                             # lane-dense out
    mhw = np.zeros((D, md_pad), np.float32)
    mhw[:, :MD] = np.asarray(params['mh_w']).T
    p['mhw'] = jnp.asarray(mhw)
    p['md_pad'] = md_pad

    # ---- every bias / LayerNorm vector in ONE padded slab ----
    W = -(-max(D5, D4, L * D2, md_pad) // _LANE) * _LANE
    R = _LAYER_BASE + _ROWS_PER_LAYER * L
    vecs = np.zeros((R, 1, W), np.float32)

    def put(r, v):
        v = np.asarray(v).reshape(-1)
        vecs[r, 0, :v.shape[0]] = v

    put(_ROW_B1, np.concatenate([np.asarray(br[0]['b1']), np.asarray(br[1]['b1'])]))
    put(_ROW_G, np.concatenate([np.asarray(br[0]['g']), np.asarray(br[1]['g'])]))
    put(_ROW_BE, np.concatenate([np.asarray(br[0]['beta']), np.asarray(br[1]['beta'])]))
    put(_ROW_B2, np.asarray(br[0]['b2']) + np.asarray(br[1]['b2']))
    put(_ROW_AG1, ag['g1']); put(_ROW_AB1, ag['beta1']); put(_ROW_AB, ag['b'])
    put(_ROW_AG2, ag['g2']); put(_ROW_AB2, ag['beta2'])
    put(_ROW_BEDGE, np.concatenate(bedge))
    put(_ROW_FING, params['norm_g']); put(_ROW_FINB, params['norm_b'])
    put(_ROW_MHB, params['mh_b'])
    for l, lp in enumerate(params['layers']):
        base = _LAYER_BASE + _ROWS_PER_LAYER * l
        put(base + 0, np.concatenate(
            [np.asarray(lp['b_' + n]) for n in ('q', 'kn', 'vn', 'self', 'hh')]))
        put(base + 1, lp['mb1'])
        put(base + 2, lp['b_ih'])
        put(base + 3, lp['b_out'])
        put(base + 4, lp['mb2'])
        put(base + 5, lp['g1'])
        put(base + 6, lp['beta1'])
        put(base + 7, lp['g2'])
        put(base + 8, lp['beta2'])
    p['vecs'] = jnp.asarray(vecs)
    p['num_layers'] = L
    return p


# ----------------------------- pallas_call glue -----------------------------


def _full_spec(a):
    nd = a.ndim
    return pl.BlockSpec(a.shape, lambda i: (0,) * nd)


def graph_interactor_forward(prep, data, local_embed, *, historical_steps,
                             embed_dim, num_modes, num_heads):
    # TODO(synk): PyG `subgraph` filters edges to a data-dependent (dynamic)
    # number of edges; the example graph has no padded agents so the static
    # full edge set is exact.
    edge_index = data['edge_index']
    src, dst = edge_index[0], edge_index[1]
    t = historical_steps - 1

    rel_pos = data['positions'][src, t] - data['positions'][dst, t]
    rel_pos = jnp.einsum('ei,eij->ej', rel_pos, data['rotate_mat'][dst])
    rel_theta = data['rotate_angles'][src] - data['rotate_angles'][dst]
    feat = jnp.concatenate([rel_pos, jnp.cos(rel_theta)[:, None],
                            jnp.sin(rel_theta)[:, None]], axis=-1)
    rel_feat = jnp.pad(feat, ((0, 0), (0, prep['rel_rows'] - feat.shape[1])))

    eidx_c = jnp.transpose(edge_index).astype(jnp.int32)         # (E, 2)
    eidx_r = edge_index.astype(jnp.int32)                        # (2, E)

    N, D = local_embed.shape
    md_pad = prep['md_pad']

    args = [rel_feat, eidx_c, eidx_r, local_embed,
            prep['wpack'], prep['wnode'], prep['wedge'], prep['wpost'],
            prep['wmlp1'], prep['wmlp2'], prep['mhw'], prep['vecs']]

    kernel = functools.partial(fused_forward_kernel,
                               num_layers=prep['num_layers'],
                               num_heads=num_heads)
    out = pl.pallas_call(
        kernel,
        out_shape=jax.ShapeDtypeStruct((N, md_pad), jnp.float32),
        grid=(1,),
        in_specs=[_full_spec(a) for a in args],
        out_specs=pl.BlockSpec((N, md_pad), lambda i: (0, 0)),
        compiler_params=pltpu.CompilerParams(
            dimension_semantics=("arbitrary",),
            vmem_limit_bytes=32 * 1024 * 1024),
    )(*args)

    out = out[:, :num_modes * embed_dim]                         # drop lane pad
    out = out.reshape(N, num_modes, embed_dim)
    return jnp.transpose(out, (1, 0, 2))                         # (modes, N, D)


# ----------------------------- parameters -----------------------------------


def _linear(key, out_dim, in_dim):
    kw, kb = jax.random.split(key)
    w = jax.random.normal(kw, (out_dim, in_dim), jnp.float32) / np.sqrt(in_dim)
    b = 0.02 * jax.random.normal(kb, (out_dim,), jnp.float32)
    return w, b


def init_params(key, D, edge_dim, num_modes, num_layers):
    ki = iter(jax.random.split(key, 64))
    p = {}
    branches = []
    for _ in range(2):
        w1, b1 = _linear(next(ki), D, edge_dim)
        w2, b2 = _linear(next(ki), D, D)
        branches.append(dict(w1=w1, b1=b1, g=jnp.ones((D,)), beta=jnp.zeros((D,)),
                             w2=w2, b2=b2))
    aw, ab = _linear(next(ki), D, D)
    p['rel'] = dict(branches=branches,
                    aggr=dict(g1=jnp.ones((D,)), beta1=jnp.zeros((D,)),
                              w=aw, b=ab,
                              g2=jnp.ones((D,)), beta2=jnp.zeros((D,))))
    layers = []
    for _ in range(num_layers):
        lp = {}
        for nm in _LIN_NAMES:
            w, b = _linear(next(ki), D, D)
            lp['w_' + nm], lp['b_' + nm] = w, b
        lp['g1'] = jnp.ones((D,)); lp['beta1'] = jnp.zeros((D,))
        lp['g2'] = jnp.ones((D,)); lp['beta2'] = jnp.zeros((D,))
        lp['mw1'], lp['mb1'] = _linear(next(ki), 4 * D, D)
        lp['mw2'], lp['mb2'] = _linear(next(ki), D, 4 * D)
        layers.append(lp)
    p['layers'] = layers
    p['norm_g'] = jnp.ones((D,)); p['norm_b'] = jnp.zeros((D,))
    p['mh_w'], p['mh_b'] = _linear(next(ki), num_modes * D, D)
    return p


# --------------------------- pure-JAX reference ------------------------------


def _ref_rel_embed(rel_pos, theta_feat, rp):
    outs = []
    for v, br in zip([rel_pos, theta_feat], rp['branches']):
        t = v @ br['w1'].T + br['b1']
        t = jnp.maximum(_ln(t, br['g'], br['beta']), 0.0)
        outs.append(t @ br['w2'].T + br['b2'])
    a = rp['aggr']
    o = outs[0] + outs[1]
    o = jnp.maximum(_ln(o, a['g1'], a['beta1']), 0.0)
    o = o @ a['w'].T + a['b']
    return _ln(o, a['g2'], a['beta2'])


def _ref_layer(x, ea, src, dst, lp, num_heads):
    N, D = x.shape
    H = num_heads
    hd = D // H
    h = _ln(x, lp['g1'], lp['beta1'])
    x_i, x_j = h[dst], h[src]
    q = (x_i @ lp['w_q'].T + lp['b_q']).reshape(-1, H, hd)
    kn = (x_j @ lp['w_kn'].T + lp['b_kn']).reshape(-1, H, hd)
    ke = (ea @ lp['w_ke'].T + lp['b_ke']).reshape(-1, H, hd)
    vn = (x_j @ lp['w_vn'].T + lp['b_vn']).reshape(-1, H, hd)
    ve = (ea @ lp['w_ve'].T + lp['b_ve']).reshape(-1, H, hd)
    alpha = (q * (kn + ke)).sum(-1) / (hd ** 0.5)
    amax = jax.ops.segment_max(alpha, dst, num_segments=N)
    ex = jnp.exp(alpha - amax[dst])
    denom = jax.ops.segment_sum(ex, dst, num_segments=N)[dst]
    attn = ex / denom
    msg = ((vn + ve) * attn[..., None]).reshape(-1, D)
    agg = jax.ops.segment_sum(msg, dst, num_segments=N)
    gate = jax.nn.sigmoid(agg @ lp['w_ih'].T + lp['b_ih']
                          + h @ lp['w_hh'].T + lp['b_hh'])
    upd = agg + gate * (h @ lp['w_self'].T + lp['b_self'] - agg)
    x1 = x + upd @ lp['w_out'].T + lp['b_out']
    h2 = _ln(x1, lp['g2'], lp['beta2'])
    ff = jnp.maximum(h2 @ lp['mw1'].T + lp['mb1'], 0.0) @ lp['mw2'].T + lp['mb2']
    return x1 + ff


def _ref_forward(params, data, local_embed, *, historical_steps, embed_dim,
                 num_modes, num_heads):
    src, dst = data['edge_index'][0], data['edge_index'][1]
    t = historical_steps - 1
    rel_pos = data['positions'][src, t] - data['positions'][dst, t]
    rel_pos = jnp.einsum('ei,eij->ej', rel_pos, data['rotate_mat'][dst])
    rel_theta = data['rotate_angles'][src] - data['rotate_angles'][dst]
    theta_feat = jnp.stack([jnp.cos(rel_theta), jnp.sin(rel_theta)], axis=-1)
    rel_embed = _ref_rel_embed(rel_pos, theta_feat, params['rel'])
    x = local_embed
    for lp in params['layers']:
        x = _ref_layer(x, rel_embed, src, dst, lp, num_heads)
    x = _ln(x, params['norm_g'], params['norm_b'])
    x = x @ params['mh_w'].T + params['mh_b']
    x = x.reshape(-1, num_modes, embed_dim)
    return jnp.transpose(x, (1, 0, 2))


# ---------------------------------- main -------------------------------------


if __name__ == "__main__":
    key = jax.random.PRNGKey(0)
    N, T, D, edge_dim = 12, 4, 32, 2
    num_modes, num_heads, num_layers = 6, 8, 3

    k_pos, k_ang, k_emb, k_par = jax.random.split(key, 4)
    positions = jax.random.normal(k_pos, (N, T, 2), jnp.float32) * 5.0
    rotate_angles = jax.random.uniform(k_ang, (N,), jnp.float32, -np.pi, np.pi)
    c, s = jnp.cos(rotate_angles), jnp.sin(rotate_angles)
    rotate_mat = jnp.stack(
        [jnp.stack([c, -s], axis=-1), jnp.stack([s, c], axis=-1)], axis=-2)  # (N,2,2)
    padding_mask = jnp.zeros((N, T), dtype=bool)       # no padded agents
    local_embed = jax.random.normal(k_emb, (N, D), jnp.float32)

    # fully-connected directed graph without self loops
    src_l, dst_l = [], []
    for i in range(N):
        for j in range(N):
            if i != j:
                src_l.append(i)
                dst_l.append(j)
    edge_index = jnp.array([src_l, dst_l], dtype=jnp.int32)   # (2, E), E = 132

    data = dict(positions=positions, padding_mask=padding_mask,
                rotate_mat=rotate_mat, rotate_angles=rotate_angles,
                edge_index=edge_index)

    params = init_params(k_par, D, edge_dim, num_modes, num_layers)
    prep = prepare_params(params, embed_dim=D, num_heads=num_heads,
                          num_modes=num_modes)

    out = graph_interactor_forward(prep, data, local_embed,
                                   historical_steps=T, embed_dim=D,
                                   num_modes=num_modes, num_heads=num_heads)
    out = jax.block_until_ready(out)
    assert out.shape == (num_modes, N, D)

    ref = _ref_forward(params, data, local_embed, historical_steps=T,
                       embed_dim=D, num_modes=num_modes, num_heads=num_heads)
    np.testing.assert_allclose(np.asarray(out), np.asarray(ref),
                               rtol=2e-3, atol=2e-3)
    print("KERNEL_OK")
</pallas_src>

<mosaic_0001>
module attributes {stable_mosaic.version = 11 : i64} {
  func.func @fused_forward_kernel(%arg0: i32, %arg1: memref<132x8xf32, #tpu.memory_space<vmem>>, %arg2: memref<132x2xi32, #tpu.memory_space<vmem>>, %arg3: memref<2x132xi32, #tpu.memory_space<vmem>>, %arg4: memref<12x32xf32, #tpu.memory_space<vmem>>, %arg5: memref<144x64xf32, #tpu.memory_space<vmem>>, %arg6: memref<3x32x160xf32, #tpu.memory_space<vmem>>, %arg7: memref<32x192xf32, #tpu.memory_space<vmem>>, %arg8: memref<6x32x32xf32, #tpu.memory_space<vmem>>, %arg9: memref<3x32x128xf32, #tpu.memory_space<vmem>>, %arg10: memref<3x128x32xf32, #tpu.memory_space<vmem>>, %arg11: memref<32x256xf32, #tpu.memory_space<vmem>>, %arg12: memref<40x1x256xf32, #tpu.memory_space<vmem>>, %arg13: memref<12x256xf32, #tpu.memory_space<vmem>>) attributes {dimension_semantics = [#tpu.dimension_semantics<arbitrary>], iteration_bounds = array<i64: 1>, scalar_prefetch = 0 : i64, scratch_operands = 0 : i64, tpu.core_type = #tpu.core_type<tc>, window_params = [{pipeline_mode = #tpu.pipeline_mode<synchronous>, transform_indices = @transform_0, window_bounds = array<i64: 132, 8>}, {pipeline_mode = #tpu.pipeline_mode<synchronous>, transform_indices = @transform_1, window_bounds = array<i64: 132, 2>}, {pipeline_mode = #tpu.pipeline_mode<synchronous>, transform_indices = @transform_2, window_bounds = array<i64: 2, 132>}, {pipeline_mode = #tpu.pipeline_mode<synchronous>, transform_indices = @transform_3, window_bounds = array<i64: 12, 32>}, {pipeline_mode = #tpu.pipeline_mode<synchronous>, transform_indices = @transform_4, window_bounds = array<i64: 144, 64>}, {pipeline_mode = #tpu.pipeline_mode<synchronous>, transform_indices = @transform_5, window_bounds = array<i64: 3, 32, 160>}, {pipeline_mode = #tpu.pipeline_mode<synchronous>, transform_indices = @transform_6, window_bounds = array<i64: 32, 192>}, {pipeline_mode = #tpu.pipeline_mode<synchronous>, transform_indices = @transform_7, window_bounds = array<i64: 6, 32, 32>}, {pipeline_mode = #tpu.pipeline_mode<synchronous>, transform_indices = @transform_8, window_bounds = array<i64: 3, 32, 128>}, {pipeline_mode = #tpu.pipeline_mode<synchronous>, transform_indices = @transform_9, window_bounds = array<i64: 3, 128, 32>}, {pipeline_mode = #tpu.pipeline_mode<synchronous>, transform_indices = @transform_10, window_bounds = array<i64: 32, 256>}, {pipeline_mode = #tpu.pipeline_mode<synchronous>, transform_indices = @transform_11, window_bounds = array<i64: 40, 1, 256>}, {pipeline_mode = #tpu.pipeline_mode<synchronous>, transform_indices = @transform_12, window_bounds = array<i64: 12, 256>}]} {
    %c0 = arith.constant 0 : index
    %c0_0 = arith.constant 0 : index
    %0 = vector.load %arg2[%c0, %c0_0] : memref<132x2xi32, #tpu.memory_space<vmem>>, vector<132x1xi32>
    %c0_1 = arith.constant 0 : index
    %c1 = arith.constant 1 : index
    %1 = vector.load %arg2[%c0_1, %c1] : memref<132x2xi32, #tpu.memory_space<vmem>>, vector<132x1xi32>
    %c1_2 = arith.constant 1 : index
    %c0_3 = arith.constant 0 : index
    %2 = vector.load %arg3[%c1_2, %c0_3] : memref<2x132xi32, #tpu.memory_space<vmem>>, vector<1x132xi32>
    %3 = tpu.iota {dimensions = array<i32: 1>} : vector<132x12xi32>
    %4 = tpu.iota {dimensions = array<i32: 0>} : vector<12x132xi32>
    %5 = vector.broadcast %0 : vector<132x1xi32> to vector<132x12xi32>
    %6 = arith.cmpi eq, %3, %5 : vector<132x12xi32>
    %7 = arith.extui %6 : vector<132x12xi1> to vector<132x12xi32>
    %8 = arith.sitofp %7 : vector<132x12xi32> to vector<132x12xf32>
    %9 = vector.broadcast %1 : vector<132x1xi32> to vector<132x12xi32>
    %10 = arith.cmpi eq, %3, %9 : vector<132x12xi32>
    %11 = arith.extui %10 : vector<132x12xi1> to vector<132x12xi32>
    %12 = arith.sitofp %11 : vector<132x12xi32> to vector<132x12xf32>
    %13 = vector.broadcast %2 : vector<1x132xi32> to vector<12x132xi32>
    %14 = arith.cmpi eq, %4, %13 : vector<12x132xi32>
    %15 = arith.extui %14 : vector<12x132xi1> to vector<12x132xi32>
    %16 = arith.sitofp %15 : vector<12x132xi32> to vector<12x132xf32>
    %c104 = arith.constant 104 : index
    %c0_4 = arith.constant 0 : index
    %17 = vector.load %arg5[%c104, %c0_4] : memref<144x64xf32, #tpu.memory_space<vmem>>, vector<32x8xf32>
    %c136 = arith.constant 136 : index
    %c0_5 = arith.constant 0 : index
    %18 = vector.load %arg5[%c136, %c0_5] : memref<144x64xf32, #tpu.memory_space<vmem>>, vector<8x32xf32>
    %c0_6 = arith.constant 0 : index
    %c0_7 = arith.constant 0 : index
    %19 = vector.load %arg1[%c0_6, %c0_7] : memref<132x8xf32, #tpu.memory_space<vmem>>, vector<132x8xf32>
    %c0_8 = arith.constant 0 : index
    %c0_9 = arith.constant 0 : index
    %20 = vector.load %arg5[%c0_8, %c0_9] : memref<144x64xf32, #tpu.memory_space<vmem>>, vector<8x64xf32>
    %cst = arith.constant dense<0.000000e+00> : vector<132x64xf32>
    %21 = tpu.matmul %19, %20, %cst {dimension_numbers = #tpu.dot_dimension_numbers<[1], [0], [0], [1], [0, 0, 1, 1], [], []>} : vector<132x8xf32>, vector<8x64xf32>, vector<132x64xf32> -> vector<132x64xf32>
    %c0_10 = arith.constant 0 : index
    %c0_11 = arith.constant 0 : index
    %c0_12 = arith.constant 0 : index
    %22 = vector.load %arg12[%c0_10, %c0_11, %c0_12] : memref<40x1x256xf32, #tpu.memory_space<vmem>>, vector<1x1x256xf32>
    %23 = vector.shape_cast %22 : vector<1x1x256xf32> to vector<1x256xf32>
    %24 = vector.extract_strided_slice %23 {offsets = [0, 0], sizes = [1, 64], strides = [1, 1]} : vector<1x256xf32> to vector<1x64xf32>
    %25 = vector.broadcast %24 : vector<1x64xf32> to vector<132x64xf32>
    %26 = arith.addf %21, %25 : vector<132x64xf32>
    %c1_13 = arith.constant 1 : index
    %c0_14 = arith.constant 0 : index
    %c0_15 = arith.constant 0 : index
    %27 = vector.load %arg12[%c1_13, %c0_14, %c0_15] : memref<40x1x256xf32, #tpu.memory_space<vmem>>, vector<1x1x256xf32>
    %28 = vector.shape_cast %27 : vector<1x1x256xf32> to vector<1x256xf32>
    %29 = vector.extract_strided_slice %28 {offsets = [0, 0], sizes = [1, 64], strides = [1, 1]} : vector<1x256xf32> to vector<1x64xf32>
    %c2 = arith.constant 2 : index
    %c0_16 = arith.constant 0 : index
    %c0_17 = arith.constant 0 : index
    %30 = vector.load %arg12[%c2, %c0_16, %c0_17] : memref<40x1x256xf32, #tpu.memory_space<vmem>>, vector<1x1x256xf32>
    %31 = vector.shape_cast %30 : vector<1x1x256xf32> to vector<1x256xf32>
    %32 = vector.extract_strided_slice %31 {offsets = [0, 0], sizes = [1, 64], strides = [1, 1]} : vector<1x256xf32> to vector<1x64xf32>
    %33 = vector.extract_strided_slice %26 {offsets = [0, 0], sizes = [132, 32], strides = [1, 1]} : vector<132x64xf32> to vector<132x32xf32>
    %34 = vector.extract_strided_slice %29 {offsets = [0, 0], sizes = [1, 32], strides = [1, 1]} : vector<1x64xf32> to vector<1x32xf32>
    %35 = vector.extract_strided_slice %32 {offsets = [0, 0], sizes = [1, 32], strides = [1, 1]} : vector<1x64xf32> to vector<1x32xf32>
    %cst_18 = arith.constant dense<0.000000e+00> : vector<132xf32>
    %36 = vector.multi_reduction <add>, %33, %cst_18 [1] : vector<132x32xf32> to vector<132xf32>
    %37 = vector.shape_cast %36 : vector<132xf32> to vector<132x1xf32>
    %cst_19 = arith.constant 3.200000e+01 : f32
    %38 = vector.broadcast %cst_19 : f32 to vector<132x1xf32>
    %39 = arith.divf %37, %38 : vector<132x1xf32>
    %40 = vector.broadcast %39 : vector<132x1xf32> to vector<132x32xf32>
    %41 = arith.subf %33, %40 : vector<132x32xf32>
    %42 = arith.mulf %41, %41 : vector<132x32xf32>
    %cst_20 = arith.constant dense<0.000000e+00> : vector<132xf32>
    %43 = vector.multi_reduction <add>, %42, %cst_20 [1] : vector<132x32xf32> to vector<132xf32>
    %44 = vector.shape_cast %43 : vector<132xf32> to vector<132x1xf32>
    %cst_21 = arith.constant 3.200000e+01 : f32
    %45 = vector.broadcast %cst_21 : f32 to vector<132x1xf32>
    %46 = arith.divf %44, %45 : vector<132x1xf32>
    %47 = vector.broadcast %39 : vector<132x1xf32> to vector<132x32xf32>
    %48 = arith.subf %33, %47 : vector<132x32xf32>
    %cst_22 = arith.constant 9.99999974E-6 : f32
    %49 = vector.broadcast %cst_22 : f32 to vector<132x1xf32>
    %50 = arith.addf %46, %49 : vector<132x1xf32>
    %51 = math.rsqrt %50 : vector<132x1xf32>
    %52 = vector.broadcast %51 : vector<132x1xf32> to vector<132x32xf32>
    %53 = arith.mulf %48, %52 : vector<132x32xf32>
    %54 = vector.broadcast %34 : vector<1x32xf32> to vector<132x32xf32>
    %55 = arith.mulf %53, %54 : vector<132x32xf32>
    %56 = vector.broadcast %35 : vector<1x32xf32> to vector<132x32xf32>
    %57 = arith.addf %55, %56 : vector<132x32xf32>
    %cst_23 = arith.constant 0.000000e+00 : f32
    %58 = vector.broadcast %cst_23 : f32 to vector<132x32xf32>
    %59 = arith.maximumf %57, %58 : vector<132x32xf32>
    %60 = vector.extract_strided_slice %26 {offsets = [0, 32], sizes = [132, 32], strides = [1, 1]} : vector<132x64xf32> to vector<132x32xf32>
    %61 = vector.extract_strided_slice %29 {offsets = [0, 32], sizes = [1, 32], strides = [1, 1]} : vector<1x64xf32> to vector<1x32xf32>
    %62 = vector.extract_strided_slice %32 {offsets = [0, 32], sizes = [1, 32], strides = [1, 1]} : vector<1x64xf32> to vector<1x32xf32>
    %cst_24 = arith.constant dense<0.000000e+00> : vector<132xf32>
    %63 = vector.multi_reduction <add>, %60, %cst_24 [1] : vector<132x32xf32> to vector<132xf32>
    %64 = vector.shape_cast %63 : vector<132xf32> to vector<132x1xf32>
    %cst_25 = arith.constant 3.200000e+01 : f32
    %65 = vector.broadcast %cst_25 : f32 to vector<132x1xf32>
    %66 = arith.divf %64, %65 : vector<132x1xf32>
    %67 = vector.broadcast %66 : vector<132x1xf32> to vector<132x32xf32>
    %68 = arith.subf %60, %67 : vector<132x32xf32>
    %69 = arith.mulf %68, %68 : vector<132x32xf32>
    %cst_26 = arith.constant dense<0.000000e+00> : vector<132xf32>
    %70 = vector.multi_reduction <add>, %69, %cst_26 [1] : vector<132x32xf32> to vector<132xf32>
    %71 = vector.shape_cast %70 : vector<132xf32> to vector<132x1xf32>
    %cst_27 = arith.constant 3.200000e+01 : f32
    %72 = vector.broadcast %cst_27 : f32 to vector<132x1xf32>
    %73 = arith.divf %71, %72 : vector<132x1xf32>
    %74 = vector.broadcast %66 : vector<132x1xf32> to vector<132x32xf32>
    %75 = arith.subf %60, %74 : vector<132x32xf32>
    %cst_28 = arith.constant 9.99999974E-6 : f32
    %76 = vector.broadcast %cst_28 : f32 to vector<132x1xf32>
    %77 = arith.addf %73, %76 : vector<132x1xf32>
    %78 = math.rsqrt %77 : vector<132x1xf32>
    %79 = vector.broadcast %78 : vector<132x1xf32> to vector<132x32xf32>
    %80 = arith.mulf %75, %79 : vector<132x32xf32>
    %81 = vector.broadcast %61 : vector<1x32xf32> to vector<132x32xf32>
    %82 = arith.mulf %80, %81 : vector<132x32xf32>
    %83 = vector.broadcast %62 : vector<1x32xf32> to vector<132x32xf32>
    %84 = arith.addf %82, %83 : vector<132x32xf32>
    %cst_29 = arith.constant 0.000000e+00 : f32
    %85 = vector.broadcast %cst_29 : f32 to vector<132x32xf32>
    %86 = arith.maximumf %84, %85 : vector<132x32xf32>
    %87 = tpu.concatenate %59, %86 in 1 : vector<132x32xf32>, vector<132x32xf32> -> vector<132x64xf32>
    %c8 = arith.constant 8 : index
    %c0_30 = arith.constant 0 : index
    %88 = vector.load %arg5[%c8, %c0_30] : memref<144x64xf32, #tpu.memory_space<vmem>>, vector<64x32xf32>
    %cst_31 = arith.constant dense<0.000000e+00> : vector<132x32xf32>
    %89 = tpu.matmul %87, %88, %cst_31 {dimension_numbers = #tpu.dot_dimension_numbers<[1], [0], [0], [1], [0, 0, 1, 1], [], []>} : vector<132x64xf32>, vector<64x32xf32>, vector<132x32xf32> -> vector<132x32xf32>
    %c3 = arith.constant 3 : index
    %c0_32 = arith.constant 0 : index
    %c0_33 = arith.constant 0 : index
    %90 = vector.load %arg12[%c3, %c0_32, %c0_33] : memref<40x1x256xf32, #tpu.memory_space<vmem>>, vector<1x1x256xf32>
    %91 = vector.shape_cast %90 : vector<1x1x256xf32> to vector<1x256xf32>
    %92 = vector.extract_strided_slice %91 {offsets = [0, 0], sizes = [1, 32], strides = [1, 1]} : vector<1x256xf32> to vector<1x32xf32>
    %93 = vector.broadcast %92 : vector<1x32xf32> to vector<132x32xf32>
    %94 = arith.addf %89, %93 : vector<132x32xf32>
    %c4 = arith.constant 4 : index
    %c0_34 = arith.constant 0 : index
    %c0_35 = arith.constant 0 : index
    %95 = vector.load %arg12[%c4, %c0_34, %c0_35] : memref<40x1x256xf32, #tpu.memory_space<vmem>>, vector<1x1x256xf32>
    %96 = vector.shape_cast %95 : vector<1x1x256xf32> to vector<1x256xf32>
    %97 = vector.extract_strided_slice %96 {offsets = [0, 0], sizes = [1, 32], strides = [1, 1]} : vector<1x256xf32> to vector<1x32xf32>
    %c5 = arith.constant 5 : index
    %c0_36 = arith.constant 0 : index
    %c0_37 = arith.constant 0 : index
    %98 = vector.load %arg12[%c5, %c0_36, %c0_37] : memref<40x1x256xf32, #tpu.memory_space<vmem>>, vector<1x1x256xf32>
    %99 = vector.shape_cast %98 : vector<1x1x256xf32> to vector<1x256xf32>
    %100 = vector.extract_strided_slice %99 {offsets = [0, 0], sizes = [1, 32], strides = [1, 1]} : vector<1x256xf32> to vector<1x32xf32>
    %cst_38 = arith.constant dense<0.000000e+00> : vector<132xf32>
    %101 = vector.multi_reduction <add>, %94, %cst_38 [1] : vector<132x32xf32> to vector<132xf32>
    %102 = vector.shape_cast %101 : vector<132xf32> to vector<132x1xf32>
    %cst_39 = arith.constant 3.200000e+01 : f32
    %103 = vector.broadcast %cst_39 : f32 to vector<132x1xf32>
    %104 = arith.divf %102, %103 : vector<132x1xf32>
    %105 = vector.broadcast %104 : vector<132x1xf32> to vector<132x32xf32>
    %106 = arith.subf %94, %105 : vector<132x32xf32>
    %107 = arith.mulf %106, %106 : vector<132x32xf32>
    %cst_40 = arith.constant dense<0.000000e+00> : vector<132xf32>
    %108 = vector.multi_reduction <add>, %107, %cst_40 [1] : vector<132x32xf32> to vector<132xf32>
    %109 = vector.shape_cast %108 : vector<132xf32> to vector<132x1xf32>
    %cst_41 = arith.constant 3.200000e+01 : f32
    %110 = vector.broadcast %cst_41 : f32 to vector<132x1xf32>
    %111 = arith.divf %109, %110 : vector<132x1xf32>
    %112 = vector.broadcast %104 : vector<132x1xf32> to vector<132x32xf32>
    %113 = arith.subf %94, %112 : vector<132x32xf32>
    %cst_42 = arith.constant 9.99999974E-6 : f32
    %114 = vector.broadcast %cst_42 : f32 to vector<132x1xf32>
    %115 = arith.addf %111, %114 : vector<132x1xf32>
    %116 = math.rsqrt %115 : vector<132x1xf32>
    %117 = vector.broadcast %116 : vector<132x1xf32> to vector<132x32xf32>
    %118 = arith.mulf %113, %117 : vector<132x32xf32>
    %119 = vector.broadcast %97 : vector<1x32xf32> to vector<132x32xf32>
    %120 = arith.mulf %118, %119 : vector<132x32xf32>
    %121 = vector.broadcast %100 : vector<1x32xf32> to vector<132x32xf32>
    %122 = arith.addf %120, %121 : vector<132x32xf32>
    %cst_43 = arith.constant 0.000000e+00 : f32
    %123 = vector.broadcast %cst_43 : f32 to vector<132x32xf32>
    %124 = arith.maximumf %122, %123 : vector<132x32xf32>
    %c72 = arith.constant 72 : index
    %c0_44 = arith.constant 0 : index
    %125 = vector.load %arg5[%c72, %c0_44] : memref<144x64xf32, #tpu.memory_space<vmem>>, vector<32x32xf32>
    %cst_45 = arith.constant dense<0.000000e+00> : vector<132x32xf32>
    %126 = tpu.matmul %124, %125, %cst_45 {dimension_numbers = #tpu.dot_dimension_numbers<[1], [0], [0], [1], [0, 0, 1, 1], [], []>} : vector<132x32xf32>, vector<32x32xf32>, vector<132x32xf32> -> vector<132x32xf32>
    %c6 = arith.constant 6 : index
    %c0_46 = arith.constant 0 : index
    %c0_47 = arith.constant 0 : index
    %127 = vector.load %arg12[%c6, %c0_46, %c0_47] : memref<40x1x256xf32, #tpu.memory_space<vmem>>, vector<1x1x256xf32>
    %128 = vector.shape_cast %127 : vector<1x1x256xf32> to vector<1x256xf32>
    %129 = vector.extract_strided_slice %128 {offsets = [0, 0], sizes = [1, 32], strides = [1, 1]} : vector<1x256xf32> to vector<1x32xf32>
    %130 = vector.broadcast %129 : vector<1x32xf32> to vector<132x32xf32>
    %131 = arith.addf %126, %130 : vector<132x32xf32>
    %c7 = arith.constant 7 : index
    %c0_48 = arith.constant 0 : index
    %c0_49 = arith.constant 0 : index
    %132 = vector.load %arg12[%c7, %c0_48, %c0_49] : memref<40x1x256xf32, #tpu.memory_space<vmem>>, vector<1x1x256xf32>
    %133 = vector.shape_cast %132 : vector<1x1x256xf32> to vector<1x256xf32>
    %134 = vector.extract_strided_slice %133 {offsets = [0, 0], sizes = [1, 32], strides = [1, 1]} : vector<1x256xf32> to vector<1x32xf32>
    %c8_50 = arith.constant 8 : index
    %c0_51 = arith.constant 0 : index
    %c0_52 = arith.constant 0 : index
    %135 = vector.load %arg12[%c8_50, %c0_51, %c0_52] : memref<40x1x256xf32, #tpu.memory_space<vmem>>, vector<1x1x256xf32>
    %136 = vector.shape_cast %135 : vector<1x1x256xf32> to vector<1x256xf32>
    %137 = vector.extract_strided_slice %136 {offsets = [0, 0], sizes = [1, 32], strides = [1, 1]} : vector<1x256xf32> to vector<1x32xf32>
    %cst_53 = arith.constant dense<0.000000e+00> : vector<132xf32>
    %138 = vector.multi_reduction <add>, %131, %cst_53 [1] : vector<132x32xf32> to vector<132xf32>
    %139 = vector.shape_cast %138 : vector<132xf32> to vector<132x1xf32>
    %cst_54 = arith.constant 3.200000e+01 : f32
    %140 = vector.broadcast %cst_54 : f32 to vector<132x1xf32>
    %141 = arith.divf %139, %140 : vector<132x1xf32>
    %142 = vector.broadcast %141 : vector<132x1xf32> to vector<132x32xf32>
    %143 = arith.subf %131, %142 : vector<132x32xf32>
    %144 = arith.mulf %143, %143 : vector<132x32xf32>
    %cst_55 = arith.constant dense<0.000000e+00> : vector<132xf32>
    %145 = vector.multi_reduction <add>, %144, %cst_55 [1] : vector<132x32xf32> to vector<132xf32>
    %146 = vector.shape_cast %145 : vector<132xf32> to vector<132x1xf32>
    %cst_56 = arith.constant 3.200000e+01 : f32
    %147 = vector.broadcast %cst_56 : f32 to vector<132x1xf32>
    %148 = arith.divf %146, %147 : vector<132x1xf32>
    %149 = vector.broadcast %141 : vector<132x1xf32> to vector<132x32xf32>
    %150 = arith.subf %131, %149 : vector<132x32xf32>
    %cst_57 = arith.constant 9.99999974E-6 : f32
    %151 = vector.broadcast %cst_57 : f32 to vector<132x1xf32>
    %152 = arith.addf %148, %151 : vector<132x1xf32>
    %153 = math.rsqrt %152 : vector<132x1xf32>
    %154 = vector.broadcast %153 : vector<132x1xf32> to vector<132x32xf32>
    %155 = arith.mulf %150, %154 : vector<132x32xf32>
    %156 = vector.broadcast %134 : vector<1x32xf32> to vector<132x32xf32>
    %157 = arith.mulf %155, %156 : vector<132x32xf32>
    %158 = vector.broadcast %137 : vector<1x32xf32> to vector<132x32xf32>
    %159 = arith.addf %157, %158 : vector<132x32xf32>
    %c0_58 = arith.constant 0 : index
    %c0_59 = arith.constant 0 : index
    %160 = vector.load %arg7[%c0_58, %c0_59] : memref<32x192xf32, #tpu.memory_space<vmem>>, vector<32x192xf32>
    %cst_60 = arith.constant dense<0.000000e+00> : vector<132x192xf32>
    %161 = tpu.matmul %159, %160, %cst_60 {dimension_numbers = #tpu.dot_dimension_numbers<[1], [0], [0], [1], [0, 0, 1, 1], [], []>} : vector<132x32xf32>, vector<32x192xf32>, vector<132x192xf32> -> vector<132x192xf32>
    %c9 = arith.constant 9 : index
    %c0_61 = arith.constant 0 : index
    %c0_62 = arith.constant 0 : index
    %162 = vector.load %arg12[%c9, %c0_61, %c0_62] : memref<40x1x256xf32, #tpu.memory_space<vmem>>, vector<1x1x256xf32>
    %163 = vector.shape_cast %162 : vector<1x1x256xf32> to vector<1x256xf32>
    %164 = vector.extract_strided_slice %163 {offsets = [0, 0], sizes = [1, 192], strides = [1, 1]} : vector<1x256xf32> to vector<1x192xf32>
    %165 = vector.broadcast %164 : vector<1x192xf32> to vector<132x192xf32>
    %166 = arith.addf %161, %165 : vector<132x192xf32>
    %c0_63 = arith.constant 0 : index
    %c0_64 = arith.constant 0 : index
    %167 = vector.load %arg4[%c0_63, %c0_64] : memref<12x32xf32, #tpu.memory_space<vmem>>, vector<12x32xf32>
    %c18 = arith.constant 18 : index
    %c0_65 = arith.constant 0 : index
    %c0_66 = arith.constant 0 : index
    %168 = vector.load %arg12[%c18, %c0_65, %c0_66] : memref<40x1x256xf32, #tpu.memory_space<vmem>>, vector<1x1x256xf32>
    %169 = vector.shape_cast %168 : vector<1x1x256xf32> to vector<1x256xf32>
    %170 = vector.extract_strided_slice %169 {offsets = [0, 0], sizes = [1, 32], strides = [1, 1]} : vector<1x256xf32> to vector<1x32xf32>
    %c19 = arith.constant 19 : index
    %c0_67 = arith.constant 0 : index
    %c0_68 = arith.constant 0 : index
    %171 = vector.load %arg12[%c19, %c0_67, %c0_68] : memref<40x1x256xf32, #tpu.memory_space<vmem>>, vector<1x1x256xf32>
    %172 = vector.shape_cast %171 : vector<1x1x256xf32> to vector<1x256xf32>
    %173 = vector.extract_strided_slice %172 {offsets = [0, 0], sizes = [1, 32], strides = [1, 1]} : vector<1x256xf32> to vector<1x32xf32>
    %cst_69 = arith.constant dense<0.000000e+00> : vector<12xf32>
    %174 = vector.multi_reduction <add>, %167, %cst_69 [1] : vector<12x32xf32> to vector<12xf32>
    %175 = vector.shape_cast %174 : vector<12xf32> to vector<12x1xf32>
    %cst_70 = arith.constant 3.200000e+01 : f32
    %176 = vector.broadcast %cst_70 : f32 to vector<12x1xf32>
    %177 = arith.divf %175, %176 : vector<12x1xf32>
    %178 = vector.broadcast %177 : vector<12x1xf32> to vector<12x32xf32>
    %179 = arith.subf %167, %178 : vector<12x32xf32>
    %180 = arith.mulf %179, %179 : vector<12x32xf32>
    %cst_71 = arith.constant dense<0.000000e+00> : vector<12xf32>
    %181 = vector.multi_reduction <add>, %180, %cst_71 [1] : vector<12x32xf32> to vector<12xf32>
    %182 = vector.shape_cast %181 : vector<12xf32> to vector<12x1xf32>
    %cst_72 = arith.constant 3.200000e+01 : f32
    %183 = vector.broadcast %cst_72 : f32 to vector<12x1xf32>
    %184 = arith.divf %182, %183 : vector<12x1xf32>
    %185 = vector.broadcast %177 : vector<12x1xf32> to vector<12x32xf32>
    %186 = arith.subf %167, %185 : vector<12x32xf32>
    %cst_73 = arith.constant 9.99999974E-6 : f32
    %187 = vector.broadcast %cst_73 : f32 to vector<12x1xf32>
    %188 = arith.addf %184, %187 : vector<12x1xf32>
    %189 = math.rsqrt %188 : vector<12x1xf32>
    %190 = vector.broadcast %189 : vector<12x1xf32> to vector<12x32xf32>
    %191 = arith.mulf %186, %190 : vector<12x32xf32>
    %192 = vector.broadcast %170 : vector<1x32xf32> to vector<12x32xf32>
    %193 = arith.mulf %191, %192 : vector<12x32xf32>
    %194 = vector.broadcast %173 : vector<1x32xf32> to vector<12x32xf32>
    %195 = arith.addf %193, %194 : vector<12x32xf32>
    %c0_74 = arith.constant 0 : index
    %c0_75 = arith.constant 0 : index
    %c0_76 = arith.constant 0 : index
    %196 = vector.load %arg6[%c0_74, %c0_75, %c0_76] : memref<3x32x160xf32, #tpu.memory_space<vmem>>, vector<1x32x160xf32>
    %197 = vector.shape_cast %196 : vector<1x32x160xf32> to vector<32x160xf32>
    %cst_77 = arith.constant dense<0.000000e+00> : vector<12x160xf32>
    %198 = tpu.matmul %195, %197, %cst_77 {dimension_numbers = #tpu.dot_dimension_numbers<[1], [0], [0], [1], [0, 0, 1, 1], [], []>} : vector<12x32xf32>, vector<32x160xf32>, vector<12x160xf32> -> vector<12x160xf32>
    %c13 = arith.constant 13 : index
    %c0_78 = arith.constant 0 : index
    %c0_79 = arith.constant 0 : index
    %199 = vector.load %arg12[%c13, %c0_78, %c0_79] : memref<40x1x256xf32, #tpu.memory_space<vmem>>, vector<1x1x256xf32>
    %200 = vector.shape_cast %199 : vector<1x1x256xf32> to vector<1x256xf32>
    %201 = vector.extract_strided_slice %200 {offsets = [0, 0], sizes = [1, 160], strides = [1, 1]} : vector<1x256xf32> to vector<1x160xf32>
    %202 = vector.broadcast %201 : vector<1x160xf32> to vector<12x160xf32>
    %203 = arith.addf %198, %202 : vector<12x160xf32>
    %204 = vector.extract_strided_slice %203 {offsets = [0, 0], sizes = [12, 32], strides = [1, 1]} : vector<12x160xf32> to vector<12x32xf32>
    %cst_80 = arith.constant dense<0.000000e+00> : vector<132x32xf32>
    %205 = tpu.matmul %12, %204, %cst_80 {dimension_numbers = #tpu.dot_dimension_numbers<[1], [0], [0], [1], [0, 0, 1, 1], [], []>} : vector<132x12xf32>, vector<12x32xf32>, vector<132x32xf32> -> vector<132x32xf32>
    %206 = vector.extract_strided_slice %203 {offsets = [0, 32], sizes = [12, 64], strides = [1, 1]} : vector<12x160xf32> to vector<12x64xf32>
    %cst_81 = arith.constant dense<0.000000e+00> : vector<132x64xf32>
    %207 = tpu.matmul %8, %206, %cst_81 {dimension_numbers = #tpu.dot_dimension_numbers<[1], [0], [0], [1], [0, 0, 1, 1], [], []>} : vector<132x12xf32>, vector<12x64xf32>, vector<132x64xf32> -> vector<132x64xf32>
    %208 = vector.extract_strided_slice %166 {offsets = [0, 0], sizes = [132, 64], strides = [1, 1]} : vector<132x192xf32> to vector<132x64xf32>
    %209 = arith.addf %207, %208 : vector<132x64xf32>
    %210 = vector.extract_strided_slice %209 {offsets = [0, 0], sizes = [132, 32], strides = [1, 1]} : vector<132x64xf32> to vector<132x32xf32>
    %211 = vector.extract_strided_slice %209 {offsets = [0, 32], sizes = [132, 32], strides = [1, 1]} : vector<132x64xf32> to vector<132x32xf32>
    %212 = arith.mulf %205, %210 : vector<132x32xf32>
    %cst_82 = arith.constant dense<0.000000e+00> : vector<132x8xf32>
    %213 = tpu.matmul %212, %17, %cst_82 {dimension_numbers = #tpu.dot_dimension_numbers<[1], [0], [0], [1], [0, 0, 1, 1], [], []>} : vector<132x32xf32>, vector<32x8xf32>, vector<132x8xf32> -> vector<132x8xf32>
    %214 = tpu.transpose %213, [1, 0] : vector<132x8xf32> -> vector<8x132xf32>
    %215 = vector.shape_cast %14 : vector<12x132xi1> to vector<12x1x132xi1>
    %216 = vector.shape_cast %214 : vector<8x132xf32> to vector<1x8x132xf32>
    %cst_83 = arith.constant -1.000000e+30 : f32
    %217 = vector.shape_cast %215 : vector<12x1x132xi1> to vector<12x1x132xi1>
    %218 = vector.broadcast %217 : vector<12x1x132xi1> to vector<12x8x132xi1>
    %219 = vector.shape_cast %216 : vector<1x8x132xf32> to vector<1x8x132xf32>
    %220 = vector.broadcast %219 : vector<1x8x132xf32> to vector<12x8x132xf32>
    %221 = vector.broadcast %cst_83 : f32 to vector<12x8x132xf32>
    %222 = arith.select %218, %220, %221 : vector<12x8x132xi1>, vector<12x8x132xf32>
    %cst_84 = arith.constant dense<0xFF800000> : vector<12x8xf32>
    %223 = vector.multi_reduction <maximumf>, %222, %cst_84 [2] : vector<12x8x132xf32> to vector<12x8xf32>
    %cst_85 = arith.constant dense<0.000000e+00> : vector<132x8xf32>
    %224 = tpu.matmul %12, %223, %cst_85 {dimension_numbers = #tpu.dot_dimension_numbers<[1], [0], [0], [1], [0, 0, 1, 1], [], []>} : vector<132x12xf32>, vector<12x8xf32>, vector<132x8xf32> -> vector<132x8xf32>
    %225 = arith.subf %213, %224 : vector<132x8xf32>
    %226 = math.exp %225 : vector<132x8xf32>
    %cst_86 = arith.constant dense<0.000000e+00> : vector<12x8xf32>
    %227 = tpu.matmul %16, %226, %cst_86 {dimension_numbers = #tpu.dot_dimension_numbers<[1], [0], [0], [1], [0, 0, 1, 1], [], []>} : vector<12x132xf32>, vector<132x8xf32>, vector<12x8xf32> -> vector<12x8xf32>
    %cst_87 = arith.constant dense<0.000000e+00> : vector<132x8xf32>
    %228 = tpu.matmul %12, %227, %cst_87 {dimension_numbers = #tpu.dot_dimension_numbers<[1], [0], [0], [1], [0, 0, 1, 1], [], []>} : vector<132x12xf32>, vector<12x8xf32>, vector<132x8xf32> -> vector<132x8xf32>
    %229 = tpu.reciprocal %228 {approx = true} : vector<132x8xf32> -> vector<132x8xf32>
    %230 = arith.mulf %228, %229 : vector<132x8xf32>
    %cst_88 = arith.constant 2.000000e+00 : f32
    %231 = vector.broadcast %cst_88 : f32 to vector<132x8xf32>
    %232 = arith.subf %231, %230 : vector<132x8xf32>
    %233 = arith.mulf %229, %232 : vector<132x8xf32>
    %234 = arith.mulf %226, %233 : vector<132x8xf32>
    %cst_89 = arith.constant dense<0.000000e+00> : vector<132x32xf32>
    %235 = tpu.matmul %234, %18, %cst_89 {dimension_numbers = #tpu.dot_dimension_numbers<[1], [0], [0], [1], [0, 0, 1, 1], [], []>} : vector<132x8xf32>, vector<8x32xf32>, vector<132x32xf32> -> vector<132x32xf32>
    %236 = arith.mulf %211, %235 : vector<132x32xf32>
    %cst_90 = arith.constant dense<0.000000e+00> : vector<12x32xf32>
    %237 = tpu.matmul %16, %236, %cst_90 {dimension_numbers = #tpu.dot_dimension_numbers<[1], [0], [0], [1], [0, 0, 1, 1], [], []>} : vector<12x132xf32>, vector<132x32xf32>, vector<12x32xf32> -> vector<12x32xf32>
    %c0_91 = arith.constant 0 : index
    %c0_92 = arith.constant 0 : index
    %c0_93 = arith.constant 0 : index
    %238 = vector.load %arg8[%c0_91, %c0_92, %c0_93] : memref<6x32x32xf32, #tpu.memory_space<vmem>>, vector<1x32x32xf32>
    %239 = vector.shape_cast %238 : vector<1x32x32xf32> to vector<32x32xf32>
    %cst_94 = arith.constant dense<0.000000e+00> : vector<12x32xf32>
    %240 = tpu.matmul %237, %239, %cst_94 {dimension_numbers = #tpu.dot_dimension_numbers<[1], [0], [0], [1], [0, 0, 1, 1], [], []>} : vector<12x32xf32>, vector<32x32xf32>, vector<12x32xf32> -> vector<12x32xf32>
    %c15 = arith.constant 15 : index
    %c0_95 = arith.constant 0 : index
    %c0_96 = arith.constant 0 : index
    %241 = vector.load %arg12[%c15, %c0_95, %c0_96] : memref<40x1x256xf32, #tpu.memory_space<vmem>>, vector<1x1x256xf32>
    %242 = vector.shape_cast %241 : vector<1x1x256xf32> to vector<1x256xf32>
    %243 = vector.extract_strided_slice %242 {offsets = [0, 0], sizes = [1, 32], strides = [1, 1]} : vector<1x256xf32> to vector<1x32xf32>
    %244 = vector.broadcast %243 : vector<1x32xf32> to vector<12x32xf32>
    %245 = arith.addf %240, %244 : vector<12x32xf32>
    %246 = vector.extract_strided_slice %203 {offsets = [0, 128], sizes = [12, 32], strides = [1, 1]} : vector<12x160xf32> to vector<12x32xf32>
    %247 = arith.addf %245, %246 : vector<12x32xf32>
    %248 = arith.negf %247 : vector<12x32xf32>
    %249 = math.exp %248 : vector<12x32xf32>
    %cst_97 = arith.constant 1.000000e+00 : f32
    %250 = vector.broadcast %cst_97 : f32 to vector<12x32xf32>
    %251 = arith.addf %250, %249 : vector<12x32xf32>
    %252 = arith.divf %250, %251 : vector<12x32xf32>
    %253 = vector.extract_strided_slice %203 {offsets = [0, 96], sizes = [12, 32], strides = [1, 1]} : vector<12x160xf32> to vector<12x32xf32>
    %254 = arith.subf %253, %237 : vector<12x32xf32>
    %255 = arith.mulf %252, %254 : vector<12x32xf32>
    %256 = arith.addf %237, %255 : vector<12x32xf32>
    %c1_98 = arith.constant 1 : index
    %c0_99 = arith.constant 0 : index
    %c0_100 = arith.constant 0 : index
    %257 = vector.load %arg8[%c1_98, %c0_99, %c0_100] : memref<6x32x32xf32, #tpu.memory_space<vmem>>, vector<1x32x32xf32>
    %258 = vector.shape_cast %257 : vector<1x32x32xf32> to vector<32x32xf32>
    %cst_101 = arith.constant dense<0.000000e+00> : vector<12x32xf32>
    %259 = tpu.matmul %256, %258, %cst_101 {dimension_numbers = #tpu.dot_dimension_numbers<[1], [0], [0], [1], [0, 0, 1, 1], [], []>} : vector<12x32xf32>, vector<32x32xf32>, vector<12x32xf32> -> vector<12x32xf32>
    %260 = arith.addf %167, %259 : vector<12x32xf32>
    %c16 = arith.constant 16 : index
    %c0_102 = arith.constant 0 : index
    %c0_103 = arith.constant 0 : index
    %261 = vector.load %arg12[%c16, %c0_102, %c0_103] : memref<40x1x256xf32, #tpu.memory_space<vmem>>, vector<1x1x256xf32>
    %262 = vector.shape_cast %261 : vector<1x1x256xf32> to vector<1x256xf32>
    %263 = vector.extract_strided_slice %262 {offsets = [0, 0], sizes = [1, 32], strides = [1, 1]} : vector<1x256xf32> to vector<1x32xf32>
    %264 = vector.broadcast %263 : vector<1x32xf32> to vector<12x32xf32>
    %265 = arith.addf %260, %264 : vector<12x32xf32>
    %c20 = arith.constant 20 : index
    %c0_104 = arith.constant 0 : index
    %c0_105 = arith.constant 0 : index
    %266 = vector.load %arg12[%c20, %c0_104, %c0_105] : memref<40x1x256xf32, #tpu.memory_space<vmem>>, vector<1x1x256xf32>
    %267 = vector.shape_cast %266 : vector<1x1x256xf32> to vector<1x256xf32>
    %268 = vector.extract_strided_slice %267 {offsets = [0, 0], sizes = [1, 32], strides = [1, 1]} : vector<1x256xf32> to vector<1x32xf32>
    %c21 = arith.constant 21 : index
    %c0_106 = arith.constant 0 : index
    %c0_107 = arith.constant 0 : index
    %269 = vector.load %arg12[%c21, %c0_106, %c0_107] : memref<40x1x256xf32, #tpu.memory_space<vmem>>, vector<1x1x256xf32>
    %270 = vector.shape_cast %269 : vector<1x1x256xf32> to vector<1x256xf32>
    %271 = vector.extract_strided_slice %270 {offsets = [0, 0], sizes = [1, 32], strides = [1, 1]} : vector<1x256xf32> to vector<1x32xf32>
    %cst_108 = arith.constant dense<0.000000e+00> : vector<12xf32>
    %272 = vector.multi_reduction <add>, %265, %cst_108 [1] : vector<12x32xf32> to vector<12xf32>
    %273 = vector.shape_cast %272 : vector<12xf32> to vector<12x1xf32>
    %cst_109 = arith.constant 3.200000e+01 : f32
    %274 = vector.broadcast %cst_109 : f32 to vector<12x1xf32>
    %275 = arith.divf %273, %274 : vector<12x1xf32>
    %276 = vector.broadcast %275 : vector<12x1xf32> to vector<12x32xf32>
    %277 = arith.subf %265, %276 : vector<12x32xf32>
    %278 = arith.mulf %277, %277 : vector<12x32xf32>
    %cst_110 = arith.constant dense<0.000000e+00> : vector<12xf32>
    %279 = vector.multi_reduction <add>, %278, %cst_110 [1] : vector<12x32xf32> to vector<12xf32>
    %280 = vector.shape_cast %279 : vector<12xf32> to vector<12x1xf32>
    %cst_111 = arith.constant 3.200000e+01 : f32
    %281 = vector.broadcast %cst_111 : f32 to vector<12x1xf32>
    %282 = arith.divf %280, %281 : vector<12x1xf32>
    %283 = vector.broadcast %275 : vector<12x1xf32> to vector<12x32xf32>
    %284 = arith.subf %265, %283 : vector<12x32xf32>
    %cst_112 = arith.constant 9.99999974E-6 : f32
    %285 = vector.broadcast %cst_112 : f32 to vector<12x1xf32>
    %286 = arith.addf %282, %285 : vector<12x1xf32>
    %287 = math.rsqrt %286 : vector<12x1xf32>
    %288 = vector.broadcast %287 : vector<12x1xf32> to vector<12x32xf32>
    %289 = arith.mulf %284, %288 : vector<12x32xf32>
    %290 = vector.broadcast %268 : vector<1x32xf32> to vector<12x32xf32>
    %291 = arith.mulf %289, %290 : vector<12x32xf32>
    %292 = vector.broadcast %271 : vector<1x32xf32> to vector<12x32xf32>
    %293 = arith.addf %291, %292 : vector<12x32xf32>
    %c0_113 = arith.constant 0 : index
    %c0_114 = arith.constant 0 : index
    %c0_115 = arith.constant 0 : index
    %294 = vector.load %arg9[%c0_113, %c0_114, %c0_115] : memref<3x32x128xf32, #tpu.memory_space<vmem>>, vector<1x32x128xf32>
    %295 = vector.shape_cast %294 : vector<1x32x128xf32> to vector<32x128xf32>
    %cst_116 = arith.constant dense<0.000000e+00> : vector<12x128xf32>
    %296 = tpu.matmul %293, %295, %cst_116 {dimension_numbers = #tpu.dot_dimension_numbers<[1], [0], [0], [1], [0, 0, 1, 1], [], []>} : vector<12x32xf32>, vector<32x128xf32>, vector<12x128xf32> -> vector<12x128xf32>
    %c14 = arith.constant 14 : index
    %c0_117 = arith.constant 0 : index
    %c0_118 = arith.constant 0 : index
    %297 = vector.load %arg12[%c14, %c0_117, %c0_118] : memref<40x1x256xf32, #tpu.memory_space<vmem>>, vector<1x1x256xf32>
    %298 = vector.shape_cast %297 : vector<1x1x256xf32> to vector<1x256xf32>
    %299 = vector.extract_strided_slice %298 {offsets = [0, 0], sizes = [1, 128], strides = [1, 1]} : vector<1x256xf32> to vector<1x128xf32>
    %300 = vector.broadcast %299 : vector<1x128xf32> to vector<12x128xf32>
    %301 = arith.addf %296, %300 : vector<12x128xf32>
    %cst_119 = arith.constant 0.000000e+00 : f32
    %302 = vector.broadcast %cst_119 : f32 to vector<12x128xf32>
    %303 = arith.maximumf %301, %302 : vector<12x128xf32>
    %c0_120 = arith.constant 0 : index
    %c0_121 = arith.constant 0 : index
    %c0_122 = arith.constant 0 : index
    %304 = vector.load %arg10[%c0_120, %c0_121, %c0_122] : memref<3x128x32xf32, #tpu.memory_space<vmem>>, vector<1x128x32xf32>
    %305 = vector.shape_cast %304 : vector<1x128x32xf32> to vector<128x32xf32>
    %cst_123 = arith.constant dense<0.000000e+00> : vector<12x32xf32>
    %306 = tpu.matmul %303, %305, %cst_123 {dimension_numbers = #tpu.dot_dimension_numbers<[1], [0], [0], [1], [0, 0, 1, 1], [], []>} : vector<12x128xf32>, vector<128x32xf32>, vector<12x32xf32> -> vector<12x32xf32>
    %307 = arith.addf %265, %306 : vector<12x32xf32>
    %c17 = arith.constant 17 : index
    %c0_124 = arith.constant 0 : index
    %c0_125 = arith.constant 0 : index
    %308 = vector.load %arg12[%c17, %c0_124, %c0_125] : memref<40x1x256xf32, #tpu.memory_space<vmem>>, vector<1x1x256xf32>
    %309 = vector.shape_cast %308 : vector<1x1x256xf32> to vector<1x256xf32>
    %310 = vector.extract_strided_slice %309 {offsets = [0, 0], sizes = [1, 32], strides = [1, 1]} : vector<1x256xf32> to vector<1x32xf32>
    %311 = vector.broadcast %310 : vector<1x32xf32> to vector<12x32xf32>
    %312 = arith.addf %307, %311 : vector<12x32xf32>
    %c27 = arith.constant 27 : index
    %c0_126 = arith.constant 0 : index
    %c0_127 = arith.constant 0 : index
    %313 = vector.load %arg12[%c27, %c0_126, %c0_127] : memref<40x1x256xf32, #tpu.memory_space<vmem>>, vector<1x1x256xf32>
    %314 = vector.shape_cast %313 : vector<1x1x256xf32> to vector<1x256xf32>
    %315 = vector.extract_strided_slice %314 {offsets = [0, 0], sizes = [1, 32], strides = [1, 1]} : vector<1x256xf32> to vector<1x32xf32>
    %c28 = arith.constant 28 : index
    %c0_128 = arith.constant 0 : index
    %c0_129 = arith.constant 0 : index
    %316 = vector.load %arg12[%c28, %c0_128, %c0_129] : memref<40x1x256xf32, #tpu.memory_space<vmem>>, vector<1x1x256xf32>
    %317 = vector.shape_cast %316 : vector<1x1x256xf32> to vector<1x256xf32>
    %318 = vector.extract_strided_slice %317 {offsets = [0, 0], sizes = [1, 32], strides = [1, 1]} : vector<1x256xf32> to vector<1x32xf32>
    %cst_130 = arith.constant dense<0.000000e+00> : vector<12xf32>
    %319 = vector.multi_reduction <add>, %312, %cst_130 [1] : vector<12x32xf32> to vector<12xf32>
    %320 = vector.shape_cast %319 : vector<12xf32> to vector<12x1xf32>
    %cst_131 = arith.constant 3.200000e+01 : f32
    %321 = vector.broadcast %cst_131 : f32 to vector<12x1xf32>
    %322 = arith.divf %320, %321 : vector<12x1xf32>
    %323 = vector.broadcast %322 : vector<12x1xf32> to vector<12x32xf32>
    %324 = arith.subf %312, %323 : vector<12x32xf32>
    %325 = arith.mulf %324, %324 : vector<12x32xf32>
    %cst_132 = arith.constant dense<0.000000e+00> : vector<12xf32>
    %326 = vector.multi_reduction <add>, %325, %cst_132 [1] : vector<12x32xf32> to vector<12xf32>
    %327 = vector.shape_cast %326 : vector<12xf32> to vector<12x1xf32>
    %cst_133 = arith.constant 3.200000e+01 : f32
    %328 = vector.broadcast %cst_133 : f32 to vector<12x1xf32>
    %329 = arith.divf %327, %328 : vector<12x1xf32>
    %330 = vector.broadcast %322 : vector<12x1xf32> to vector<12x32xf32>
    %331 = arith.subf %312, %330 : vector<12x32xf32>
    %cst_134 = arith.constant 9.99999974E-6 : f32
    %332 = vector.broadcast %cst_134 : f32 to vector<12x1xf32>
    %333 = arith.addf %329, %332 : vector<12x1xf32>
    %334 = math.rsqrt %333 : vector<12x1xf32>
    %335 = vector.broadcast %334 : vector<12x1xf32> to vector<12x32xf32>
    %336 = arith.mulf %331, %335 : vector<12x32xf32>
    %337 = vector.broadcast %315 : vector<1x32xf32> to vector<12x32xf32>
    %338 = arith.mulf %336, %337 : vector<12x32xf32>
    %339 = vector.broadcast %318 : vector<1x32xf32> to vector<12x32xf32>
    %340 = arith.addf %338, %339 : vector<12x32xf32>
    %c1_135 = arith.constant 1 : index
    %c0_136 = arith.constant 0 : index
    %c0_137 = arith.constant 0 : index
    %341 = vector.load %arg6[%c1_135, %c0_136, %c0_137] : memref<3x32x160xf32, #tpu.memory_space<vmem>>, vector<1x32x160xf32>
    %342 = vector.shape_cast %341 : vector<1x32x160xf32> to vector<32x160xf32>
    %cst_138 = arith.constant dense<0.000000e+00> : vector<12x160xf32>
    %343 = tpu.matmul %340, %342, %cst_138 {dimension_numbers = #tpu.dot_dimension_numbers<[1], [0], [0], [1], [0, 0, 1, 1], [], []>} : vector<12x32xf32>, vector<32x160xf32>, vector<12x160xf32> -> vector<12x160xf32>
    %c22 = arith.constant 22 : index
    %c0_139 = arith.constant 0 : index
    %c0_140 = arith.constant 0 : index
    %344 = vector.load %arg12[%c22, %c0_139, %c0_140] : memref<40x1x256xf32, #tpu.memory_space<vmem>>, vector<1x1x256xf32>
    %345 = vector.shape_cast %344 : vector<1x1x256xf32> to vector<1x256xf32>
    %346 = vector.extract_strided_slice %345 {offsets = [0, 0], sizes = [1, 160], strides = [1, 1]} : vector<1x256xf32> to vector<1x160xf32>
    %347 = vector.broadcast %346 : vector<1x160xf32> to vector<12x160xf32>
    %348 = arith.addf %343, %347 : vector<12x160xf32>
    %349 = vector.extract_strided_slice %348 {offsets = [0, 0], sizes = [12, 32], strides = [1, 1]} : vector<12x160xf32> to vector<12x32xf32>
    %cst_141 = arith.constant dense<0.000000e+00> : vector<132x32xf32>
    %350 = tpu.matmul %12, %349, %cst_141 {dimension_numbers = #tpu.dot_dimension_numbers<[1], [0], [0], [1], [0, 0, 1, 1], [], []>} : vector<132x12xf32>, vector<12x32xf32>, vector<132x32xf32> -> vector<132x32xf32>
    %351 = vector.extract_strided_slice %348 {offsets = [0, 32], sizes = [12, 64], strides = [1, 1]} : vector<12x160xf32> to vector<12x64xf32>
    %cst_142 = arith.constant dense<0.000000e+00> : vector<132x64xf32>
    %352 = tpu.matmul %8, %351, %cst_142 {dimension_numbers = #tpu.dot_dimension_numbers<[1], [0], [0], [1], [0, 0, 1, 1], [], []>} : vector<132x12xf32>, vector<12x64xf32>, vector<132x64xf32> -> vector<132x64xf32>
    %353 = vector.extract_strided_slice %166 {offsets = [0, 64], sizes = [132, 64], strides = [1, 1]} : vector<132x192xf32> to vector<132x64xf32>
    %354 = arith.addf %352, %353 : vector<132x64xf32>
    %355 = vector.extract_strided_slice %354 {offsets = [0, 0], sizes = [132, 32], strides = [1, 1]} : vector<132x64xf32> to vector<132x32xf32>
    %356 = vector.extract_strided_slice %354 {offsets = [0, 32], sizes = [132, 32], strides = [1, 1]} : vector<132x64xf32> to vector<132x32xf32>
    %357 = arith.mulf %350, %355 : vector<132x32xf32>
    %cst_143 = arith.constant dense<0.000000e+00> : vector<132x8xf32>
    %358 = tpu.matmul %357, %17, %cst_143 {dimension_numbers = #tpu.dot_dimension_numbers<[1], [0], [0], [1], [0, 0, 1, 1], [], []>} : vector<132x32xf32>, vector<32x8xf32>, vector<132x8xf32> -> vector<132x8xf32>
    %359 = tpu.transpose %358, [1, 0] : vector<132x8xf32> -> vector<8x132xf32>
    %360 = vector.shape_cast %14 : vector<12x132xi1> to vector<12x1x132xi1>
    %361 = vector.shape_cast %359 : vector<8x132xf32> to vector<1x8x132xf32>
    %cst_144 = arith.constant -1.000000e+30 : f32
    %362 = vector.shape_cast %360 : vector<12x1x132xi1> to vector<12x1x132xi1>
    %363 = vector.broadcast %362 : vector<12x1x132xi1> to vector<12x8x132xi1>
    %364 = vector.shape_cast %361 : vector<1x8x132xf32> to vector<1x8x132xf32>
    %365 = vector.broadcast %364 : vector<1x8x132xf32> to vector<12x8x132xf32>
    %366 = vector.broadcast %cst_144 : f32 to vector<12x8x132xf32>
    %367 = arith.select %363, %365, %366 : vector<12x8x132xi1>, vector<12x8x132xf32>
    %cst_145 = arith.constant dense<0xFF800000> : vector<12x8xf32>
    %368 = vector.multi_reduction <maximumf>, %367, %cst_145 [2] : vector<12x8x132xf32> to vector<12x8xf32>
    %cst_146 = arith.constant dense<0.000000e+00> : vector<132x8xf32>
    %369 = tpu.matmul %12, %368, %cst_146 {dimension_numbers = #tpu.dot_dimension_numbers<[1], [0], [0], [1], [0, 0, 1, 1], [], []>} : vector<132x12xf32>, vector<12x8xf32>, vector<132x8xf32> -> vector<132x8xf32>
    %370 = arith.subf %358, %369 : vector<132x8xf32>
    %371 = math.exp %370 : vector<132x8xf32>
    %cst_147 = arith.constant dense<0.000000e+00> : vector<12x8xf32>
    %372 = tpu.matmul %16, %371, %cst_147 {dimension_numbers = #tpu.dot_dimension_numbers<[1], [0], [0], [1], [0, 0, 1, 1], [], []>} : vector<12x132xf32>, vector<132x8xf32>, vector<12x8xf32> -> vector<12x8xf32>
    %cst_148 = arith.constant dense<0.000000e+00> : vector<132x8xf32>
    %373 = tpu.matmul %12, %372, %cst_148 {dimension_numbers = #tpu.dot_dimension_numbers<[1], [0], [0], [1], [0, 0, 1, 1], [], []>} : vector<132x12xf32>, vector<12x8xf32>, vector<132x8xf32> -> vector<132x8xf32>
    %374 = tpu.reciprocal %373 {approx = true} : vector<132x8xf32> -> vector<132x8xf32>
    %375 = arith.mulf %373, %374 : vector<132x8xf32>
    %cst_149 = arith.constant 2.000000e+00 : f32
    %376 = vector.broadcast %cst_149 : f32 to vector<132x8xf32>
    %377 = arith.subf %376, %375 : vector<132x8xf32>
    %378 = arith.mulf %374, %377 : vector<132x8xf32>
    %379 = arith.mulf %371, %378 : vector<132x8xf32>
    %cst_150 = arith.constant dense<0.000000e+00> : vector<132x32xf32>
    %380 = tpu.matmul %379, %18, %cst_150 {dimension_numbers = #tpu.dot_dimension_numbers<[1], [0], [0], [1], [0, 0, 1, 1], [], []>} : vector<132x8xf32>, vector<8x32xf32>, vector<132x32xf32> -> vector<132x32xf32>
    %381 = arith.mulf %356, %380 : vector<132x32xf32>
    %cst_151 = arith.constant dense<0.000000e+00> : vector<12x32xf32>
    %382 = tpu.matmul %16, %381, %cst_151 {dimension_numbers = #tpu.dot_dimension_numbers<[1], [0], [0], [1], [0, 0, 1, 1], [], []>} : vector<12x132xf32>, vector<132x32xf32>, vector<12x32xf32> -> vector<12x32xf32>
    %c2_152 = arith.constant 2 : index
    %c0_153 = arith.constant 0 : index
    %c0_154 = arith.constant 0 : index
    %383 = vector.load %arg8[%c2_152, %c0_153, %c0_154] : memref<6x32x32xf32, #tpu.memory_space<vmem>>, vector<1x32x32xf32>
    %384 = vector.shape_cast %383 : vector<1x32x32xf32> to vector<32x32xf32>
    %cst_155 = arith.constant dense<0.000000e+00> : vector<12x32xf32>
    %385 = tpu.matmul %382, %384, %cst_155 {dimension_numbers = #tpu.dot_dimension_numbers<[1], [0], [0], [1], [0, 0, 1, 1], [], []>} : vector<12x32xf32>, vector<32x32xf32>, vector<12x32xf32> -> vector<12x32xf32>
    %c24 = arith.constant 24 : index
    %c0_156 = arith.constant 0 : index
    %c0_157 = arith.constant 0 : index
    %386 = vector.load %arg12[%c24, %c0_156, %c0_157] : memref<40x1x256xf32, #tpu.memory_space<vmem>>, vector<1x1x256xf32>
    %387 = vector.shape_cast %386 : vector<1x1x256xf32> to vector<1x256xf32>
    %388 = vector.extract_strided_slice %387 {offsets = [0, 0], sizes = [1, 32], strides = [1, 1]} : vector<1x256xf32> to vector<1x32xf32>
    %389 = vector.broadcast %388 : vector<1x32xf32> to vector<12x32xf32>
    %390 = arith.addf %385, %389 : vector<12x32xf32>
    %391 = vector.extract_strided_slice %348 {offsets = [0, 128], sizes = [12, 32], strides = [1, 1]} : vector<12x160xf32> to vector<12x32xf32>
    %392 = arith.addf %390, %391 : vector<12x32xf32>
    %393 = arith.negf %392 : vector<12x32xf32>
    %394 = math.exp %393 : vector<12x32xf32>
    %cst_158 = arith.constant 1.000000e+00 : f32
    %395 = vector.broadcast %cst_158 : f32 to vector<12x32xf32>
    %396 = arith.addf %395, %394 : vector<12x32xf32>
    %397 = arith.divf %395, %396 : vector<12x32xf32>
    %398 = vector.extract_strided_slice %348 {offsets = [0, 96], sizes = [12, 32], strides = [1, 1]} : vector<12x160xf32> to vector<12x32xf32>
    %399 = arith.subf %398, %382 : vector<12x32xf32>
    %400 = arith.mulf %397, %399 : vector<12x32xf32>
    %401 = arith.addf %382, %400 : vector<12x32xf32>
    %c3_159 = arith.constant 3 : index
    %c0_160 = arith.constant 0 : index
    %c0_161 = arith.constant 0 : index
    %402 = vector.load %arg8[%c3_159, %c0_160, %c0_161] : memref<6x32x32xf32, #tpu.memory_space<vmem>>, vector<1x32x32xf32>
    %403 = vector.shape_cast %402 : vector<1x32x32xf32> to vector<32x32xf32>
    %cst_162 = arith.constant dense<0.000000e+00> : vector<12x32xf32>
    %404 = tpu.matmul %401, %403, %cst_162 {dimension_numbers = #tpu.dot_dimension_numbers<[1], [0], [0], [1], [0, 0, 1, 1], [], []>} : vector<12x32xf32>, vector<32x32xf32>, vector<12x32xf32> -> vector<12x32xf32>
    %405 = arith.addf %312, %404 : vector<12x32xf32>
    %c25 = arith.constant 25 : index
    %c0_163 = arith.constant 0 : index
    %c0_164 = arith.constant 0 : index
    %406 = vector.load %arg12[%c25, %c0_163, %c0_164] : memref<40x1x256xf32, #tpu.memory_space<vmem>>, vector<1x1x256xf32>
    %407 = vector.shape_cast %406 : vector<1x1x256xf32> to vector<1x256xf32>
    %408 = vector.extract_strided_slice %407 {offsets = [0, 0], sizes = [1, 32], strides = [1, 1]} : vector<1x256xf32> to vector<1x32xf32>
    %409 = vector.broadcast %408 : vector<1x32xf32> to vector<12x32xf32>
    %410 = arith.addf %405, %409 : vector<12x32xf32>
    %c29 = arith.constant 29 : index
    %c0_165 = arith.constant 0 : index
    %c0_166 = arith.constant 0 : index
    %411 = vector.load %arg12[%c29, %c0_165, %c0_166] : memref<40x1x256xf32, #tpu.memory_space<vmem>>, vector<1x1x256xf32>
    %412 = vector.shape_cast %411 : vector<1x1x256xf32> to vector<1x256xf32>
    %413 = vector.extract_strided_slice %412 {offsets = [0, 0], sizes = [1, 32], strides = [1, 1]} : vector<1x256xf32> to vector<1x32xf32>
    %c30 = arith.constant 30 : index
    %c0_167 = arith.constant 0 : index
    %c0_168 = arith.constant 0 : index
    %414 = vector.load %arg12[%c30, %c0_167, %c0_168] : memref<40x1x256xf32, #tpu.memory_space<vmem>>, vector<1x1x256xf32>
    %415 = vector.shape_cast %414 : vector<1x1x256xf32> to vector<1x256xf32>
    %416 = vector.extract_strided_slice %415 {offsets = [0, 0], sizes = [1, 32], strides = [1, 1]} : vector<1x256xf32> to vector<1x32xf32>
    %cst_169 = arith.constant dense<0.000000e+00> : vector<12xf32>
    %417 = vector.multi_reduction <add>, %410, %cst_169 [1] : vector<12x32xf32> to vector<12xf32>
    %418 = vector.shape_cast %417 : vector<12xf32> to vector<12x1xf32>
    %cst_170 = arith.constant 3.200000e+01 : f32
    %419 = vector.broadcast %cst_170 : f32 to vector<12x1xf32>
    %420 = arith.divf %418, %419 : vector<12x1xf32>
    %421 = vector.broadcast %420 : vector<12x1xf32> to vector<12x32xf32>
    %422 = arith.subf %410, %421 : vector<12x32xf32>
    %423 = arith.mulf %422, %422 : vector<12x32xf32>
    %cst_171 = arith.constant dense<0.000000e+00> : vector<12xf32>
    %424 = vector.multi_reduction <add>, %423, %cst_171 [1] : vector<12x32xf32> to vector<12xf32>
    %425 = vector.shape_cast %424 : vector<12xf32> to vector<12x1xf32>
    %cst_172 = arith.constant 3.200000e+01 : f32
    %426 = vector.broadcast %cst_172 : f32 to vector<12x1xf32>
    %427 = arith.divf %425, %426 : vector<12x1xf32>
    %428 = vector.broadcast %420 : vector<12x1xf32> to vector<12x32xf32>
    %429 = arith.subf %410, %428 : vector<12x32xf32>
    %cst_173 = arith.constant 9.99999974E-6 : f32
    %430 = vector.broadcast %cst_173 : f32 to vector<12x1xf32>
    %431 = arith.addf %427, %430 : vector<12x1xf32>
    %432 = math.rsqrt %431 : vector<12x1xf32>
    %433 = vector.broadcast %432 : vector<12x1xf32> to vector<12x32xf32>
    %434 = arith.mulf %429, %433 : vector<12x32xf32>
    %435 = vector.broadcast %413 : vector<1x32xf32> to vector<12x32xf32>
    %436 = arith.mulf %434, %435 : vector<12x32xf32>
    %437 = vector.broadcast %416 : vector<1x32xf32> to vector<12x32xf32>
    %438 = arith.addf %436, %437 : vector<12x32xf32>
    %c1_174 = arith.constant 1 : index
    %c0_175 = arith.constant 0 : index
    %c0_176 = arith.constant 0 : index
    %439 = vector.load %arg9[%c1_174, %c0_175, %c0_176] : memref<3x32x128xf32, #tpu.memory_space<vmem>>, vector<1x32x128xf32>
    %440 = vector.shape_cast %439 : vector<1x32x128xf32> to vector<32x128xf32>
    %cst_177 = arith.constant dense<0.000000e+00> : vector<12x128xf32>
    %441 = tpu.matmul %438, %440, %cst_177 {dimension_numbers = #tpu.dot_dimension_numbers<[1], [0], [0], [1], [0, 0, 1, 1], [], []>} : vector<12x32xf32>, vector<32x128xf32>, vector<12x128xf32> -> vector<12x128xf32>
    %c23 = arith.constant 23 : index
    %c0_178 = arith.constant 0 : index
    %c0_179 = arith.constant 0 : index
    %442 = vector.load %arg12[%c23, %c0_178, %c0_179] : memref<40x1x256xf32, #tpu.memory_space<vmem>>, vector<1x1x256xf32>
    %443 = vector.shape_cast %442 : vector<1x1x256xf32> to vector<1x256xf32>
    %444 = vector.extract_strided_slice %443 {offsets = [0, 0], sizes = [1, 128], strides = [1, 1]} : vector<1x256xf32> to vector<1x128xf32>
    %445 = vector.broadcast %444 : vector<1x128xf32> to vector<12x128xf32>
    %446 = arith.addf %441, %445 : vector<12x128xf32>
    %cst_180 = arith.constant 0.000000e+00 : f32
    %447 = vector.broadcast %cst_180 : f32 to vector<12x128xf32>
    %448 = arith.maximumf %446, %447 : vector<12x128xf32>
    %c1_181 = arith.constant 1 : index
    %c0_182 = arith.constant 0 : index
    %c0_183 = arith.constant 0 : index
    %449 = vector.load %arg10[%c1_181, %c0_182, %c0_183] : memref<3x128x32xf32, #tpu.memory_space<vmem>>, vector<1x128x32xf32>
    %450 = vector.shape_cast %449 : vector<1x128x32xf32> to vector<128x32xf32>
    %cst_184 = arith.constant dense<0.000000e+00> : vector<12x32xf32>
    %451 = tpu.matmul %448, %450, %cst_184 {dimension_numbers = #tpu.dot_dimension_numbers<[1], [0], [0], [1], [0, 0, 1, 1], [], []>} : vector<12x128xf32>, vector<128x32xf32>, vector<12x32xf32> -> vector<12x32xf32>
    %452 = arith.addf %410, %451 : vector<12x32xf32>
    %c26 = arith.constant 26 : index
    %c0_185 = arith.constant 0 : index
    %c0_186 = arith.constant 0 : index
    %453 = vector.load %arg12[%c26, %c0_185, %c0_186] : memref<40x1x256xf32, #tpu.memory_space<vmem>>, vector<1x1x256xf32>
    %454 = vector.shape_cast %453 : vector<1x1x256xf32> to vector<1x256xf32>
    %455 = vector.extract_strided_slice %454 {offsets = [0, 0], sizes = [1, 32], strides = [1, 1]} : vector<1x256xf32> to vector<1x32xf32>
    %456 = vector.broadcast %455 : vector<1x32xf32> to vector<12x32xf32>
    %457 = arith.addf %452, %456 : vector<12x32xf32>
    %c36 = arith.constant 36 : index
    %c0_187 = arith.constant 0 : index
    %c0_188 = arith.constant 0 : index
    %458 = vector.load %arg12[%c36, %c0_187, %c0_188] : memref<40x1x256xf32, #tpu.memory_space<vmem>>, vector<1x1x256xf32>
    %459 = vector.shape_cast %458 : vector<1x1x256xf32> to vector<1x256xf32>
    %460 = vector.extract_strided_slice %459 {offsets = [0, 0], sizes = [1, 32], strides = [1, 1]} : vector<1x256xf32> to vector<1x32xf32>
    %c37 = arith.constant 37 : index
    %c0_189 = arith.constant 0 : index
    %c0_190 = arith.constant 0 : index
    %461 = vector.load %arg12[%c37, %c0_189, %c0_190] : memref<40x1x256xf32, #tpu.memory_space<vmem>>, vector<1x1x256xf32>
    %462 = vector.shape_cast %461 : vector<1x1x256xf32> to vector<1x256xf32>
    %463 = vector.extract_strided_slice %462 {offsets = [0, 0], sizes = [1, 32], strides = [1, 1]} : vector<1x256xf32> to vector<1x32xf32>
    %cst_191 = arith.constant dense<0.000000e+00> : vector<12xf32>
    %464 = vector.multi_reduction <add>, %457, %cst_191 [1] : vector<12x32xf32> to vector<12xf32>
    %465 = vector.shape_cast %464 : vector<12xf32> to vector<12x1xf32>
    %cst_192 = arith.constant 3.200000e+01 : f32
    %466 = vector.broadcast %cst_192 : f32 to vector<12x1xf32>
    %467 = arith.divf %465, %466 : vector<12x1xf32>
    %468 = vector.broadcast %467 : vector<12x1xf32> to vector<12x32xf32>
    %469 = arith.subf %457, %468 : vector<12x32xf32>
    %470 = arith.mulf %469, %469 : vector<12x32xf32>
    %cst_193 = arith.constant dense<0.000000e+00> : vector<12xf32>
    %471 = vector.multi_reduction <add>, %470, %cst_193 [1] : vector<12x32xf32> to vector<12xf32>
    %472 = vector.shape_cast %471 : vector<12xf32> to vector<12x1xf32>
    %cst_194 = arith.constant 3.200000e+01 : f32
    %473 = vector.broadcast %cst_194 : f32 to vector<12x1xf32>
    %474 = arith.divf %472, %473 : vector<12x1xf32>
    %475 = vector.broadcast %467 : vector<12x1xf32> to vector<12x32xf32>
    %476 = arith.subf %457, %475 : vector<12x32xf32>
    %cst_195 = arith.constant 9.99999974E-6 : f32
    %477 = vector.broadcast %cst_195 : f32 to vector<12x1xf32>
    %478 = arith.addf %474, %477 : vector<12x1xf32>
    %479 = math.rsqrt %478 : vector<12x1xf32>
    %480 = vector.broadcast %479 : vector<12x1xf32> to vector<12x32xf32>
    %481 = arith.mulf %476, %480 : vector<12x32xf32>
    %482 = vector.broadcast %460 : vector<1x32xf32> to vector<12x32xf32>
    %483 = arith.mulf %481, %482 : vector<12x32xf32>
    %484 = vector.broadcast %463 : vector<1x32xf32> to vector<12x32xf32>
    %485 = arith.addf %483, %484 : vector<12x32xf32>
    %c2_196 = arith.constant 2 : index
    %c0_197 = arith.constant 0 : index
    %c0_198 = arith.constant 0 : index
    %486 = vector.load %arg6[%c2_196, %c0_197, %c0_198] : memref<3x32x160xf32, #tpu.memory_space<vmem>>, vector<1x32x160xf32>
    %487 = vector.shape_cast %486 : vector<1x32x160xf32> to vector<32x160xf32>
    %cst_199 = arith.constant dense<0.000000e+00> : vector<12x160xf32>
    %488 = tpu.matmul %485, %487, %cst_199 {dimension_numbers = #tpu.dot_dimension_numbers<[1], [0], [0], [1], [0, 0, 1, 1], [], []>} : vector<12x32xf32>, vector<32x160xf32>, vector<12x160xf32> -> vector<12x160xf32>
    %c31 = arith.constant 31 : index
    %c0_200 = arith.constant 0 : index
    %c0_201 = arith.constant 0 : index
    %489 = vector.load %arg12[%c31, %c0_200, %c0_201] : memref<40x1x256xf32, #tpu.memory_space<vmem>>, vector<1x1x256xf32>
    %490 = vector.shape_cast %489 : vector<1x1x256xf32> to vector<1x256xf32>
    %491 = vector.extract_strided_slice %490 {offsets = [0, 0], sizes = [1, 160], strides = [1, 1]} : vector<1x256xf32> to vector<1x160xf32>
    %492 = vector.broadcast %491 : vector<1x160xf32> to vector<12x160xf32>
    %493 = arith.addf %488, %492 : vector<12x160xf32>
    %494 = vector.extract_strided_slice %493 {offsets = [0, 0], sizes = [12, 32], strides = [1, 1]} : vector<12x160xf32> to vector<12x32xf32>
    %cst_202 = arith.constant dense<0.000000e+00> : vector<132x32xf32>
    %495 = tpu.matmul %12, %494, %cst_202 {dimension_numbers = #tpu.dot_dimension_numbers<[1], [0], [0], [1], [0, 0, 1, 1], [], []>} : vector<132x12xf32>, vector<12x32xf32>, vector<132x32xf32> -> vector<132x32xf32>
    %496 = vector.extract_strided_slice %493 {offsets = [0, 32], sizes = [12, 64], strides = [1, 1]} : vector<12x160xf32> to vector<12x64xf32>
    %cst_203 = arith.constant dense<0.000000e+00> : vector<132x64xf32>
    %497 = tpu.matmul %8, %496, %cst_203 {dimension_numbers = #tpu.dot_dimension_numbers<[1], [0], [0], [1], [0, 0, 1, 1], [], []>} : vector<132x12xf32>, vector<12x64xf32>, vector<132x64xf32> -> vector<132x64xf32>
    %498 = vector.extract_strided_slice %166 {offsets = [0, 128], sizes = [132, 64], strides = [1, 1]} : vector<132x192xf32> to vector<132x64xf32>
    %499 = arith.addf %497, %498 : vector<132x64xf32>
    %500 = vector.extract_strided_slice %499 {offsets = [0, 0], sizes = [132, 32], strides = [1, 1]} : vector<132x64xf32> to vector<132x32xf32>
    %501 = vector.extract_strided_slice %499 {offsets = [0, 32], sizes = [132, 32], strides = [1, 1]} : vector<132x64xf32> to vector<132x32xf32>
    %502 = arith.mulf %495, %500 : vector<132x32xf32>
    %cst_204 = arith.constant dense<0.000000e+00> : vector<132x8xf32>
    %503 = tpu.matmul %502, %17, %cst_204 {dimension_numbers = #tpu.dot_dimension_numbers<[1], [0], [0], [1], [0, 0, 1, 1], [], []>} : vector<132x32xf32>, vector<32x8xf32>, vector<132x8xf32> -> vector<132x8xf32>
    %504 = tpu.transpose %503, [1, 0] : vector<132x8xf32> -> vector<8x132xf32>
    %505 = vector.shape_cast %14 : vector<12x132xi1> to vector<12x1x132xi1>
    %506 = vector.shape_cast %504 : vector<8x132xf32> to vector<1x8x132xf32>
    %cst_205 = arith.constant -1.000000e+30 : f32
    %507 = vector.shape_cast %505 : vector<12x1x132xi1> to vector<12x1x132xi1>
    %508 = vector.broadcast %507 : vector<12x1x132xi1> to vector<12x8x132xi1>
    %509 = vector.shape_cast %506 : vector<1x8x132xf32> to vector<1x8x132xf32>
    %510 = vector.broadcast %509 : vector<1x8x132xf32> to vector<12x8x132xf32>
    %511 = vector.broadcast %cst_205 : f32 to vector<12x8x132xf32>
    %512 = arith.select %508, %510, %511 : vector<12x8x132xi1>, vector<12x8x132xf32>
    %cst_206 = arith.constant dense<0xFF800000> : vector<12x8xf32>
    %513 = vector.multi_reduction <maximumf>, %512, %cst_206 [2] : vector<12x8x132xf32> to vector<12x8xf32>
    %cst_207 = arith.constant dense<0.000000e+00> : vector<132x8xf32>
    %514 = tpu.matmul %12, %513, %cst_207 {dimension_numbers = #tpu.dot_dimension_numbers<[1], [0], [0], [1], [0, 0, 1, 1], [], []>} : vector<132x12xf32>, vector<12x8xf32>, vector<132x8xf32> -> vector<132x8xf32>
    %515 = arith.subf %503, %514 : vector<132x8xf32>
    %516 = math.exp %515 : vector<132x8xf32>
    %cst_208 = arith.constant dense<0.000000e+00> : vector<12x8xf32>
    %517 = tpu.matmul %16, %516, %cst_208 {dimension_numbers = #tpu.dot_dimension_numbers<[1], [0], [0], [1], [0, 0, 1, 1], [], []>} : vector<12x132xf32>, vector<132x8xf32>, vector<12x8xf32> -> vector<12x8xf32>
    %cst_209 = arith.constant dense<0.000000e+00> : vector<132x8xf32>
    %518 = tpu.matmul %12, %517, %cst_209 {dimension_numbers = #tpu.dot_dimension_numbers<[1], [0], [0], [1], [0, 0, 1, 1], [], []>} : vector<132x12xf32>, vector<12x8xf32>, vector<132x8xf32> -> vector<132x8xf32>
    %519 = tpu.reciprocal %518 {approx = true} : vector<132x8xf32> -> vector<132x8xf32>
    %520 = arith.mulf %518, %519 : vector<132x8xf32>
    %cst_210 = arith.constant 2.000000e+00 : f32
    %521 = vector.broadcast %cst_210 : f32 to vector<132x8xf32>
    %522 = arith.subf %521, %520 : vector<132x8xf32>
    %523 = arith.mulf %519, %522 : vector<132x8xf32>
    %524 = arith.mulf %516, %523 : vector<132x8xf32>
    %cst_211 = arith.constant dense<0.000000e+00> : vector<132x32xf32>
    %525 = tpu.matmul %524, %18, %cst_211 {dimension_numbers = #tpu.dot_dimension_numbers<[1], [0], [0], [1], [0, 0, 1, 1], [], []>} : vector<132x8xf32>, vector<8x32xf32>, vector<132x32xf32> -> vector<132x32xf32>
    %526 = arith.mulf %501, %525 : vector<132x32xf32>
    %cst_212 = arith.constant dense<0.000000e+00> : vector<12x32xf32>
    %527 = tpu.matmul %16, %526, %cst_212 {dimension_numbers = #tpu.dot_dimension_numbers<[1], [0], [0], [1], [0, 0, 1, 1], [], []>} : vector<12x132xf32>, vector<132x32xf32>, vector<12x32xf32> -> vector<12x32xf32>
    %c4_213 = arith.constant 4 : index
    %c0_214 = arith.constant 0 : index
    %c0_215 = arith.constant 0 : index
    %528 = vector.load %arg8[%c4_213, %c0_214, %c0_215] : memref<6x32x32xf32, #tpu.memory_space<vmem>>, vector<1x32x32xf32>
    %529 = vector.shape_cast %528 : vector<1x32x32xf32> to vector<32x32xf32>
    %cst_216 = arith.constant dense<0.000000e+00> : vector<12x32xf32>
    %530 = tpu.matmul %527, %529, %cst_216 {dimension_numbers = #tpu.dot_dimension_numbers<[1], [0], [0], [1], [0, 0, 1, 1], [], []>} : vector<12x32xf32>, vector<32x32xf32>, vector<12x32xf32> -> vector<12x32xf32>
    %c33 = arith.constant 33 : index
    %c0_217 = arith.constant 0 : index
    %c0_218 = arith.constant 0 : index
    %531 = vector.load %arg12[%c33, %c0_217, %c0_218] : memref<40x1x256xf32, #tpu.memory_space<vmem>>, vector<1x1x256xf32>
    %532 = vector.shape_cast %531 : vector<1x1x256xf32> to vector<1x256xf32>
    %533 = vector.extract_strided_slice %532 {offsets = [0, 0], sizes = [1, 32], strides = [1, 1]} : vector<1x256xf32> to vector<1x32xf32>
    %534 = vector.broadcast %533 : vector<1x32xf32> to vector<12x32xf32>
    %535 = arith.addf %530, %534 : vector<12x32xf32>
    %536 = vector.extract_strided_slice %493 {offsets = [0, 128], sizes = [12, 32], strides = [1, 1]} : vector<12x160xf32> to vector<12x32xf32>
    %537 = arith.addf %535, %536 : vector<12x32xf32>
    %538 = arith.negf %537 : vector<12x32xf32>
    %539 = math.exp %538 : vector<12x32xf32>
    %cst_219 = arith.constant 1.000000e+00 : f32
    %540 = vector.broadcast %cst_219 : f32 to vector<12x32xf32>
    %541 = arith.addf %540, %539 : vector<12x32xf32>
    %542 = arith.divf %540, %541 : vector<12x32xf32>
    %543 = vector.extract_strided_slice %493 {offsets = [0, 96], sizes = [12, 32], strides = [1, 1]} : vector<12x160xf32> to vector<12x32xf32>
    %544 = arith.subf %543, %527 : vector<12x32xf32>
    %545 = arith.mulf %542, %544 : vector<12x32xf32>
    %546 = arith.addf %527, %545 : vector<12x32xf32>
    %c5_220 = arith.constant 5 : index
    %c0_221 = arith.constant 0 : index
    %c0_222 = arith.constant 0 : index
    %547 = vector.load %arg8[%c5_220, %c0_221, %c0_222] : memref<6x32x32xf32, #tpu.memory_space<vmem>>, vector<1x32x32xf32>
    %548 = vector.shape_cast %547 : vector<1x32x32xf32> to vector<32x32xf32>
    %cst_223 = arith.constant dense<0.000000e+00> : vector<12x32xf32>
    %549 = tpu.matmul %546, %548, %cst_223 {dimension_numbers = #tpu.dot_dimension_numbers<[1], [0], [0], [1], [0, 0, 1, 1], [], []>} : vector<12x32xf32>, vector<32x32xf32>, vector<12x32xf32> -> vector<12x32xf32>
    %550 = arith.addf %457, %549 : vector<12x32xf32>
    %c34 = arith.constant 34 : index
    %c0_224 = arith.constant 0 : index
    %c0_225 = arith.constant 0 : index
    %551 = vector.load %arg12[%c34, %c0_224, %c0_225] : memref<40x1x256xf32, #tpu.memory_space<vmem>>, vector<1x1x256xf32>
    %552 = vector.shape_cast %551 : vector<1x1x256xf32> to vector<1x256xf32>
    %553 = vector.extract_strided_slice %552 {offsets = [0, 0], sizes = [1, 32], strides = [1, 1]} : vector<1x256xf32> to vector<1x32xf32>
    %554 = vector.broadcast %553 : vector<1x32xf32> to vector<12x32xf32>
    %555 = arith.addf %550, %554 : vector<12x32xf32>
    %c38 = arith.constant 38 : index
    %c0_226 = arith.constant 0 : index
    %c0_227 = arith.constant 0 : index
    %556 = vector.load %arg12[%c38, %c0_226, %c0_227] : memref<40x1x256xf32, #tpu.memory_space<vmem>>, vector<1x1x256xf32>
    %557 = vector.shape_cast %556 : vector<1x1x256xf32> to vector<1x256xf32>
    %558 = vector.extract_strided_slice %557 {offsets = [0, 0], sizes = [1, 32], strides = [1, 1]} : vector<1x256xf32> to vector<1x32xf32>
    %c39 = arith.constant 39 : index
    %c0_228 = arith.constant 0 : index
    %c0_229 = arith.constant 0 : index
    %559 = vector.load %arg12[%c39, %c0_228, %c0_229] : memref<40x1x256xf32, #tpu.memory_space<vmem>>, vector<1x1x256xf32>
    %560 = vector.shape_cast %559 : vector<1x1x256xf32> to vector<1x256xf32>
    %561 = vector.extract_strided_slice %560 {offsets = [0, 0], sizes = [1, 32], strides = [1, 1]} : vector<1x256xf32> to vector<1x32xf32>
    %cst_230 = arith.constant dense<0.000000e+00> : vector<12xf32>
    %562 = vector.multi_reduction <add>, %555, %cst_230 [1] : vector<12x32xf32> to vector<12xf32>
    %563 = vector.shape_cast %562 : vector<12xf32> to vector<12x1xf32>
    %cst_231 = arith.constant 3.200000e+01 : f32
    %564 = vector.broadcast %cst_231 : f32 to vector<12x1xf32>
    %565 = arith.divf %563, %564 : vector<12x1xf32>
    %566 = vector.broadcast %565 : vector<12x1xf32> to vector<12x32xf32>
    %567 = arith.subf %555, %566 : vector<12x32xf32>
    %568 = arith.mulf %567, %567 : vector<12x32xf32>
    %cst_232 = arith.constant dense<0.000000e+00> : vector<12xf32>
    %569 = vector.multi_reduction <add>, %568, %cst_232 [1] : vector<12x32xf32> to vector<12xf32>
    %570 = vector.shape_cast %569 : vector<12xf32> to vector<12x1xf32>
    %cst_233 = arith.constant 3.200000e+01 : f32
    %571 = vector.broadcast %cst_233 : f32 to vector<12x1xf32>
    %572 = arith.divf %570, %571 : vector<12x1xf32>
    %573 = vector.broadcast %565 : vector<12x1xf32> to vector<12x32xf32>
    %574 = arith.subf %555, %573 : vector<12x32xf32>
    %cst_234 = arith.constant 9.99999974E-6 : f32
    %575 = vector.broadcast %cst_234 : f32 to vector<12x1xf32>
    %576 = arith.addf %572, %575 : vector<12x1xf32>
    %577 = math.rsqrt %576 : vector<12x1xf32>
    %578 = vector.broadcast %577 : vector<12x1xf32> to vector<12x32xf32>
    %579 = arith.mulf %574, %578 : vector<12x32xf32>
    %580 = vector.broadcast %558 : vector<1x32xf32> to vector<12x32xf32>
    %581 = arith.mulf %579, %580 : vector<12x32xf32>
    %582 = vector.broadcast %561 : vector<1x32xf32> to vector<12x32xf32>
    %583 = arith.addf %581, %582 : vector<12x32xf32>
    %c2_235 = arith.constant 2 : index
    %c0_236 = arith.constant 0 : index
    %c0_237 = arith.constant 0 : index
    %584 = vector.load %arg9[%c2_235, %c0_236, %c0_237] : memref<3x32x128xf32, #tpu.memory_space<vmem>>, vector<1x32x128xf32>
    %585 = vector.shape_cast %584 : vector<1x32x128xf32> to vector<32x128xf32>
    %cst_238 = arith.constant dense<0.000000e+00> : vector<12x128xf32>
    %586 = tpu.matmul %583, %585, %cst_238 {dimension_numbers = #tpu.dot_dimension_numbers<[1], [0], [0], [1], [0, 0, 1, 1], [], []>} : vector<12x32xf32>, vector<32x128xf32>, vector<12x128xf32> -> vector<12x128xf32>
    %c32 = arith.constant 32 : index
    %c0_239 = arith.constant 0 : index
    %c0_240 = arith.constant 0 : index
    %587 = vector.load %arg12[%c32, %c0_239, %c0_240] : memref<40x1x256xf32, #tpu.memory_space<vmem>>, vector<1x1x256xf32>
    %588 = vector.shape_cast %587 : vector<1x1x256xf32> to vector<1x256xf32>
    %589 = vector.extract_strided_slice %588 {offsets = [0, 0], sizes = [1, 128], strides = [1, 1]} : vector<1x256xf32> to vector<1x128xf32>
    %590 = vector.broadcast %589 : vector<1x128xf32> to vector<12x128xf32>
    %591 = arith.addf %586, %590 : vector<12x128xf32>
    %cst_241 = arith.constant 0.000000e+00 : f32
    %592 = vector.broadcast %cst_241 : f32 to vector<12x128xf32>
    %593 = arith.maximumf %591, %592 : vector<12x128xf32>
    %c2_242 = arith.constant 2 : index
    %c0_243 = arith.constant 0 : index
    %c0_244 = arith.constant 0 : index
    %594 = vector.load %arg10[%c2_242, %c0_243, %c0_244] : memref<3x128x32xf32, #tpu.memory_space<vmem>>, vector<1x128x32xf32>
    %595 = vector.shape_cast %594 : vector<1x128x32xf32> to vector<128x32xf32>
    %cst_245 = arith.constant dense<0.000000e+00> : vector<12x32xf32>
    %596 = tpu.matmul %593, %595, %cst_245 {dimension_numbers = #tpu.dot_dimension_numbers<[1], [0], [0], [1], [0, 0, 1, 1], [], []>} : vector<12x128xf32>, vector<128x32xf32>, vector<12x32xf32> -> vector<12x32xf32>
    %597 = arith.addf %555, %596 : vector<12x32xf32>
    %c35 = arith.constant 35 : index
    %c0_246 = arith.constant 0 : index
    %c0_247 = arith.constant 0 : index
    %598 = vector.load %arg12[%c35, %c0_246, %c0_247] : memref<40x1x256xf32, #tpu.memory_space<vmem>>, vector<1x1x256xf32>
    %599 = vector.shape_cast %598 : vector<1x1x256xf32> to vector<1x256xf32>
    %600 = vector.extract_strided_slice %599 {offsets = [0, 0], sizes = [1, 32], strides = [1, 1]} : vector<1x256xf32> to vector<1x32xf32>
    %601 = vector.broadcast %600 : vector<1x32xf32> to vector<12x32xf32>
    %602 = arith.addf %597, %601 : vector<12x32xf32>
    %c10 = arith.constant 10 : index
    %c0_248 = arith.constant 0 : index
    %c0_249 = arith.constant 0 : index
    %603 = vector.load %arg12[%c10, %c0_248, %c0_249] : memref<40x1x256xf32, #tpu.memory_space<vmem>>, vector<1x1x256xf32>
    %604 = vector.shape_cast %603 : vector<1x1x256xf32> to vector<1x256xf32>
    %605 = vector.extract_strided_slice %604 {offsets = [0, 0], sizes = [1, 32], strides = [1, 1]} : vector<1x256xf32> to vector<1x32xf32>
    %c11 = arith.constant 11 : index
    %c0_250 = arith.constant 0 : index
    %c0_251 = arith.constant 0 : index
    %606 = vector.load %arg12[%c11, %c0_250, %c0_251] : memref<40x1x256xf32, #tpu.memory_space<vmem>>, vector<1x1x256xf32>
    %607 = vector.shape_cast %606 : vector<1x1x256xf32> to vector<1x256xf32>
    %608 = vector.extract_strided_slice %607 {offsets = [0, 0], sizes = [1, 32], strides = [1, 1]} : vector<1x256xf32> to vector<1x32xf32>
    %cst_252 = arith.constant dense<0.000000e+00> : vector<12xf32>
    %609 = vector.multi_reduction <add>, %602, %cst_252 [1] : vector<12x32xf32> to vector<12xf32>
    %610 = vector.shape_cast %609 : vector<12xf32> to vector<12x1xf32>
    %cst_253 = arith.constant 3.200000e+01 : f32
    %611 = vector.broadcast %cst_253 : f32 to vector<12x1xf32>
    %612 = arith.divf %610, %611 : vector<12x1xf32>
    %613 = vector.broadcast %612 : vector<12x1xf32> to vector<12x32xf32>
    %614 = arith.subf %602, %613 : vector<12x32xf32>
    %615 = arith.mulf %614, %614 : vector<12x32xf32>
    %cst_254 = arith.constant dense<0.000000e+00> : vector<12xf32>
    %616 = vector.multi_reduction <add>, %615, %cst_254 [1] : vector<12x32xf32> to vector<12xf32>
    %617 = vector.shape_cast %616 : vector<12xf32> to vector<12x1xf32>
    %cst_255 = arith.constant 3.200000e+01 : f32
    %618 = vector.broadcast %cst_255 : f32 to vector<12x1xf32>
    %619 = arith.divf %617, %618 : vector<12x1xf32>
    %620 = vector.broadcast %612 : vector<12x1xf32> to vector<12x32xf32>
    %621 = arith.subf %602, %620 : vector<12x32xf32>
    %cst_256 = arith.constant 9.99999974E-6 : f32
    %622 = vector.broadcast %cst_256 : f32 to vector<12x1xf32>
    %623 = arith.addf %619, %622 : vector<12x1xf32>
    %624 = math.rsqrt %623 : vector<12x1xf32>
    %625 = vector.broadcast %624 : vector<12x1xf32> to vector<12x32xf32>
    %626 = arith.mulf %621, %625 : vector<12x32xf32>
    %627 = vector.broadcast %605 : vector<1x32xf32> to vector<12x32xf32>
    %628 = arith.mulf %626, %627 : vector<12x32xf32>
    %629 = vector.broadcast %608 : vector<1x32xf32> to vector<12x32xf32>
    %630 = arith.addf %628, %629 : vector<12x32xf32>
    %c0_257 = arith.constant 0 : index
    %c0_258 = arith.constant 0 : index
    %631 = vector.load %arg11[%c0_257, %c0_258] : memref<32x256xf32, #tpu.memory_space<vmem>>, vector<32x256xf32>
    %cst_259 = arith.constant dense<0.000000e+00> : vector<12x256xf32>
    %632 = tpu.matmul %630, %631, %cst_259 {dimension_numbers = #tpu.dot_dimension_numbers<[1], [0], [0], [1], [0, 0, 1, 1], [], []>} : vector<12x32xf32>, vector<32x256xf32>, vector<12x256xf32> -> vector<12x256xf32>
    %c12 = arith.constant 12 : index
    %c0_260 = arith.constant 0 : index
    %c0_261 = arith.constant 0 : index
    %633 = vector.load %arg12[%c12, %c0_260, %c0_261] : memref<40x1x256xf32, #tpu.memory_space<vmem>>, vector<1x1x256xf32>
    %634 = vector.shape_cast %633 : vector<1x1x256xf32> to vector<1x256xf32>
    %635 = vector.broadcast %634 : vector<1x256xf32> to vector<12x256xf32>
    %636 = arith.addf %632, %635 : vector<12x256xf32>
    %c0_262 = arith.constant 0 : index
    %c0_263 = arith.constant 0 : index
    %637 = vector.load %arg13[%c0_262, %c0_263] : memref<12x256xf32, #tpu.memory_space<vmem>>, vector<12x256xf32>
    tpu.vector_store %arg13[%c0_262, %c0_263], %636 {strides = array<i32>} : memref<12x256xf32, #tpu.memory_space<vmem>>, vector<12x256xf32>,
    return
  }
  func.func @transform_0(%arg0: i32) -> (i32, i32) {
    %c0_i32 = arith.constant 0 : i32
    %c0_i32_0 = arith.constant 0 : i32
    %c0_i32_1 = arith.constant 0 : i32
    return %c0_i32, %c0_i32_0 : i32, i32
  }
  func.func @transform_1(%arg0: i32) -> (i32, i32) {
    %c0_i32 = arith.constant 0 : i32
    %c0_i32_0 = arith.constant 0 : i32
    %c0_i32_1 = arith.constant 0 : i32
    return %c0_i32, %c0_i32_0 : i32, i32
  }
  func.func @transform_2(%arg0: i32) -> (i32, i32) {
    %c0_i32 = arith.constant 0 : i32
    %c0_i32_0 = arith.constant 0 : i32
    %c0_i32_1 = arith.constant 0 : i32
    return %c0_i32, %c0_i32_0 : i32, i32
  }
  func.func @transform_3(%arg0: i32) -> (i32, i32) {
    %c0_i32 = arith.constant 0 : i32
    %c0_i32_0 = arith.constant 0 : i32
    %c0_i32_1 = arith.constant 0 : i32
    return %c0_i32, %c0_i32_0 : i32, i32
  }
  func.func @transform_4(%arg0: i32) -> (i32, i32) {
    %c0_i32 = arith.constant 0 : i32
    %c0_i32_0 = arith.constant 0 : i32
    %c0_i32_1 = arith.constant 0 : i32
    return %c0_i32, %c0_i32_0 : i32, i32
  }
  func.func @transform_5(%arg0: i32) -> (i32, i32, i32) {
    %c0_i32 = arith.constant 0 : i32
    %c0_i32_0 = arith.constant 0 : i32
    %c0_i32_1 = arith.constant 0 : i32
    %c0_i32_2 = arith.constant 0 : i32
    return %c0_i32, %c0_i32_0, %c0_i32_1 : i32, i32, i32
  }
  func.func @transform_6(%arg0: i32) -> (i32, i32) {
    %c0_i32 = arith.constant 0 : i32
    %c0_i32_0 = arith.constant 0 : i32
    %c0_i32_1 = arith.constant 0 : i32
    return %c0_i32, %c0_i32_0 : i32, i32
  }
  func.func @transform_7(%arg0: i32) -> (i32, i32, i32) {
    %c0_i32 = arith.constant 0 : i32
    %c0_i32_0 = arith.constant 0 : i32
    %c0_i32_1 = arith.constant 0 : i32
    %c0_i32_2 = arith.constant 0 : i32
    return %c0_i32, %c0_i32_0, %c0_i32_1 : i32, i32, i32
  }
  func.func @transform_8(%arg0: i32) -> (i32, i32, i32) {
    %c0_i32 = arith.constant 0 : i32
    %c0_i32_0 = arith.constant 0 : i32
    %c0_i32_1 = arith.constant 0 : i32
    %c0_i32_2 = arith.constant 0 : i32
    return %c0_i32, %c0_i32_0, %c0_i32_1 : i32, i32, i32
  }
  func.func @transform_9(%arg0: i32) -> (i32, i32, i32) {
    %c0_i32 = arith.constant 0 : i32
    %c0_i32_0 = arith.constant 0 : i32
    %c0_i32_1 = arith.constant 0 : i32
    %c0_i32_2 = arith.constant 0 : i32
    return %c0_i32, %c0_i32_0, %c0_i32_1 : i32, i32, i32
  }
  func.func @transform_10(%arg0: i32) -> (i32, i32) {
    %c0_i32 = arith.constant 0 : i32
    %c0_i32_0 = arith.constant 0 : i32
    %c0_i32_1 = arith.constant 0 : i32
    return %c0_i32, %c0_i32_0 : i32, i32
  }
  func.func @transform_11(%arg0: i32) -> (i32, i32, i32) {
    %c0_i32 = arith.constant 0 : i32
    %c0_i32_0 = arith.constant 0 : i32
    %c0_i32_1 = arith.constant 0 : i32
    %c0_i32_2 = arith.constant 0 : i32
    return %c0_i32, %c0_i32_0, %c0_i32_1 : i32, i32, i32
  }
  func.func @transform_12(%arg0: i32) -> (i32, i32) {
    %c0_i32 = arith.constant 0 : i32
    %c0_i32_0 = arith.constant 0 : i32
    %c0_i32_1 = arith.constant 0 : i32
    return %c0_i32, %c0_i32_0 : i32, i32
  }
}

</mosaic_0001>

<bundles_post_ra>
// kernel: tpu_custom_call.1
= control target key start
LH: loop header
LB: loop body
LE: loop exit
PB: predicated region body
PF: predicated region fallthrough
CT: control target
= control target key end

     0   :  { %vm13960_vm0 = vcmask 64512   ;;  %s13872_s0 = inlined_call_operand.vmem [shape: f32[132,8], index: 0, kind: input, shape index: {}]   ;;  %s13873_s1 = inlined_call_operand.vmem [shape: s32[132,2], index: 1, kind: input, shape index: {}]   ;;  %s13874_s2 = inlined_call_operand.vmem [shape: s32[2,132], index: 2, kind: input, shape index: {}]   ;;  %s13875_s3 = inlined_call_operand.vmem [shape: f32[12,32], index: 3, kind: input, shape index: {}]   ;;  %s13876_s4 = inlined_call_operand.vmem [shape: f32[144,64], index: 4, kind: input, shape index: {}]   ;;  %s13877_s5 = inlined_call_operand.vmem [shape: f32[3,32,160], index: 5, kind: input, shape index: {}]   ;;  %s13878_s6 = inlined_call_operand.vmem [shape: f32[32,192], index: 6, kind: input, shape index: {}]   ;;  %s13879_s7 = inlined_call_operand.vmem [shape: f32[6,32,32], index: 7, kind: input, shape index: {}]   ;;  %s13880_s8 = inlined_call_operand.vmem [shape: f32[3,32,128], index: 8, kind: input, shape index: {}]   ;;  %s13881_s9 = inlined_call_operand.vmem [shape: f32[3,128,32], index: 9, kind: input, shape index: {}]   ;;  %s13882_s10 = inlined_call_operand.vmem [shape: f32[32,256], index: 10, kind: input, shape index: {}]   ;;  %s13883_s11 = inlined_call_operand.vmem [shape: f32[40,1,256], index: 11, kind: input, shape index: {}]   ;;  %s13884_s12 = inlined_call_operand.hbm [shape: f32[12,256], index: 12, kind: output, shape index: {}]  }
   0x1   :  { %v306_v0 = vld [vmem:[%s13876_s4] sm:$0xff] }
   0x2   :  { %v289_v1 = vld [vmem:[%s13872_s0] sm:$0xff]  ;;  %378 = vmatpush.msra.mxu0 %v306_v0 }
   0x3   :  { %7782 = vmatmul.msk.f32.vlgmr.msra.gmra.mxu0 %vm13960_vm0, %v289_v1 }
   0x4   :  { %17 = vsyncpa [#allocation3], 0  ;;  %v290_v2 = vld [vmem:[%s13872_s0 + $0x8] sm:$0xff]  ;;  %v291_v3 = vld [vmem:[%s13872_s0 + $0x10] sm:$0xff]  ;;  %vm13959_vm1 = vcmask 261120   ;;  %s8979_s23 = smov 96  }
   0x5   :  { %v292_v4 = vld [vmem:[%s13872_s0 + $0x18] sm:$0xff]  ;;  %v293_v5 = vld [vmem:[%s13872_s0 + $0x20] sm:$0xff]  ;;  %v294_v6 = vld [vmem:[%s13872_s0 + $0x28] sm:$0xff]  ;;  %v8980_v60 = vmov 32.0   ;;  %vm13958_vm3 = vcmask 257024   ;;  %s8985_s28 = smov 32  }
   0x6   :  { %v295_v7 = vld [vmem:[%s13872_s0 + $0x30] sm:$0xff]  ;;  %v296_v8 = vld [vmem:[%s13872_s0 + $0x38] sm:$0xff]  ;;  %v297_v9 = vld [vmem:[%s13872_s0 + $0x40] sm:$0xff]  ;;  %8543 = vrcp.f32 %v8980_v60  ;;  %s7731_s14 = sshll.u32 %s13884_s12, 4  ;;  %s8989_s15 = smov 16   ;;  %s7732_s14 = int_to_ptr.hbm [resolvable:$true] %s7731_s14 }
   0x7   :  { %v298_v10 = vld [vmem:[%s13872_s0 + $0x48] sm:$0xff]  ;;  %v299_v11 = vld [vmem:[%s13872_s0 + $0x50] sm:$0xff]  ;;  %v300_v12 = vld [vmem:[%s13872_s0 + $0x58] sm:$0xff] }
   0x8   :  { %v301_v13 = vld [vmem:[%s13872_s0 + $0x60] sm:$0xff]  ;;  %v302_v14 = vld [vmem:[%s13872_s0 + $0x68] sm:$0xff]  ;;  %v303_v15 = vld [vmem:[%s13872_s0 + $0x70] sm:$0xff] }
   0x9   :  { %v304_v16 = vld [vmem:[%s13872_s0 + $0x78] sm:$0xff]  ;;  %v307_v17 = vld [vmem:[%s13883_s11] sm:$0x3] }
   0xa   :  { %v9125_v18 = vperm.slane %v307_v17, 0  ;;  %v305_v20 = vld [vmem:[%s13872_s0 + $0x80] sm:$0xf] }
   0xb   :  { %7783 = vmatmul.msk.f32.gmra.mxu0 %vm13960_vm0, %v290_v2 }
   0xc   :  { %v8544_v61 = vpop.eup %8543 }
   0xd   :  { %v489_v63 = vmul.f32 32.0, %v8544_v61  ;;  %vm493_vm2 = vweird.f32 %v8544_v61 }
   0xf   :  { %v490_v1 = vsub.f32 1.0, %v489_v63 }
  0x13   :  { %7784 = vmatmul.msk.f32.gmra.mxu0 %vm13960_vm0, %v291_v3 }
  0x1b   :  { %7785 = vmatmul.msk.f32.gmra.mxu0 %vm13960_vm0, %v292_v4  ;;  %v491_v4 = vmul.f32 %v8544_v61, %v490_v1 }
  0x23   :  { %7786 = vmatmul.msk.f32.gmra.mxu0 %vm13960_vm0, %v293_v5 }
  0x2b   :  { %7787 = vmatmul.msk.f32.gmra.mxu0 %vm13960_vm0, %v294_v6  ;;  %v492_v6 = vadd.f32 %v8544_v61, %v491_v4 }
  0x33   :  { %7788 = vmatmul.msk.f32.gmra.mxu0 %vm13960_vm0, %v295_v7 }
  0x3b   :  { %7789 = vmatmul.msk.f32.gmra.mxu0 %vm13960_vm0, %v296_v8  ;;  %v9225_v8 = vsel %vm493_vm2, %v8544_v61, %v492_v6  ;;  %vm1466_vm2 = vcmask 523264  }
  0x3c   :  { %14124 = vst [vmem:[#allocation5_spill] sm:$0xff] %v9225_v8 }
  0x43   :  { %7790 = vmatmul.msk.f32.gmra.mxu0 %vm13960_vm0, %v297_v9 }
  0x4b   :  { %7791 = vmatmul.msk.f32.gmra.mxu0 %vm13960_vm0, %v298_v10 }
  0x53   :  { %7792 = vmatmul.msk.f32.gmra.mxu0 %vm13960_vm0, %v299_v11 }
  0x5b   :  { %7793 = vmatmul.msk.f32.gmra.mxu0 %vm13960_vm0, %v300_v12 }
  0x63   :  { %7794 = vmatmul.msk.f32.gmra.mxu0 %vm13960_vm0, %v301_v13 }
  0x6b   :  { %7795 = vmatmul.msk.f32.gmra.mxu0 %vm13960_vm0, %v302_v14 }
  0x73   :  { %7796 = vmatmul.msk.f32.gmra.mxu0 %vm13960_vm0, %v303_v15 }
  0x7b   :  { %7797 = vmatmul.msk.f32.gmra.mxu0 %vm13960_vm0, %v304_v16 }
  0x80   :  { %v380_v19 = vpop.f32.mrf.mxu0 }
  0x81   :  { %v9131_v21 = vadd.f32 %v380_v19, %v9125_v18 }
  0x83   :  { %892 = vrot.lane.b32.xlu0 %v9131_v21, %s8979_s23  ;;  %v436_v22 = vsel %vm13959_vm1, %v9131_v21, 0.0  ;;  %7798 = vmatmul.msk.f32.gmra.mxu0 %vm13960_vm0, %v305_v20 }
  0x84   :  { %437 = vadd.xlane.f32.xlu2 %v436_v22 }
  0x88   :  { %v383_v23 = vpop.f32.mrf.mxu0 }
  0x89   :  { %v9139_v24 = vadd.f32 %v383_v23, %v9125_v18 }
  0x8b   :  { %894 = vrot.lane.b32.xlu0 %v9139_v24, %s8979_s23  ;;  %v439_v31 = vsel %vm13959_vm1, %v9139_v24, 0.0 }
  0x90   :  { %v386_v25 = vpop.f32.mrf.mxu0 }
  0x91   :  { %v9144_v26 = vadd.f32 %v386_v25, %v9125_v18 }
  0x93   :  { %896 = vrot.lane.b32.xlu1 %v9144_v26, %s8979_s23  ;;  %v442_v35 = vsel %vm13959_vm1, %v9144_v26, 0.0 }
  0x98   :  { %v389_v27 = vpop.f32.mrf.mxu0 }
  0x99   :  { %v9149_v28 = vadd.f32 %v389_v27, %v9125_v18 }
  0x9b   :  { %v445_v37 = vsel %vm13959_vm1, %v9149_v28, 0.0 }
  0x9c   :  { %898 = vrot.lane.b32.xlu2 %v9149_v28, %s8979_s23 }
  0xa0   :  { %v392_v29 = vpop.f32.mrf.mxu0 }
  0xa1   :  { %v9156_v32 = vadd.f32 %v392_v29, %v9125_v18 }
  0xa3   :  { %v448_v34 = vsel %vm13959_vm1, %v9156_v32, 0.0 }
  0xa8   :  { %v395_v30 = vpop.f32.mrf.mxu0 }
  0xa9   :  { %v9172_v41 = vadd.f32 %v395_v30, %v9125_v18 }
  0xab   :  { %v451_v48 = vsel %vm13959_vm1, %v9172_v41, 0.0 }
  0xb0   :  { %v398_v33 = vpop.f32.mrf.mxu0 }
  0xb1   :  { %v9184_v49 = vadd.f32 %v398_v33, %v9125_v18 }
  0xb3   :  { %v454_v50 = vsel %vm13959_vm1, %v9184_v49, 0.0 }
  0xb5   :  { %440 = vadd.xlane.f32.xlu0 %v439_v31 }
  0xb8   :  { %v401_v36 = vpop.f32.mrf.mxu0 }
  0xb9   :  { %v9165_v39 = vadd.f32 %v401_v36, %v9125_v18 }
  0xbb   :  { %v457_v0 = vsel %vm13959_vm1, %v9165_v39, 0.0 }
  0xbd   :  { %443 = vadd.xlane.f32.xlu1 %v442_v35  ;;  %449 = vadd.xlane.f32.xlu0 %v448_v34 }
  0xc0   :  { %v404_v38 = vpop.f32.mrf.mxu0 }
  0xc1   :  { %v9177_v45 = vadd.f32 %v404_v38, %v9125_v18 }
  0xc3   :  { %v460_v46 = vsel %vm13959_vm1, %v9177_v45, 0.0 }
  0xc5   :  { %446 = vadd.xlane.f32.xlu2 %v445_v37 }
  0xc8   :  { %v407_v40 = vpop.f32.mrf.mxu0 }
  0xc9   :  { %v9233_v15 = vadd.f32 %v407_v40, %v9125_v18 }
  0xd0   :  { %v410_v42 = vpop.f32.mrf.mxu0 }
  0xd1   :  { %906 = vrot.lane.b32.xlu0 %v9165_v39, %s8979_s23  ;;  %v9189_v52 = vadd.f32 %v410_v42, %v9125_v18 }
  0xd6   :  { %900 = vrot.lane.b32.xlu1 %v9156_v32, %s8979_s23 }
  0xd8   :  { %v413_v43 = vpop.f32.mrf.mxu0 }
  0xd9   :  { %v9245_v23 = vadd.f32 %v413_v43, %v9125_v18 }
  0xdd   :  { %902 = vrot.lane.b32.xlu2 %v9172_v41, %s8979_s23 }
  0xe0   :  { %v416_v44 = vpop.f32.mrf.mxu0 }
  0xe1   :  { %v9208_v57 = vadd.f32 %v416_v44, %v9125_v18 }
  0xe8   :  { %v419_v47 = vpop.f32.mrf.mxu0 }
  0xe9   :  { %v9194_v54 = vadd.f32 %v419_v47, %v9125_v18 }
  0xf0   :  { %v422_v51 = vpop.f32.mrf.mxu0 }
  0xf1   :  { %v9213_v58 = vadd.f32 %v422_v51, %v9125_v18 }
  0xf5   :  { %v893_v2 = vpop.permute.xlu0 %892 }
  0xf7   :  { %v438_v9 = vpop.xlane.xlu2 %437 }
  0xf8   :  { %v425_v53 = vpop.f32.mrf.mxu0  ;;  %v495_v12 = vmul.f32 %v9225_v8, %v438_v9 }
  0xf9   :  { %v9218_v59 = vadd.f32 %v425_v53, %v9125_v18 }
  0xfa   :  { %v9230_v13 = vsub.f32 %v9131_v21, %v495_v12 }
  0xfb   :  { %461 = vadd.xlane.f32.xlu0 %v460_v46 }
  0xfc   :  { %v529_v17 = vmul.f32 %v9230_v13, %v9230_v13 }
  0xfd   :  { %v895_v10 = vpop.permute.xlu0 %894 }
  0xfe   :  { %v546_v20 = vsel %vm13959_vm1, %v529_v17, 0.0  ;;  %v946_v53 = vsel %vm13959_vm1, %v895_v10, 0.0 }
  0xff   :  { %v899_v22 = vpop.permute.xlu2 %898 }
 0x100   :  { %452 = vadd.xlane.f32.xlu1 %v451_v48  ;;  %v428_v55 = vpop.f32.mrf.mxu0  ;;  %v943_v48 = vsel %vm13959_vm1, %v893_v2, 0.0  ;;  %v952_v61 = vsel %vm13959_vm1, %v899_v22, 0.0 }
 0x101   :  { %v9201_v56 = vadd.f32 %v428_v55, %v9125_v18 }
 0x105   :  { %v897_v62 = vpop.permute.xlu1 %896 }
 0x106   :  { %455 = vadd.xlane.f32.xlu2 %v454_v50  ;;  %v949_v5 = vsel %vm13959_vm1, %v897_v62, 0.0 }
 0x10f   :  { %912 = vrot.lane.b32.xlu0 %v9189_v52, %s8979_s23 }
 0x117   :  { %918 = vrot.lane.b32.xlu0 %v9194_v54, %s8979_s23 }
 0x119   :  { %904 = vrot.lane.b32.xlu1 %v9184_v49, %s8979_s23 }
 0x11e   :  { %908 = vrot.lane.b32.xlu2 %v9177_v45, %s8979_s23 }
 0x11f   :  { %924 = vrot.lane.b32.xlu0 %v9201_v56, %s8979_s23 }
 0x126   :  { %916 = vrot.lane.b32.xlu2 %v9208_v57, %s8979_s23 }
 0x128   :  { %v441_v14 = vpop.xlane.xlu0 %440 }
 0x129   :  { %v496_v16 = vmul.f32 %v9225_v8, %v441_v14 }
 0x12b   :  { %v9241_v19 = vsub.f32 %v9139_v24, %v496_v16 }
 0x12d   :  { %v530_v27 = vmul.f32 %v9241_v19, %v9241_v19 }
 0x12e   :  { %920 = vrot.lane.b32.xlu2 %v9213_v58, %s8979_s23 }
 0x12f   :  { %v549_v30 = vsel %vm13959_vm1, %v530_v27, 0.0  ;;  %v463_v27 = vsel %vm13959_vm1, %v9233_v15, 0.0 }
 0x130   :  { %v444_v3 = vpop.xlane.xlu1 %443  ;;  %v450_v37 = vpop.xlane.xlu0 %449 }
 0x131   :  { %v497_v25 = vmul.f32 %v9225_v8, %v444_v3 }
 0x133   :  { %v9253_v29 = vsub.f32 %v9144_v26, %v497_v25 }
 0x135   :  { %v531_v33 = vmul.f32 %v9253_v29, %v9253_v29 }
 0x136   :  { %922 = vrot.lane.b32.xlu2 %v9218_v59, %s8979_s23 }
 0x137   :  { %v552_v18 = vsel %vm13959_vm1, %v531_v33, 0.0 }
 0x138   :  { %v447_v31 = vpop.xlane.xlu2 %446 }
 0x139   :  { %v498_v6 = vmul.f32 %v9225_v8, %v447_v31 }
 0x13b   :  { %v9283_v9 = vsub.f32 %v9149_v28, %v498_v6 }
 0x13d   :  { %v532_v16 = vmul.f32 %v9283_v9, %v9283_v9 }
 0x13f   :  { %v555_v17 = vsel %vm13959_vm1, %v532_v16, 0.0 }
 0x140   :  { %v903_v34 = vpop.permute.xlu2 %902 }
 0x141   :  { %v958_v35 = vsel %vm13959_vm1, %v903_v34, 0.0 }
 0x143   :  { %458 = vadd.xlane.f32.xlu1 %v457_v0  ;;  %v907_v42 = vpop.permute.xlu0 %906 }
 0x144   :  { %v964_v51 = vsel %vm13959_vm1, %v907_v42, 0.0 }
 0x148   :  { %v901_v7 = vpop.permute.xlu1 %900 }
 0x149   :  { %950 = vadd.xlane.f32.xlu0 %v949_v5  ;;  %v955_v11 = vsel %vm13959_vm1, %v901_v7, 0.0 }
 0x151   :  { %956 = vadd.xlane.f32.xlu0 %v955_v11 }
 0x15c   :  { %910 = vrot.lane.b32.xlu1 %v9233_v15, %s8979_s23 }
 0x15f   :  { %547 = vadd.xlane.f32.xlu2 %v546_v20 }
 0x164   :  { %914 = vrot.lane.b32.xlu1 %v9245_v23, %s8979_s23 }
 0x167   :  { %550 = vadd.xlane.f32.xlu2 %v549_v30  ;;  %v499_v30 = vmul.f32 %v9225_v8, %v450_v37 }
 0x16e   :  { %v9267_v50 = vpop.xlane.xlu0 %461 }
 0x16f   :  { %553 = vadd.xlane.f32.xlu2 %v552_v18  ;;  %v9304_v18 = vsub.f32 %v9156_v32, %v499_v30 }
 0x173   :  { %v9262_v40 = vpop.xlane.xlu1 %452 }
 0x177   :  { %959 = vadd.xlane.f32.xlu2 %v958_v35 }
 0x179   :  { %v9260_v36 = vpop.xlane.xlu2 %455 }
 0x181   :  { %v909_v38 = vpop.permute.xlu2 %908  ;;  %v913_v55 = vpop.permute.xlu0 %912 }
 0x182   :  { %v973_v60 = vsel %vm13959_vm1, %v913_v55, 0.0  ;;  %v967_v62 = vsel %vm13959_vm1, %v909_v38, 0.0 }
 0x189   :  { %v917_v43 = vpop.permute.xlu2 %916  ;;  %v919_v4 = vpop.permute.xlu0 %918 }
 0x18a   :  { %v979_v44 = vsel %vm13959_vm1, %v917_v43, 0.0  ;;  %v982_v11 = vsel %vm13959_vm1, %v919_v4, 0.0 }
 0x18b   :  { %v905_v46 = vpop.permute.xlu1 %904  ;;  %980 = vadd.xlane.f32.xlu2 %v979_v44 }
 0x18c   :  { %v961_v47 = vsel %vm13959_vm1, %v905_v46, 0.0 }
 0x18d   :  { %962 = vadd.xlane.f32.xlu0 %v961_v47 }
 0x18e   :  { %944 = vadd.xlane.f32.xlu1 %v943_v48 }
 0x191   :  { %v921_v63 = vpop.permute.xlu2 %920  ;;  %v9287_v12 = vpop.permute.xlu0 %924 }
 0x192   :  { %v985_v35 = vsel %vm13959_vm1, %v921_v63, 0.0 }
 0x195   :  { %965 = vadd.xlane.f32.xlu0 %v964_v51 }
 0x196   :  { %947 = vadd.xlane.f32.xlu1 %v946_v53 }
 0x199   :  { %v9276_v1 = vpop.permute.xlu2 %922 }
 0x19d   :  { %974 = vadd.xlane.f32.xlu0 %v973_v60 }
 0x19e   :  { %953 = vadd.xlane.f32.xlu1 %v952_v61 }
 0x1a6   :  { %968 = vadd.xlane.f32.xlu1 %v967_v62 }
 0x1b6   :  { %v9274_v0 = vpop.xlane.xlu1 %458 }
 0x1bc   :  { %v951_v22 = vpop.xlane.xlu0 %950 }
 0x1bd   :  { %v996_v25 = vmul.f32 %v951_v22, %v9225_v8 }
 0x1bf   :  { %v9301_v31 = vsub.f32 %v9144_v26, %v996_v25  ;;  %v533_v26 = vmul.f32 %v9304_v18, %v9304_v18 }
 0x1c1   :  { %v1030_v38 = vmul.f32 %v9301_v31, %v9301_v31  ;;  %v558_v37 = vsel %vm13959_vm1, %v533_v26, 0.0 }
 0x1c4   :  { %v957_v44 = vpop.xlane.xlu0 %956 }
 0x1ce   :  { %v911_v2 = vpop.permute.xlu1 %910 }
 0x1cf   :  { %v970_v3 = vsel %vm13959_vm1, %v911_v2, 0.0 }
 0x1d0   :  { %971 = vadd.xlane.f32.xlu1 %v970_v3  ;;  %v998_v3 = vmul.f32 %v957_v44, %v9225_v8 }
 0x1d2   :  { %v9279_v5 = vpop.xlane.xlu2 %547  ;;  %v9343_v6 = vsub.f32 %v9156_v32, %v998_v3 }
 0x1d4   :  { %v1032_v16 = vmul.f32 %v9343_v6, %v9343_v6 }
 0x1d6   :  { %v915_v7 = vpop.permute.xlu1 %914 }
 0x1d7   :  { %v976_v10 = vsel %vm13959_vm1, %v915_v7, 0.0 }
 0x1d8   :  { %977 = vadd.xlane.f32.xlu0 %v976_v10  ;;  %983 = vadd.xlane.f32.xlu1 %v982_v11 }
 0x1da   :  { %v9289_v14 = vpop.xlane.xlu2 %550 }
 0x1e0   :  { %556 = vadd.xlane.f32.xlu0 %v555_v17 }
 0x1e2   :  { %v9294_v20 = vpop.xlane.xlu2 %553 }
 0x1e8   :  { %464 = vadd.xlane.f32.xlu0 %v463_v27 }
 0x1ea   :  { %v960_v33 = vpop.xlane.xlu2 %959 }
 0x1eb   :  { %v999_v34 = vmul.f32 %v960_v33, %v9225_v8  ;;  %v500_v33 = vmul.f32 %v9225_v8, %v9262_v40 }
 0x1ed   :  { %v9312_v42 = vsub.f32 %v9172_v41, %v999_v34  ;;  %v9372_v34 = vsub.f32 %v9172_v41, %v500_v33  ;;  %v469_v41 = vsel %vm13959_vm1, %v9245_v23, 0.0 }
 0x1ef   :  { %v1033_v43 = vmul.f32 %v9312_v42, %v9312_v42 }
 0x1f0   :  { %986 = vadd.xlane.f32.xlu0 %v985_v35  ;;  %v988_v35 = vsel %vm13959_vm1, %v9276_v1, 0.0  ;;  %v991_v1 = vsel %vm13958_vm3, %v9287_v12, 0.0 }
 0x1f1   :  { %1066 = vrot.lane.b32.xlu1 %v1030_v38, %s8979_s23  ;;  %v534_v38 = vmul.f32 %v9372_v34, %v9372_v34 }
 0x1f3   :  { %v561_v26 = vsel %vm13959_vm1, %v534_v38, 0.0 }
 0x1f8   :  { %559 = vadd.xlane.f32.xlu0 %v558_v37 }
 0x1f9   :  { %1072 = vrot.lane.b32.xlu1 %v1033_v43, %s8979_s23 }
 0x200   :  { %v963_v46 = vpop.xlane.xlu0 %962 }
 0x201   :  { %v1000_v47 = vmul.f32 %v963_v46, %v9225_v8  ;;  %v945_v48 = vpop.xlane.xlu1 %944  ;;  %v981_v46 = vpop.xlane.xlu2 %980 }
 0x202   :  { %v994_v51 = vmul.f32 %v945_v48, %v9225_v8  ;;  %v1006_v3 = vmul.f32 %v981_v46, %v9225_v8 }
 0x203   :  { %v9323_v53 = vsub.f32 %v9184_v49, %v1000_v47 }
 0x204   :  { %v9326_v55 = vsub.f32 %v9131_v21, %v994_v51 }
 0x205   :  { %v1034_v60 = vmul.f32 %v9323_v53, %v9323_v53 }
 0x206   :  { %v1028_v61 = vmul.f32 %v9326_v55, %v9326_v55 }
 0x207   :  { %1074 = vrot.lane.b32.xlu1 %v1034_v60, %s8979_s23 }
 0x208   :  { %1062 = vrot.lane.b32.xlu2 %v1028_v61, %s8979_s23  ;;  %v966_v10 = vpop.xlane.xlu0 %965 }
 0x209   :  { %v948_v62 = vpop.xlane.xlu1 %947 }
 0x20a   :  { %v995_v63 = vmul.f32 %v948_v62, %v9225_v8 }
 0x20c   :  { %v9336_v2 = vsub.f32 %v9139_v24, %v995_v63  ;;  %v1001_v24 = vmul.f32 %v966_v10, %v9225_v8 }
 0x20e   :  { %v1029_v21 = vmul.f32 %v9336_v2, %v9336_v2  ;;  %v9357_v22 = vsub.f32 %v9165_v39, %v1001_v24 }
 0x210   :  { %1064 = vrot.lane.b32.xlu2 %v1029_v21, %s8979_s23  ;;  %v1035_v27 = vmul.f32 %v9357_v22, %v9357_v22  ;;  %v975_v37 = vpop.xlane.xlu0 %974 }
 0x211   :  { %v954_v4 = vpop.xlane.xlu1 %953  ;;  %v1004_v43 = vmul.f32 %v975_v37, %v9225_v8 }
 0x212   :  { %v997_v7 = vmul.f32 %v954_v4, %v9225_v8  ;;  %v501_v4 = vmul.f32 %v9225_v8, %v9260_v36 }
 0x213   :  { %v9381_v44 = vsub.f32 %v9189_v52, %v1004_v43 }
 0x214   :  { %v9347_v11 = vsub.f32 %v9149_v28, %v997_v7  ;;  %v9403_v7 = vsub.f32 %v9208_v57, %v1006_v3  ;;  %v9406_v10 = vsub.f32 %v9184_v49, %v501_v4  ;;  %v503_v4 = vmul.f32 %v9225_v8, %v9267_v50 }
 0x215   :  { %v1038_v40 = vmul.f32 %v9381_v44, %v9381_v44 }
 0x216   :  { %v1031_v17 = vmul.f32 %v9347_v11, %v9347_v11  ;;  %v1040_v24 = vmul.f32 %v9403_v7, %v9403_v7 }
 0x218   :  { %1070 = vrot.lane.b32.xlu2 %v1032_v16, %s8979_s23  ;;  %1068 = vrot.lane.b32.xlu0 %v1031_v17, %s8979_s23  ;;  %v535_v17 = vmul.f32 %v9406_v10, %v9406_v10 }
 0x219   :  { %v969_v32 = vpop.xlane.xlu1 %968 }
 0x21a   :  { %v1002_v25 = vmul.f32 %v969_v32, %v9225_v8  ;;  %v564_v36 = vsel %vm13959_vm1, %v535_v17, 0.0  ;;  %v597_v17 = vmul.f32 %v9279_v5, %v9225_v8  ;;  %v1460_v5 = vld [vmem:[%s13876_s4 + $0x40] sm:$0xff] }
 0x21b   :  { %1526 = vmatpush.msra.mxu1 %v1460_v5 }
 0x21c   :  { %v9361_v28 = vsub.f32 %v9177_v45, %v1002_v25 }
 0x21e   :  { %v1036_v30 = vmul.f32 %v9361_v28, %v9361_v28 }
 0x220   :  { %1076 = vrot.lane.b32.xlu2 %v1035_v27, %s8979_s23  ;;  %1078 = vrot.lane.b32.xlu1 %v1036_v30, %s8979_s23 }
 0x242   :  { %989 = vadd.xlane.f32.xlu0 %v988_v35 }
 0x243   :  { %v972_v21 = vpop.xlane.xlu1 %971 }
 0x244   :  { %v1003_v16 = vmul.f32 %v972_v21, %v9225_v8  ;;  %v481_v21 = vsel %vm13959_vm1, %v9218_v59, 0.0 }
 0x246   :  { %v9415_v25 = vsub.f32 %v9233_v15, %v1003_v16 }
 0x248   :  { %v1037_v49 = vmul.f32 %v9415_v25, %v9415_v25 }
 0x249   :  { %562 = vadd.xlane.f32.xlu2 %v561_v26 }
 0x24b   :  { %v978_v51 = vpop.xlane.xlu0 %977  ;;  %v984_v32 = vpop.xlane.xlu1 %983 }
 0x24c   :  { %v1005_v60 = vmul.f32 %v978_v51, %v9225_v8  ;;  %v1007_v43 = vmul.f32 %v984_v32, %v9225_v8 }
 0x24e   :  { %v9393_v62 = vsub.f32 %v9245_v23, %v1005_v60  ;;  %v466_v60 = vsel %vm13959_vm1, %v9189_v52, 0.0 }
 0x250   :  { %v1039_v12 = vmul.f32 %v9393_v62, %v9393_v62 }
 0x251   :  { %470 = vadd.xlane.f32.xlu2 %v469_v41  ;;  %v9429_v41 = vsub.f32 %v9194_v54, %v1007_v43  ;;  %v1459_v43 = vld [vmem:[%s13876_s4 + $0x38] sm:$0xff] }
 0x252   :  { %1527 = vmatpush.msra.mxu1 %v1459_v43 }
 0x253   :  { %v9418_v27 = vpop.xlane.xlu0 %556  ;;  %v1041_v46 = vmul.f32 %v9429_v41, %v9429_v41 }
 0x256   :  { %1082 = vrot.lane.b32.xlu0 %v1038_v40, %s8979_s23 }
 0x259   :  { %992 = vadd.xlane.f32.xlu2 %v991_v1  ;;  %v475_v1 = vsel %vm13959_vm1, %v9194_v54, 0.0 }
 0x25b   :  { %v465_v35 = vpop.xlane.xlu0 %464 }
 0x25c   :  { %v504_v32 = vmul.f32 %v9225_v8, %v465_v35  ;;  %v598_v35 = vmul.f32 %v9289_v14, %v9225_v8 }
 0x262   :  { %v1063_v47 = vpop.permute.xlu2 %1062 }
 0x263   :  { %v1113_v48 = vsel %vm13959_vm1, %v1063_v47, 0.0  ;;  %v1067_v30 = vpop.permute.xlu1 %1066  ;;  %v9425_v37 = vpop.xlane.xlu0 %986 }
 0x264   :  { %1114 = vadd.xlane.f32.xlu1 %v1113_v48  ;;  %v1119_v33 = vsel %vm13959_vm1, %v1067_v30, 0.0  ;;  %v9471_v30 = vsub.f32 %v9233_v15, %v504_v32 }
 0x266   :  { %v538_v15 = vmul.f32 %v9471_v30, %v9471_v30 }
 0x268   :  { %v573_v14 = vsel %vm13959_vm1, %v538_v15, 0.0 }
 0x26a   :  { %v1065_v61 = vpop.permute.xlu2 %1064 }
 0x26b   :  { %v1116_v63 = vsel %vm13959_vm1, %v1065_v61, 0.0  ;;  %v9431_v40 = vpop.xlane.xlu0 %559  ;;  %v1073_v51 = vpop.permute.xlu1 %1072 }
 0x26c   :  { %1117 = vadd.xlane.f32.xlu1 %v1116_v63  ;;  %v1128_v61 = vsel %vm13959_vm1, %v1073_v51, 0.0  ;;  %v502_v63 = vmul.f32 %v9225_v8, %v9274_v0  ;;  %v9458_v0 = vsub.f32 %v9177_v45, %v503_v4 }
 0x26e   :  { %v9445_v3 = vsub.f32 %v9165_v39, %v502_v63  ;;  %v537_v50 = vmul.f32 %v9458_v0, %v9458_v0 }
 0x271   :  { %1084 = vrot.lane.b32.xlu2 %v1039_v12, %s8979_s23  ;;  %v472_v12 = vsel %vm13959_vm1, %v9208_v57, 0.0 }
 0x272   :  { %v1071_v38 = vpop.permute.xlu2 %1070 }
 0x273   :  { %v1125_v26 = vsel %vm13959_vm1, %v1071_v38, 0.0 }
 0x279   :  { %1086 = vrot.lane.b32.xlu2 %v1040_v24, %s8979_s23  ;;  %v536_v24 = vmul.f32 %v9445_v3, %v9445_v3  ;;  %v1075_v38 = vpop.permute.xlu1 %1074 }
 0x27a   :  { %v9455_v16 = vpop.permute.xlu2 %1076 }
 0x27b   :  { %v567_v39 = vsel %vm13959_vm1, %v536_v24, 0.0 }
 0x280   :  { %565 = vadd.xlane.f32.xlu0 %v564_v36  ;;  %v9466_v36 = vadd.f32 1e-05, %v597_v17  ;;  %v1454_v17 = vld [vmem:[%s13876_s4 + $0x10] sm:$0xff] }
 0x282   :  { %8545 = vrsqrt.f32 %v9466_v36  ;;  %vm637_vm5 = vweird.f32 %v9466_v36 }
 0x285   :  { %1080 = vrot.lane.b32.xlu1 %v1037_v49, %s8979_s23 }
 0x288   :  { %1120 = vadd.xlane.f32.xlu0 %v1119_v33  ;;  %v570_v33 = vsel %vm13959_vm1, %v537_v50, 0.0  ;;  %v9498_v51 = vpop.eup %8545 }
 0x289   :  { %v632_v4 = vmul.f32 %v9498_v51, %v9466_v36  ;;  %vm638_vm4 = vweird.f32 %v9498_v51 }
 0x28a   :  { %v1069_v47 = vpop.permute.xlu0 %1068  ;;  %vm639_vm6 = vmor %vm637_vm5, %vm638_vm4 }
 0x28b   :  { %v1122_v48 = vsel %vm13959_vm1, %v1069_v47, 0.0  ;;  %v633_v32 = vmul.f32 %v9498_v51, %v632_v4 }
 0x28d   :  { %v634_v43 = vmul.f32 0.5, %v633_v32 }
 0x290   :  { %1126 = vadd.xlane.f32.xlu0 %v1125_v26 }
 0x292   :  { %v1079_v63 = vpop.permute.xlu1 %1078 }
 0x2a2   :  { %476 = vadd.xlane.f32.xlu2 %v475_v1  ;;  %v1458_v1 = vld [vmem:[%s13876_s4 + $0x30] sm:$0xff] }
 0x2a3   :  { %1528 = vmatpush.msra.mxu1 %v1458_v1 }
 0x2a4   :  { %1088 = vrot.lane.b32.xlu0 %v1041_v46, %s8979_s23  ;;  %v9489_v46 = vadd.f32 1e-05, %v598_v35  ;;  %v1131_v35 = vsel %vm13959_vm1, %v1075_v38, 0.0  ;;  %v1134_v38 = vsel %vm13959_vm1, %v9455_v16, 0.0  ;;  %v599_v16 = vmul.f32 %v9294_v20, %v9225_v8 }
 0x2a6   :  { %8547 = vrsqrt.f32 %v9489_v46  ;;  %vm647_vm9 = vweird.f32 %v9489_v46 }
 0x2aa   :  { %1123 = vadd.xlane.f32.xlu2 %v1122_v48  ;;  %v1457_v48 = vld [vmem:[%s13876_s4 + $0x28] sm:$0xff] }
 0x2ab   :  { %1529 = vmatpush.msra.mxu1 %v1457_v48  ;;  %v635_v48 = vsub.f32 1.5, %v634_v43 }
 0x2ac   :  { %v9527_v5 = vpop.eup %8547 }
 0x2ad   :  { %vm648_vm7 = vweird.f32 %v9527_v5 }
 0x2ae   :  { %vm9564_vm10 = vmor %vm647_vm9, %vm648_vm7 }
 0x2af   :  { %467 = vadd.xlane.f32.xlu1 %v466_v60 }
 0x2b2   :  { %1129 = vadd.xlane.f32.xlu2 %v1128_v61  ;;  %v478_v61 = vsel %vm13959_vm1, %v9213_v58, 0.0 }
 0x2b5   :  { %v990_v45 = vpop.xlane.xlu0 %989 }
 0x2b6   :  { %v1009_v26 = vmul.f32 %v990_v45, %v9225_v8  ;;  %v485_v45 = vsel %vm13958_vm3, %v9201_v56, 0.0 }
 0x2b7   :  { %473 = vadd.xlane.f32.xlu1 %v472_v12  ;;  %v1456_v12 = vld [vmem:[%s13876_s4 + $0x20] sm:$0xff] }
 0x2b8   :  { %v9492_v47 = vsub.f32 %v9218_v59, %v1009_v26  ;;  %1530 = vmatpush.msra.mxu1 %v1456_v12 }
 0x2ba   :  { %482 = vadd.xlane.f32.xlu2 %v481_v21  ;;  %v1043_v21 = vmul.f32 %v9492_v47, %v9492_v47 }
 0x2bc   :  { %v9468_v49 = vpop.xlane.xlu2 %562 }
 0x2bf   :  { %568 = vadd.xlane.f32.xlu1 %v567_v39  ;;  %v1455_v39 = vld [vmem:[%s13876_s4 + $0x18] sm:$0xff] }
 0x2c0   :  { %1531 = vmatpush.msra.mxu1 %v1455_v39 }
 0x2c2   :  { %1532 = vmatpush.msra.mxu1 %v1454_v17 }
 0x2c4   :  { %v471_v60 = vpop.xlane.xlu2 %470 }
 0x2c5   :  { %v506_v24 = vmul.f32 %v9225_v8, %v471_v60 }
 0x2c7   :  { %571 = vadd.xlane.f32.xlu1 %v570_v33  ;;  %v9520_v50 = vsub.f32 %v9245_v23, %v506_v24  ;;  %v1453_v33 = vld [vmem:[%s13876_s4 + $0x8] sm:$0xff]  ;;  %v642_v23 = vmul.f32 %v9527_v5, %v9489_v46  ;;  %v636_v24 = vmul.f32 %v9498_v51, %v635_v48  ;;  %v9554_v48 = vadd.f32 1e-05, %v599_v16 }
 0x2c8   :  { %1533 = vmatpush.msra.mxu1 %v1453_v33  ;;  %v1083_v32 = vpop.permute.xlu0 %1082 }
 0x2c9   :  { %v540_v1 = vmul.f32 %v9520_v50, %v9520_v50  ;;  %v643_v60 = vmul.f32 %v9527_v5, %v642_v23  ;;  %v1143_v43 = vsel %vm13959_vm1, %v1083_v32, 0.0  ;;  %v7799_v23 = vld [vmem:[%s13883_s11 + $0x2] sm:$0x3]  ;;  %vm657_vm5 = vweird.f32 %v9554_v48 }
 0x2cb   :  { %v644_v39 = vmul.f32 0.5, %v643_v60 }
 0x2ce   :  { %574 = vadd.xlane.f32.xlu0 %v573_v14 }
 0x2cf   :  { %479 = vadd.xlane.f32.xlu1 %v478_v61  ;;  %v579_v61 = vsel %vm13959_vm1, %v540_v1, 0.0  ;;  %v1137_v1 = vsel %vm13959_vm1, %v1079_v63, 0.0 }
 0x2d2   :  { %1092 = vrot.lane.b32.xlu2 %v1043_v21, %s8979_s23  ;;  %v9539_v21 = vpop.xlane.xlu2 %992 }
 0x2d6   :  { %486 = vadd.xlane.f32.xlu0 %v485_v45 }
 0x2d7   :  { %v1115_v26 = vpop.xlane.xlu1 %1114  ;;  %1132 = vadd.xlane.f32.xlu1 %v1131_v35  ;;  %v640_v35 = vsel %vm639_vm6, %v9498_v51, %v636_v24  ;;  %v9557_v51 = vperm.slane %v7799_v23, 0 }
 0x2d8   :  { %v1164_v15 = vmul.f32 %v1115_v26, %v9225_v8  ;;  %v645_v26 = vsub.f32 1.5, %v644_v39  ;;  %v801_v20 = vmul.f32 %v640_v35, %v9230_v13 }
 0x2da   :  { %v1181_v14 = vadd.f32 1e-05, %v1164_v15  ;;  %v646_v60 = vmul.f32 %v9527_v5, %v645_v26  ;;  %v1085_v63 = vpop.permute.xlu2 %1084  ;;  %v821_v39 = vmul.f32 %v9557_v51, %v801_v20 }
 0x2db   :  { %v1146_v35 = vsel %vm13959_vm1, %v1085_v63, 0.0 }
 0x2dc   :  { %8549 = vrsqrt.f32 %v1181_v14  ;;  %vm1204_vm11 = vweird.f32 %v1181_v14 }
 0x2de   :  { %580 = vadd.xlane.f32.xlu0 %v579_v61 }
 0x2df   :  { %v1118_v12 = vpop.xlane.xlu1 %1117  ;;  %1135 = vadd.xlane.f32.xlu1 %v1134_v38  ;;  %v7800_v38 = vld [vmem:[%s13883_s11 + $0x4] sm:$0x3] }
 0x2e0   :  { %v1165_v4 = vmul.f32 %v1118_v12, %v9225_v8  ;;  %v9570_v32 = vperm.slane %v7800_v38, 0 }
 0x2e2   :  { %v8550_v17 = vpop.eup %8549  ;;  %v1182_v45 = vadd.f32 1e-05, %v1165_v4 }
 0x2e3   :  { %v1199_v33 = vmul.f32 %v8550_v17, %v1181_v14  ;;  %vm1205_vm8 = vweird.f32 %v8550_v17 }
 0x2e4   :  { %8551 = vrsqrt.f32 %v1182_v45  ;;  %vm1206_vm12 = vmor %vm1204_vm11, %vm1205_vm8  ;;  %vm1214_vm14 = vweird.f32 %v1182_v45 }
 0x2e5   :  { %v1200_v15 = vmul.f32 %v8550_v17, %v1199_v33  ;;  %8553 = vrsqrt.f32 %v9554_v48  ;;  %v650_v33 = vsel %vm9564_vm10, %v9527_v5, %v646_v60 }
 0x2e6   :  { %1144 = vadd.xlane.f32.xlu0 %v1143_v43  ;;  %v802_v23 = vmul.f32 %v650_v33, %v9241_v19  ;;  %v1008_v19 = vmul.f32 %v9425_v37, %v9225_v8 }
 0x2e7   :  { %v1201_v36 = vmul.f32 0.5, %v1200_v15  ;;  %1138 = vadd.xlane.f32.xlu1 %v1137_v1  ;;  %v841_v15 = vadd.f32 %v9570_v32, %v821_v39 }
 0x2e9   :  { %v1202_v61 = vsub.f32 1.5, %v1201_v36  ;;  %v858_v60 = vmax.f32 %v841_v15, 0.0 }
 0x2ea   :  { %v8552_v12 = vpop.eup %8551 }
 0x2eb   :  { %v1203_v24 = vmul.f32 %v8550_v17, %v1202_v61  ;;  %v1209_v13 = vmul.f32 %v8552_v12, %v1182_v45  ;;  %vm1215_vm13 = vweird.f32 %v8552_v12  ;;  %v8554_v36 = vpop.eup %8553 }
 0x2ec   :  { %vm1216_vm15 = vmor %vm1214_vm14, %vm1215_vm13  ;;  %v652_v38 = vmul.f32 %v8554_v36, %v9554_v48  ;;  %vm658_vm4 = vweird.f32 %v8554_v36  ;;  %v601_v48 = vmul.f32 %v9431_v40, %v9225_v8 }
 0x2ed   :  { %v1207_v46 = vsel %vm1206_vm12, %v8550_v17, %v1203_v24  ;;  %v1210_v16 = vmul.f32 %v8552_v12, %v1209_v13  ;;  %vm659_vm6 = vmor %vm657_vm5, %vm658_vm4 }
 0x2ee   :  { %1147 = vadd.xlane.f32.xlu0 %v1146_v35  ;;  %v1368_v26 = vmul.f32 %v1207_v46, %v9326_v55  ;;  %v822_v55 = vmul.f32 %v9557_v51, %v802_v23  ;;  %v653_v33 = vmul.f32 %v8554_v36, %v652_v38  ;;  %v9593_v46 = vsub.f32 %v9213_v58, %v1008_v19 }
 0x2ef   :  { %v1211_v14 = vmul.f32 0.5, %v1210_v16 }
 0x2f0   :  { %v1385_v43 = vmul.f32 %v1368_v26, %v9557_v51  ;;  %v842_v13 = vadd.f32 %v9570_v32, %v822_v55  ;;  %v1042_v23 = vmul.f32 %v9593_v46, %v9593_v46 }
 0x2f1   :  { %v1212_v1 = vsub.f32 1.5, %v1211_v14  ;;  %v654_v14 = vmul.f32 0.5, %v653_v33 }
 0x2f2   :  { %v1402_v20 = vadd.f32 %v1385_v43, %v9570_v32 }
 0x2f3   :  { %v1213_v5 = vmul.f32 %v8552_v12, %v1212_v1  ;;  %v9581_v17 = vpop.xlane.xlu0 %565  ;;  %v655_v1 = vsub.f32 1.5, %v654_v14 }
 0x2f4   :  { %v1419_v61 = vmax.f32 %v1402_v20, 0.0  ;;  %v600_v20 = vmul.f32 %v9418_v27, %v9225_v8 }
 0x2f5   :  { %v1217_v63 = vsel %vm1216_vm15, %v8552_v12, %v1213_v5  ;;  %v656_v5 = vmul.f32 %v8554_v36, %v655_v1 }
 0x2f6   :  { %v1436_v4 = vsel %vm13959_vm1, %v858_v60, %v1419_v61  ;;  %v1369_v24 = vmul.f32 %v1217_v63, %v9336_v2  ;;  %v859_v2 = vmax.f32 %v842_v13, 0.0  ;;  %v9606_v55 = vadd.f32 1e-05, %v600_v20 }
 0x2f7   :  { %7802 = vmatmul.msk.f32.vlgmr.msra.gmra.mxu1 %vm1466_vm2, %v1436_v4  ;;  %v1081_v45 = vpop.permute.xlu1 %1080  ;;  %v660_v38 = vsel %vm659_vm6, %v8554_v36, %v656_v5  ;;  %v1010_v63 = vmul.f32 %v9539_v21, %v9225_v8 }
 0x2f8   :  { %v1386_v39 = vmul.f32 %v1369_v24, %v9557_v51  ;;  %v1140_v12 = vsel %vm13959_vm1, %v1081_v45, 0.0  ;;  %v803_v45 = vmul.f32 %v660_v38, %v9253_v29  ;;  %vm667_vm11 = vweird.f32 %v9606_v55 }
 0x2f9   :  { %v9616_v13 = vsub.f32 %v9201_v56, %v1010_v63 }
 0x2fa   :  { %v1403_v16 = vadd.f32 %v1386_v39, %v9570_v32  ;;  %v9618_v39 = vpop.permute.xlu2 %1086 }
 0x2fb   :  { %v1121_v37 = vpop.xlane.xlu0 %1120  ;;  %1141 = vadd.xlane.f32.xlu2 %v1140_v12  ;;  %v823_v12 = vmul.f32 %v9557_v51, %v803_v45  ;;  %v1044_v40 = vmul.f32 %v9616_v13, %v9616_v13 }
 0x2fc   :  { %v1166_v35 = vmul.f32 %v1121_v37, %v9225_v8  ;;  %v1420_v26 = vmax.f32 %v1403_v16, 0.0  ;;  %v9623_v16 = vadd.f32 1e-05, %v601_v48 }
 0x2fe   :  { %v1183_v15 = vadd.f32 1e-05, %v1166_v35  ;;  %v1437_v43 = vsel %vm13959_vm1, %v859_v2, %v1420_v26  ;;  %v843_v2 = vadd.f32 %v9570_v32, %v823_v12  ;;  %vm677_vm5 = vweird.f32 %v9623_v16 }
 0x2ff   :  { %7803 = vmatmul.msk.f32.gmra.mxu1 %vm1466_vm2, %v1437_v43 }
 0x300   :  { %8555 = vrsqrt.f32 %v1183_v15  ;;  %1090 = vrot.lane.b32.xlu1 %v1042_v23, %s8979_s23  ;;  %vm1224_vm8 = vweird.f32 %v1183_v15  ;;  %v860_v20 = vmax.f32 %v843_v2, 0.0 }
 0x301   :  { %8557 = vrsqrt.f32 %v9606_v55 }
 0x303   :  { %v1127_v4 = vpop.xlane.xlu0 %1126 }
 0x304   :  { %v1168_v27 = vmul.f32 %v1127_v4, %v9225_v8 }
 0x306   :  { %v8556_v60 = vpop.eup %8555  ;;  %v9620_v33 = vadd.f32 1e-05, %v1168_v27 }
 0x307   :  { %v1219_v61 = vmul.f32 %v8556_v60, %v1183_v15  ;;  %vm1225_vm7 = vweird.f32 %v8556_v60  ;;  %v8558_v37 = vpop.eup %8557  ;;  %v602_v15 = vmul.f32 %v9468_v49, %v9225_v8 }
 0x308   :  { %vm1226_vm9 = vmor %vm1224_vm8, %vm1225_vm7  ;;  %8559 = vrsqrt.f32 %v9620_v33  ;;  %v662_v14 = vmul.f32 %v8558_v37, %v9606_v55  ;;  %vm668_vm10 = vweird.f32 %v8558_v37  ;;  %vm1244_vm15 = vweird.f32 %v9620_v33 }
 0x309   :  { %v1220_v19 = vmul.f32 %v8556_v60, %v1219_v61  ;;  %8561 = vrsqrt.f32 %v9623_v16  ;;  %v9641_v61 = vadd.f32 1e-05, %v602_v15  ;;  %vm669_vm12 = vmor %vm667_vm11, %vm668_vm10 }
 0x30b   :  { %v1221_v24 = vmul.f32 0.5, %v1220_v19  ;;  %8563 = vrsqrt.f32 %v9641_v61 }
 0x30d   :  { %v1222_v36 = vsub.f32 1.5, %v1221_v24 }
 0x30e   :  { %v9643_v38 = vpop.eup %8559 }
 0x30f   :  { %v1223_v21 = vmul.f32 %v8556_v60, %v1222_v36  ;;  %v9648_v19 = vpop.eup %8561  ;;  %v1239_v24 = vmul.f32 %v9643_v38, %v9620_v33  ;;  %vm1245_vm13 = vweird.f32 %v9643_v38 }
 0x310   :  { %v672_v45 = vmul.f32 %v9648_v19, %v9623_v16  ;;  %vm678_vm14 = vweird.f32 %v9648_v19  ;;  %vm9685_vm6 = vmor %vm1244_vm15, %vm1245_vm13 }
 0x311   :  { %v1227_v29 = vsel %vm1226_vm9, %v8556_v60, %v1223_v21  ;;  %v663_v60 = vmul.f32 %v8558_v37, %v662_v14  ;;  %v1240_v12 = vmul.f32 %v9643_v38, %v1239_v24  ;;  %vm9692_vm7 = vmor %vm677_vm5, %vm678_vm14 }
 0x312   :  { %v1370_v35 = vmul.f32 %v1227_v29, %v9301_v31  ;;  %v673_v29 = vmul.f32 %v9648_v19, %v672_v45 }
 0x313   :  { %1094 = vrot.lane.b32.xlu2 %v1044_v40, %s8979_s23  ;;  %v1241_v14 = vmul.f32 0.5, %v1240_v12 }
 0x314   :  { %v1387_v26 = vmul.f32 %v1370_v35, %v9557_v51  ;;  %v9660_v35 = vpop.eup %8563 }
 0x315   :  { %v477_v43 = vpop.xlane.xlu2 %476  ;;  %vm688_vm10 = vweird.f32 %v9660_v35 }
 0x316   :  { %v508_v23 = vmul.f32 %v9225_v8, %v477_v43  ;;  %v1404_v31 = vadd.f32 %v1387_v26, %v9570_v32 }
 0x318   :  { %v9639_v1 = vsub.f32 %v9194_v54, %v508_v23  ;;  %v1421_v5 = vmax.f32 %v1404_v31, 0.0  ;;  %v664_v54 = vmul.f32 0.5, %v663_v60  ;;  %v674_v23 = vmul.f32 0.5, %v673_v29 }
 0x319   :  { %v682_v31 = vmul.f32 %v9660_v35, %v9641_v61 }
 0x31a   :  { %v1438_v63 = vsel %vm13959_vm1, %v860_v20, %v1421_v5  ;;  %v542_v49 = vmul.f32 %v9639_v1, %v9639_v1  ;;  %v665_v21 = vsub.f32 1.5, %v664_v54  ;;  %v675_v24 = vsub.f32 1.5, %v674_v23 }
 0x31b   :  { %7804 = vmatmul.msk.f32.gmra.mxu1 %vm1466_vm2, %v1438_v63 }
 0x31c   :  { %v585_v4 = vsel %vm13959_vm1, %v542_v49, 0.0  ;;  %v666_v26 = vmul.f32 %v8558_v37, %v665_v21 }
 0x31d   :  { %586 = vadd.xlane.f32.xlu0 %v585_v4  ;;  %v1124_v27 = vpop.xlane.xlu2 %1123  ;;  %v1242_v4 = vsub.f32 1.5, %v1241_v14  ;;  %v1149_v14 = vsel %vm13959_vm1, %v9618_v39, 0.0 }
 0x31e   :  { %v1167_v48 = vmul.f32 %v1124_v27, %v9225_v8  ;;  %v670_v49 = vsel %vm669_vm12, %v8558_v37, %v666_v26  ;;  %v683_v27 = vmul.f32 %v9660_v35, %v682_v31  ;;  %v676_v37 = vmul.f32 %v9648_v19, %v675_v24 }
 0x31f   :  { %v1243_v21 = vmul.f32 %v9643_v38, %v1242_v4  ;;  %vm687_vm12 = vweird.f32 %v9641_v61 }
 0x320   :  { %v1184_v36 = vadd.f32 1e-05, %v1167_v48  ;;  %v804_v48 = vmul.f32 %v670_v49, %v9283_v9  ;;  %v684_v29 = vmul.f32 0.5, %v683_v27  ;;  %v603_v49 = vmul.f32 %v9581_v17, %v9225_v8  ;;  %vm9722_vm13 = vmor %vm687_vm12, %vm688_vm10 }
 0x321   :  { %v1247_v33 = vsel %vm9685_vm6, %v9643_v38, %v1243_v21 }
 0x322   :  { %8565 = vrsqrt.f32 %v1184_v36  ;;  %v468_v40 = vpop.xlane.xlu1 %467  ;;  %vm1234_vm8 = vweird.f32 %v1184_v36 }
 0x323   :  { %v505_v2 = vmul.f32 %v9225_v8, %v468_v40 }
 0x325   :  { %v9664_v15 = vsub.f32 %v9189_v52, %v505_v2  ;;  %v1130_v43 = vpop.xlane.xlu2 %1129 }
 0x326   :  { %v1169_v20 = vmul.f32 %v1130_v43, %v9225_v8  ;;  %v824_v43 = vmul.f32 %v9557_v51, %v804_v48 }
 0x327   :  { %v539_v5 = vmul.f32 %v9664_v15, %v9664_v15 }
 0x328   :  { %v8566_v60 = vpop.eup %8565  ;;  %v9672_v63 = vadd.f32 1e-05, %v1169_v20  ;;  %v680_v20 = vsel %vm9692_vm7, %v9648_v19, %v676_v37  ;;  %v844_v27 = vadd.f32 %v9570_v32, %v824_v43 }
 0x329   :  { %v1229_v52 = vmul.f32 %v8566_v60, %v1184_v36  ;;  %v576_v54 = vsel %vm13959_vm1, %v539_v5, 0.0  ;;  %vm1235_vm4 = vweird.f32 %v8566_v60  ;;  %v685_v5 = vsub.f32 1.5, %v684_v29 }
 0x32a   :  { %8567 = vrsqrt.f32 %v9672_v63  ;;  %v474_v45 = vpop.xlane.xlu1 %473  ;;  %577 = vadd.xlane.f32.xlu1 %v576_v54  ;;  %vm1236_vm9 = vmor %vm1234_vm8, %vm1235_vm4  ;;  %v1372_v36 = vmul.f32 %v1247_v33, %v9343_v6  ;;  %v805_v17 = vmul.f32 %v680_v20, %v9304_v18  ;;  %vm1254_vm14 = vweird.f32 %v9672_v63 }
 0x32b   :  { %v1230_v55 = vmul.f32 %v8566_v60, %v1229_v52  ;;  %v507_v2 = vmul.f32 %v9225_v8, %v474_v45  ;;  %v686_v19 = vmul.f32 %v9660_v35, %v685_v5  ;;  %v1089_v45 = vpop.permute.xlu0 %1088  ;;  %v861_v61 = vmax.f32 %v844_v27, 0.0 }
 0x32c   :  { %v1389_v48 = vmul.f32 %v1372_v36, %v9557_v51  ;;  %v1152_v18 = vsel %vm13959_vm1, %v1089_v45, 0.0 }
 0x32d   :  { %v1231_v12 = vmul.f32 0.5, %v1230_v55  ;;  %v9706_v54 = vsub.f32 %v9208_v57, %v507_v2  ;;  %v690_v37 = vsel %vm9722_vm13, %v9660_v35, %v686_v19  ;;  %v825_v2 = vmul.f32 %v9557_v51, %v805_v17 }
 0x32e   :  { %v1406_v23 = vadd.f32 %v1389_v48, %v9570_v32 }
 0x32f   :  { %v1232_v40 = vsub.f32 1.5, %v1231_v12  ;;  %v845_v33 = vadd.f32 %v9570_v32, %v825_v2 }
 0x330   :  { %v8568_v26 = vpop.eup %8567 }
 0x331   :  { %v1233_v31 = vmul.f32 %v8566_v60, %v1232_v40  ;;  %v1249_v16 = vmul.f32 %v8568_v26, %v9672_v63  ;;  %vm1255_vm11 = vweird.f32 %v8568_v26 }
 0x332   :  { %v569_v39 = vpop.xlane.xlu1 %568  ;;  %1150 = vadd.xlane.f32.xlu1 %v1149_v14  ;;  %vm1256_vm15 = vmor %vm1254_vm14, %vm1255_vm11 }
 0x333   :  { %v1237_v4 = vsel %vm1236_vm9, %v8566_v60, %v1233_v31  ;;  %v1250_v52 = vmul.f32 %v8568_v26, %v1249_v16  ;;  %v9715_v60 = vadd.f32 1e-05, %v603_v49  ;;  %v604_v14 = vmul.f32 %v569_v39, %v9225_v8  ;;  %v483_v49 = vpop.xlane.xlu2 %482 }
 0x334   :  { %v1371_v38 = vmul.f32 %v1237_v4, %v9347_v11  ;;  %v541_v11 = vmul.f32 %v9706_v54, %v9706_v54  ;;  %v806_v31 = vmul.f32 %v690_v37, %v9372_v34  ;;  %v510_v19 = vmul.f32 %v9225_v8, %v483_v49 }
 0x335   :  { %v1251_v24 = vmul.f32 0.5, %v1250_v52  ;;  %8569 = vrsqrt.f32 %v9715_v60  ;;  %v9741_v16 = vadd.f32 1e-05, %v604_v14  ;;  %v862_v52 = vmax.f32 %v845_v33, 0.0 }
 0x336   :  { %v1388_v55 = vmul.f32 %v1371_v38, %v9557_v51  ;;  %v582_v63 = vsel %vm13959_vm1, %v541_v11, 0.0  ;;  %v826_v38 = vmul.f32 %v9557_v51, %v806_v31  ;;  %v9768_v21 = vsub.f32 %v9218_v59, %v510_v19 }
 0x337   :  { %v1252_v57 = vsub.f32 1.5, %v1251_v24  ;;  %8571 = vrsqrt.f32 %v9741_v16  ;;  %vm697_vm5 = vweird.f32 %v9715_v60  ;;  %vm707_vm9 = vweird.f32 %v9741_v16 }
 0x338   :  { %v1405_v6 = vadd.f32 %v1388_v55, %v9570_v32  ;;  %v846_v55 = vadd.f32 %v9570_v32, %v826_v38  ;;  %v544_v14 = vmul.f32 %v9768_v21, %v9768_v21 }
 0x339   :  { %v1253_v12 = vmul.f32 %v8568_v26, %v1252_v57 }
 0x33a   :  { %v572_v29 = vpop.xlane.xlu1 %571  ;;  %1153 = vadd.xlane.f32.xlu1 %v1152_v18  ;;  %v1422_v40 = vmax.f32 %v1405_v6, 0.0  ;;  %v863_v37 = vmax.f32 %v846_v55, 0.0 }
 0x33b   :  { %v1257_v9 = vsel %vm1256_vm15, %v8568_v26, %v1253_v12  ;;  %v1423_v26 = vmax.f32 %v1406_v23, 0.0  ;;  %v9744_v5 = vpop.eup %8569  ;;  %v605_v36 = vmul.f32 %v572_v29, %v9225_v8 }
 0x33c   :  { %583 = vadd.xlane.f32.xlu2 %v582_v63  ;;  %v1439_v43 = vsel %vm13959_vm1, %v861_v61, %v1422_v40  ;;  %v1373_v35 = vmul.f32 %v1257_v9, %v9312_v42  ;;  %v692_v34 = vmul.f32 %v9744_v5, %v9715_v60  ;;  %vm698_vm4 = vweird.f32 %v9744_v5 }
 0x33d   :  { %7805 = vmatmul.msk.f32.gmra.mxu1 %vm1466_vm2, %v1439_v43  ;;  %v1440_v24 = vsel %vm13959_vm1, %v862_v52, %v1423_v26  ;;  %v9763_v11 = vadd.f32 1e-05, %v605_v36  ;;  %v9765_v48 = vpop.eup %8571  ;;  %vm699_vm6 = vmor %vm697_vm5, %vm698_vm4 }
 0x33e   :  { %v1390_v20 = vmul.f32 %v1373_v35, %v9557_v51  ;;  %v693_v57 = vmul.f32 %v9744_v5, %v692_v34  ;;  %v702_v40 = vmul.f32 %v9765_v48, %v9741_v16  ;;  %v591_v35 = vsel %vm13959_vm1, %v544_v14, 0.0 }
 0x33f   :  { %8573 = vrsqrt.f32 %v9763_v11  ;;  %vm708_vm7 = vweird.f32 %v9765_v48  ;;  %vm717_vm4 = vweird.f32 %v9763_v11 }
 0x340   :  { %v1407_v27 = vadd.f32 %v1390_v20, %v9570_v32  ;;  %v694_v61 = vmul.f32 0.5, %v693_v57  ;;  %v703_v43 = vmul.f32 %v9765_v48, %v702_v40  ;;  %vm9806_vm10 = vmor %vm707_vm9, %vm708_vm7 }
 0x341   :  { %v575_v39 = vpop.xlane.xlu0 %574 }
 0x342   :  { %v480_v4 = vpop.xlane.xlu1 %479  ;;  %v1424_v6 = vmax.f32 %v1407_v27, 0.0  ;;  %v695_v63 = vsub.f32 1.5, %v694_v61  ;;  %v704_v49 = vmul.f32 0.5, %v703_v43 }
 0x343   :  { %v509_v42 = vmul.f32 %v9225_v8, %v480_v4 }
 0x344   :  { %v1441_v2 = vsel %vm13959_vm1, %v863_v37, %v1424_v6  ;;  %v696_v20 = vmul.f32 %v9744_v5, %v695_v63 }
 0x345   :  { %v9756_v45 = vsub.f32 %v9213_v58, %v509_v42  ;;  %7806 = vmatmul.msk.f32.gmra.mxu1 %vm1466_vm2, %v1440_v24  ;;  %v9785_v33 = vpop.eup %8573  ;;  %v606_v42 = vmul.f32 %v575_v39, %v9225_v8  ;;  %v705_v24 = vsub.f32 1.5, %v704_v49 }
 0x346   :  { %v712_v52 = vmul.f32 %v9785_v33, %v9763_v11  ;;  %v700_v36 = vsel %vm699_vm6, %v9744_v5, %v696_v20  ;;  %vm718_vm14 = vweird.f32 %v9785_v33 }
 0x347   :  { %v543_v17 = vmul.f32 %v9756_v45, %v9756_v45  ;;  %v807_v39 = vmul.f32 %v700_v36, %v9406_v10  ;;  %vm719_vm6 = vmor %vm717_vm4, %vm718_vm14 }
 0x348   :  { %v713_v19 = vmul.f32 %v9785_v33, %v712_v52 }
 0x349   :  { %v588_v58 = vsel %vm13959_vm1, %v543_v17, 0.0  ;;  %v487_v12 = vpop.xlane.xlu0 %486  ;;  %v9799_v17 = vadd.f32 1e-05, %v606_v42  ;;  %v827_v10 = vmul.f32 %v9557_v51, %v807_v39 }
 0x34a   :  { %v1133_v18 = vpop.xlane.xlu1 %1132  ;;  %589 = vadd.xlane.f32.xlu0 %v588_v58  ;;  %v511_v9 = vmul.f32 %v9225_v8, %v487_v12  ;;  %v706_v58 = vmul.f32 %v9765_v48, %v705_v24 }
 0x34b   :  { %v1170_v29 = vmul.f32 %v1133_v18, %v9225_v8  ;;  %v714_v18 = vmul.f32 0.5, %v713_v19 }
 0x34c   :  { %v9782_v23 = vsub.f32 %v9201_v56, %v511_v9 }
 0x34d   :  { %v1187_v59 = vadd.f32 1e-05, %v1170_v29  ;;  %7807 = vmatmul.msk.f32.gmra.mxu1 %vm1466_vm2, %v1441_v2  ;;  %v710_v2 = vsel %vm9806_vm10, %v9765_v48, %v706_v58  ;;  %v715_v14 = vsub.f32 1.5, %v714_v18 }
 0x34e   :  { %v545_v56 = vmul.f32 %v9782_v23, %v9782_v23 }
 0x34f   :  { %8575 = vrsqrt.f32 %v1187_v59  ;;  %vm1264_vm11 = vweird.f32 %v1187_v59  ;;  %v716_v52 = vmul.f32 %v9785_v33, %v715_v14 }
 0x350   :  { %v594_v55 = vsel %vm13958_vm3, %v545_v56, 0.0 }
 0x351   :  { %v720_v19 = vsel %vm719_vm6, %v9785_v33, %v716_v52 }
 0x352   :  { %v1136_v31 = vpop.xlane.xlu1 %1135  ;;  %592 = vadd.xlane.f32.xlu0 %v591_v35  ;;  %v847_v35 = vadd.f32 %v9570_v32, %v827_v10  ;;  %v809_v58 = vmul.f32 %v720_v19, %v9458_v0 }
 0x353   :  { %v1171_v26 = vmul.f32 %v1136_v31, %v9225_v8 }
 0x355   :  { %v8576_v4 = vpop.eup %8575  ;;  %v1188_v38 = vadd.f32 1e-05, %v1171_v26 }
 0x356   :  { %v1259_v34 = vmul.f32 %v8576_v4, %v1187_v59  ;;  %vm1265_vm8 = vweird.f32 %v8576_v4  ;;  %v808_v59 = vmul.f32 %v710_v2, %v9445_v3  ;;  %v864_v3 = vmax.f32 %v847_v35, 0.0 }
 0x357   :  { %8577 = vrsqrt.f32 %v1188_v38  ;;  %vm1266_vm12 = vmor %vm1264_vm11, %vm1265_vm8  ;;  %vm1274_vm15 = vweird.f32 %v1188_v38  ;;  %v829_v2 = vmul.f32 %v9557_v51, %v809_v58  ;;  %vm727_vm11 = vweird.f32 %v9799_v17 }
 0x358   :  { %v1260_v27 = vmul.f32 %v8576_v4, %v1259_v34  ;;  %8579 = vrsqrt.f32 %v9799_v17  ;;  %v828_v34 = vmul.f32 %v9557_v51, %v808_v59 }
 0x35a   :  { %v1261_v57 = vmul.f32 0.5, %v1260_v27  ;;  %v1139_v6 = vpop.xlane.xlu1 %1138  ;;  %595 = vadd.xlane.f32.xlu0 %v594_v55  ;;  %v848_v11 = vadd.f32 %v9570_v32, %v828_v34 }
 0x35b   :  { %v1172_v60 = vmul.f32 %v1139_v6, %v9225_v8 }
 0x35c   :  { %v1262_v5 = vsub.f32 1.5, %v1261_v57  ;;  %v865_v29 = vmax.f32 %v848_v11, 0.0 }
 0x35d   :  { %v8578_v12 = vpop.eup %8577  ;;  %v1189_v37 = vadd.f32 1e-05, %v1172_v60 }
 0x35e   :  { %v1263_v61 = vmul.f32 %v8576_v4, %v1262_v5  ;;  %v1269_v40 = vmul.f32 %v8578_v12, %v1188_v38  ;;  %v9819_v26 = vpop.eup %8579  ;;  %vm1275_vm13 = vweird.f32 %v8578_v12 }
 0x35f   :  { %8581 = vrsqrt.f32 %v1189_v37  ;;  %vm1276_vm5 = vmor %vm1274_vm15, %vm1275_vm13  ;;  %v722_v36 = vmul.f32 %v9819_v26, %v9799_v17  ;;  %vm1284_vm8 = vweird.f32 %v1189_v37  ;;  %vm728_vm10 = vweird.f32 %v9819_v26 }
 0x360   :  { %v1267_v16 = vsel %vm1266_vm12, %v8576_v4, %v1263_v61  ;;  %v1270_v9 = vmul.f32 %v8578_v12, %v1269_v40  ;;  %v9824_v4 = vpop.permute.xlu2 %1092  ;;  %vm729_vm12 = vmor %vm727_vm11, %vm728_vm10 }
 0x361   :  { %v1374_v63 = vmul.f32 %v1267_v16, %v9323_v53  ;;  %v723_v60 = vmul.f32 %v9819_v26, %v722_v36  ;;  %v1158_v36 = vsel %vm13959_vm1, %v9824_v4, 0.0 }
 0x362   :  { %v1271_v43 = vmul.f32 0.5, %v1270_v9 }
 0x363   :  { %v1391_v31 = vmul.f32 %v1374_v63, %v9557_v51  ;;  %v724_v40 = vmul.f32 0.5, %v723_v60 }
 0x364   :  { %v1272_v20 = vsub.f32 1.5, %v1271_v43 }
 0x365   :  { %v8582_v49 = vpop.eup %8581  ;;  %v1408_v48 = vadd.f32 %v1391_v31, %v9570_v32  ;;  %v725_v43 = vsub.f32 1.5, %v724_v40  ;;  %v849_v31 = vadd.f32 %v9570_v32, %v829_v2 }
 0x366   :  { %v1273_v53 = vmul.f32 %v8578_v12, %v1272_v20  ;;  %v1279_v56 = vmul.f32 %v8582_v49, %v1189_v37  ;;  %vm1285_vm7 = vweird.f32 %v8582_v49  ;;  %v581_v20 = vpop.xlane.xlu0 %580 }
 0x367   :  { %v1425_v42 = vmax.f32 %v1408_v48, 0.0  ;;  %vm1286_vm9 = vmor %vm1284_vm8, %vm1285_vm7  ;;  %v726_v48 = vmul.f32 %v9819_v26, %v725_v43 }
 0x368   :  { %v1277_v24 = vsel %vm1276_vm5, %v8578_v12, %v1273_v53  ;;  %v1280_v27 = vmul.f32 %v8582_v49, %v1279_v56  ;;  %v866_v53 = vmax.f32 %v849_v31, 0.0 }
 0x369   :  { %v1442_v55 = vsel %vm13959_vm1, %v864_v3, %v1425_v42  ;;  %v1375_v38 = vmul.f32 %v1277_v24, %v9357_v22  ;;  %v7801_v22 = vld [vmem:[%s13883_s11 + $0x6] sm:$0x3]  ;;  %v730_v24 = vsel %vm729_vm12, %v9819_v26, %v726_v48 }
 0x36a   :  { %v1281_v57 = vmul.f32 0.5, %v1280_v27  ;;  %7808 = vmatmul.msk.f32.gmra.mxu1 %vm1466_vm2, %v1442_v55  ;;  %v9845_v9 = vperm.slane %v7801_v22, 0  ;;  %v810_v11 = vmul.f32 %v730_v24, %v9471_v30 }
 0x36b   :  { %v1392_v6 = vmul.f32 %v1375_v38, %v9557_v51 }
 0x36c   :  { %v1282_v39 = vsub.f32 1.5, %v1281_v57 }
 0x36d   :  { %v1409_v5 = vadd.f32 %v1392_v6, %v9570_v32 }
 0x36e   :  { %v1283_v33 = vmul.f32 %v8582_v49, %v1282_v39  ;;  %v1142_v12 = vpop.xlane.xlu2 %1141  ;;  %v1145_v57 = vpop.xlane.xlu0 %1144  ;;  %v830_v39 = vmul.f32 %v9557_v51, %v810_v11 }
 0x36f   :  { %v1173_v18 = vmul.f32 %v1142_v12, %v9225_v8  ;;  %v1426_v61 = vmax.f32 %v1409_v5, 0.0 }
 0x370   :  { %v1287_v10 = vsel %vm1286_vm9, %v8582_v49, %v1283_v33  ;;  %v1174_v33 = vmul.f32 %v1145_v57, %v9225_v8  ;;  %v850_v12 = vadd.f32 %v9570_v32, %v830_v39 }
 0x371   :  { %v1190_v16 = vadd.f32 1e-05, %v1173_v18  ;;  %v1443_v0 = vsel %vm13959_vm1, %v865_v29, %v1426_v61  ;;  %v1376_v37 = vmul.f32 %v1287_v10, %v9361_v28 }
 0x372   :  { %v1091_v14 = vpop.permute.xlu1 %1090  ;;  %7809 = vmatmul.msk.f32.gmra.mxu1 %vm1466_vm2, %v1443_v0  ;;  %v1191_v29 = vadd.f32 1e-05, %v1174_v33  ;;  %v867_v61 = vmax.f32 %v850_v12, 0.0 }
 0x373   :  { %8583 = vrsqrt.f32 %v1190_v16  ;;  %v1155_v63 = vsel %vm13959_vm1, %v1091_v14, 0.0  ;;  %v1393_v59 = vmul.f32 %v1376_v37, %v9557_v51  ;;  %vm1294_vm14 = vweird.f32 %v1190_v16 }
 0x374   :  { %v1535_v35 = vpop.f32.mrf.mxu1  ;;  %1156 = vadd.xlane.f32.xlu1 %v1155_v63  ;;  %8585 = vrsqrt.f32 %v1191_v29  ;;  %vm1304_vm5 = vweird.f32 %v1191_v29 }
 0x375   :  { %v9853_v49 = vadd.f32 %v1535_v35, %v9845_v9  ;;  %v1410_v52 = vadd.f32 %v1393_v59, %v9570_v32 }
 0x376   :  { %v1095_v60 = vpop.permute.xlu2 %1094  ;;  %v1148_v22 = vpop.xlane.xlu0 %1147 }
 0x377   :  { %v1590_v28 = vsel %vm13959_vm1, %v9853_v49, 0.0  ;;  %v1427_v56 = vmax.f32 %v1410_v52, 0.0  ;;  %v1161_v26 = vsel %vm13958_vm3, %v1095_v60, 0.0  ;;  %v1175_v10 = vmul.f32 %v1148_v22, %v9225_v8 }
 0x378   :  { %1591 = vadd.xlane.f32.xlu0 %v1590_v28 }
 0x379   :  { %v8584_v3 = vpop.eup %8583  ;;  %v1444_v34 = vsel %vm13959_vm1, %v866_v53, %v1427_v56 }
 0x37a   :  { %v1289_v42 = vmul.f32 %v8584_v3, %v1190_v16  ;;  %7810 = vmatmul.msk.f32.gmra.mxu1 %vm1466_vm2, %v1444_v34  ;;  %vm1295_vm13 = vweird.f32 %v8584_v3  ;;  %v608_v16 = vmul.f32 %v581_v20, %v9225_v8  ;;  %v8586_v37 = vpop.eup %8585 }
 0x37b   :  { %vm1296_vm15 = vmor %vm1294_vm14, %vm1295_vm13  ;;  %v1299_v14 = vmul.f32 %v8586_v37, %v1191_v29  ;;  %vm1305_vm4 = vweird.f32 %v8586_v37 }
 0x37c   :  { %v1290_v27 = vmul.f32 %v8584_v3, %v1289_v42  ;;  %v1538_v19 = vpop.f32.mrf.mxu1  ;;  %1159 = vadd.xlane.f32.xlu1 %v1158_v36  ;;  %v625_v0 = vadd.f32 1e-05, %v608_v16  ;;  %vm1306_vm6 = vmor %vm1304_vm5, %vm1305_vm4 }
 0x37d   :  { %v9867_v55 = vadd.f32 %v1538_v19, %v9845_v9  ;;  %v1300_v31 = vmul.f32 %v8586_v37, %v1299_v14 }
 0x37e   :  { %v1291_v38 = vmul.f32 0.5, %v1290_v27  ;;  %vm747_vm11 = vweird.f32 %v625_v0 }
 0x37f   :  { %v1593_v17 = vsel %vm13959_vm1, %v9867_v55, 0.0 }
 0x380   :  { %v1292_v6 = vsub.f32 1.5, %v1291_v38  ;;  %1594 = vadd.xlane.f32.xlu2 %v1593_v17 }
 0x382   :  { %v1293_v4 = vmul.f32 %v8584_v3, %v1292_v6 }
 0x384   :  { %v1297_v58 = vsel %vm1296_vm15, %v8584_v3, %v1293_v4  ;;  %1162 = vadd.xlane.f32.xlu1 %v1161_v26  ;;  %v1301_v3 = vmul.f32 0.5, %v1300_v31 }
 0x385   :  { %v1377_v5 = vmul.f32 %v1297_v58, %v9415_v25  ;;  %v1192_v25 = vadd.f32 1e-05, %v1175_v10 }
 0x386   :  { %v1302_v27 = vsub.f32 1.5, %v1301_v3 }
 0x387   :  { %v1394_v30 = vmul.f32 %v1377_v5, %v9557_v51  ;;  %8587 = vrsqrt.f32 %v1192_v25  ;;  %vm1314_vm9 = vweird.f32 %v1192_v25 }
 0x388   :  { %8589 = vrsqrt.f32 %v625_v0  ;;  %v1303_v6 = vmul.f32 %v8586_v37, %v1302_v27 }
 0x389   :  { %v1411_v18 = vadd.f32 %v1394_v30, %v9570_v32 }
 0x38a   :  { %v1307_v5 = vsel %vm1306_vm6, %v8586_v37, %v1303_v6 }
 0x38b   :  { %v1428_v40 = vmax.f32 %v1411_v18, 0.0 }
 0x38d   :  { %v1445_v2 = vsel %vm13959_vm1, %v867_v61, %v1428_v40  ;;  %v9886_v35 = vpop.eup %8587  ;;  %v1378_v61 = vmul.f32 %v1307_v5, %v9381_v44 }
 0x38e   :  { %7811 = vmatmul.msk.f32.gmra.mxu1 %vm1466_vm2, %v1445_v2  ;;  %v9890_v20 = vpop.eup %8589  ;;  %v1309_v28 = vmul.f32 %v9886_v35, %v1192_v25  ;;  %vm1315_vm7 = vweird.f32 %v9886_v35 }
 0x38f   :  { %v742_v56 = vmul.f32 %v9890_v20, %v625_v0  ;;  %vm748_vm8 = vweird.f32 %v9890_v20  ;;  %vm9913_vm12 = vmor %vm1314_vm9, %vm1315_vm7 }
 0x390   :  { %v587_v52 = vpop.xlane.xlu0 %586  ;;  %v1310_v36 = vmul.f32 %v9886_v35, %v1309_v28  ;;  %vm9920_vm13 = vmor %vm747_vm11, %vm748_vm8  ;;  %v1395_v28 = vmul.f32 %v1378_v61, %v9557_v51 }
 0x391   :  { %v610_v42 = vmul.f32 %v587_v52, %v9225_v8  ;;  %v743_v24 = vmul.f32 %v9890_v20, %v742_v56 }
 0x392   :  { %v1311_v38 = vmul.f32 0.5, %v1310_v36 }
 0x393   :  { %v9898_v19 = vadd.f32 1e-05, %v610_v42  ;;  %v744_v11 = vmul.f32 0.5, %v743_v24  ;;  %v1412_v24 = vadd.f32 %v1395_v28, %v9570_v32 }
 0x394   :  { %v1312_v26 = vsub.f32 1.5, %v1311_v38 }
 0x395   :  { %v745_v58 = vsub.f32 1.5, %v744_v11  ;;  %vm767_vm11 = vweird.f32 %v9898_v19 }
 0x396   :  { %v1313_v30 = vmul.f32 %v9886_v35, %v1312_v26 }
 0x397   :  { %v746_v40 = vmul.f32 %v9890_v20, %v745_v58 }
 0x398   :  { %v1541_v63 = vpop.f32.mrf.mxu1  ;;  %v1317_v25 = vsel %vm9913_vm12, %v9886_v35, %v1313_v30 }
 0x399   :  { %v9884_v43 = vadd.f32 %v1541_v63, %v9845_v9  ;;  %v1379_v42 = vmul.f32 %v1317_v25, %v9393_v62 }
 0x39b   :  { %v1596_v59 = vsel %vm13959_vm1, %v9884_v43, 0.0  ;;  %v1396_v11 = vmul.f32 %v1379_v42, %v9557_v51 }
 0x39c   :  { %1597 = vadd.xlane.f32.xlu2 %v1596_v59 }
 0x39d   :  { %v578_v48 = vpop.xlane.xlu1 %577 }
 0x39e   :  { %v607_v53 = vmul.f32 %v578_v48, %v9225_v8  ;;  %v750_v48 = vsel %vm9920_vm13, %v9890_v20, %v746_v40 }
 0x39f   :  { %v812_v27 = vmul.f32 %v750_v48, %v9520_v50 }
 0x3a0   :  { %v624_v34 = vadd.f32 1e-05, %v607_v53 }
 0x3a1   :  { %v832_v58 = vmul.f32 %v9557_v51, %v812_v27 }
 0x3a2   :  { %8591 = vrsqrt.f32 %v624_v34  ;;  %vm737_vm14 = vweird.f32 %v624_v34 }
 0x3a3   :  { %8593 = vrsqrt.f32 %v9898_v19  ;;  %v852_v40 = vadd.f32 %v9570_v32, %v832_v58 }
 0x3a5   :  { %v1151_v57 = vpop.xlane.xlu1 %1150  ;;  %v869_v25 = vmax.f32 %v852_v40, 0.0 }
 0x3a6   :  { %v1176_v17 = vmul.f32 %v1151_v57, %v9225_v8 }
 0x3a8   :  { %v8592_v60 = vpop.eup %8591  ;;  %v9902_v4 = vadd.f32 1e-05, %v1176_v17 }
 0x3a9   :  { %v732_v39 = vmul.f32 %v8592_v60, %v624_v34  ;;  %v9905_v12 = vpop.eup %8593  ;;  %vm738_vm10 = vweird.f32 %v8592_v60 }
 0x3aa   :  { %8595 = vrsqrt.f32 %v9902_v4  ;;  %v762_v14 = vmul.f32 %v9905_v12, %v9898_v19  ;;  %vm739_vm15 = vmor %vm737_vm14, %vm738_vm10  ;;  %vm1324_vm5 = vweird.f32 %v9902_v4  ;;  %vm768_vm8 = vweird.f32 %v9905_v12 }
 0x3ab   :  { %v733_v33 = vmul.f32 %v8592_v60, %v732_v39  ;;  %v1429_v39 = vmax.f32 %v1412_v24, 0.0  ;;  %vm769_vm13 = vmor %vm767_vm11, %vm768_vm8 }
 0x3ac   :  { %v763_v3 = vmul.f32 %v9905_v12, %v762_v14 }
 0x3ad   :  { %v734_v22 = vmul.f32 0.5, %v733_v33  ;;  %v1154_v18 = vpop.xlane.xlu1 %1153 }
 0x3ae   :  { %v1177_v29 = vmul.f32 %v1154_v18, %v9225_v8  ;;  %v764_v17 = vmul.f32 0.5, %v763_v3 }
 0x3af   :  { %v735_v10 = vsub.f32 1.5, %v734_v22  ;;  %v584_v2 = vpop.xlane.xlu2 %583  ;;  %v1413_v22 = vadd.f32 %v1396_v11, %v9570_v32 }
 0x3b0   :  { %v8596_v16 = vpop.eup %8595  ;;  %v1194_v63 = vadd.f32 1e-05, %v1177_v29  ;;  %v609_v31 = vmul.f32 %v584_v2, %v9225_v8  ;;  %v765_v33 = vsub.f32 1.5, %v764_v17 }
 0x3b1   :  { %v736_v59 = vmul.f32 %v8592_v60, %v735_v10  ;;  %v1319_v0 = vmul.f32 %v8596_v16, %v9902_v4  ;;  %vm1325_vm4 = vweird.f32 %v8596_v16  ;;  %v1430_v37 = vmax.f32 %v1413_v22, 0.0 }
 0x3b2   :  { %8597 = vrsqrt.f32 %v1194_v63  ;;  %v626_v52 = vadd.f32 1e-05, %v609_v31  ;;  %vm1326_vm6 = vmor %vm1324_vm5, %vm1325_vm4  ;;  %v766_v4 = vmul.f32 %v9905_v12, %v765_v33  ;;  %vm1334_vm9 = vweird.f32 %v1194_v63 }
 0x3b3   :  { %v740_v53 = vsel %vm739_vm15, %v8592_v60, %v736_v59  ;;  %v1320_v56 = vmul.f32 %v8596_v16, %v1319_v0  ;;  %v1447_v28 = vsel %vm13959_vm1, %v869_v25, %v1430_v37 }
 0x3b4   :  { %8599 = vrsqrt.f32 %v626_v52  ;;  %v811_v35 = vmul.f32 %v740_v53, %v9664_v15  ;;  %vm757_vm14 = vweird.f32 %v626_v52 }
 0x3b5   :  { %v1321_v34 = vmul.f32 0.5, %v1320_v56 }
 0x3b6   :  { %v831_v36 = vmul.f32 %v9557_v51, %v811_v35 }
 0x3b7   :  { %v1322_v38 = vsub.f32 1.5, %v1321_v34 }
 0x3b8   :  { %v8598_v57 = vpop.eup %8597  ;;  %v851_v20 = vadd.f32 %v9570_v32, %v831_v36 }
 0x3b9   :  { %v1323_v6 = vmul.f32 %v8596_v16, %v1322_v38  ;;  %v1329_v60 = vmul.f32 %v8598_v57, %v1194_v63  ;;  %vm1335_vm7 = vweird.f32 %v8598_v57 }
 0x3ba   :  { %v8600_v15 = vpop.eup %8599  ;;  %v9940_v26 = vpop.f32.mrf.mxu1  ;;  %v868_v62 = vmax.f32 %v851_v20, 0.0  ;;  %vm1336_vm12 = vmor %vm1334_vm9, %vm1335_vm7 }
 0x3bb   :  { %v1330_v50 = vmul.f32 %v8598_v57, %v1329_v60  ;;  %v752_v5 = vmul.f32 %v8600_v15, %v626_v52  ;;  %v1327_v18 = vsel %vm1326_vm6, %v8596_v16, %v1323_v6  ;;  %vm758_vm10 = vweird.f32 %v8600_v15 }
 0x3bc   :  { %v1446_v30 = vsel %vm13959_vm1, %v868_v62, %v1429_v39  ;;  %v1380_v14 = vmul.f32 %v1327_v18, %v9403_v7  ;;  %vm759_vm15 = vmor %vm757_vm14, %vm758_vm10  ;;  %v770_v7 = vsel %vm769_vm13, %v9905_v12, %v766_v4 }
 0x3bd   :  { %v1331_v29 = vmul.f32 0.5, %v1330_v50  ;;  %v753_v61 = vmul.f32 %v8600_v15, %v752_v5  ;;  %7812 = vmatmul.msk.f32.gmra.mxu1 %vm1466_vm2, %v1446_v30  ;;  %v814_v52 = vmul.f32 %v770_v7, %v9639_v1  ;;  %v590_v35 = vpop.xlane.xlu0 %589 }
 0x3be   :  { %v1397_v48 = vmul.f32 %v1380_v14, %v9557_v51 }
 0x3bf   :  { %v1332_v10 = vsub.f32 1.5, %v1331_v29  ;;  %v754_v2 = vmul.f32 0.5, %v753_v61 }
 0x3c0   :  { %v1414_v3 = vadd.f32 %v1397_v48, %v9570_v32 }
 0x3c1   :  { %v1333_v31 = vmul.f32 %v8598_v57, %v1332_v10  ;;  %v755_v44 = vsub.f32 1.5, %v754_v2 }
 0x3c2   :  { %v9952_v16 = vpop.f32.mrf.mxu1  ;;  %v1431_v27 = vmax.f32 %v1414_v3, 0.0 }
 0x3c3   :  { %v1337_v59 = vsel %vm1336_vm12, %v8598_v57, %v1333_v31  ;;  %v756_v0 = vmul.f32 %v8600_v15, %v755_v44  ;;  %v611_v57 = vmul.f32 %v590_v35, %v9225_v8 }
 0x3c4   :  { %v1381_v53 = vmul.f32 %v1337_v59, %v9429_v41 }
 0x3c5   :  { %v760_v63 = vsel %vm759_vm15, %v8600_v15, %v756_v0  ;;  %7813 = vmatmul.msk.f32.gmra.mxu1 %vm1466_vm2, %v1447_v28  ;;  %v593_v11 = vpop.xlane.xlu0 %592  ;;  %v628_v6 = vadd.f32 1e-05, %v611_v57 }
 0x3c6   :  { %v813_v19 = vmul.f32 %v760_v63, %v9706_v54  ;;  %v1398_v36 = vmul.f32 %v1381_v53, %v9557_v51  ;;  %v834_v54 = vmul.f32 %v9557_v51, %v814_v52  ;;  %v612_v62 = vmul.f32 %v593_v11, %v9225_v8 }
 0x3c7   :  { %8601 = vrsqrt.f32 %v628_v6  ;;  %vm777_vm5 = vweird.f32 %v628_v6 }
 0x3c8   :  { %v833_v56 = vmul.f32 %v9557_v51, %v813_v19  ;;  %v1415_v1 = vadd.f32 %v1398_v36, %v9570_v32  ;;  %v854_v17 = vadd.f32 %v9570_v32, %v834_v54  ;;  %v629_v39 = vadd.f32 1e-05, %v612_v62 }
 0x3ca   :  { %v1550_v42 = vpop.f32.mrf.mxu1  ;;  %v853_v34 = vadd.f32 %v9570_v32, %v833_v56  ;;  %v1432_v20 = vmax.f32 %v1415_v1, 0.0  ;;  %v871_v60 = vmax.f32 %v854_v17, 0.0  ;;  %8603 = vrsqrt.f32 %v629_v39 }
 0x3cb   :  { %v9966_v12 = vadd.f32 %v1550_v42, %v9845_v9  ;;  %vm787_vm9 = vweird.f32 %v629_v39 }
 0x3cc   :  { %v870_v24 = vmax.f32 %v853_v34, 0.0  ;;  %v1449_v15 = vsel %vm13959_vm1, %v871_v60, %v1432_v20 }
 0x3cd   :  { %v1605_v41 = vsel %vm13959_vm1, %v9966_v12, 0.0  ;;  %v596_v58 = vpop.xlane.xlu0 %595  ;;  %v8602_v50 = vpop.eup %8601 }
 0x3ce   :  { %1606 = vadd.xlane.f32.xlu2 %v1605_v41  ;;  %v1448_v38 = vsel %vm13959_vm1, %v870_v24, %v1431_v27  ;;  %v613_v5 = vmul.f32 %v596_v58, %v9225_v8  ;;  %v772_v33 = vmul.f32 %v8602_v50, %v628_v6  ;;  %vm778_vm4 = vweird.f32 %v8602_v50 }
 0x3cf   :  { %7814 = vmatmul.msk.f32.gmra.mxu1 %vm1466_vm2, %v1448_v38  ;;  %vm779_vm6 = vmor %vm777_vm5, %vm778_vm4  ;;  %v10007_v27 = vadd.f32 %v9940_v26, %v9845_v9 }
 0x3d0   :  { %v9980_v30 = vadd.f32 1e-05, %v613_v5  ;;  %v773_v22 = vmul.f32 %v8602_v50, %v772_v33  ;;  %v9982_v18 = vpop.eup %8603 }
 0x3d1   :  { %v782_v10 = vmul.f32 %v9982_v18, %v629_v39  ;;  %vm788_vm7 = vweird.f32 %v9982_v18 }
 0x3d2   :  { %8605 = vrsqrt.f32 %v9980_v30  ;;  %v774_v40 = vmul.f32 0.5, %v773_v22  ;;  %vm10023_vm10 = vmor %vm787_vm9, %vm788_vm7  ;;  %vm797_vm15 = vweird.f32 %v9980_v30 }
 0x3d3   :  { %v783_v31 = vmul.f32 %v9982_v18, %v782_v10 }
 0x3d4   :  { %v775_v14 = vsub.f32 1.5, %v774_v40 }
 0x3d5   :  { %v784_v63 = vmul.f32 0.5, %v783_v31 }
 0x3d6   :  { %v776_v7 = vmul.f32 %v8602_v50, %v775_v14 }
 0x3d7   :  { %7815 = vmatmul.msk.f32.gmra.mxu1 %vm1466_vm2, %v1449_v15  ;;  %v785_v34 = vsub.f32 1.5, %v784_v63  ;;  %v1599_v15 = vsel %vm13959_vm1, %v10007_v27, 0.0 }
 0x3d8   :  { %v9989_v44 = vpop.eup %8605  ;;  %v780_v42 = vsel %vm779_vm6, %v8602_v50, %v776_v7 }
 0x3d9   :  { %v792_v19 = vmul.f32 %v9989_v44, %v9980_v30  ;;  %v815_v17 = vmul.f32 %v780_v42, %v9756_v45  ;;  %v786_v20 = vmul.f32 %v9982_v18, %v785_v34  ;;  %vm798_vm13 = vweird.f32 %v9989_v44 }
 0x3da   :  { %vm10052_vm4 = vmor %vm797_vm15, %vm798_vm13 }
 0x3db   :  { %v793_v36 = vmul.f32 %v9989_v44, %v792_v19  ;;  %v835_v39 = vmul.f32 %v9557_v51, %v815_v17  ;;  %v790_v5 = vsel %vm10023_vm10, %v9982_v18, %v786_v20 }
 0x3dc   :  { %v816_v18 = vmul.f32 %v790_v5, %v9768_v21 }
 0x3dd   :  { %v794_v11 = vmul.f32 0.5, %v793_v36 }
 0x3de   :  { %v836_v19 = vmul.f32 %v9557_v51, %v816_v18 }
 0x3df   :  { %v795_v33 = vsub.f32 1.5, %v794_v11 }
 0x3e0   :  { %v856_v36 = vadd.f32 %v9570_v32, %v836_v19 }
 0x3e1   :  { %v796_v14 = vmul.f32 %v9989_v44, %v795_v33 }
 0x3e2   :  { %v873_v17 = vmax.f32 %v856_v36, 0.0 }
 0x3e7   :  { %v1157_v29 = vpop.xlane.xlu1 %1156  ;;  %v1553_v59 = vpop.f32.mrf.mxu1 }
 0x3e8   :  { %v1178_v61 = vmul.f32 %v1157_v29, %v9225_v8  ;;  %v10038_v40 = vadd.f32 %v1553_v59, %v9845_v9 }
 0x3ea   :  { %v1195_v2 = vadd.f32 1e-05, %v1178_v61  ;;  %v10035_v61 = vadd.f32 %v9952_v16, %v9845_v9  ;;  %v1608_v59 = vsel %vm13959_vm1, %v10038_v40, 0.0 }
 0x3eb   :  { %v1592_v4 = vpop.xlane.xlu0 %1591 }
 0x3ec   :  { %8607 = vrsqrt.f32 %v1195_v2  ;;  %v1641_v37 = vmul.f32 %v1592_v4, %v9225_v8  ;;  %vm1344_vm11 = vweird.f32 %v1195_v2  ;;  %v855_v4 = vadd.f32 %v9570_v32, %v835_v39 }
 0x3ee   :  { %v9992_v25 = vsub.f32 %v9853_v49, %v1641_v37  ;;  %v872_v30 = vmax.f32 %v855_v4, 0.0 }
 0x3ef   :  { %v1160_v0 = vpop.xlane.xlu1 %1159  ;;  %v1556_v26 = vpop.f32.mrf.mxu1 }
 0x3f0   :  { %v1179_v28 = vmul.f32 %v1160_v0, %v9225_v8  ;;  %v1675_v48 = vmul.f32 %v9992_v25, %v9992_v25 }
 0x3f2   :  { %v8608_v53 = vpop.eup %8607  ;;  %v9999_v56 = vadd.f32 1e-05, %v1179_v28  ;;  %v1692_v3 = vsel %vm13959_vm1, %v1675_v48, 0.0 }
 0x3f3   :  { %v1339_v49 = vmul.f32 %v8608_v53, %v1195_v2  ;;  %1693 = vadd.xlane.f32.xlu1 %v1692_v3  ;;  %v1595_v52 = vpop.xlane.xlu2 %1594  ;;  %vm1345_vm8 = vweird.f32 %v8608_v53 }
 0x3f4   :  { %8609 = vrsqrt.f32 %v9999_v56  ;;  %v1642_v35 = vmul.f32 %v1595_v52, %v9225_v8  ;;  %vm1346_vm12 = vmor %vm1344_vm11, %vm1345_vm8  ;;  %vm1354_vm5 = vweird.f32 %v9999_v56  ;;  %v10063_v52 = vadd.f32 %v1556_v26, %v9845_v9 }
 0x3f5   :  { %v1340_v24 = vmul.f32 %v8608_v53, %v1339_v49 }
 0x3f6   :  { %v10010_v54 = vsub.f32 %v9867_v55, %v1642_v35 }
 0x3f7   :  { %v1341_v41 = vmul.f32 0.5, %v1340_v24  ;;  %v1163_v38 = vpop.xlane.xlu1 %1162  ;;  %v1559_v48 = vpop.f32.mrf.mxu1 }
 0x3f8   :  { %v1180_v1 = vmul.f32 %v1163_v38, %v9225_v8  ;;  %v1676_v57 = vmul.f32 %v10010_v54, %v10010_v54 }
 0x3f9   :  { %v1342_v6 = vsub.f32 1.5, %v1341_v41 }
 0x3fa   :  { %v8610_v60 = vpop.eup %8609  ;;  %v10018_v55 = vadd.f32 1e-05, %v1180_v1  ;;  %v1695_v62 = vsel %vm13959_vm1, %v1676_v57, 0.0  ;;  %v1611_v1 = vsel %vm13959_vm1, %v10063_v52, 0.0 }
 0x3fb   :  { %v1343_v45 = vmul.f32 %v8608_v53, %v1342_v6  ;;  %v1349_v50 = vmul.f32 %v8610_v60, %v9999_v56  ;;  %1600 = vadd.xlane.f32.xlu1 %v1599_v15  ;;  %1696 = vadd.xlane.f32.xlu0 %v1695_v62  ;;  %vm1355_vm14 = vweird.f32 %v8610_v60  ;;  %v10066_v56 = vadd.f32 %v1559_v48, %v9845_v9 }
 0x3fc   :  { %8611 = vrsqrt.f32 %v10018_v55  ;;  %vm1356_vm6 = vmor %vm1354_vm5, %vm1355_vm14  ;;  %vm1364_vm8 = vweird.f32 %v10018_v55 }
 0x3fd   :  { %v1347_v22 = vsel %vm1346_vm12, %v8608_v53, %v1343_v45  ;;  %v1350_v29 = vmul.f32 %v8610_v60, %v1349_v50  ;;  %v800_v53 = vsel %vm10052_vm4, %v9989_v44, %v796_v14  ;;  %v1614_v38 = vsel %vm13959_vm1, %v10066_v56, 0.0 }
 0x3fe   :  { %v1382_v10 = vmul.f32 %v1347_v22, %v9593_v46  ;;  %v1602_v46 = vsel %vm13959_vm1, %v10035_v61, 0.0  ;;  %v817_v44 = vmul.f32 %v800_v53, %v9782_v23 }
 0x3ff   :  { %v1351_v2 = vmul.f32 0.5, %v1350_v29 }
 0x400   :  { %v1399_v37 = vmul.f32 %v1382_v10, %v9557_v51  ;;  %v837_v23 = vmul.f32 %v9557_v51, %v817_v44 }
 0x401   :  { %v1352_v31 = vsub.f32 1.5, %v1351_v2 }
 0x402   :  { %v8612_v16 = vpop.eup %8611  ;;  %v1416_v0 = vadd.f32 %v1399_v37, %v9570_v32  ;;  %v857_v62 = vadd.f32 %v9570_v32, %v837_v23 }
 0x403   :  { %v1353_v21 = vmul.f32 %v8610_v60, %v1352_v31  ;;  %v1359_v7 = vmul.f32 %v8612_v16, %v10018_v55  ;;  %1609 = vadd.xlane.f32.xlu1 %v1608_v59  ;;  %1603 = vadd.xlane.f32.xlu0 %v1602_v46  ;;  %vm1365_vm7 = vweird.f32 %v8612_v16  ;;  %v2023_v59 = vld [vmem:[%s13876_s4 + $0x58] sm:$0xff]  ;;  %v2022_v46 = vld [vmem:[%s13876_s4 + $0x50] sm:$0xff] }
 0x404   :  { %v1433_v63 = vmax.f32 %v1416_v0, 0.0  ;;  %vm1366_vm9 = vmor %vm1364_vm8, %vm1365_vm7  ;;  %v874_v50 = vmax.f32 %v857_v62, 0.0  ;;  %v2021_v0 = vld [vmem:[%s13876_s4 + $0x48] sm:$0xff] }
 0x405   :  { %v1357_v3 = vsel %vm1356_vm6, %v8610_v60, %v1353_v21  ;;  %v1360_v49 = vmul.f32 %v8612_v16, %v1359_v7 }
 0x406   :  { %v1450_v35 = vsel %vm13959_vm1, %v872_v30, %v1433_v63  ;;  %v1383_v42 = vmul.f32 %v1357_v3, %v9492_v47 }
 0x407   :  { %v1361_v34 = vmul.f32 0.5, %v1360_v49  ;;  %7816 = vmatmul.msk.f32.gmra.mxu1 %vm1466_vm2, %v1450_v35 }
 0x408   :  { %v1400_v24 = vmul.f32 %v1383_v42, %v9557_v51 }
 0x409   :  { %v1362_v41 = vsub.f32 1.5, %v1361_v34 }
 0x40a   :  { %v1417_v57 = vadd.f32 %v1400_v24, %v9570_v32 }
 0x40b   :  { %v1363_v47 = vmul.f32 %v8612_v16, %v1362_v41  ;;  %1615 = vadd.xlane.f32.xlu1 %v1614_v38  ;;  %1612 = vadd.xlane.f32.xlu0 %v1611_v1  ;;  %v1562_v22 = vpop.f32.mrf.mxu1 }
 0x40c   :  { %v1434_v20 = vmax.f32 %v1417_v57, 0.0  ;;  %v7819_v57 = vld [vmem:[%s13883_s11 + $0x8] sm:$0x3] }
 0x40d   :  { %v1367_v11 = vsel %vm1366_vm9, %v8612_v16, %v1363_v47 }
 0x40e   :  { %v1451_v6 = vsel %vm13959_vm1, %v873_v17, %v1434_v20  ;;  %v1384_v26 = vmul.f32 %v1367_v11, %v9616_v13 }
 0x40f   :  { %7817 = vmatmul.msk.f32.gmra.mxu1 %vm1466_vm2, %v1451_v6  ;;  %v1598_v60 = vpop.xlane.xlu2 %1597  ;;  %v7820_v6 = vld [vmem:[%s13883_s11 + $0xa] sm:$0x3] }
 0x410   :  { %v1643_v15 = vmul.f32 %v1598_v60, %v9225_v8  ;;  %v1401_v55 = vmul.f32 %v1384_v26, %v9557_v51  ;;  %v10097_v51 = vadd.f32 %v1562_v22, %v9845_v9  ;;  %v10152_v60 = vperm.slane %v7819_v57, 0 }
 0x412   :  { %v10088_v58 = vsub.f32 %v9884_v43, %v1643_v15  ;;  %v1418_v45 = vadd.f32 %v1401_v55, %v9570_v32  ;;  %v1617_v43 = vsel %vm13959_vm1, %v10097_v51, 0.0 }
 0x414   :  { %v1435_v39 = vmax.f32 %v1418_v45, 0.0  ;;  %v1677_v5 = vmul.f32 %v10088_v58, %v10088_v58 }
 0x416   :  { %v1452_v13 = vsel %vm13959_vm1, %v874_v50, %v1435_v39  ;;  %v1698_v33 = vsel %vm13959_vm1, %v1677_v5, 0.0  ;;  %v10161_v5 = vperm.slane %v7820_v6, 0 }
 0x417   :  { %7818 = vmatmul.msk.f32.gmra.mxu1 %vm1466_vm2, %v1452_v13  ;;  %1699 = vadd.xlane.f32.xlu2 %v1698_v33 }
 0x41f   :  { %1618 = vadd.xlane.f32.xlu2 %v1617_v43 }
 0x43a   :  { %v1565_v32 = vpop.f32.mrf.mxu1 }
 0x43b   :  { %v10138_v1 = vadd.f32 %v1565_v32, %v9845_v9 }
 0x43d   :  { %v1620_v55 = vsel %vm13959_vm1, %v10138_v1, 0.0 }
 0x441   :  { %v1607_v29 = vpop.xlane.xlu2 %1606 }
 0x442   :  { %v1646_v10 = vmul.f32 %v1607_v29, %v9225_v8  ;;  %v10105_v4 = vpop.f32.mrf.mxu1 }
 0x443   :  { %v10167_v29 = vadd.f32 %v10105_v4, %v9845_v9 }
 0x444   :  { %v10103_v2 = vsub.f32 %v9966_v12, %v1646_v10  ;;  %v2024_v12 = vld [vmem:[%s13876_s4 + $0x60] sm:$0xff] }
 0x445   :  { %2093 = vmatpush.msra.mxu2 %v2024_v12 }
 0x446   :  { %v1680_v37 = vmul.f32 %v10103_v2, %v10103_v2 }
 0x447   :  { %2094 = vmatpush.msra.mxu2 %v2023_v59  ;;  %v1623_v59 = vsel %vm13959_vm1, %v10167_v29, 0.0 }
 0x448   :  { %v1707_v18 = vsel %vm13959_vm1, %v1680_v37, 0.0 }
 0x449   :  { %1708 = vadd.xlane.f32.xlu2 %v1707_v18  ;;  %2095 = vmatpush.msra.mxu2 %v2022_v46 }
 0x44b   :  { %2096 = vmatpush.msra.mxu2 %v2021_v0 }
 0x44c   :  { %v1571_v14 = vpop.f32.mrf.mxu1 }
 0x44d   :  { %v10111_v31 = vadd.f32 %v1571_v14, %v9845_v9 }
 0x44f   :  { %v1626_v16 = vsel %vm13959_vm1, %v10111_v31, 0.0 }
 0x451   :  { %1627 = vadd.xlane.f32.xlu2 %v1626_v16 }
 0x454   :  { %v1574_v15 = vpop.f32.mrf.mxu1 }
 0x466   :  { %v1694_v28 = vpop.xlane.xlu1 %1693 }
 0x467   :  { %v1743_v21 = vmul.f32 %v1694_v28, %v9225_v8 }
 0x469   :  { %v1760_v48 = vadd.f32 1e-05, %v1743_v21 }
 0x46b   :  { %8613 = vrsqrt.f32 %v1760_v48  ;;  %vm1783_vm10 = vweird.f32 %v1760_v48 }
 0x46e   :  { %v1601_v7 = vpop.xlane.xlu1 %1600  ;;  %v1697_v30 = vpop.xlane.xlu0 %1696 }
 0x46f   :  { %v1644_v63 = vmul.f32 %v1601_v7, %v9225_v8  ;;  %v1744_v19 = vmul.f32 %v1697_v30, %v9225_v8  ;;  %v10189_v7 = vadd.f32 %v1574_v15, %v9845_v9 }
 0x471   :  { %v8614_v53 = vpop.eup %8613  ;;  %v10131_v3 = vsub.f32 %v10007_v27, %v1644_v63  ;;  %v1761_v49 = vadd.f32 1e-05, %v1744_v19 }
 0x472   :  { %v1778_v35 = vmul.f32 %v8614_v53, %v1760_v48  ;;  %vm1784_vm2 = vweird.f32 %v8614_v53 }
 0x473   :  { %8615 = vrsqrt.f32 %v1761_v49  ;;  %v1678_v42 = vmul.f32 %v10131_v3, %v10131_v3  ;;  %vm1785_vm11 = vmor %vm1783_vm10, %vm1784_vm2  ;;  %vm1793_vm13 = vweird.f32 %v1761_v49 }
 0x474   :  { %v1779_v34 = vmul.f32 %v8614_v53, %v1778_v35 }
 0x475   :  { %v1701_v36 = vsel %vm13959_vm1, %v1678_v42, 0.0  ;;  %v1629_v42 = vsel %vm13959_vm1, %v10189_v7, 0.0 }
 0x476   :  { %v1780_v24 = vmul.f32 0.5, %v1779_v34  ;;  %v1610_v44 = vpop.xlane.xlu1 %1609  ;;  %1702 = vadd.xlane.f32.xlu0 %v1701_v36  ;;  %v1604_v41 = vpop.xlane.xlu0 %1603 }
 0x477   :  { %v1645_v38 = vmul.f32 %v1604_v41, %v9225_v8  ;;  %v1647_v17 = vmul.f32 %v1610_v44, %v9225_v8 }
 0x478   :  { %v1781_v27 = vsub.f32 1.5, %v1780_v24 }
 0x479   :  { %v8616_v47 = vpop.eup %8615  ;;  %v10145_v20 = vsub.f32 %v10035_v61, %v1645_v38  ;;  %v10157_v45 = vsub.f32 %v10038_v40, %v1647_v17 }
 0x47a   :  { %v1782_v23 = vmul.f32 %v8614_v53, %v1781_v27  ;;  %v1788_v11 = vmul.f32 %v8616_v47, %v1761_v49  ;;  %vm1794_vm12 = vweird.f32 %v8616_v47 }
 0x47b   :  { %v1679_v26 = vmul.f32 %v10145_v20, %v10145_v20  ;;  %v1681_v18 = vmul.f32 %v10157_v45, %v10157_v45  ;;  %vm1795_vm14 = vmor %vm1793_vm13, %vm1794_vm12 }
 0x47c   :  { %v1789_v62 = vmul.f32 %v8616_v47, %v1788_v11  ;;  %v1786_v61 = vsel %vm1785_vm11, %v8614_v53, %v1782_v23 }
 0x47d   :  { %v1704_v50 = vsel %vm13959_vm1, %v1679_v26, 0.0  ;;  %v1947_v39 = vmul.f32 %v1786_v61, %v9992_v25  ;;  %v1710_v0 = vsel %vm13959_vm1, %v1681_v18, 0.0 }
 0x47e   :  { %v1790_v13 = vmul.f32 0.5, %v1789_v62  ;;  %v1616_v33 = vpop.xlane.xlu1 %1615  ;;  %1621 = vadd.xlane.f32.xlu0 %v1620_v55  ;;  %1705 = vadd.xlane.f32.xlu1 %v1704_v50  ;;  %v1613_v22 = vpop.xlane.xlu0 %1612 }
 0x47f   :  { %v1649_v43 = vmul.f32 %v1616_v33, %v9225_v8  ;;  %v1967_v32 = vmul.f32 %v10152_v60, %v1947_v39  ;;  %v1648_v25 = vmul.f32 %v1613_v22, %v9225_v8 }
 0x480   :  { %v1791_v40 = vsub.f32 1.5, %v1790_v13 }
 0x481   :  { %v10170_v10 = vsub.f32 %v10066_v56, %v1649_v43  ;;  %v1987_v37 = vadd.f32 %v10161_v5, %v1967_v32  ;;  %v10181_v46 = vsub.f32 %v10063_v52, %v1648_v25 }
 0x482   :  { %v1792_v14 = vmul.f32 %v8616_v47, %v1791_v40 }
 0x483   :  { %v2004_v16 = vmax.f32 %v1987_v37, 0.0  ;;  %v1683_v4 = vmul.f32 %v10170_v10, %v10170_v10  ;;  %v1682_v52 = vmul.f32 %v10181_v46, %v10181_v46 }
 0x484   :  { %v1577_v12 = vpop.f32.mrf.mxu1  ;;  %v1796_v56 = vsel %vm1795_vm14, %v8616_v47, %v1792_v14 }
 0x485   :  { %7822 = vmatmul.msk.f32.vlgmr.msra.gmra.mxu2 %vm13959_vm1, %v2004_v16  ;;  %v1716_v28 = vsel %vm13959_vm1, %v1683_v4, 0.0  ;;  %v1948_v21 = vmul.f32 %v1796_v56, %v10010_v54  ;;  %v1713_v34 = vsel %vm13959_vm1, %v1682_v52, 0.0  ;;  %v10205_v24 = vadd.f32 %v1577_v12, %v9845_v9 }
 0x486   :  { %1711 = vadd.xlane.f32.xlu0 %v1710_v0  ;;  %1624 = vadd.xlane.f32.xlu1 %v1623_v59 }
 0x487   :  { %1717 = vadd.xlane.f32.xlu2 %v1716_v28  ;;  %v1968_v48 = vmul.f32 %v10152_v60, %v1948_v21  ;;  %v1632_v57 = vsel %vm13959_vm1, %v10205_v24, 0.0 }
 0x489   :  { %v1988_v30 = vadd.f32 %v10161_v5, %v1968_v48 }
 0x48a   :  { %v1700_v63 = vpop.xlane.xlu2 %1699 }
 0x48b   :  { %v1745_v19 = vmul.f32 %v1700_v63, %v9225_v8  ;;  %v2005_v53 = vmax.f32 %v1988_v30, 0.0 }
 0x48c   :  { %v1580_v49 = vpop.f32.mrf.mxu1 }
 0x48d   :  { %v1762_v35 = vadd.f32 1e-05, %v1745_v19  ;;  %v10196_v54 = vadd.f32 %v1580_v49, %v9845_v9  ;;  %7823 = vmatmul.msk.f32.gmra.mxu2 %vm13959_vm1, %v2005_v53 }
 0x48e   :  { %1630 = vadd.xlane.f32.xlu0 %v1629_v42  ;;  %1714 = vadd.xlane.f32.xlu1 %v1713_v34 }
 0x48f   :  { %8617 = vrsqrt.f32 %v1762_v35  ;;  %v1635_v36 = vsel %vm13959_vm1, %v10196_v54, 0.0  ;;  %vm1803_vm4 = vweird.f32 %v1762_v35 }
 0x490   :  { %1636 = vadd.xlane.f32.xlu2 %v1635_v36 }
 0x492   :  { %v1619_v44 = vpop.xlane.xlu2 %1618 }
 0x493   :  { %v1650_v41 = vmul.f32 %v1619_v44, %v9225_v8 }
 0x494   :  { %v1583_v26 = vpop.f32.mrf.mxu1 }
 0x495   :  { %v8618_v38 = vpop.eup %8617  ;;  %v10209_v27 = vsub.f32 %v10097_v51, %v1650_v41  ;;  %v10217_v62 = vadd.f32 %v1583_v26, %v9845_v9 }
 0x496   :  { %v1798_v47 = vmul.f32 %v8618_v38, %v1762_v35  ;;  %1633 = vadd.xlane.f32.xlu1 %v1632_v57  ;;  %vm1804_vm15 = vweird.f32 %v8618_v38 }
 0x497   :  { %v1684_v17 = vmul.f32 %v10209_v27, %v10209_v27  ;;  %vm1805_vm5 = vmor %vm1803_vm4, %vm1804_vm15  ;;  %v1638_v61 = vsel %vm13958_vm3, %v10217_v62, 0.0 }
 0x498   :  { %v1799_v23 = vmul.f32 %v8618_v38, %v1798_v47 }
 0x499   :  { %v1719_v11 = vsel %vm13959_vm1, %v1684_v17, 0.0 }
 0x49a   :  { %v1800_v6 = vmul.f32 0.5, %v1799_v23  ;;  %1720 = vadd.xlane.f32.xlu0 %v1719_v11 }
 0x49c   :  { %v1801_v15 = vsub.f32 1.5, %v1800_v6 }
 0x49e   :  { %v1802_v51 = vmul.f32 %v8618_v38, %v1801_v15 }
 0x4a0   :  { %v1806_v55 = vsel %vm1805_vm5, %v8618_v38, %v1802_v51 }
 0x4a1   :  { %v1949_v50 = vmul.f32 %v1806_v55, %v10088_v58 }
 0x4a2   :  { %1639 = vadd.xlane.f32.xlu0 %v1638_v61 }
 0x4a3   :  { %v1969_v39 = vmul.f32 %v10152_v60, %v1949_v50 }
 0x4a5   :  { %v1989_v13 = vadd.f32 %v10161_v5, %v1969_v39 }
 0x4a7   :  { %v2006_v33 = vmax.f32 %v1989_v13, 0.0 }
 0x4a9   :  { %7824 = vmatmul.msk.f32.gmra.mxu2 %vm13959_vm1, %v2006_v33 }
 0x4bc   :  { %v1709_v22 = vpop.xlane.xlu2 %1708 }
 0x4bd   :  { %v1748_v9 = vmul.f32 %v1709_v22, %v9225_v8 }
 0x4bf   :  { %v10226_v43 = vadd.f32 1e-05, %v1748_v9 }
 0x4c1   :  { %8619 = vrsqrt.f32 %v10226_v43  ;;  %vm1833_vm10 = vweird.f32 %v10226_v43 }
 0x4c4   :  { %v1628_v58 = vpop.xlane.xlu2 %1627 }
 0x4c5   :  { %v1653_v59 = vmul.f32 %v1628_v58, %v9225_v8 }
 0x4c7   :  { %v10230_v14 = vpop.eup %8619  ;;  %v10243_v52 = vsub.f32 %v10111_v31, %v1653_v59 }
 0x4c8   :  { %v1828_v28 = vmul.f32 %v10230_v14, %v10226_v43  ;;  %vm1834_vm2 = vweird.f32 %v10230_v14 }
 0x4c9   :  { %v1687_v57 = vmul.f32 %v10243_v52, %v10243_v52  ;;  %vm10295_vm13 = vmor %vm1833_vm10, %vm1834_vm2 }
 0x4ca   :  { %v1829_v19 = vmul.f32 %v10230_v14, %v1828_v28 }
 0x4cb   :  { %v1728_v51 = vsel %vm13959_vm1, %v1687_v57, 0.0 }
 0x4cc   :  { %v1830_v47 = vmul.f32 0.5, %v1829_v19 }
 0x4ce   :  { %v1831_v61 = vsub.f32 1.5, %v1830_v47 }
 0x4e9   :  { %v1703_v32 = vpop.xlane.xlu0 %1702 }
 0x4ea   :  { %v1746_v40 = vmul.f32 %v1703_v32, %v9225_v8 }
 0x4ec   :  { %v1763_v25 = vadd.f32 1e-05, %v1746_v40 }
 0x4ee   :  { %8621 = vrsqrt.f32 %v1763_v25  ;;  %vm1813_vm7 = vweird.f32 %v1763_v25 }
 0x4f1   :  { %v1706_v37 = vpop.xlane.xlu1 %1705  ;;  %v1622_v18 = vpop.xlane.xlu0 %1621 }
 0x4f2   :  { %v1747_v16 = vmul.f32 %v1706_v37, %v9225_v8  ;;  %v1651_v4 = vmul.f32 %v1622_v18, %v9225_v8 }
 0x4f4   :  { %v8622_v12 = vpop.eup %8621  ;;  %v1764_v56 = vadd.f32 1e-05, %v1747_v16  ;;  %v10236_v0 = vsub.f32 %v10138_v1, %v1651_v4  ;;  %v1832_v16 = vmul.f32 %v10230_v14, %v1831_v61 }
 0x4f5   :  { %v1808_v21 = vmul.f32 %v8622_v12, %v1763_v25  ;;  %vm1814_vm6 = vweird.f32 %v8622_v12 }
 0x4f6   :  { %8623 = vrsqrt.f32 %v1764_v56  ;;  %v1685_v48 = vmul.f32 %v10236_v0, %v10236_v0  ;;  %vm1815_vm8 = vmor %vm1813_vm7, %vm1814_vm6  ;;  %vm1823_vm11 = vweird.f32 %v1764_v56 }
 0x4f7   :  { %v1809_v30 = vmul.f32 %v8622_v12, %v1808_v21 }
 0x4f8   :  { %v1722_v63 = vsel %vm13959_vm1, %v1685_v48, 0.0 }
 0x4f9   :  { %v1810_v53 = vmul.f32 0.5, %v1809_v30  ;;  %v1625_v49 = vpop.xlane.xlu1 %1624  ;;  %1723 = vadd.xlane.f32.xlu1 %v1722_v63  ;;  %v1712_v1 = vpop.xlane.xlu0 %1711 }
 0x4fa   :  { %v1652_v35 = vmul.f32 %v1625_v49, %v9225_v8  ;;  %v1749_v42 = vmul.f32 %v1712_v1, %v9225_v8  ;;  %v1718_v34 = vpop.xlane.xlu2 %1717  ;;  %v1836_v1 = vsel %vm10295_vm13, %v10230_v14, %v1832_v16 }
 0x4fb   :  { %v1811_v36 = vsub.f32 1.5, %v1810_v53  ;;  %v1751_v44 = vmul.f32 %v1718_v34, %v9225_v8  ;;  %v1952_v14 = vmul.f32 %v1836_v1, %v10103_v2 }
 0x4fc   :  { %v8624_v41 = vpop.eup %8623  ;;  %v10251_v31 = vsub.f32 %v10167_v29, %v1652_v35  ;;  %v10253_v38 = vadd.f32 1e-05, %v1749_v42 }
 0x4fd   :  { %v1812_v17 = vmul.f32 %v8622_v12, %v1811_v36  ;;  %v1818_v23 = vmul.f32 %v8624_v41, %v1764_v56  ;;  %v10260_v26 = vadd.f32 1e-05, %v1751_v44  ;;  %vm1824_vm9 = vweird.f32 %v8624_v41 }
 0x4fe   :  { %8625 = vrsqrt.f32 %v10253_v38  ;;  %v1686_v11 = vmul.f32 %v10251_v31, %v10251_v31  ;;  %vm10285_vm12 = vmor %vm1823_vm11, %vm1824_vm9  ;;  %vm1843_vm15 = vweird.f32 %v10253_v38 }
 0x4ff   :  { %v1819_v6 = vmul.f32 %v8624_v41, %v1818_v23  ;;  %v1816_v29 = vsel %vm1815_vm8, %v8622_v12, %v1812_v17  ;;  %8627 = vrsqrt.f32 %v10260_v26  ;;  %vm1863_vm9 = vweird.f32 %v10260_v26 }
 0x500   :  { %v1725_v15 = vsel %vm13959_vm1, %v1686_v11, 0.0  ;;  %v1950_v55 = vmul.f32 %v1816_v29, %v10131_v3 }
 0x501   :  { %v1820_v50 = vmul.f32 0.5, %v1819_v6  ;;  %v1715_v39 = vpop.xlane.xlu1 %1714  ;;  %v1631_v13 = vpop.xlane.xlu0 %1630  ;;  %1726 = vadd.xlane.f32.xlu2 %v1725_v15  ;;  %1729 = vadd.xlane.f32.xlu1 %v1728_v51 }
 0x502   :  { %v1750_v33 = vmul.f32 %v1715_v39, %v9225_v8  ;;  %v1654_v22 = vmul.f32 %v1631_v13, %v9225_v8  ;;  %v1970_v9 = vmul.f32 %v10152_v60, %v1950_v55  ;;  %v1972_v13 = vmul.f32 %v10152_v60, %v1952_v14 }
 0x503   :  { %v1821_v32 = vsub.f32 1.5, %v1820_v50  ;;  %v1637_v40 = vpop.xlane.xlu2 %1636 }
 0x504   :  { %v10269_v25 = vpop.eup %8625  ;;  %v10271_v3 = vadd.f32 1e-05, %v1750_v33  ;;  %v10274_v58 = vsub.f32 %v10189_v7, %v1654_v22  ;;  %v1656_v37 = vmul.f32 %v1637_v40, %v9225_v8  ;;  %v1990_v18 = vadd.f32 %v10161_v5, %v1970_v9 }
 0x505   :  { %v1822_v4 = vmul.f32 %v8624_v41, %v1821_v32  ;;  %v1838_v12 = vmul.f32 %v10269_v25, %v10253_v38  ;;  %v10301_v63 = vpop.eup %8627  ;;  %vm1844_vm14 = vweird.f32 %v10269_v25 }
 0x506   :  { %8629 = vrsqrt.f32 %v10271_v3  ;;  %v10291_v28 = vsub.f32 %v10196_v54, %v1656_v37  ;;  %v2007_v21 = vmax.f32 %v1990_v18, 0.0  ;;  %v1688_v48 = vmul.f32 %v10274_v58, %v10274_v58  ;;  %vm10333_vm4 = vmor %vm1843_vm15, %vm1844_vm14 }
 0x507   :  { %v1839_v59 = vmul.f32 %v10269_v25, %v1838_v12  ;;  %v1826_v56 = vsel %vm10285_vm12, %v8624_v41, %v1822_v4  ;;  %v7821_v41 = vld [vmem:[%s13883_s11 + $0xc] sm:$0x3]  ;;  %v1992_v18 = vadd.f32 %v10161_v5, %v1972_v13  ;;  %vm1853_vm6 = vweird.f32 %v10271_v3 }
 0x508   :  { %v2098_v43 = vpop.f32.mrf.mxu2  ;;  %7825 = vmatmul.msk.f32.gmra.mxu2 %vm13959_vm1, %v2007_v21  ;;  %v1731_v54 = vsel %vm13959_vm1, %v1688_v48, 0.0  ;;  %v1690_v49 = vmul.f32 %v10291_v28, %v10291_v28  ;;  %v1951_v42 = vmul.f32 %v1826_v56, %v10145_v20  ;;  %v1858_v20 = vmul.f32 %v10301_v63, %v10260_v26 }
 0x509   :  { %v1840_v19 = vmul.f32 0.5, %v1839_v59  ;;  %v1634_v53 = vpop.xlane.xlu1 %1633  ;;  %1732 = vadd.xlane.f32.xlu0 %v1731_v54  ;;  %v10331_v15 = vperm.slane %v7821_v41, 0  ;;  %v2009_v48 = vmax.f32 %v1992_v18, 0.0  ;;  %vm1864_vm8 = vweird.f32 %v10301_v63 }
 0x50a   :  { %v1655_v35 = vmul.f32 %v1634_v53, %v9225_v8  ;;  %v1737_v36 = vsel %vm13959_vm1, %v1690_v49, 0.0  ;;  %v1971_v47 = vmul.f32 %v10152_v60, %v1951_v42  ;;  %v1859_v33 = vmul.f32 %v10301_v63, %v1858_v20  ;;  %vm1865_vm2 = vmor %vm1863_vm9, %vm1864_vm8 }
 0x50b   :  { %v1841_v34 = vsub.f32 1.5, %v1840_v19  ;;  %1738 = vadd.xlane.f32.xlu1 %v1737_v36  ;;  %v10350_v37 = vadd.f32 %v2098_v43, %v10331_v15  ;;  %v10381_v36 = vld [vmem:[%s13875_s3] sm:$0xff] }
 0x50c   :  { %v8630_v44 = vpop.eup %8629  ;;  %v10317_v57 = vsub.f32 %v10205_v24, %v1655_v35  ;;  %v1991_v24 = vadd.f32 %v10161_v5, %v1971_v47  ;;  %v1860_v4 = vmul.f32 0.5, %v1859_v33  ;;  %v2775_v14 = vsel %vm13959_vm1, %v10381_v36, 0.0 }
 0x50d   :  { %v1842_v17 = vmul.f32 %v10269_v25, %v1841_v34  ;;  %v1848_v23 = vmul.f32 %v8630_v44, %v10271_v3  ;;  %v1721_v11 = vpop.xlane.xlu0 %1720  ;;  %vm1854_vm5 = vweird.f32 %v8630_v44  ;;  %v2153_v30 = vsel %vm13959_vm1, %v10350_v37, 0.0 }
 0x50e   :  { %v1752_v6 = vmul.f32 %v1721_v11, %v9225_v8  ;;  %v1689_v29 = vmul.f32 %v10317_v57, %v10317_v57  ;;  %v2008_v50 = vmax.f32 %v1991_v24, 0.0  ;;  %vm1855_vm7 = vmor %vm1853_vm6, %vm1854_vm5 }
 0x50f   :  { %v1849_v2 = vmul.f32 %v8630_v44, %v1848_v23  ;;  %v1846_v38 = vsel %vm10333_vm4, %v10269_v25, %v1842_v17 }
 0x510   :  { %v1769_v55 = vadd.f32 1e-05, %v1752_v6  ;;  %v2101_v61 = vpop.f32.mrf.mxu2  ;;  %v1734_v39 = vsel %vm13959_vm1, %v1689_v29, 0.0  ;;  %7826 = vmatmul.msk.f32.gmra.mxu2 %vm13959_vm1, %v2008_v50  ;;  %v1953_v16 = vmul.f32 %v1846_v38, %v10157_v45  ;;  %v1861_v45 = vsub.f32 1.5, %v1860_v4 }
 0x511   :  { %v1850_v22 = vmul.f32 0.5, %v1849_v2  ;;  %v10341_v9 = vadd.f32 %v2101_v61, %v10331_v15  ;;  %1735 = vadd.xlane.f32.xlu2 %v1734_v39 }
 0x512   :  { %8631 = vrsqrt.f32 %v1769_v55  ;;  %v1973_v43 = vmul.f32 %v10152_v60, %v1953_v16  ;;  %v1862_v35 = vmul.f32 %v10301_v63, %v1861_v45  ;;  %vm1873_vm11 = vweird.f32 %v1769_v55 }
 0x513   :  { %v1851_v32 = vsub.f32 1.5, %v1850_v22  ;;  %v2156_v40 = vsel %vm13959_vm1, %v10341_v9, 0.0 }
 0x514   :  { %2157 = vadd.xlane.f32.xlu1 %v2156_v40  ;;  %v1993_v49 = vadd.f32 %v10161_v5, %v1973_v43  ;;  %v1866_v47 = vsel %vm1865_vm2, %v10301_v63, %v1862_v35 }
 0x515   :  { %v1852_v12 = vmul.f32 %v8630_v44, %v1851_v32  ;;  %v1640_v7 = vpop.xlane.xlu0 %1639  ;;  %v1955_v17 = vmul.f32 %v1866_v47, %v10170_v10 }
 0x516   :  { %v1657_v25 = vmul.f32 %v1640_v7, %v9225_v8 }
 0x517   :  { %v1856_v19 = vsel %vm1855_vm7, %v8630_v44, %v1852_v12  ;;  %v2010_v44 = vmax.f32 %v1993_v49, 0.0  ;;  %v1975_v11 = vmul.f32 %v10152_v60, %v1955_v17 }
 0x518   :  { %v8632_v59 = vpop.eup %8631  ;;  %v10357_v21 = vsub.f32 %v10217_v62, %v1657_v25  ;;  %7827 = vmatmul.msk.f32.gmra.mxu2 %vm13959_vm1, %v2009_v48  ;;  %v10368_v62 = vld [vmem:[%s13875_s3 + $0x8] sm:$0xf]  ;;  %v1954_v1 = vmul.f32 %v1856_v19, %v10181_v46 }
 0x519   :  { %v1868_v56 = vmul.f32 %v8632_v59, %v1769_v55  ;;  %2154 = vadd.xlane.f32.xlu2 %v2153_v30  ;;  %v2778_v34 = vsel %vm13958_vm3, %v10368_v62, 0.0  ;;  %vm1874_vm10 = vweird.f32 %v8632_v59  ;;  %v1995_v63 = vadd.f32 %v10161_v5, %v1975_v11 }
 0x51a   :  { %v1691_v3 = vmul.f32 %v10357_v21, %v10357_v21  ;;  %v1974_v46 = vmul.f32 %v10152_v60, %v1954_v1  ;;  %vm1875_vm12 = vmor %vm1873_vm11, %vm1874_vm10 }
 0x51b   :  { %v1869_v53 = vmul.f32 %v8632_v59, %v1868_v56  ;;  %v2012_v29 = vmax.f32 %v1995_v63, 0.0 }
 0x51c   :  { %v1740_v54 = vsel %vm13958_vm3, %v1691_v3, 0.0  ;;  %v1994_v26 = vadd.f32 %v10161_v5, %v1974_v46 }
 0x51d   :  { %v1870_v42 = vmul.f32 0.5, %v1869_v53  ;;  %1741 = vadd.xlane.f32.xlu0 %v1740_v54 }
 0x51e   :  { %v2011_v23 = vmax.f32 %v1994_v26, 0.0 }
 0x51f   :  { %v1871_v41 = vsub.f32 1.5, %v1870_v42 }
 0x520   :  { %7828 = vmatmul.msk.f32.gmra.mxu2 %vm13959_vm1, %v2010_v44 }
 0x521   :  { %2779 = vadd.xlane.f32.xlu2 %v2778_v34  ;;  %v1872_v20 = vmul.f32 %v8632_v59, %v1871_v41 }
 0x523   :  { %v1876_v6 = vsel %vm1875_vm12, %v8632_v59, %v1872_v20 }
 0x524   :  { %v1956_v24 = vmul.f32 %v1876_v6, %v10209_v27 }
 0x525   :  { %2776 = vadd.xlane.f32.xlu0 %v2775_v14 }
 0x526   :  { %v1976_v2 = vmul.f32 %v10152_v60, %v1956_v24 }
 0x528   :  { %7829 = vmatmul.msk.f32.gmra.mxu2 %vm13959_vm1, %v2011_v23  ;;  %v1996_v10 = vadd.f32 %v10161_v5, %v1976_v2 }
 0x52a   :  { %v2013_v51 = vmax.f32 %v1996_v10, 0.0 }
 0x52c   :  { %v2104_v35 = vpop.f32.mrf.mxu2 }
 0x530   :  { %7830 = vmatmul.msk.f32.gmra.mxu2 %vm13959_vm1, %v2012_v29 }
 0x538   :  { %7831 = vmatmul.msk.f32.gmra.mxu2 %vm13959_vm1, %v2013_v51 }
 0x56c   :  { %v1724_v55 = vpop.xlane.xlu1 %1723 }
 0x56d   :  { %v1753_v61 = vmul.f32 %v1724_v55, %v9225_v8 }
 0x56f   :  { %v1770_v50 = vadd.f32 1e-05, %v1753_v61 }
 0x571   :  { %8633 = vrsqrt.f32 %v1770_v50  ;;  %vm1883_vm14 = vweird.f32 %v1770_v50 }
 0x574   :  { %v1730_v39 = vpop.xlane.xlu1 %1729  ;;  %v1727_v13 = vpop.xlane.xlu2 %1726 }
 0x575   :  { %v1755_v33 = vmul.f32 %v1730_v39, %v9225_v8  ;;  %v1754_v27 = vmul.f32 %v1727_v13, %v9225_v8 }
 0x577   :  { %v8634_v22 = vpop.eup %8633  ;;  %v1772_v38 = vadd.f32 1e-05, %v1755_v33  ;;  %v1771_v32 = vadd.f32 1e-05, %v1754_v27 }
 0x578   :  { %v1878_v40 = vmul.f32 %v8634_v22, %v1770_v50  ;;  %vm1884_vm13 = vweird.f32 %v8634_v22 }
 0x579   :  { %8635 = vrsqrt.f32 %v1772_v38  ;;  %vm1885_vm15 = vmor %vm1883_vm14, %vm1884_vm13  ;;  %vm1903_vm6 = vweird.f32 %v1772_v38  ;;  %vm1893_vm8 = vweird.f32 %v1771_v32 }
 0x57a   :  { %v1879_v18 = vmul.f32 %v8634_v22, %v1878_v40  ;;  %8637 = vrsqrt.f32 %v1771_v32 }
 0x57c   :  { %v1880_v16 = vmul.f32 0.5, %v1879_v18  ;;  %v1733_v4 = vpop.xlane.xlu0 %1732 }
 0x57d   :  { %v1756_v7 = vmul.f32 %v1733_v4, %v9225_v8 }
 0x57e   :  { %v1881_v12 = vsub.f32 1.5, %v1880_v16  ;;  %v1739_v59 = vpop.xlane.xlu1 %1738 }
 0x57f   :  { %v8636_v25 = vpop.eup %8635  ;;  %v10402_v45 = vadd.f32 1e-05, %v1756_v7  ;;  %v1758_v19 = vmul.f32 %v1739_v59, %v9225_v8 }
 0x580   :  { %v8638_v48 = vpop.eup %8637  ;;  %v1882_v30 = vmul.f32 %v8634_v22, %v1881_v12  ;;  %v1898_v43 = vmul.f32 %v8636_v25, %v1772_v38  ;;  %vm1904_vm4 = vweird.f32 %v8636_v25 }
 0x581   :  { %v1888_v56 = vmul.f32 %v8638_v48, %v1771_v32  ;;  %8639 = vrsqrt.f32 %v10402_v45  ;;  %v10406_v49 = vadd.f32 1e-05, %v1758_v19  ;;  %vm1894_vm5 = vweird.f32 %v8638_v48  ;;  %vm10416_vm7 = vmor %vm1903_vm6, %vm1904_vm4 }
 0x582   :  { %v1899_v3 = vmul.f32 %v8636_v25, %v1898_v43  ;;  %v1886_v53 = vsel %vm1885_vm15, %v8634_v22, %v1882_v30  ;;  %vm1895_vm9 = vmor %vm1893_vm8, %vm1894_vm5  ;;  %vm1913_vm10 = vweird.f32 %v10402_v45 }
 0x583   :  { %v1889_v54 = vmul.f32 %v8638_v48, %v1888_v56  ;;  %v1957_v1 = vmul.f32 %v1886_v53, %v10236_v0  ;;  %8641 = vrsqrt.f32 %v10406_v49  ;;  %vm1933_vm4 = vweird.f32 %v10406_v49 }
 0x584   :  { %v1900_v42 = vmul.f32 0.5, %v1899_v3  ;;  %v1736_v34 = vpop.xlane.xlu2 %1735 }
 0x585   :  { %v1890_v44 = vmul.f32 0.5, %v1889_v54  ;;  %v1757_v46 = vmul.f32 %v1736_v34, %v9225_v8  ;;  %v1977_v47 = vmul.f32 %v10152_v60, %v1957_v1 }
 0x586   :  { %v1901_v41 = vsub.f32 1.5, %v1900_v42 }
 0x587   :  { %v1891_v14 = vsub.f32 1.5, %v1890_v44  ;;  %v10412_v26 = vadd.f32 1e-05, %v1757_v46  ;;  %v2158_v17 = vpop.xlane.xlu1 %2157  ;;  %v8640_v20 = vpop.eup %8639  ;;  %v1997_v11 = vadd.f32 %v10161_v5, %v1977_v47 }
 0x588   :  { %v1902_v23 = vmul.f32 %v8636_v25, %v1901_v41  ;;  %v2205_v0 = vmul.f32 %v2158_v17, %v9225_v8  ;;  %v1908_v24 = vmul.f32 %v8640_v20, %v10402_v45  ;;  %vm1914_vm2 = vweird.f32 %v8640_v20 }
 0x589   :  { %v1892_v63 = vmul.f32 %v8638_v48, %v1891_v14  ;;  %8643 = vrsqrt.f32 %v10412_v26  ;;  %v2014_v2 = vmax.f32 %v1997_v11, 0.0  ;;  %v10427_v61 = vpop.eup %8641  ;;  %vm10453_vm11 = vmor %vm1913_vm10, %vm1914_vm2  ;;  %vm1923_vm13 = vweird.f32 %v10412_v26  ;;  %v2570_v11 = vld [vmem:[%s13878_s6 + $0x18] sm:$0xff] }
 0x58a   :  { %v10423_v29 = vsub.f32 %v10341_v9, %v2205_v0  ;;  %v1909_v10 = vmul.f32 %v8640_v20, %v1908_v24  ;;  %v1906_v55 = vsel %vm10416_vm7, %v8636_v25, %v1902_v23  ;;  %v1928_v16 = vmul.f32 %v10427_v61, %v10406_v49 }
 0x58b   :  { %v1896_v51 = vsel %vm1895_vm9, %v8638_v48, %v1892_v63  ;;  %v10429_v50 = vpop.f32.mrf.mxu2  ;;  %7832 = vmatmul.msk.f32.gmra.mxu2 %vm13959_vm1, %v2014_v2  ;;  %v1959_v32 = vmul.f32 %v1906_v55, %v10243_v52  ;;  %v10451_v48 = vadd.f32 %v2104_v35, %v10331_v15  ;;  %vm1934_vm15 = vweird.f32 %v10427_v61 }
 0x58c   :  { %v2155_v39 = vpop.xlane.xlu2 %2154  ;;  %v2239_v13 = vmul.f32 %v10423_v29, %v10423_v29  ;;  %v1958_v33 = vmul.f32 %v1896_v51, %v10251_v31  ;;  %v1910_v9 = vmul.f32 0.5, %v1909_v10  ;;  %v1929_v19 = vmul.f32 %v10427_v61, %v1928_v16  ;;  %vm1935_vm5 = vmor %vm1933_vm4, %vm1934_vm15 }
 0x58d   :  { %v2204_v27 = vmul.f32 %v2155_v39, %v9225_v8  ;;  %v1979_v56 = vmul.f32 %v10152_v60, %v1959_v32  ;;  %v2159_v44 = vsel %vm13959_vm1, %v10451_v48, 0.0 }
 0x58e   :  { %v2258_v22 = vsel %vm13959_vm1, %v2239_v13, 0.0  ;;  %v1978_v38 = vmul.f32 %v10152_v60, %v1958_v33  ;;  %v1911_v18 = vsub.f32 1.5, %v1910_v9  ;;  %v1930_v47 = vmul.f32 0.5, %v1929_v19 }
 0x58f   :  { %v8644_v40 = vpop.eup %8643  ;;  %v10442_v4 = vsub.f32 %v10350_v37, %v2204_v27  ;;  %2259 = vadd.xlane.f32.xlu0 %v2258_v22  ;;  %v1999_v46 = vadd.f32 %v10161_v5, %v1979_v56  ;;  %v10506_v22 = vadd.f32 %v10429_v50, %v10331_v15 }
 0x590   :  { %v1918_v31 = vmul.f32 %v8644_v40, %v10412_v26  ;;  %v1742_v12 = vpop.xlane.xlu0 %1741  ;;  %v1998_v7 = vadd.f32 %v10161_v5, %v1978_v38  ;;  %v1912_v25 = vmul.f32 %v8640_v20, %v1911_v18  ;;  %vm1924_vm12 = vweird.f32 %v8644_v40 }
 0x591   :  { %v1759_v52 = vmul.f32 %v1742_v12, %v9225_v8  ;;  %v2238_v59 = vmul.f32 %v10442_v4, %v10442_v4  ;;  %vm10478_vm14 = vmor %vm1923_vm13, %vm1924_vm12  ;;  %v2016_v6 = vmax.f32 %v1999_v46, 0.0  ;;  %v1931_v24 = vsub.f32 1.5, %v1930_v47  ;;  %v10552_v46 = vld [vmem:[%s13873_s1] sm:$0xff]  ;;  %v2574_v47 = vld [vmem:[%s13878_s6 + $0x38] sm:$0xff] }
 0x592   :  { %v1919_v30 = vmul.f32 %v8644_v40, %v1918_v31  ;;  %v2015_v43 = vmax.f32 %v1998_v7, 0.0  ;;  %v1916_v53 = vsel %vm10453_vm11, %v8640_v20, %v1912_v25  ;;  %v2162_v50 = vsel %vm13959_vm1, %v10506_v22, 0.0  ;;  %2713 = vmatpush.msrb.mxu0 %v2574_v47  ;;  %8374 = vmatpush.msrb.mxu1 %v2574_v47 }
 0x593   :  { %v10459_v3 = vadd.f32 1e-05, %v1759_v52  ;;  %v2255_v45 = vsel %vm13959_vm1, %v2238_v59, 0.0  ;;  %v2110_v35 = vpop.f32.mrf.mxu2  ;;  %v1960_v41 = vmul.f32 %v1916_v53, %v10274_v58  ;;  %v1932_v27 = vmul.f32 %v10427_v61, %v1931_v24 }
 0x594   :  { %v1920_v54 = vmul.f32 0.5, %v1919_v30  ;;  %7833 = vmatmul.msk.f32.gmra.mxu2 %vm13959_vm1, %v2015_v43  ;;  %2256 = vadd.xlane.f32.xlu1 %v2255_v45  ;;  %v2780_v1 = vpop.xlane.xlu2 %2779  ;;  %v10483_v58 = vadd.f32 %v2110_v35, %v10331_v15 }
 0x595   :  { %8645 = vrsqrt.f32 %v10459_v3  ;;  %v2782_v42 = vmul.f32 %v2780_v1, %v9225_v8  ;;  %v1936_v31 = vsel %vm1935_vm5, %v10427_v61, %v1932_v27  ;;  %vm1943_vm7 = vweird.f32 %v10459_v3 }
 0x596   :  { %v1921_v34 = vsub.f32 1.5, %v1920_v54  ;;  %v1962_v7 = vmul.f32 %v1936_v31, %v10291_v28 }
 0x597   :  { %v10472_v14 = vsub.f32 %v10368_v62, %v2782_v42  ;;  %2160 = vadd.xlane.f32.xlu0 %v2159_v44  ;;  %v1980_v62 = vmul.f32 %v10152_v60, %v1960_v41  ;;  %v2573_v41 = vld [vmem:[%s13878_s6 + $0x30] sm:$0xff] }
 0x598   :  { %v1922_v17 = vmul.f32 %v8644_v40, %v1921_v34  ;;  %v2777_v20 = vpop.xlane.xlu0 %2776  ;;  %v1982_v61 = vmul.f32 %v10152_v60, %v1962_v7  ;;  %2645 = vmatpush.msrb.mxu2 %v2573_v41  ;;  %8370 = vmatpush.msra.mxu3 %v2573_v41  ;;  %v2829_v7 = vld [vmem:[%s13877_s5] sm:$0xff] }
 0x599   :  { %v2781_v23 = vmul.f32 %v2777_v20, %v9225_v8  ;;  %v2786_v0 = vmul.f32 %v10472_v14, %v10472_v14  ;;  %v2000_v33 = vadd.f32 %v10161_v5, %v1980_v62  ;;  %v2572_v20 = vld [vmem:[%s13878_s6 + $0x28] sm:$0xff]  ;;  %v2567_v62 = vld [vmem:[%s13878_s6] sm:$0xff] }
 0x59a   :  { %v1926_v10 = vsel %vm10478_vm14, %v8644_v40, %v1922_v17  ;;  %v2002_v56 = vadd.f32 %v10161_v5, %v1982_v61  ;;  %v2571_v17 = vld [vmem:[%s13878_s6 + $0x20] sm:$0xff]  ;;  %2714 = vmatpush.msrb.mxu0 %v2572_v20  ;;  %8375 = vmatpush.msrb.mxu1 %v2572_v20 }
 0x59b   :  { %v8646_v63 = vpop.eup %8645  ;;  %v10487_v2 = vsub.f32 %v10381_v36, %v2781_v23  ;;  %v2790_v26 = vsel %vm13958_vm3, %v2786_v0, 0.0  ;;  %v10494_v55 = vpop.f32.mrf.mxu2  ;;  %v2165_v36 = vsel %vm13959_vm1, %v10483_v58, 0.0  ;;  %v1961_v9 = vmul.f32 %v1926_v10, %v10317_v57  ;;  %2646 = vmatpush.msrb.mxu2 %v2571_v17  ;;  %v2569_v0 = vld [vmem:[%s13878_s6 + $0x10] sm:$0xff]  ;;  %8371 = vmatpush.msra.mxu3 %v2571_v17 }
 0x59c   :  { %v1938_v51 = vmul.f32 %v8646_v63, %v10459_v3  ;;  %7834 = vmatmul.msk.f32.gmra.mxu2 %vm13959_vm1, %v2016_v6  ;;  %2791 = vadd.xlane.f32.xlu1 %v2790_v26  ;;  %v2017_v40 = vmax.f32 %v2000_v33, 0.0  ;;  %v13888_v57 = vmov 0   ;;  %vm1944_vm6 = vweird.f32 %v8646_v63 }
 0x59d   :  { %v2785_v39 = vmul.f32 %v10487_v2, %v10487_v2  ;;  %v1981_v18 = vmul.f32 %v10152_v60, %v1961_v9  ;;  %8405 = vset.pattern.permute.xlu1 %v13888_v57  ;;  %8406 = vset.pattern.permute.xlu0 %v13888_v57  ;;  %vm1945_vm8 = vmor %vm1943_vm7, %vm1944_vm6  ;;  %v2019_v45 = vmax.f32 %v2002_v56, 0.0 }
 0x59e   :  { %v1939_v13 = vmul.f32 %v8646_v63, %v1938_v51  ;;  %8408 = vset.pattern.permute.xlu2 %v13888_v57  ;;  %2647 = vmatpush.msrb.mxu2 %v2569_v0 }
 0x59f   :  { %2166 = vadd.xlane.f32.xlu0 %v2165_v36  ;;  %v2787_v38 = vsel %vm13959_vm1, %v2785_v39, 0.0  ;;  %v2001_v12 = vadd.f32 %v10161_v5, %v1981_v18  ;;  %2715 = vmatpush.msrb.mxu0 %v2570_v11  ;;  %v2835_v36 = vld [vmem:[%s13877_s5 + $0x30] sm:$0xff] }
 0x5a0   :  { %v1940_v32 = vmul.f32 0.5, %v1939_v13  ;;  %2788 = vadd.xlane.f32.xlu2 %v2787_v38  ;;  %8376 = vmatpush.msrb.mxu1 %v2570_v11 }
 0x5a1   :  { %v2018_v59 = vmax.f32 %v2001_v12, 0.0  ;;  %8372 = vmatpush.msra.mxu3 %v2569_v0  ;;  %2648 = vmatpush.msrb.mxu2 %v2567_v62 }
 0x5a2   :  { %v1941_v16 = vsub.f32 1.5, %v1940_v32  ;;  %v2833_v32 = vld [vmem:[%s13877_s5 + $0x20] sm:$0xff] }
 0x5a3   :  { %v2116_v49 = vpop.f32.mrf.mxu2  ;;  %8373 = vmatpush.msra.mxu3 %v2567_v62  ;;  %2862 = vmatpush.msra.mxu2 %v2835_v36 }
 0x5a4   :  { %7835 = vmatmul.msk.f32.gmra.mxu2 %vm13959_vm1, %v2017_v40  ;;  %2163 = vadd.xlane.f32.xlu1 %v2162_v50  ;;  %v1942_v25 = vmul.f32 %v8646_v63, %v1941_v16  ;;  %v10521_v52 = vadd.f32 %v2116_v49, %v10331_v15  ;;  %v2831_v40 = vld [vmem:[%s13877_s5 + $0x10] sm:$0xff] }
 0x5a5   :  { %2863 = vmatpush.msra.mxu2 %v2833_v32 }
 0x5a6   :  { %v2171_v37 = vsel %vm13959_vm1, %v10521_v52, 0.0  ;;  %v1946_v30 = vsel %vm1945_vm8, %v8646_v63, %v1942_v25  ;;  %v2568_v63 = vld [vmem:[%s13878_s6 + $0x8] sm:$0xff]  ;;  %vm13974_vm8 = vcmask 1043456  }
 0x5a7   :  { %v1963_v19 = vmul.f32 %v1946_v30, %v10357_v21  ;;  %2716 = vmatpush.msrb.mxu0 %v2568_v63  ;;  %8377 = vmatpush.msrb.mxu1 %v2568_v63 }
 0x5a8   :  { %2864 = vmatpush.msra.mxu2 %v2831_v40 }
 0x5a9   :  { %v1983_v53 = vmul.f32 %v10152_v60, %v1963_v19 }
 0x5aa   :  { %2865 = vmatpush.msra.mxu2 %v2829_v7 }
 0x5ab   :  { %v2119_v43 = vpop.f32.mrf.mxu2  ;;  %v2003_v35 = vadd.f32 %v10161_v5, %v1983_v53  ;;  %v10558_v5 = vld [vmem:[%s13873_s1 + $0x8] sm:$0xff] }
 0x5ac   :  { %7836 = vmatmul.msk.f32.gmra.mxu2 %vm13959_vm1, %v2018_v59  ;;  %2172 = vadd.xlane.f32.xlu1 %v2171_v37  ;;  %v10529_v28 = vadd.f32 %v2119_v43, %v10331_v15 }
 0x5ad   :  { %v2020_v21 = vmax.f32 %v2003_v35, 0.0  ;;  %v7839_v35 = vld [vmem:[%s13883_s11 + $0xe] sm:$0x3] }
 0x5ae   :  { %v2174_v3 = vsel %vm13959_vm1, %v10529_v28, 0.0  ;;  %v10619_v41 = vperm.slane %v7839_v35, 0 }
 0x5af   :  { %2175 = vadd.xlane.f32.xlu0 %v2174_v3 }
 0x5b3   :  { %v2122_v54 = vpop.f32.mrf.mxu2 }
 0x5b4   :  { %7837 = vmatmul.msk.f32.gmra.mxu2 %vm13959_vm1, %v2019_v45  ;;  %v10538_v1 = vadd.f32 %v2122_v54, %v10331_v15 }
 0x5b6   :  { %v2177_v42 = vsel %vm13959_vm1, %v10538_v1, 0.0 }
 0x5b7   :  { %2178 = vadd.xlane.f32.xlu0 %v2177_v42 }
 0x5bb   :  { %v2125_v34 = vpop.f32.mrf.mxu2 }
 0x5bc   :  { %7838 = vmatmul.msk.f32.gmra.mxu2 %vm13959_vm1, %v2020_v21  ;;  %v10545_v44 = vadd.f32 %v2125_v34, %v10331_v15  ;;  %v7840_v21 = vld [vmem:[%s13883_s11 + $0x10] sm:$0x3] }
 0x5be   :  { %v2180_v60 = vsel %vm13959_vm1, %v10545_v44, 0.0 }
 0x5bf   :  { %2181 = vadd.xlane.f32.xlu1 %v2180_v60 }
 0x5d8   :  { %67 = vperm.xlu1 %8405, %v10552_v46  }
 0x5e0   :  { %70 = vperm.xlu1 %8405, %v10558_v5  }
 0x602   :  { %v2260_v23 = vpop.xlane.xlu0 %2259 }
 0x603   :  { %v2307_v6 = vmul.f32 %v2260_v23, %v9225_v8 }
 0x605   :  { %v2324_v24 = vadd.f32 1e-05, %v2307_v6  ;;  %v10625_v6 = vperm.slane %v7840_v21, 0  ;;  %v13885_v21 = vmov 1  }
 0x606   :  { %8407 = vset.pattern.permute.xlu1 %v13885_v21 }
 0x607   :  { %8647 = vrsqrt.f32 %v2324_v24  ;;  %v2257_v26 = vpop.xlane.xlu1 %2256  ;;  %vm2356_vm12 = vweird.f32 %v2324_v24 }
 0x608   :  { %v2306_v10 = vmul.f32 %v2257_v26, %v9225_v8 }
 0x60a   :  { %v2323_v51 = vadd.f32 1e-05, %v2306_v10  ;;  %v2161_v35 = vpop.xlane.xlu0 %2160 }
 0x60c   :  { %8649 = vrsqrt.f32 %v2323_v51  ;;  %vm2346_vm2 = vweird.f32 %v2323_v51 }
 0x60d   :  { %v8648_v39 = vpop.eup %8647 }
 0x60e   :  { %v2351_v13 = vmul.f32 %v8648_v39, %v2324_v24  ;;  %v10590_v33 = vpop.f32.mrf.mxu2  ;;  %vm2357_vm10 = vweird.f32 %v8648_v39 }
 0x60f   :  { %v2792_v9 = vpop.xlane.xlu1 %2791  ;;  %vm2358_vm13 = vmor %vm2356_vm12, %vm2357_vm10 }
 0x610   :  { %v2352_v27 = vmul.f32 %v8648_v39, %v2351_v13  ;;  %v2794_v38 = vmul.f32 %v2792_v9, %v9225_v8 }
 0x612   :  { %v8650_v18 = vpop.eup %8649  ;;  %v10599_v16 = vadd.f32 1e-05, %v2794_v38  ;;  %v2353_v50 = vmul.f32 0.5, %v2352_v27 }
 0x613   :  { %v2341_v31 = vmul.f32 %v8650_v18, %v2323_v51  ;;  %v2789_v49 = vpop.xlane.xlu2 %2788  ;;  %vm2347_vm9 = vweird.f32 %v8650_v18 }
 0x614   :  { %8651 = vrsqrt.f32 %v10599_v16  ;;  %v2793_v12 = vmul.f32 %v2789_v49, %v9225_v8  ;;  %v2354_v61 = vsub.f32 1.5, %v2353_v50  ;;  %vm2348_vm11 = vmor %vm2346_vm2, %vm2347_vm9  ;;  %vm2813_vm5 = vweird.f32 %v10599_v16 }
 0x615   :  { %v2342_v25 = vmul.f32 %v8650_v18, %v2341_v31 }
 0x616   :  { %v2795_v59 = vadd.f32 1e-05, %v2793_v12  ;;  %v2355_v45 = vmul.f32 %v8648_v39, %v2354_v61  ;;  %v44_v61 = vld [vmem:[%s13873_s1 + $0x10] sm:$0xff] }
 0x617   :  { %v2343_v37 = vmul.f32 0.5, %v2342_v25  ;;  %v2131_v30 = vpop.f32.mrf.mxu2 }
 0x618   :  { %8653 = vrsqrt.f32 %v2795_v59  ;;  %v10607_v43 = vadd.f32 %v2131_v30, %v10331_v15  ;;  %v2359_v23 = vsel %vm2358_vm13, %v8648_v39, %v2355_v45  ;;  %vm2803_vm14 = vweird.f32 %v2795_v59 }
 0x619   :  { %v2344_v56 = vsub.f32 1.5, %v2343_v37  ;;  %v10669_v45 = vadd.f32 %v10494_v55, %v10331_v15 }
 0x61a   :  { %v8652_v19 = vpop.eup %8651  ;;  %v2186_v3 = vsel %vm13959_vm1, %v10607_v43, 0.0 }
 0x61b   :  { %v2345_v53 = vmul.f32 %v8650_v18, %v2344_v56  ;;  %v2808_v54 = vmul.f32 %v8652_v19, %v10599_v16  ;;  %2187 = vadd.xlane.f32.xlu0 %v2186_v3  ;;  %vm2814_vm6 = vweird.f32 %v8652_v19  ;;  %v7877_v16 = vld [vmem:[%s13883_s11 + $0x26] sm:$0x3] }
 0x61c   :  { %vm2815_vm7 = vmor %vm2813_vm5, %vm2814_vm6 }
 0x61d   :  { %v2349_v42 = vsel %vm2348_vm11, %v8650_v18, %v2345_v53  ;;  %v2809_v47 = vmul.f32 %v8652_v19, %v2808_v54  ;;  %v2168_v53 = vsel %vm13959_vm1, %v10669_v45, 0.0  ;;  %v10675_v54 = vadd.f32 %v10590_v33, %v10331_v15 }
 0x61e   :  { %v8654_v34 = vpop.eup %8653  ;;  %v2510_v60 = vmul.f32 %v2349_v42, %v10442_v4  ;;  %v2511_v4 = vmul.f32 %v2359_v23, %v10423_v29  ;;  %v7876_v29 = vld [vmem:[%s13883_s11 + $0x24] sm:$0x3] }
 0x61f   :  { %v2798_v17 = vmul.f32 %v8654_v34, %v2795_v59  ;;  %v2134_v20 = vpop.f32.mrf.mxu2  ;;  %v2810_v26 = vmul.f32 0.5, %v2809_v47  ;;  %vm2804_vm15 = vweird.f32 %v8654_v34  ;;  %v2820_v18 = vperm.slane %v7876_v29, 0 }
 0x620   :  { %v10622_v0 = vadd.f32 %v2134_v20, %v10331_v15  ;;  %v2530_v11 = vmul.f32 %v10619_v41, %v2510_v60  ;;  %vm2805_vm4 = vmor %vm2803_vm14, %vm2804_vm15  ;;  %v2531_v39 = vmul.f32 %v10619_v41, %v2511_v4  ;;  %v2183_v42 = vsel %vm13959_vm1, %v10675_v54, 0.0  ;;  %v2164_v4 = vpop.xlane.xlu1 %2163 }
 0x621   :  { %v2799_v62 = vmul.f32 %v8654_v34, %v2798_v17  ;;  %v2811_v13 = vsub.f32 1.5, %v2810_v26 }
 0x622   :  { %v2189_v63 = vsel %vm13959_vm1, %v10622_v0, 0.0  ;;  %v2550_v24 = vadd.f32 %v10625_v6, %v2530_v11  ;;  %v2551_v32 = vadd.f32 %v10625_v6, %v2531_v39  ;;  %v46_v11 = vld [vmem:[%s13873_s1 + $0x20] sm:$0xff] }
 0x623   :  { %v2800_v10 = vmul.f32 0.5, %v2799_v62  ;;  %2190 = vadd.xlane.f32.xlu0 %v2189_v63  ;;  %v2812_v40 = vmul.f32 %v8652_v19, %v2811_v13 }
 0x624   :  { %7842 = vmatmul.msk.f32.vlgmr.msrb.gmra.mxu2 %vm13959_vm1, %v2550_v24  ;;  %7859 = vmatmul.msk.f32.vlgmr.msrb.gmra.mxu0 %vm13959_vm1, %v2550_v24  ;;  %v2206_v24 = vmul.f32 %v2161_v35, %v9225_v8 }
 0x625   :  { %v2801_v51 = vsub.f32 1.5, %v2800_v10  ;;  %v2816_v49 = vsel %vm2815_vm7, %v8652_v19, %v2812_v40 }
 0x626   :  { %v2818_v59 = vmul.f32 %v2816_v49, %v10472_v14  ;;  %v10714_v26 = vsub.f32 %v10451_v48, %v2206_v24 }
 0x627   :  { %v2802_v36 = vmul.f32 %v8654_v34, %v2801_v51  ;;  %v2137_v9 = vpop.f32.mrf.mxu2  ;;  %v2207_v51 = vmul.f32 %v2164_v4, %v9225_v8  ;;  %v10793_v4 = vld [vmem:[%s13873_s1 + $0x40] sm:$0xff] }
 0x628   :  { %v2823_v37 = vmul.f32 %v2820_v18, %v2818_v59  ;;  %v10683_v55 = vadd.f32 %v2137_v9, %v10331_v15  ;;  %v2240_v13 = vmul.f32 %v10714_v26, %v10714_v26  ;;  %v7878_v59 = vld [vmem:[%s13883_s11 + $0x1a] sm:$0x3] }
 0x629   :  { %v2806_v27 = vsel %vm2805_vm4, %v8654_v34, %v2802_v36  ;;  %v2167_v34 = vpop.xlane.xlu0 %2166  ;;  %v10724_v9 = vsub.f32 %v10506_v22, %v2207_v51 }
 0x62a   :  { %v2817_v38 = vmul.f32 %v2806_v27, %v10487_v2  ;;  %v2825_v2 = vperm.slane %v7877_v16, 0  ;;  %v2192_v33 = vsel %vm13959_vm1, %v10683_v55, 0.0  ;;  %v2208_v60 = vmul.f32 %v2167_v34, %v9225_v8  ;;  %v2173_v27 = vpop.xlane.xlu1 %2172 }
 0x62b   :  { %v2261_v29 = vsel %vm13959_vm1, %v2240_v13, 0.0  ;;  %v2241_v40 = vmul.f32 %v10724_v9, %v10724_v9 }
 0x62c   :  { %7843 = vmatmul.msk.f32.gmra.mxu2 %vm13959_vm1, %v2551_v32  ;;  %7860 = vmatmul.msk.f32.gmra.mxu0 %vm13959_vm1, %v2551_v32  ;;  %v2822_v50 = vmul.f32 %v2820_v18, %v2817_v38  ;;  %v10658_v56 = vadd.f32 %v2825_v2, %v2823_v37  ;;  %v10692_v17 = vsub.f32 %v10483_v58, %v2208_v60  ;;  %v2840_v37 = vperm.slane %v7878_v59, 0 }
 0x62d   :  { %v2210_v32 = vmul.f32 %v2173_v27, %v9225_v8  ;;  %v2264_v22 = vsel %vm13959_vm1, %v2241_v40, 0.0 }
 0x62e   :  { %v10650_v25 = vadd.f32 %v2825_v2, %v2822_v50  ;;  %v2242_v20 = vmul.f32 %v10692_v17, %v10692_v17 }
 0x62f   :  { %v2140_v31 = vpop.f32.mrf.mxu2 }
 0x630   :  { %v10646_v12 = vadd.f32 %v2140_v31, %v10331_v15  ;;  %v2267_v23 = vsel %vm13959_vm1, %v2242_v20, 0.0 }
 0x631   :  { %v2176_v58 = vpop.xlane.xlu0 %2175 }
 0x632   :  { %v2195_v7 = vsel %vm13959_vm1, %v10646_v12, 0.0  ;;  %v2182_v18 = vpop.xlane.xlu1 %2181 }
 0x633   :  { %2196 = vadd.xlane.f32.xlu1 %v2195_v7  ;;  %v2213_v16 = vmul.f32 %v2182_v18, %v9225_v8 }
 0x634   :  { %7879 = vmatmul.msk.f32.vlgmr.msra.gmra.mxu2 %vm13959_vm1, %v10650_v25 }
 0x635   :  { %v10743_v49 = vsub.f32 %v10545_v44, %v2213_v16 }
 0x637   :  { %v2143_v30 = vpop.f32.mrf.mxu2  ;;  %73 = vperm.xlu0 %8406, %v44_v61  }
 0x638   :  { %v10689_v47 = vadd.f32 %v2143_v30, %v10331_v15 }
 0x639   :  { %v2179_v62 = vpop.xlane.xlu0 %2178 }
 0x63c   :  { %7880 = vmatmul.msk.f32.gmra.mxu2 %vm13959_vm1, %v10658_v56 }
 0x63f   :  { %v2146_v19 = vpop.f32.mrf.mxu2  ;;  %8412 = vset.pattern.permute.xlu0 %v13885_v21 }
 0x640   :  { %v10663_v3 = vadd.f32 %v2146_v19, %v10331_v15  ;;  %v10703_v15 = vld [vmem:[%s13873_s1 + $0x18] sm:$0xff] }
 0x642   :  { %v2201_v14 = vsel %vm13958_vm3, %v10663_v3, 0.0 }
 0x643   :  { %2202 = vadd.xlane.f32.xlu2 %v2201_v14 }
 0x64b   :  { %2169 = vadd.xlane.f32.xlu2 %v2168_v53 }
 0x64c   :  { %169 = vperm.xlu1 %8407, %v10552_v46   ;;  %v2198_v46 = vsel %vm13959_vm1, %v10689_v47, 0.0 }
 0x653   :  { %2184 = vadd.xlane.f32.xlu2 %v2183_v42  ;;  %v47_v42 = vld [vmem:[%s13873_s1 + $0x28] sm:$0xff] }
 0x654   :  { %175 = vperm.xlu1 %8407, %v44_v61  }
 0x65b   :  { %2193 = vadd.xlane.f32.xlu2 %v2192_v33  ;;  %v2211_v33 = vmul.f32 %v2176_v58, %v9225_v8  ;;  %v2212_v58 = vmul.f32 %v2179_v62, %v9225_v8 }
 0x65c   :  { %8409 = vset.pattern.permute.xlu1 %v13888_v57 }
 0x65d   :  { %79 = vperm.xlu1 %8409, %v46_v11   ;;  %v10774_v20 = vsub.f32 %v10529_v28, %v2211_v33  ;;  %v10787_v24 = vsub.f32 %v10538_v1, %v2212_v58 }
 0x65f   :  { %v2246_v62 = vmul.f32 %v10787_v24, %v10787_v24 }
 0x661   :  { %2199 = vadd.xlane.f32.xlu0 %v2198_v46  ;;  %v2279_v51 = vsel %vm13959_vm1, %v2246_v62, 0.0 }
 0x665   :  { %8410 = vset.pattern.permute.xlu1 %v13885_v21 }
 0x669   :  { %2268 = vadd.xlane.f32.xlu0 %v2267_v23 }
 0x673   :  { %76 = vperm.xlu2 %8408, %v10703_v15  }
 0x68e   :  { %v10710_v63 = vpop.xlane.xlu0 %2187 }
 0x696   :  { %v2191_v10 = vpop.xlane.xlu0 %2190 }
 0x697   :  { %v2216_v39 = vmul.f32 %v2191_v10, %v9225_v8 }
 0x699   :  { %v10721_v36 = vsub.f32 %v10622_v0, %v2216_v39  ;;  %v10734_v0 = vsub.f32 %v10521_v52, %v2210_v32  ;;  %v2247_v52 = vmul.f32 %v10743_v49, %v10743_v49 }
 0x69b   :  { %v2250_v48 = vmul.f32 %v10721_v36, %v10721_v36  ;;  %v2244_v31 = vmul.f32 %v10734_v0, %v10734_v0  ;;  %v2282_v61 = vsel %vm13959_vm1, %v2247_v52, 0.0 }
 0x69c   :  { %2262 = vadd.xlane.f32.xlu2 %v2261_v29 }
 0x69d   :  { %v2291_v38 = vsel %vm13959_vm1, %v2250_v48, 0.0  ;;  %v2273_v2 = vsel %vm13959_vm1, %v2244_v31, 0.0  ;;  %v2215_v48 = vmul.f32 %v10710_v63, %v9225_v8  ;;  %v10827_v31 = vpop.permute.xlu1 %67 }
 0x69e   :  { %2292 = vadd.xlane.f32.xlu0 %v2291_v38 }
 0x69f   :  { %v10813_v27 = vsub.f32 %v10607_v43, %v2215_v48 }
 0x6a1   :  { %v2249_v32 = vmul.f32 %v10813_v27, %v10813_v27 }
 0x6a4   :  { %2265 = vadd.xlane.f32.xlu2 %v2264_v22  ;;  %v2288_v22 = vsel %vm13959_vm1, %v2249_v32, 0.0 }
 0x6a5   :  { %v10832_v59 = vpop.permute.xlu1 %70 }
 0x6a7   :  { %v10738_v50 = vpop.f32.mrf.mxu2 }
 0x6a9   :  { %v10808_v29 = vpop.permute.xlu0 %73 }
 0x6ac   :  { %2274 = vadd.xlane.f32.xlu2 %v2273_v2 }
 0x6af   :  { %v10746_v7 = vpop.f32.mrf.mxu2 }
 0x6b2   :  { %181 = vperm.xlu0 %8412, %v46_v11   ;;  %v2245_v11 = vmul.f32 %v10774_v20, %v10774_v20 }
 0x6b4   :  { %2283 = vadd.xlane.f32.xlu2 %v2282_v61  ;;  %v2276_v28 = vsel %vm13959_vm1, %v2245_v11, 0.0 }
 0x6b6   :  { %v2203_v30 = vpop.xlane.xlu2 %2202 }
 0x6b7   :  { %v2867_v44 = vpop.f32.mrf.mxu2  ;;  %v2220_v10 = vmul.f32 %v2203_v30, %v9225_v8 }
 0x6b8   :  { %v10754_v19 = vadd.f32 %v2867_v44, %v2840_v37 }
 0x6b9   :  { %v10801_v1 = vsub.f32 %v10663_v3, %v2220_v10 }
 0x6ba   :  { %14155 = vst [vmem:[#allocation6_spill] sm:$0xff] %v10754_v19  ;;  %3021 = vrot.lane.b32.xlu0 %v10754_v19, %s8979_s23 }
 0x6bb   :  { %v2254_v39 = vmul.f32 %v10801_v1, %v10801_v1 }
 0x6bd   :  { %v2303_v13 = vsel %vm13958_vm3, %v2254_v39, 0.0 }
 0x6be   :  { %v2170_v14 = vpop.xlane.xlu2 %2169 }
 0x6bf   :  { %v2209_v53 = vmul.f32 %v2170_v14, %v9225_v8  ;;  %v2870_v35 = vpop.f32.mrf.mxu2  ;;  %v10842_v14 = vpop.xlane.xlu1 %2196 }
 0x6c0   :  { %v10762_v34 = vadd.f32 %v2870_v35, %v2840_v37 }
 0x6c1   :  { %v10766_v60 = vsub.f32 %v10669_v45, %v2209_v53  ;;  %v10780_v45 = vld [vmem:[%s13873_s1 + $0x38] sm:$0xff] }
 0x6c2   :  { %14156 = vst [vmem:[#allocation7_spill] sm:$0xff] %v10762_v34  ;;  %7883 = vmatpush.msk.msra.mxu1 %vm13974_vm8, %v10762_v34  ;;  %184 = vperm.xlu0 %8412, %v47_v42  }
 0x6c3   :  { %v2243_v46 = vmul.f32 %v10766_v60, %v10766_v60 }
 0x6c4   :  { %2967 = vmatpush.msra.mxu1 %v10754_v19 }
 0x6c5   :  { %v2270_v23 = vsel %vm13959_vm1, %v2243_v46, 0.0 }
 0x6c6   :  { %2271 = vadd.xlane.f32.xlu1 %v2270_v23  ;;  %v2185_v18 = vpop.xlane.xlu2 %2184  ;;  %v10851_v23 = vld [vmem:[%s13873_s1 + $0x30] sm:$0xff] }
 0x6c7   :  { %v2214_v44 = vmul.f32 %v2185_v18, %v9225_v8 }
 0x6ca   :  { %190 = vperm.xlu0 %8412, %v10780_v45  }
 0x6cc   :  { %82 = vperm.xlu2 %8408, %v47_v42  }
 0x6ce   :  { %2277 = vadd.xlane.f32.xlu1 %v2276_v28  ;;  %v2194_v16 = vpop.xlane.xlu2 %2193 }
 0x6cf   :  { %v2217_v28 = vmul.f32 %v2194_v16, %v9225_v8 }
 0x6d2   :  { %193 = vperm.xlu0 %8412, %v10793_v4  }
 0x6d4   :  { %8411 = vset.pattern.permute.xlu2 %v13885_v21  ;;  %v2200_v3 = vpop.xlane.xlu0 %2199 }
 0x6d5   :  { %v2219_v38 = vmul.f32 %v2200_v3, %v9225_v8 }
 0x6d6   :  { %2280 = vadd.xlane.f32.xlu1 %v2279_v51  ;;  %v10829_v2 = vpop.permute.xlu2 %76  ;;  %v10858_v51 = vpop.permute.xlu1 %169 }
 0x6d7   :  { %v10819_v40 = vsub.f32 %v10689_v47, %v2219_v38 }
 0x6d9   :  { %v2253_v63 = vmul.f32 %v10819_v40, %v10819_v40 }
 0x6da   :  { %8418 = vset.pattern.permute.xlu0 %v13888_v57 }
 0x6db   :  { %v2300_v43 = vsel %vm13959_vm1, %v2253_v63, 0.0 }
 0x6dc   :  { %v2269_v47 = vpop.xlane.xlu0 %2268 }
 0x6dd   :  { %v2310_v52 = vmul.f32 %v2269_v47, %v9225_v8 }
 0x6de   :  { %2304 = vadd.xlane.f32.xlu1 %v2303_v13  ;;  %v10861_v13 = vsub.f32 %v10683_v55, %v2217_v28 }
 0x6e0   :  { %v2251_v63 = vmul.f32 %v10861_v13, %v10861_v13 }
 0x6f5   :  { %2289 = vadd.xlane.f32.xlu2 %v2288_v22 }
 0x6f7   :  { %178 = vperm.xlu1 %8410, %v10703_v15   ;;  %v10835_v15 = vadd.f32 1e-05, %v2310_v52 }
 0x6f9   :  { %8655 = vrsqrt.f32 %v10835_v15  ;;  %vm2386_vm15 = vweird.f32 %v10835_v15 }
 0x6fc   :  { %2301 = vadd.xlane.f32.xlu0 %v2300_v43 }
 0x6ff   :  { %8413 = vset.pattern.permute.xlu1 %v13888_v57  ;;  %v8656_v35 = vpop.eup %8655 }
 0x700   :  { %v2381_v58 = vmul.f32 %v8656_v35, %v10835_v15  ;;  %vm2387_vm12 = vweird.f32 %v8656_v35 }
 0x701   :  { %vm2388_vm4 = vmor %vm2386_vm15, %vm2387_vm12 }
 0x702   :  { %v2382_v62 = vmul.f32 %v8656_v35, %v2381_v58 }
 0x704   :  { %v2383_v32 = vmul.f32 0.5, %v2382_v62 }
 0x706   :  { %v2384_v47 = vsub.f32 1.5, %v2383_v32 }
 0x708   :  { %v2385_v58 = vmul.f32 %v8656_v35, %v2384_v47 }
 0x70a   :  { %v2389_v28 = vsel %vm2388_vm4, %v8656_v35, %v2385_v58 }
 0x70d   :  { %172 = vperm.xlu2 %8411, %v10558_v5   ;;  %v10845_v5 = vsub.f32 %v10675_v54, %v2214_v44 }
 0x70f   :  { %v2263_v61 = vpop.xlane.xlu2 %2262  ;;  %v2248_v10 = vmul.f32 %v10845_v5, %v10845_v5 }
 0x710   :  { %v2308_v37 = vmul.f32 %v2263_v61, %v9225_v8  ;;  %v2294_v61 = vsel %vm13959_vm1, %v2251_v63, 0.0  ;;  %v2218_v63 = vmul.f32 %v10842_v14, %v9225_v8 }
 0x711   :  { %v2285_v48 = vsel %vm13959_vm1, %v2248_v10, 0.0 }
 0x712   :  { %v2325_v30 = vadd.f32 1e-05, %v2308_v37 }
 0x714   :  { %8657 = vrsqrt.f32 %v2325_v30  ;;  %vm2366_vm2 = vweird.f32 %v2325_v30 }
 0x715   :  { %3023 = vrot.lane.b32.xlu2 %v10762_v34, %s8979_s23 }
 0x717   :  { %v2266_v53 = vpop.xlane.xlu2 %2265 }
 0x718   :  { %v2309_v42 = vmul.f32 %v2266_v53, %v9225_v8 }
 0x71a   :  { %v8658_v33 = vpop.eup %8657  ;;  %v2326_v46 = vadd.f32 1e-05, %v2309_v42 }
 0x71b   :  { %v2361_v11 = vmul.f32 %v8658_v33, %v2325_v30  ;;  %vm2367_vm9 = vweird.f32 %v8658_v33  ;;  %v10871_v30 = vpop.permute.xlu1 %175 }
 0x71c   :  { %8659 = vrsqrt.f32 %v2326_v46  ;;  %vm2368_vm10 = vmor %vm2366_vm2, %vm2367_vm9  ;;  %vm2376_vm13 = vweird.f32 %v2326_v46 }
 0x71d   :  { %v2362_v54 = vmul.f32 %v8658_v33, %v2361_v11  ;;  %187 = vperm.xlu2 %8411, %v10851_v23  }
 0x71f   :  { %v2363_v39 = vmul.f32 0.5, %v2362_v54  ;;  %v2275_v53 = vpop.xlane.xlu2 %2274 }
 0x721   :  { %v2364_v3 = vsub.f32 1.5, %v2363_v39  ;;  %2286 = vadd.xlane.f32.xlu1 %v2285_v48  ;;  %v2514_v39 = vmul.f32 %v2389_v28, %v10692_v17 }
 0x722   :  { %v8660_v38 = vpop.eup %8659 }
 0x723   :  { %v2365_v22 = vmul.f32 %v8658_v33, %v2364_v3  ;;  %v2371_v18 = vmul.f32 %v8660_v38, %v2326_v46  ;;  %vm2377_vm11 = vweird.f32 %v8660_v38  ;;  %v10880_v62 = vpop.permute.xlu1 %79  ;;  %v2534_v15 = vmul.f32 %v10619_v41, %v2514_v39  ;;  %v51_v39 = vld [vmem:[%s13873_s1 + $0x48] sm:$0xff] }
 0x724   :  { %vm2378_vm14 = vmor %vm2376_vm13, %vm2377_vm11 }
 0x725   :  { %v2372_v43 = vmul.f32 %v8660_v38, %v2371_v18  ;;  %8414 = vset.pattern.permute.xlu2 %v13888_v57  ;;  %v2369_v16 = vsel %vm2368_vm10, %v8658_v33, %v2365_v22  ;;  %v2554_v35 = vadd.f32 %v10625_v6, %v2534_v15 }
 0x726   :  { %91 = vperm.xlu2 %8414, %v10793_v4   ;;  %v2512_v55 = vmul.f32 %v2369_v16, %v10714_v26  ;;  %v2312_v26 = vmul.f32 %v2275_v53, %v9225_v8 }
 0x727   :  { %v2373_v52 = vmul.f32 0.5, %v2372_v43  ;;  %v2284_v22 = vpop.xlane.xlu2 %2283 }
 0x728   :  { %v2532_v37 = vmul.f32 %v10619_v41, %v2512_v55  ;;  %v2329_v10 = vadd.f32 1e-05, %v2312_v26  ;;  %v2315_v55 = vmul.f32 %v2284_v22, %v9225_v8 }
 0x729   :  { %v2374_v44 = vsub.f32 1.5, %v2373_v52  ;;  %2295 = vadd.xlane.f32.xlu1 %v2294_v61 }
 0x72a   :  { %v2552_v42 = vadd.f32 %v10625_v6, %v2532_v37  ;;  %8661 = vrsqrt.f32 %v2329_v10  ;;  %v10897_v37 = vsub.f32 %v10646_v12, %v2218_v63  ;;  %v10899_v53 = vadd.f32 1e-05, %v2315_v55 }
 0x72b   :  { %v2375_v33 = vmul.f32 %v8660_v38, %v2374_v44  ;;  %vm2406_vm2 = vweird.f32 %v2329_v10 }
 0x72c   :  { %7844 = vmatmul.msk.f32.vlgmr.msra.gmra.mxu3 %vm13959_vm1, %v2552_v42  ;;  %7861 = vmatmul.msk.f32.gmra.mxu0 %vm13959_vm1, %v2552_v42 }
 0x72d   :  { %v2379_v4 = vsel %vm2378_vm14, %v8660_v38, %v2375_v33 }
 0x72e   :  { %v2513_v11 = vmul.f32 %v2379_v4, %v10724_v9 }
 0x730   :  { %v2533_v54 = vmul.f32 %v10619_v41, %v2513_v11  ;;  %v8662_v3 = vpop.eup %8661 }
 0x731   :  { %v2401_v32 = vmul.f32 %v8662_v3, %v2329_v10  ;;  %vm2407_vm6 = vweird.f32 %v8662_v3 }
 0x732   :  { %v2553_v46 = vadd.f32 %v10625_v6, %v2533_v54  ;;  %vm2408_vm10 = vmor %vm2406_vm2, %vm2407_vm6  ;;  %vm2436_vm2 = vweird.f32 %v10899_v53 }
 0x733   :  { %v2402_v17 = vmul.f32 %v8662_v3, %v2401_v32 }
 0x734   :  { %7845 = vmatmul.msk.f32.gmra.mxu3 %vm13959_vm1, %v2553_v46  ;;  %7862 = vmatmul.msk.f32.gmra.mxu0 %vm13959_vm1, %v2553_v46 }
 0x735   :  { %v2403_v52 = vmul.f32 0.5, %v2402_v17 }
 0x737   :  { %v2404_v42 = vsub.f32 1.5, %v2403_v52 }
 0x739   :  { %v2272_v48 = vpop.xlane.xlu1 %2271  ;;  %v2405_v11 = vmul.f32 %v8662_v3, %v2404_v42 }
 0x73a   :  { %v2311_v9 = vmul.f32 %v2272_v48, %v9225_v8 }
 0x73c   :  { %v2328_v38 = vadd.f32 1e-05, %v2311_v9  ;;  %7846 = vmatmul.msk.f32.gmra.mxu3 %vm13959_vm1, %v2554_v35  ;;  %7863 = vmatmul.msk.f32.gmra.mxu0 %vm13959_vm1, %v2554_v35 }
 0x73e   :  { %8663 = vrsqrt.f32 %v2328_v38  ;;  %vm2396_vm7 = vweird.f32 %v2328_v38 }
 0x741   :  { %v2278_v18 = vpop.xlane.xlu1 %2277 }
 0x742   :  { %v2313_v43 = vmul.f32 %v2278_v18, %v9225_v8  ;;  %85 = vperm.xlu1 %8413, %v10851_v23   ;;  %v2252_v23 = vmul.f32 %v10897_v37, %v10897_v37 }
 0x744   :  { %v8664_v16 = vpop.eup %8663  ;;  %v2330_v47 = vadd.f32 1e-05, %v2313_v43  ;;  %v2297_v46 = vsel %vm13959_vm1, %v2252_v23, 0.0 }
 0x745   :  { %v2391_v61 = vmul.f32 %v8664_v16, %v2328_v38  ;;  %vm2397_vm5 = vweird.f32 %v8664_v16  ;;  %v2409_v38 = vsel %vm2408_vm10, %v8662_v3, %v2405_v11 }
 0x746   :  { %8665 = vrsqrt.f32 %v2330_v47  ;;  %vm2398_vm9 = vmor %vm2396_vm7, %vm2397_vm5  ;;  %vm2416_vm12 = vweird.f32 %v2330_v47 }
 0x747   :  { %v2392_v44 = vmul.f32 %v8664_v16, %v2391_v61  ;;  %8667 = vrsqrt.f32 %v10899_v53 }
 0x749   :  { %v2393_v58 = vmul.f32 0.5, %v2392_v44  ;;  %v2281_v14 = vpop.xlane.xlu1 %2280 }
 0x74a   :  { %v2314_v33 = vmul.f32 %v2281_v14, %v9225_v8  ;;  %88 = vperm.xlu1 %8413, %v10780_v45  }
 0x74b   :  { %v2394_v26 = vsub.f32 1.5, %v2393_v58  ;;  %v10928_v58 = vld [vmem:[%s13873_s1 + $0x68] sm:$0xff] }
 0x74c   :  { %v8666_v4 = vpop.eup %8665  ;;  %v2331_v12 = vadd.f32 1e-05, %v2314_v33  ;;  %106 = vperm.xlu0 %8418, %v10928_v58  }
 0x74d   :  { %v2395_v28 = vmul.f32 %v8664_v16, %v2394_v26  ;;  %v2411_v54 = vmul.f32 %v8666_v4, %v2330_v47  ;;  %v10912_v32 = vpop.eup %8667  ;;  %vm2417_vm11 = vweird.f32 %v8666_v4 }
 0x74e   :  { %8669 = vrsqrt.f32 %v2331_v12  ;;  %vm2418_vm13 = vmor %vm2416_vm12, %vm2417_vm11  ;;  %vm2426_vm15 = vweird.f32 %v2331_v12  ;;  %vm2437_vm6 = vweird.f32 %v10912_v32  ;;  %vm13962_vm12 = vcmask 97280  }
 0x74f   :  { %v2412_v45 = vmul.f32 %v8666_v4, %v2411_v54  ;;  %2298 = vadd.xlane.f32.xlu2 %v2297_v46  ;;  %v2399_v15 = vsel %vm2398_vm9, %v8664_v16, %v2395_v28  ;;  %v2516_v16 = vmul.f32 %v2409_v38, %v10734_v0  ;;  %v10935_v54 = vpop.permute.xlu2 %82  ;;  %vm2438_vm10 = vmor %vm2436_vm2, %vm2437_vm6 }
 0x750   :  { %v2515_v48 = vmul.f32 %v2399_v15, %v10766_v60  ;;  %v2431_v60 = vmul.f32 %v10912_v32, %v10899_v53 }
 0x751   :  { %v2413_v9 = vmul.f32 0.5, %v2412_v45  ;;  %v2305_v35 = vpop.xlane.xlu1 %2304  ;;  %v2536_v61 = vmul.f32 %v10619_v41, %v2516_v16 }
 0x752   :  { %v2322_v17 = vmul.f32 %v2305_v35, %v9225_v8  ;;  %94 = vperm.xlu1 %8413, %v51_v39   ;;  %v2535_v10 = vmul.f32 %v10619_v41, %v2515_v48  ;;  %v2432_v44 = vmul.f32 %v10912_v32, %v2431_v60 }
 0x753   :  { %v2414_v22 = vsub.f32 1.5, %v2413_v9  ;;  %v2556_v33 = vadd.f32 %v10625_v6, %v2536_v61  ;;  %v52_v9 = vld [vmem:[%s13873_s1 + $0x50] sm:$0xff] }
 0x754   :  { %v8670_v18 = vpop.eup %8669  ;;  %v2339_v63 = vadd.f32 1e-05, %v2322_v17  ;;  %v2555_v43 = vadd.f32 %v10625_v6, %v2535_v10  ;;  %v2433_v26 = vmul.f32 0.5, %v2432_v44 }
 0x755   :  { %v2415_v55 = vmul.f32 %v8666_v4, %v2414_v22  ;;  %v2421_v3 = vmul.f32 %v8670_v18, %v2331_v12  ;;  %vm2427_vm14 = vweird.f32 %v8670_v18  ;;  %v10952_v22 = vpop.xlane.xlu0 %2292 }
 0x756   :  { %8671 = vrsqrt.f32 %v2339_v63  ;;  %7847 = vmatmul.msk.f32.gmra.mxu3 %vm13959_vm1, %v2555_v43  ;;  %7864 = vmatmul.msk.f32.gmra.mxu0 %vm13959_vm1, %v2555_v43  ;;  %vm2428_vm4 = vmor %vm2426_vm15, %vm2427_vm14  ;;  %v2434_v45 = vsub.f32 1.5, %v2433_v26  ;;  %vm2506_vm7 = vweird.f32 %v2339_v63  ;;  %v57_v26 = vld [vmem:[%s13873_s1 + $0x78] sm:$0xff] }
 0x757   :  { %v2422_v52 = vmul.f32 %v8670_v18, %v2421_v3  ;;  %v2419_v0 = vsel %vm2418_vm13, %v8666_v4, %v2415_v55  ;;  %v54_v55 = vld [vmem:[%s13873_s1 + $0x60] sm:$0xff]  ;;  %v13890_v3 = vlaneseq }
 0x758   :  { %v2517_v23 = vmul.f32 %v2419_v0, %v10774_v20  ;;  %v53_v20 = vld [vmem:[%s13873_s1 + $0x58] sm:$0xff]  ;;  %v2435_v38 = vmul.f32 %v10912_v32, %v2434_v45 }
 0x759   :  { %v2423_v42 = vmul.f32 0.5, %v2422_v52  ;;  %v10975_v44 = vand.u32 127, %v13890_v3 }
 0x75a   :  { %8415 = vset.pattern.permute.xlu1 %v13885_v21  ;;  %v2537_v46 = vmul.f32 %v10619_v41, %v2517_v23  ;;  %v2439_v16 = vsel %vm2438_vm10, %v10912_v32, %v2435_v38 }
 0x75b   :  { %v2424_v14 = vsub.f32 1.5, %v2423_v42  ;;  %196 = vperm.xlu1 %8415, %v51_v39   ;;  %14157 = vst [vmem:[#allocation8_spill] sm:$0xff] %v10975_v44  ;;  %vm219_vm11 = vcmp.eq.s32.totalorder %v10975_v44, %v10858_v51  ;;  %v13886_v42 = vmov 0.0   ;;  %vm117_vm13 = vcmp.eq.s32.totalorder %v10975_v44, %v10827_v31 }
 0x75c   :  { %v8672_v47 = vpop.eup %8671  ;;  %v2557_v12 = vadd.f32 %v10625_v6, %v2537_v46  ;;  %v10981_v0 = vsel %vm219_vm11, 1.0, %v13886_v42  ;;  %vm118_vm15 = vcmp.eq.s32.totalorder %v10975_v44, %v10832_v59  ;;  %v2318_v46 = vmul.f32 %v10952_v22, %v9225_v8 }
 0x75d   :  { %v2425_v11 = vmul.f32 %v8670_v18, %v2424_v14  ;;  %v2501_v4 = vmul.f32 %v8672_v47, %v2339_v63  ;;  %vm2507_vm5 = vweird.f32 %v8672_v47  ;;  %v10971_v32 = vpop.permute.xlu0 %181  ;;  %v11012_v23 = vsel %vm118_vm15, 1.0, %v13886_v42 }
 0x75e   :  { %7848 = vmatmul.msk.f32.gmra.mxu3 %vm13959_vm1, %v2556_v33  ;;  %7865 = vmatmul.msk.f32.gmra.mxu0 %vm13959_vm1, %v2556_v33  ;;  %vm2508_vm9 = vmor %vm2506_vm7, %vm2507_vm5  ;;  %v56_v33 = vld [vmem:[%s13873_s1 + $0x70] sm:$0xff]  ;;  %14159 = vst [vmem:[#allocation10_spill] sm:$0xff] %v11012_v23  ;;  %vm119_vm5 = vcmp.eq.s32.totalorder %v10975_v44, %v10808_v29  ;;  %vm120_vm7 = vcmp.eq.s32.totalorder %v10975_v44, %v10829_v2  ;;  %v11048_v45 = vadd.f32 1e-05, %v2318_v46 }
 0x75f   :  { %v2502_v28 = vmul.f32 %v8672_v47, %v2501_v4  ;;  %v2429_v15 = vsel %vm2428_vm4, %v8670_v18, %v2425_v11  ;;  %vm221_vm4 = vcmp.eq.s32.totalorder %v10975_v44, %v10871_v30  ;;  %v11031_v4 = vsel %vm119_vm5, 1.0, %v13886_v42 }
 0x760   :  { %v2518_v35 = vmul.f32 %v2429_v15, %v10787_v24  ;;  %v11020_v11 = vsel %vm221_vm4, 1.0, %v13886_v42  ;;  %14160 = vst [vmem:[#allocation11_spill] sm:$0xff] %v11031_v4  ;;  %vm121_vm2 = vcmp.eq.s32.totalorder %v10975_v44, %v10880_v62  ;;  %vm122_vm11 = vcmp.eq.s32.totalorder %v10975_v44, %v10935_v54 }
 0x761   :  { %v2503_v39 = vmul.f32 0.5, %v2502_v28  ;;  %v58_v28 = vld [vmem:[%s13873_s1 + $0x80] sm:$0xf]  ;;  %v11069_v38 = vsel %vm121_vm2, 1.0, %v13886_v42  ;;  %s8986_s1 = smov 64  }
 0x762   :  { %v2538_v43 = vmul.f32 %v10619_v41, %v2518_v35  ;;  %14162 = vst [vmem:[#allocation13_spill] sm:$0xff] %v11069_v38 }
 0x763   :  { %v2504_v48 = vsub.f32 1.5, %v2503_v39  ;;  %8416 = vset.pattern.permute.xlu1 %v13888_v57  ;;  %v11051_v39 = vsel %vm120_vm7, 1.0, %v13886_v42 }
 0x764   :  { %100 = vperm.xlu1 %8416, %v53_v20   ;;  %v2558_v60 = vadd.f32 %v10625_v6, %v2538_v43  ;;  %14161 = vst [vmem:[#allocation12_spill] sm:$0xff] %v11051_v39 }
 0x765   :  { %v2505_v17 = vmul.f32 %v8672_v47, %v2504_v48  ;;  %v3022_v14 = vpop.permute.xlu0 %3021 }
 0x766   :  { %7849 = vmatmul.msk.f32.gmra.mxu3 %vm13959_vm1, %v2557_v12  ;;  %7866 = vmatmul.msk.f32.gmra.mxu0 %vm13959_vm1, %v2557_v12 }
 0x767   :  { %v2509_v10 = vsel %vm2508_vm9, %v8672_v47, %v2505_v17  ;;  %97 = vperm.xlu2 %8414, %v52_v9   ;;  %v10992_v47 = vsel %vm117_vm13, 1.0, %v13886_v42  ;;  %vm223_vm9 = vcmp.eq.s32.totalorder %v10975_v44, %v10971_v32 }
 0x768   :  { %v2526_v24 = vmul.f32 %v2509_v10, %v10801_v1  ;;  %v2290_v18 = vpop.xlane.xlu2 %2289  ;;  %v2519_v1 = vmul.f32 %v2439_v16, %v10743_v49  ;;  %14158 = vst [vmem:[#allocation9_spill] sm:$0xff] %v10992_v47  ;;  %v11060_v2 = vsel %vm223_vm9, 1.0, %v13886_v42 }
 0x769   :  { %v2317_v59 = vmul.f32 %v2290_v18, %v9225_v8  ;;  %v179_v30 = vpop.permute.xlu1 %178 }
 0x76a   :  { %v2546_v63 = vmul.f32 %v10619_v41, %v2526_v24  ;;  %v2539_v61 = vmul.f32 %v10619_v41, %v2519_v1  ;;  %vm222_vm6 = vcmp.eq.s32.totalorder %v10975_v44, %v179_v30 }
 0x76b   :  { %v11041_v29 = vsel %vm222_vm6, 1.0, %v13886_v42 }
 0x76c   :  { %8417 = vset.pattern.permute.xlu1 %v13885_v21  ;;  %v10961_v53 = vadd.f32 %v10625_v6, %v2546_v63  ;;  %v2559_v49 = vadd.f32 %v10625_v6, %v2539_v61  ;;  %v11091_v61 = vsel %vm122_vm11, 1.0, %v13886_v42 }
 0x76d   :  { %199 = vperm.xlu1 %8417, %v52_v9   ;;  %14163 = vst [vmem:[#allocation14_spill] sm:$0xff] %v11091_v61 }
 0x76e   :  { %7850 = vmatmul.msk.f32.gmra.mxu3 %vm13959_vm1, %v2558_v60  ;;  %7867 = vmatmul.msk.f32.gmra.mxu0 %vm13959_vm1, %v2558_v60 }
 0x76f   :  { %7875 = vmatmul.msk.f32.vlgmr.msrb.gmra.mxu1 %vm13959_vm1, %v10961_v53  ;;  %103 = vperm.xlu2 %8414, %v54_v55  }
 0x770   :  { %v173_v52 = vpop.permute.xlu2 %172 }
 0x771   :  { %vm220_vm14 = vcmp.eq.s32.totalorder %v10975_v44, %v173_v52 }
 0x772   :  { %v11002_v31 = vsel %vm220_vm14, 1.0, %v13886_v42 }
 0x775   :  { %202 = vperm.xlu1 %8417, %v53_v20   ;;  %v185_v20 = vpop.permute.xlu0 %184 }
 0x776   :  { %7851 = vmatmul.msk.f32.gmra.mxu3 %vm13959_vm1, %v2559_v49  ;;  %7868 = vmatmul.msk.f32.gmra.mxu0 %vm13959_vm1, %v2559_v49  ;;  %vm224_vm10 = vcmp.eq.s32.totalorder %v10975_v44, %v185_v20 }
 0x777   :  { %7884 = vmatmul.msk.f32.vlgmr.msra.gmra.mxu1 %vm13962_vm12, %v10981_v0  ;;  %8419 = vset.pattern.permute.xlu2 %v13885_v21  ;;  %v11078_v18 = vsel %vm224_vm10, 1.0, %v13886_v42  ;;  %vm2466_vm10 = vweird.f32 %v11048_v45 }
 0x778   :  { %v3024_v51 = vpop.permute.xlu2 %3023  ;;  %205 = vperm.xlu2 %8419, %v54_v55  }
 0x779   :  { %7901 = vmatpush.msk.msrb.mxu2 %vm13974_vm8, %v3024_v51 }
 0x77b   :  { %3094 = vmatpush.msrb.mxu2 %v3022_v14 }
 0x77c   :  { %7902 = vmatmul.msk.f32.vlgmr.msrb.gmra.mxu2 %vm13962_vm12, %v10992_v47 }
 0x77d   :  { %8420 = vset.pattern.permute.xlu1 %v13888_v57  ;;  %v191_v62 = vpop.permute.xlu0 %190 }
 0x77e   :  { %109 = vperm.xlu1 %8420, %v56_v33   ;;  %vm226_vm7 = vcmp.eq.s32.totalorder %v10975_v44, %v191_v62 }
 0x77f   :  { %7885 = vmatmul.msk.f32.gmra.mxu1 %vm13962_vm12, %v11002_v31 }
 0x780   :  { %208 = vperm.xlu2 %8419, %v10928_v58   ;;  %v11027_v58 = vadd.f32 1e-05, %v2317_v59  ;;  %v188_v55 = vpop.permute.xlu2 %187 }
 0x781   :  { %vm225_vm13 = vcmp.eq.s32.totalorder %v10975_v44, %v188_v55 }
 0x782   :  { %8673 = vrsqrt.f32 %v11027_v58  ;;  %v11097_v54 = vsel %vm225_vm13, 1.0, %v13886_v42  ;;  %vm2456_vm6 = vweird.f32 %v11027_v58 }
 0x783   :  { %8675 = vrsqrt.f32 %v11048_v45 }
 0x784   :  { %7903 = vmatmul.msk.f32.gmra.mxu2 %vm13962_vm12, %v11012_v23 }
 0x785   :  { %v194_v30 = vpop.permute.xlu0 %193 }
 0x786   :  { %112 = vperm.xlu1 %8420, %v57_v26   ;;  %vm227_vm13 = vcmp.eq.s32.totalorder %v10975_v44, %v194_v30 }
 0x787   :  { %7886 = vmatmul.msk.f32.gmra.mxu1 %vm13962_vm12, %v11020_v11 }
 0x788   :  { %211 = vperm.xlu2 %8419, %v56_v33   ;;  %v8674_v48 = vpop.eup %8673 }
 0x789   :  { %v2451_v35 = vmul.f32 %v8674_v48, %v11027_v58  ;;  %v11072_v17 = vpop.eup %8675  ;;  %vm2457_vm15 = vweird.f32 %v8674_v48 }
 0x78a   :  { %v2461_v16 = vmul.f32 %v11072_v17, %v11048_v45  ;;  %vm2458_vm9 = vmor %vm2456_vm6, %vm2457_vm15  ;;  %vm2467_vm2 = vweird.f32 %v11072_v17 }
 0x78b   :  { %v2452_v10 = vmul.f32 %v8674_v48, %v2451_v35  ;;  %vm2468_vm11 = vmor %vm2466_vm10, %vm2467_vm2 }
 0x78c   :  { %7904 = vmatmul.msk.f32.gmra.mxu2 %vm13962_vm12, %v11031_v4  ;;  %v2462_v52 = vmul.f32 %v11072_v17, %v2461_v16 }
 0x78d   :  { %v2453_v60 = vmul.f32 0.5, %v2452_v10 }
 0x78e   :  { %115 = vperm.xlu1 %8420, %v58_v28  }
 0x78f   :  { %7887 = vmatmul.msk.f32.gmra.mxu1 %vm13962_vm12, %v11041_v29  ;;  %v2454_v49 = vsub.f32 1.5, %v2453_v60 }
 0x790   :  { %214 = vperm.xlu2 %8419, %v57_v26   ;;  %v2463_v26 = vmul.f32 0.5, %v2462_v52 }
 0x791   :  { %v2455_v59 = vmul.f32 %v8674_v48, %v2454_v49 }
 0x793   :  { %v2459_v10 = vsel %vm2458_vm9, %v8674_v48, %v2455_v59  ;;  %v2302_v48 = vpop.xlane.xlu0 %2301 }
 0x794   :  { %7905 = vmatmul.msk.f32.gmra.mxu2 %vm13962_vm12, %v11051_v39  ;;  %v2287_v15 = vpop.xlane.xlu1 %2286  ;;  %v2521_v58 = vmul.f32 %v2459_v10, %v10813_v27  ;;  %v2321_v55 = vmul.f32 %v2302_v48, %v9225_v8 }
 0x795   :  { %v2316_v12 = vmul.f32 %v2287_v15, %v9225_v8 }
 0x796   :  { %8421 = vset.pattern.permute.xlu1 %v13885_v21  ;;  %v11135_v49 = vadd.f32 1e-05, %v2321_v55 }
 0x797   :  { %v2333_v9 = vadd.f32 1e-05, %v2316_v12  ;;  %7888 = vmatmul.msk.f32.gmra.mxu1 %vm13962_vm12, %v11060_v2  ;;  %217 = vperm.xlu1 %8421, %v58_v28   ;;  %v2464_v12 = vsub.f32 1.5, %v2463_v26 }
 0x799   :  { %8677 = vrsqrt.f32 %v2333_v9  ;;  %vm2446_vm4 = vweird.f32 %v2333_v9  ;;  %v2465_v62 = vmul.f32 %v11072_v17, %v2464_v12 }
 0x79b   :  { %v2469_v27 = vsel %vm2468_vm11, %v11072_v17, %v2465_v62 }
 0x79c   :  { %7906 = vmatmul.msk.f32.gmra.mxu2 %vm13962_vm12, %v11069_v38  ;;  %v2296_v22 = vpop.xlane.xlu1 %2295  ;;  %v2522_v17 = vmul.f32 %v2469_v27, %v10721_v36  ;;  %v2836_v27 = vld [vmem:[%s13877_s5 + $0x38] sm:$0xff] }
 0x79d   :  { %v2319_v24 = vmul.f32 %v2296_v22, %v9225_v8  ;;  %2885 = vmatpush.msrb.mxu3 %v2836_v27 }
 0x79f   :  { %v8678_v43 = vpop.eup %8677  ;;  %v11082_v63 = vadd.f32 1e-05, %v2319_v24  ;;  %7889 = vmatmul.msk.f32.gmra.mxu1 %vm13962_vm12, %v11078_v18  ;;  %v11107_v24 = vsel %vm226_vm7, 1.0, %v13886_v42 }
 0x7a0   :  { %v2441_v1 = vmul.f32 %v8678_v43, %v2333_v9  ;;  %vm2447_vm14 = vweird.f32 %v8678_v43 }
 0x7a1   :  { %8679 = vrsqrt.f32 %v11082_v63  ;;  %vm2448_vm5 = vmor %vm2446_vm4, %vm2447_vm14  ;;  %vm2476_vm4 = vweird.f32 %v11082_v63 }
 0x7a2   :  { %v2442_v32 = vmul.f32 %v8678_v43, %v2441_v1  ;;  %v11124_v1 = vsel %vm227_vm13, 1.0, %v13886_v42  ;;  %8681 = vrsqrt.f32 %v11135_v49 }
 0x7a4   :  { %v2443_v51 = vmul.f32 0.5, %v2442_v32  ;;  %7907 = vmatmul.msk.f32.gmra.mxu2 %vm13962_vm12, %v11091_v61 }
 0x7a6   :  { %v2444_v14 = vsub.f32 1.5, %v2443_v51  ;;  %v92_v51 = vpop.permute.xlu2 %91 }
 0x7a7   :  { %v8680_v33 = vpop.eup %8679  ;;  %7890 = vmatmul.msk.f32.gmra.mxu1 %vm13962_vm12, %v11097_v54  ;;  %vm125_vm7 = vcmp.eq.s32.totalorder %v10975_v44, %v92_v51  ;;  %v2832_v51 = vld [vmem:[%s13877_s5 + $0x18] sm:$0xff] }
 0x7a8   :  { %v2445_v28 = vmul.f32 %v8678_v43, %v2444_v14  ;;  %v2471_v46 = vmul.f32 %v8680_v33, %v11082_v63  ;;  %vm2477_vm15 = vweird.f32 %v8680_v33  ;;  %v2542_v14 = vmul.f32 %v10619_v41, %v2522_v17  ;;  %v2834_v17 = vld [vmem:[%s13877_s5 + $0x28] sm:$0xff] }
 0x7a9   :  { %v11157_v10 = vsel %vm125_vm7, 1.0, %v13886_v42  ;;  %2886 = vmatpush.msrb.mxu3 %v2834_v17 }
 0x7aa   :  { %v2449_v20 = vsel %vm2448_vm5, %v8678_v43, %v2445_v28  ;;  %v2472_v35 = vmul.f32 %v8680_v33, %v2471_v46  ;;  %v2541_v43 = vmul.f32 %v10619_v41, %v2521_v58  ;;  %vm2478_vm5 = vmor %vm2476_vm4, %vm2477_vm15  ;;  %v2562_v30 = vadd.f32 %v10625_v6, %v2542_v14  ;;  %14166 = vst [vmem:[#allocation17_spill] sm:$0xff] %v11157_v10  ;;  %v2830_v14 = vld [vmem:[%s13877_s5 + $0x8] sm:$0xff] }
 0x7ab   :  { %v2520_v15 = vmul.f32 %v2449_v20, %v10845_v5  ;;  %2887 = vmatpush.msrb.mxu3 %v2832_v51  ;;  %vm2496_vm4 = vweird.f32 %v11135_v49 }
 0x7ac   :  { %v2473_v5 = vmul.f32 0.5, %v2472_v35  ;;  %v2561_v45 = vadd.f32 %v10625_v6, %v2541_v43 }
 0x7ad   :  { %v2540_v22 = vmul.f32 %v10619_v41, %v2520_v15  ;;  %2888 = vmatpush.msrb.mxu3 %v2830_v14 }
 0x7ae   :  { %v2474_v16 = vsub.f32 1.5, %v2473_v5 }
 0x7af   :  { %7891 = vmatmul.msk.f32.gmra.mxu1 %vm13962_vm12, %v11107_v24  ;;  %v2560_v9 = vadd.f32 %v10625_v6, %v2540_v22 }
 0x7b0   :  { %v2475_v52 = vmul.f32 %v8680_v33, %v2474_v16 }
 0x7b1   :  { %7852 = vmatmul.msk.f32.gmra.mxu3 %vm13959_vm1, %v2560_v9  ;;  %7869 = vmatmul.msk.f32.gmra.mxu0 %vm13959_vm1, %v2560_v9 }
 0x7b2   :  { %v2479_v59 = vsel %vm2478_vm5, %v8680_v33, %v2475_v52  ;;  %v8682_v33 = vpop.eup %8681 }
 0x7b3   :  { %v2523_v28 = vmul.f32 %v2479_v59, %v10861_v13  ;;  %v2491_v35 = vmul.f32 %v8682_v33, %v11135_v49  ;;  %vm2497_vm13 = vweird.f32 %v8682_v33 }
 0x7b4   :  { %v86_v60 = vpop.permute.xlu1 %85  ;;  %vm2498_vm5 = vmor %vm2496_vm4, %vm2497_vm13 }
 0x7b5   :  { %vm123_vm14 = vcmp.eq.s32.totalorder %v10975_v44, %v86_v60  ;;  %v2543_v20 = vmul.f32 %v10619_v41, %v2523_v28  ;;  %v2492_v22 = vmul.f32 %v8682_v33, %v2491_v35 }
 0x7b6   :  { %v11127_v32 = vsel %vm123_vm14, 1.0, %v13886_v42 }
 0x7b7   :  { %14164 = vst [vmem:[#allocation15_spill] sm:$0xff] %v11127_v32  ;;  %7892 = vmatmul.msk.f32.gmra.mxu1 %vm13962_vm12, %v11124_v1  ;;  %7908 = vmatmul.msk.f32.gmra.mxu2 %vm13962_vm12, %v11127_v32  ;;  %v2563_v13 = vadd.f32 %v10625_v6, %v2543_v20  ;;  %v2493_v62 = vmul.f32 0.5, %v2492_v22 }
 0x7b9   :  { %7853 = vmatmul.msk.f32.gmra.mxu3 %vm13959_vm1, %v2561_v45  ;;  %7870 = vmatmul.msk.f32.gmra.mxu0 %vm13959_vm1, %v2561_v45  ;;  %v2494_v55 = vsub.f32 1.5, %v2493_v62 }
 0x7bc   :  { %v89_v26 = vpop.permute.xlu1 %88 }
 0x7bd   :  { %vm124_vm6 = vcmp.eq.s32.totalorder %v10975_v44, %v89_v26  ;;  %v2495_v26 = vmul.f32 %v8682_v33, %v2494_v55 }
 0x7be   :  { %v11144_v36 = vsel %vm124_vm6, 1.0, %v13886_v42  ;;  %v107_v27 = vpop.permute.xlu0 %106 }
 0x7bf   :  { %14165 = vst [vmem:[#allocation16_spill] sm:$0xff] %v11144_v36  ;;  %7909 = vmatmul.msk.f32.gmra.mxu2 %vm13962_vm12, %v11144_v36  ;;  %v2499_v20 = vsel %vm2498_vm5, %v8682_v33, %v2495_v26 }
 0x7c1   :  { %7854 = vmatmul.msk.f32.gmra.mxu3 %vm13959_vm1, %v2562_v30  ;;  %7871 = vmatmul.msk.f32.gmra.mxu0 %vm13959_vm1, %v2562_v30 }
 0x7c2   :  { %v2299_v63 = vpop.xlane.xlu2 %2298 }
 0x7c3   :  { %v2320_v46 = vmul.f32 %v2299_v63, %v9225_v8 }
 0x7c4   :  { %v95_v15 = vpop.permute.xlu1 %94 }
 0x7c5   :  { %v2337_v12 = vadd.f32 1e-05, %v2320_v46  ;;  %vm126_vm9 = vcmp.eq.s32.totalorder %v10975_v44, %v95_v15 }
 0x7c6   :  { %v11166_v48 = vsel %vm126_vm9, 1.0, %v13886_v42 }
 0x7c7   :  { %8683 = vrsqrt.f32 %v2337_v12  ;;  %7910 = vmatmul.msk.f32.gmra.mxu2 %vm13962_vm12, %v11157_v10  ;;  %14167 = vst [vmem:[#allocation18_spill] sm:$0xff] %v11166_v48  ;;  %vm2486_vm14 = vweird.f32 %v2337_v12 }
 0x7c9   :  { %7855 = vmatmul.msk.f32.gmra.mxu3 %vm13959_vm1, %v2563_v13  ;;  %7872 = vmatmul.msk.f32.gmra.mxu0 %vm13959_vm1, %v2563_v13  ;;  %v2525_v13 = vmul.f32 %v2499_v20, %v10819_v40 }
 0x7ca   :  { %v98_v60 = vpop.permute.xlu2 %97 }
 0x7cb   :  { %vm127_vm10 = vcmp.eq.s32.totalorder %v10975_v44, %v98_v60  ;;  %v2545_v40 = vmul.f32 %v10619_v41, %v2525_v13 }
 0x7cc   :  { %v11190_v30 = vsel %vm127_vm10, 1.0, %v13886_v42  ;;  %vm130_vm10 = vcmp.eq.s32.totalorder %v10975_v44, %v107_v27 }
 0x7cd   :  { %v8684_v9 = vpop.eup %8683  ;;  %v197_v58 = vpop.permute.xlu1 %196  ;;  %14168 = vst [vmem:[#allocation19_spill] sm:$0xff] %v11190_v30  ;;  %v11244_v55 = vsel %vm130_vm10, 1.0, %v13886_v42  ;;  %vm13977_vm10 = vcmask 1041409  }
 0x7ce   :  { %v2481_v5 = vmul.f32 %v8684_v9, %v2337_v12  ;;  %vm228_vm2 = vcmp.eq.s32.totalorder %v10975_v44, %v197_v58  ;;  %vm2487_vm11 = vweird.f32 %v8684_v9  ;;  %v285_v58 = vld [vmem:[%s13876_s4 + $0x70] sm:$0xff]  ;;  %14171 = vst [vmem:[#allocation22_spill] sm:$0xff] %v11244_v55 }
 0x7cf   :  { %v11170_v43 = vsel %vm228_vm2, 1.0, %v13886_v42  ;;  %7911 = vmatmul.msk.f32.gmra.mxu2 %vm13962_vm12, %v11166_v48  ;;  %vm2488_vm15 = vmor %vm2486_vm14, %vm2487_vm11 }
 0x7d0   :  { %v2482_v16 = vmul.f32 %v8684_v9, %v2481_v5  ;;  %7893 = vmatmul.msk.f32.gmra.mxu1 %vm13962_vm12, %v11170_v43  ;;  %v2565_v5 = vadd.f32 %v10625_v6, %v2545_v40 }
 0x7d2   :  { %v2483_v45 = vmul.f32 0.5, %v2482_v16  ;;  %v104_v15 = vpop.permute.xlu2 %103 }
 0x7d3   :  { %vm129_vm9 = vcmp.eq.s32.totalorder %v10975_v44, %v104_v15 }
 0x7d4   :  { %v2484_v52 = vsub.f32 1.5, %v2483_v45  ;;  %v11229_v16 = vsel %vm129_vm9, 1.0, %v13886_v42  ;;  %v2656_v45 = vpop.f32.mrf.mxu3 }
 0x7d5   :  { %14170 = vst [vmem:[#allocation21_spill] sm:$0xff] %v11229_v16 }
 0x7d6   :  { %v2485_v59 = vmul.f32 %v8684_v9, %v2484_v52  ;;  %v101_v28 = vpop.permute.xlu1 %100 }
 0x7d7   :  { %7912 = vmatmul.msk.f32.gmra.mxu2 %vm13962_vm12, %v11190_v30  ;;  %vm128_vm6 = vcmp.eq.s32.totalorder %v10975_v44, %v101_v28 }
 0x7d8   :  { %v2489_v63 = vsel %vm2488_vm15, %v8684_v9, %v2485_v59  ;;  %v11201_v22 = vsel %vm128_vm6, 1.0, %v13886_v42  ;;  %v286_v9 = vld [vmem:[%s13876_s4 + $0x78] sm:$0xff] }
 0x7d9   :  { %v2524_v46 = vmul.f32 %v2489_v63, %v10897_v37  ;;  %14169 = vst [vmem:[#allocation20_spill] sm:$0xff] %v11201_v22  ;;  %v287_v37 = vld [vmem:[%s13876_s4 + $0x80] sm:$0xff]  ;;  %v7841_v63 = vld [vmem:[%s13883_s11 + $0x12] sm:$0x3] }
 0x7da   :  { %3227 = vmatpush.msra.mxu3 %v287_v37  ;;  %v206_v62 = vpop.permute.xlu2 %205  ;;  %v11274_v15 = vperm.slane %v7841_v63, 0 }
 0x7db   :  { %v2544_v35 = vmul.f32 %v10619_v41, %v2524_v46  ;;  %v284_v41 = vld [vmem:[%s13876_s4 + $0x68] sm:$0xff]  ;;  %vm231_vm11 = vcmp.eq.s32.totalorder %v10975_v44, %v206_v62 }
 0x7dc   :  { %3228 = vmatpush.msra.mxu3 %v286_v9  ;;  %v11247_v17 = vsel %vm231_vm11, 1.0, %v13886_v42  ;;  %v2659_v46 = vpop.f32.mrf.mxu3  ;;  %vm3349_vm11 = vcmask 1040384  }
 0x7dd   :  { %v2564_v12 = vadd.f32 %v10625_v6, %v2544_v35 }
 0x7de   :  { %3229 = vmatpush.msra.mxu3 %v285_v58  ;;  %v11302_v58 = vadd.f32 %v10746_v7, %v11274_v15 }
 0x7df   :  { %7856 = vmatmul.msk.f32.gmra.mxu3 %vm13959_vm1, %v2564_v12  ;;  %7873 = vmatmul.msk.f32.gmra.mxu0 %vm13959_vm1, %v2564_v12  ;;  %v200_v49 = vpop.permute.xlu1 %199 }
 0x7e0   :  { %7913 = vmatmul.msk.f32.gmra.mxu2 %vm13962_vm12, %v11201_v22  ;;  %vm229_vm7 = vcmp.eq.s32.totalorder %v10975_v44, %v200_v49  ;;  %3230 = vmatpush.msra.mxu3 %v284_v41  ;;  %14178 = vst [vmem:[#allocation29_spill] sm:$0xff] %v11302_v58 }
 0x7e1   :  { %v11212_v33 = vsel %vm229_vm7, 1.0, %v13886_v42 }
 0x7e2   :  { %7894 = vmatmul.msk.f32.gmra.mxu1 %vm13962_vm12, %v11212_v33  ;;  %v209_v52 = vpop.permute.xlu2 %208 }
 0x7e3   :  { %vm232_vm14 = vcmp.eq.s32.totalorder %v10975_v44, %v209_v52 }
 0x7e4   :  { %v11267_v59 = vsel %vm232_vm14, 1.0, %v13886_v42  ;;  %v2662_v40 = vpop.f32.mrf.mxu3  ;;  %vm13976_vm14 = vcmask 1042434  }
 0x7e7   :  { %7857 = vmatmul.msk.f32.gmra.mxu3 %vm13959_vm1, %v2565_v5  ;;  %7874 = vmatmul.msk.f32.gmra.mxu0 %vm13959_vm1, %v2565_v5  ;;  %v203_v60 = vpop.permute.xlu1 %202 }
 0x7e8   :  { %7914 = vmatmul.msk.f32.gmra.mxu2 %vm13962_vm12, %v11229_v16  ;;  %vm230_vm2 = vcmp.eq.s32.totalorder %v10975_v44, %v203_v60 }
 0x7e9   :  { %v11237_v6 = vsel %vm230_vm2, 1.0, %v13886_v42 }
 0x7ea   :  { %7895 = vmatmul.msk.f32.gmra.mxu1 %vm13962_vm12, %v11237_v6  ;;  %v212_v28 = vpop.permute.xlu2 %211 }
 0x7eb   :  { %vm233_vm4 = vcmp.eq.s32.totalorder %v10975_v44, %v212_v28 }
 0x7ec   :  { %v11251_v51 = vpop.f32.mrf.mxu1  ;;  %v11290_v13 = vsel %vm233_vm4, 1.0, %v13886_v42  ;;  %v2665_v7 = vpop.f32.mrf.mxu3 }
 0x7ed   :  { %14172 = vst [vmem:[#allocation23_spill] sm:$0xff] %v11251_v51 }
 0x7ee   :  { %14176 = vst [vmem:[#allocation27_spill] sm:$0xff] %v11290_v13 }
 0x7ef   :  { %7858 = vmatmul.msk.f32.gmra.mxu3 %vm13959_vm1, %v10961_v53 }
 0x7f0   :  { %7915 = vmatmul.msk.f32.gmra.mxu2 %vm13962_vm12, %v11244_v55  ;;  %v110_v14 = vpop.permute.xlu1 %109 }
 0x7f1   :  { %vm131_vm13 = vcmp.eq.s32.totalorder %v10975_v44, %v110_v14 }
 0x7f2   :  { %7896 = vmatmul.msk.f32.gmra.mxu1 %vm13962_vm12, %v11247_v17  ;;  %v11259_v26 = vsel %vm131_vm13, 1.0, %v13886_v42  ;;  %vm13967_vm13 = vcmask 1046534  }
 0x7f3   :  { %14173 = vst [vmem:[#allocation24_spill] sm:$0xff] %v11259_v26 }
 0x7f4   :  { %v2969_v20 = vpop.f32.mrf.mxu1 }
 0x7f7   :  { %7881 = vmatmul.msk.f32.vlgmr.msrb.gmra.mxu3 %vm13959_vm1, %v10650_v25  ;;  %v11280_v25 = vadd.f32 %v10738_v50, %v11274_v15  ;;  %v215_v50 = vpop.permute.xlu2 %214 }
 0x7f8   :  { %7916 = vmatmul.msk.f32.gmra.mxu2 %vm13962_vm12, %v11259_v26  ;;  %v113_v53 = vpop.permute.xlu1 %112  ;;  %vm234_vm6 = vcmp.eq.s32.totalorder %v10975_v44, %v215_v50  ;;  %v11334_v50 = vadd.f32 %v2659_v46, %v11274_v15 }
 0x7f9   :  { %vm132_vm15 = vcmp.eq.s32.totalorder %v10975_v44, %v113_v53  ;;  %14174 = vst [vmem:[#allocation25_spill] sm:$0xff] %v11280_v25  ;;  %v11311_v41 = vsel %vm234_vm6, 1.0, %v13886_v42  ;;  %v11321_v53 = vadd.f32 %v2656_v45, %v11274_v15  ;;  %vm13975_vm6 = vcmask 1043459  }
 0x7fa   :  { %7897 = vmatmul.msk.f32.gmra.mxu1 %vm13962_vm12, %v11267_v59  ;;  %v11283_v35 = vsel %vm132_vm15, 1.0, %v13886_v42  ;;  %14180 = vst [vmem:[#allocation31_spill] sm:$0xff] %v11311_v41  ;;  %vm3369_vm15 = vcmask 1046528  }
 0x7fb   :  { %14175 = vst [vmem:[#allocation26_spill] sm:$0xff] %v11283_v35 }
 0x7fc   :  { %v2972_v9 = vpop.f32.mrf.mxu1  ;;  %14182 = vst [vmem:[#allocation33_spill] sm:$0xff] %v11321_v53 }
 0x7fd   :  { %14185 = vst [vmem:[#allocation36_spill] sm:$0xff] %v11334_v50 }
 0x7ff   :  { %7882 = vmatmul.msk.f32.gmra.mxu3 %vm13959_vm1, %v10658_v56  ;;  %v3096_v12 = vpop.f32.mrf.mxu2 }
 0x800   :  { %7917 = vmatmul.msk.f32.gmra.mxu2 %vm13962_vm12, %v11283_v35  ;;  %v11293_v49 = vadd.f32 %v3096_v12, %v11280_v25  ;;  %v116_v37 = vpop.permute.xlu1 %115  ;;  %v14218_v25 = vmov 0  }
 0x801   :  { %vm133_vm5 = vcmp.eq.s32.totalorder %v10975_v44, %v116_v37  ;;  %v2668_v37 = vpop.f32.mrf.mxu3 }
 0x802   :  { %14177 = vst [vmem:[#allocation28_spill] sm:$0xff] %v11293_v49  ;;  %7898 = vmatmul.msk.f32.gmra.mxu1 %vm13962_vm12, %v11290_v13  ;;  %v3147_v56 = vmul.f32 %v11293_v49, %v2969_v20  ;;  %v11305_v62 = vsel %vm133_vm5, 1.0, %v13886_v42  ;;  %v11359_v3 = vadd.f32 %v2668_v37, %v11274_v15 }
 0x803   :  { %14179 = vst [vmem:[#allocation30_spill] sm:$0xff] %v11305_v62 }
 0x804   :  { %v2975_v14 = vpop.f32.mrf.mxu1  ;;  %14191 = vst [vmem:[#allocation42_spill] sm:$0xff] %v11359_v3 }
 0x807   :  { %v3099_v5 = vpop.f32.mrf.mxu2  ;;  %7919 = vmatmul.msk.f32.vlgmr.msra.gmra.mxu3 %vm13959_vm1, %v3147_v56 }
 0x808   :  { %7918 = vmatmul.msk.f32.gmra.mxu2 %vm13962_vm12, %v11305_v62  ;;  %v11314_v60 = vadd.f32 %v3099_v5, %v11302_v58 }
 0x809   :  { %v218_v27 = vpop.permute.xlu1 %217 }
 0x80a   :  { %14181 = vst [vmem:[#allocation32_spill] sm:$0xff] %v11314_v60  ;;  %7899 = vmatmul.msk.f32.gmra.mxu1 %vm13962_vm12, %v11311_v41  ;;  %vm235_vm7 = vcmp.eq.s32.totalorder %v10975_v44, %v218_v27  ;;  %v3148_v52 = vmul.f32 %v11314_v60, %v2972_v9  ;;  %v11342_v27 = vadd.f32 %v2662_v40, %v11274_v15 }
 0x80b   :  { %v11325_v63 = vsel %vm235_vm7, 1.0, %v13886_v42 }
 0x80c   :  { %14183 = vst [vmem:[#allocation34_spill] sm:$0xff] %v11325_v63  ;;  %v2978_v9 = vpop.f32.mrf.mxu1 }
 0x80d   :  { %14187 = vst [vmem:[#allocation38_spill] sm:$0xff] %v11342_v27 }
 0x80f   :  { %v3102_v28 = vpop.f32.mrf.mxu2  ;;  %7920 = vmatmul.msk.f32.gmra.mxu3 %vm13959_vm1, %v3148_v52 }
 0x810   :  { %v11328_v20 = vadd.f32 %v3102_v28, %v11321_v53 }
 0x812   :  { %14184 = vst [vmem:[#allocation35_spill] sm:$0xff] %v11328_v20  ;;  %7900 = vmatmul.msk.f32.gmra.mxu1 %vm13962_vm12, %v11325_v63  ;;  %v3149_v12 = vmul.f32 %v11328_v20, %v2975_v14  ;;  %v2671_v14 = vpop.f32.mrf.mxu3 }
 0x814   :  { %v2981_v46 = vpop.f32.mrf.mxu1 }
 0x817   :  { %v3105_v45 = vpop.f32.mrf.mxu2  ;;  %7921 = vmatmul.msk.f32.gmra.mxu3 %vm13959_vm1, %v3149_v12  ;;  %v11350_v12 = vadd.f32 %v2665_v7, %v11274_v15 }
 0x818   :  { %v11338_v56 = vadd.f32 %v3105_v45, %v11334_v50 }
 0x819   :  { %14189 = vst [vmem:[#allocation40_spill] sm:$0xff] %v11350_v12 }
 0x81a   :  { %14186 = vst [vmem:[#allocation37_spill] sm:$0xff] %v11338_v56  ;;  %v3150_v5 = vmul.f32 %v11338_v56, %v2978_v9  ;;  %v2674_v40 = vpop.f32.mrf.mxu3 }
 0x81c   :  { %v2984_v42 = vpop.f32.mrf.mxu1 }
 0x81f   :  { %v3108_v52 = vpop.f32.mrf.mxu2  ;;  %7922 = vmatmul.msk.f32.gmra.mxu3 %vm13959_vm1, %v3150_v5 }
 0x820   :  { %v11346_v28 = vadd.f32 %v3108_v52, %v11342_v27 }
 0x822   :  { %14188 = vst [vmem:[#allocation39_spill] sm:$0xff] %v11346_v28  ;;  %v3151_v21 = vmul.f32 %v11346_v28, %v2981_v46  ;;  %v2677_v52 = vpop.f32.mrf.mxu3 }
 0x824   :  { %v2987_v57 = vpop.f32.mrf.mxu1 }
 0x827   :  { %v3111_v45 = vpop.f32.mrf.mxu2  ;;  %7923 = vmatmul.msk.f32.gmra.mxu3 %vm13959_vm1, %v3151_v21 }
 0x828   :  { %v11354_v9 = vadd.f32 %v3111_v45, %v11350_v12  ;;  %v11367_v45 = vadd.f32 %v2671_v14, %v11274_v15 }
 0x82a   :  { %14190 = vst [vmem:[#allocation41_spill] sm:$0xff] %v11354_v9  ;;  %v3152_v5 = vmul.f32 %v11354_v9, %v2984_v42 }
 0x82b   :  { %14193 = vst [vmem:[#allocation44_spill] sm:$0xff] %v11367_v45 }
 0x82c   :  { %v2990_v42 = vpop.f32.mrf.mxu1 }
 0x82f   :  { %7924 = vmatmul.msk.f32.gmra.mxu3 %vm13959_vm1, %v3152_v5 }
 0x834   :  { %v2680_v51 = vpop.f32.mrf.mxu3 }
 0x835   :  { %v11391_v30 = vadd.f32 %v2680_v51, %v11274_v15 }
 0x837   :  { %14199 = vst [vmem:[#allocation50_spill] sm:$0xff] %v11391_v30 }
 0x83a   :  { %v3114_v46 = vpop.f32.mrf.mxu2 }
 0x83b   :  { %v11362_v7 = vadd.f32 %v3114_v46, %v11359_v3  ;;  %v11375_v46 = vadd.f32 %v2674_v40, %v11274_v15 }
 0x83c   :  { %v2683_v35 = vpop.f32.mrf.mxu3 }
 0x83d   :  { %14192 = vst [vmem:[#allocation43_spill] sm:$0xff] %v11362_v7  ;;  %v3153_v21 = vmul.f32 %v11362_v7, %v2987_v57  ;;  %v11399_v10 = vadd.f32 %v2683_v35, %v11274_v15 }
 0x83e   :  { %14195 = vst [vmem:[#allocation46_spill] sm:$0xff] %v11375_v46 }
 0x83f   :  { %7925 = vmatmul.msk.f32.gmra.mxu3 %vm13959_vm1, %v3153_v21  ;;  %v2993_v21 = vpop.f32.mrf.mxu1  ;;  %14201 = vst [vmem:[#allocation52_spill] sm:$0xff] %v11399_v10 }
 0x842   :  { %v3117_v62 = vpop.f32.mrf.mxu2 }
 0x843   :  { %v11370_v5 = vadd.f32 %v3117_v62, %v11367_v45  ;;  %v11383_v62 = vadd.f32 %v2677_v52, %v11274_v15 }
 0x844   :  { %v2686_v55 = vpop.f32.mrf.mxu3 }
 0x845   :  { %14194 = vst [vmem:[#allocation45_spill] sm:$0xff] %v11370_v5  ;;  %v3154_v37 = vmul.f32 %v11370_v5, %v2990_v42  ;;  %v11407_v32 = vadd.f32 %v2686_v55, %v11274_v15 }
 0x846   :  { %14197 = vst [vmem:[#allocation48_spill] sm:$0xff] %v11383_v62 }
 0x847   :  { %7926 = vmatmul.msk.f32.gmra.mxu3 %vm13959_vm1, %v3154_v37  ;;  %14203 = vst [vmem:[#allocation54_spill] sm:$0xff] %v11407_v32 }
 0x84a   :  { %v3120_v26 = vpop.f32.mrf.mxu2 }
 0x84b   :  { %v11378_v57 = vadd.f32 %v3120_v26, %v11375_v46 }
 0x84c   :  { %v2689_v26 = vpop.f32.mrf.mxu3 }
 0x84d   :  { %14196 = vst [vmem:[#allocation47_spill] sm:$0xff] %v11378_v57  ;;  %v3155_v14 = vmul.f32 %v11378_v57, %v2993_v21  ;;  %v2996_v37 = vpop.f32.mrf.mxu1  ;;  %v11415_v38 = vadd.f32 %v2689_v26, %v11274_v15 }
 0x84f   :  { %7927 = vmatmul.msk.f32.gmra.mxu3 %vm13959_vm1, %v3155_v14  ;;  %14205 = vst [vmem:[#allocation56_spill] sm:$0xff] %v11415_v38 }
 0x852   :  { %v3123_v42 = vpop.f32.mrf.mxu2 }
 0x853   :  { %v11386_v16 = vadd.f32 %v3123_v42, %v11383_v62 }
 0x855   :  { %14198 = vst [vmem:[#allocation49_spill] sm:$0xff] %v11386_v16  ;;  %v3156_v40 = vmul.f32 %v11386_v16, %v2996_v37 }
 0x857   :  { %7928 = vmatmul.msk.f32.gmra.mxu3 %vm13959_vm1, %v3156_v40 }
 0x85a   :  { %v3126_v22 = vpop.f32.mrf.mxu2 }
 0x85b   :  { %v11394_v21 = vadd.f32 %v3126_v22, %v11391_v30  ;;  %v14215_v30 = vlaneseq }
 0x85d   :  { %14200 = vst [vmem:[#allocation51_spill] sm:$0xff] %v11394_v21  ;;  %v64_v45 = vshrl.u32 %v14215_v30, 7 }
 0x85f   :  { %v2999_v14 = vpop.f32.mrf.mxu1  ;;  %v65_v57 = vadd.s32 8, %v64_v45 }
 0x860   :  { %v3157_v52 = vmul.f32 %v11394_v21, %v2999_v14  ;;  %v14237_v21 = vmov 0 }
 0x862   :  { %v2692_v48 = vpop.f32.mrf.mxu3  ;;  %7929 = vmatmul.msk.f32.gmra.mxu3 %vm13959_vm1, %v3157_v52 }
 0x863   :  { %v3129_v42 = vpop.f32.mrf.mxu2 }
 0x864   :  { %v11402_v37 = vadd.f32 %v3129_v42, %v11399_v10 }
 0x866   :  { %14202 = vst [vmem:[#allocation53_spill] sm:$0xff] %v11402_v37 }
 0x867   :  { %v3002_v40 = vpop.f32.mrf.mxu1 }
 0x868   :  { %v3158_v51 = vmul.f32 %v11402_v37, %v3002_v40 }
 0x86a   :  { %v2695_v36 = vpop.f32.mrf.mxu3  ;;  %7930 = vmatmul.msk.f32.gmra.mxu3 %vm13959_vm1, %v3158_v51 }
 0x86b   :  { %v3132_v22 = vpop.f32.mrf.mxu2 }
 0x86c   :  { %v11410_v14 = vadd.f32 %v3132_v22, %v11407_v32 }
 0x86e   :  { %14204 = vst [vmem:[#allocation55_spill] sm:$0xff] %v11410_v14 }
 0x86f   :  { %v3005_v52 = vpop.f32.mrf.mxu1 }
 0x870   :  { %v3159_v35 = vmul.f32 %v11410_v14, %v3005_v52  ;;  %v11425_v52 = vadd.f32 %v2692_v48, %v11274_v15 }
 0x872   :  { %v2698_v61 = vpop.f32.mrf.mxu3  ;;  %7931 = vmatmul.msk.f32.gmra.mxu3 %vm13959_vm1, %v3159_v35  ;;  %14208 = vst [vmem:[#allocation59_spill] sm:$0xff] %v11425_v52 }
 0x873   :  { %v3135_v42 = vpop.f32.mrf.mxu2 }
 0x874   :  { %v11418_v40 = vadd.f32 %v3135_v42, %v11415_v38 }
 0x876   :  { %14206 = vst [vmem:[#allocation57_spill] sm:$0xff] %v11418_v40 }
 0x877   :  { %v3008_v51 = vpop.f32.mrf.mxu1 }
 0x878   :  { %v3160_v55 = vmul.f32 %v11418_v40, %v3008_v51  ;;  %v11435_v51 = vadd.f32 %v2695_v36, %v11274_v15 }
 0x87a   :  { %v11421_v39 = vpop.f32.mrf.mxu3  ;;  %7932 = vmatmul.msk.f32.gmra.mxu3 %vm13959_vm1, %v3160_v55  ;;  %14211 = vst [vmem:[#allocation62_spill] sm:$0xff] %v11435_v51 }
 0x87b   :  { %14207 = vst [vmem:[#allocation58_spill] sm:$0xff] %v11421_v39  ;;  %v3138_v22 = vpop.f32.mrf.mxu2 }
 0x87c   :  { %v11428_v35 = vadd.f32 %v3138_v22, %v11425_v52 }
 0x87e   :  { %14209 = vst [vmem:[#allocation60_spill] sm:$0xff] %v11428_v35 }
 0x87f   :  { %v3011_v4 = vpop.f32.mrf.mxu1 }
 0x880   :  { %v3161_v26 = vmul.f32 %v11428_v35, %v3011_v4  ;;  %v11446_v4 = vadd.f32 %v2698_v61, %v11274_v15 }
 0x882   :  { %v11431_v23 = vpop.f32.mrf.mxu3  ;;  %7933 = vmatmul.msk.f32.gmra.mxu3 %vm13959_vm1, %v3161_v26  ;;  %14213 = vst [vmem:[#allocation64_spill] sm:$0xff] %v11446_v4 }
 0x883   :  { %14210 = vst [vmem:[#allocation61_spill] sm:$0xff] %v11431_v23  ;;  %v3141_v42 = vpop.f32.mrf.mxu2  ;;  %v14219_v23 = vmov 0 }
 0x884   :  { %v11438_v55 = vadd.f32 %v3141_v42, %v11435_v51 }
 0x886   :  { %14212 = vst [vmem:[#allocation63_spill] sm:$0xff] %v11438_v55 }
 0x887   :  { %v3014_v47 = vpop.f32.mrf.mxu1 }
 0x888   :  { %v3162_v48 = vmul.f32 %v11438_v55, %v3014_v47 }
 0x88a   :  { %v11441_v10 = vpop.f32.mrf.mxu3  ;;  %7934 = vmatmul.msk.f32.gmra.mxu3 %vm13959_vm1, %v3162_v48 }
 0x88b   :  { %v3144_v22 = vpop.f32.mrf.mxu2  ;;  %3283 = vxpose.xlu1.b32.start [1/16] (narrow) %v11441_v10, 8 }
 0x88c   :  { %v11449_v26 = vadd.f32 %v3144_v22, %v11446_v4  ;;  %v7743_v4 = vld [vmem:[%s13874_s2 + $0x1] ss:$2 sm:$0x3] }
 0x88d   :  { %v271_v38 = vperm.slane %v7743_v4, 1  ;;  %v270_v27 = vperm.slane %v7743_v4, 0 }
 0x88e   :  { %14214 = vst [vmem:[#allocation65_spill] sm:$0xff] %v11449_v26 }
 0x88f   :  { %v3017_v36 = vpop.f32.mrf.mxu1  ;;  %vm11505_vm9 = vcmp.eq.s32.totalorder %v64_v45, %v271_v38  ;;  %vm11512_vm2 = vcmp.eq.s32.totalorder %v64_v45, %v270_v27  ;;  %vm11586_vm12 = vcmp.eq.s32.totalorder %v65_v57, %v270_v27 }
 0x890   :  { %v3163_v42 = vmul.f32 %v11449_v26, %v3017_v36  ;;  %v277_v8 = vsel %vm11505_vm9, 1, %v14218_v25  ;;  %v14220_v23 = vsel %vm11512_vm2, 4294967295, %v14219_v23  ;;  %v11521_v19 = vsel %vm11512_vm2, 1, %v14218_v25 }
 0x891   :  { %v11516_v39 = vrot.slane %v277_v8, 7  ;;  %v11602_v27 = vsel %vm11586_vm12, 1, %v14218_v25 }
 0x892   :  { %v11452_v52 = vpop.f32.mrf.mxu3  ;;  %7935 = vmatmul.msk.f32.gmra.mxu3 %vm13959_vm1, %v3163_v42  ;;  %vm13993_vm1 = vcmask 31744  }
 0x893   :  { %3284 = vxpose.xlu1.b32.cont [2/16] (narrow) %v11452_v52, 8  ;;  %v3352_v30 = vsel %vm13977_vm10, %v11521_v19, %v11516_v39  ;;  %v11529_v34 = vsel %vm13967_vm13, %v11521_v19, %v11516_v39  ;;  %v3350_v8 = vsel %vm3349_vm11, %v11521_v19, %v11516_v39  ;;  %v3355_v26 = vsel %vm13976_vm14, %v11521_v19, %v11516_v39 }
 0x894   :  { %v3353_v4 = vrot.slane %v3352_v30, 1  ;;  %v11539_v60 = vsel %vm3369_vm15, %v11516_v39, %v11521_v19  ;;  %vm3379_vm5 = vcmp.ne.s32.totalorder %v3350_v8, 0  ;;  %v3356_v30 = vrot.slane %v3355_v26, 2 }
 0x895   :  { %v3391_v56 = vsel %vm3379_vm5, 1, %v14218_v25  ;;  %v3358_v9 = vsel %vm13975_vm6, %v11521_v19, %v11516_v39  ;;  %v14221_v26 = vmov 0  ;;  %vm11557_vm5 = vcmp.eq.s32.totalorder %v65_v57, %v271_v38 }
 0x896   :  { %vm3380_vm4 = vcmp.ne.s32.totalorder %v3353_v4, 0  ;;  %vm3381_vm7 = vcmp.ne.s32.totalorder %v3356_v30, 0  ;;  %v3403_v28 = vperm.slane %v3391_v56, 0  ;;  %v3404_v5 = vperm.slane %v3391_v56, 1 }
 0x897   :  { %v3392_v49 = vsel %vm3380_vm4, 1, %v14218_v25  ;;  %v3393_v7 = vsel %vm3381_vm7, 1, %v14218_v25  ;;  %v3359_v4 = vrot.slane %v3358_v9, 3  ;;  %v14224_v30 = vmov 0 }
 0x898   :  { %v3405_v20 = vperm.slane %v3392_v49, 0  ;;  %v3406_v16 = vperm.slane %v3392_v49, 1  ;;  %vm11553_vm4 = vcmp.eq.s32.totalorder %v3403_v28, 1  ;;  %v14229_v49 = vmov 0 }
 0x899   :  { %v14225_v30 = vsel %vm11553_vm4, 4294967295, %v14224_v30  ;;  %vm11565_vm7 = vcmp.eq.s32.totalorder %v3404_v5, 1  ;;  %v14232_v56 = vmov 0  ;;  %vm3382_vm0 = vcmp.ne.s32.totalorder %v3359_v4, 0 }
 0x89a   :  { %v11456_v47 = vpop.f32.mrf.mxu3  ;;  %vm11549_vm15 = vcmp.eq.s32.totalorder %v3405_v20, 1  ;;  %14226 = vst [vmem:[#allocation67_spill] sm:$0xff] %v14225_v30  ;;  %vm11561_vm3 = vcmp.eq.s32.totalorder %v3406_v16, 1  ;;  %v14233_v56 = vsel %vm11565_vm7, 4294967295, %v14232_v56  ;;  %v3408_v20 = vperm.slane %v3393_v7, 1 }
 0x89b   :  { %3285 = vxpose.xlu1.b32.cont [3/16] (narrow) %v11456_v47, 8  ;;  %v14222_v26 = vsel %vm11549_vm15, 4294967295, %v14221_v26  ;;  %v14230_v49 = vsel %vm11561_vm3, 4294967295, %v14229_v49  ;;  %14234 = vst [vmem:[#allocation69_spill] sm:$0xff] %v14233_v56  ;;  %v279_v16 = vsel %vm11557_vm5, 1, %v14218_v25  ;;  %v3407_v35 = vperm.slane %v3393_v7, 0 }
 0x89c   :  { %14223 = vst [vmem:[#allocation66_spill] sm:$0xff] %v14222_v26  ;;  %v14235_v26 = vmov 0  ;;  %vm11592_vm13 = vcmp.eq.s32.totalorder %v3408_v20, 1  ;;  %v3394_v14 = vsel %vm3382_vm0, 1, %v14218_v25  ;;  %v11597_v40 = vrot.slane %v279_v16, 7 }
 0x89d   :  { %14231 = vst [vmem:[#allocation68_spill] sm:$0xff] %v14230_v49  ;;  %v14236_v26 = vsel %vm11586_vm12, 4294967295, %v14235_v26  ;;  %v14238_v21 = vsel %vm11592_vm13, 4294967295, %v14237_v21  ;;  %vm11604_vm8 = vcmp.eq.s32.totalorder %v3407_v35, 1  ;;  %v14240_v7 = vmov 0 }
 0x89e   :  { %14239 = vst [vmem:[#allocation70_spill] sm:$0xff] %v14238_v21  ;;  %v14241_v7 = vsel %vm11604_vm8, 4294967295, %v14240_v7  ;;  %v3410_v20 = vperm.slane %v3394_v14, 1  ;;  %v3409_v35 = vperm.slane %v3394_v14, 0  ;;  %vm13984_vm14 = vcmask 1044484  }
 0x89f   :  { %14242 = vst [vmem:[#allocation71_spill] sm:$0xff] %v14241_v7 }
 0x8a0   :  { %vm11621_vm6 = vcmp.eq.s32.totalorder %v3410_v20, 1 }
 0x8a2   :  { %v11459_v48 = vpop.f32.mrf.mxu3 }
 0x8a3   :  { %3286 = vxpose.xlu1.b32.cont [4/16] (narrow) %v11459_v48, 8 }
 0x8aa   :  { %v11462_v61 = vpop.f32.mrf.mxu3 }
 0x8ab   :  { %3287 = vxpose.xlu1.b32.cont [5/16] (narrow) %v11462_v61, 8 }
 0x8b2   :  { %v11465_v15 = vpop.f32.mrf.mxu3 }
 0x8b3   :  { %3288 = vxpose.xlu1.b32.cont [6/16] (narrow) %v11465_v15, 8 }
 0x8c2   :  { %v11468_v22 = vpop.f32.mrf.mxu3 }
 0x8c3   :  { %3289 = vxpose.xlu1.b32.cont [7/16] (narrow) %v11468_v22, 8 }
 0x8ca   :  { %v11471_v36 = vpop.f32.mrf.mxu3 }
 0x8cb   :  { %3290 = vxpose.xlu1.b32.cont [8/16] (narrow) %v11471_v36, 8 }
 0x8d2   :  { %v11474_v42 = vpop.f32.mrf.mxu3 }
 0x8d3   :  { %3291 = vxpose.xlu1.b32.cont [9/16] (narrow) %v11474_v42, 8 }
 0x8da   :  { %v11477_v51 = vpop.f32.mrf.mxu3 }
 0x8db   :  { %3292 = vxpose.xlu1.b32.cont [10/16] (narrow) %v11477_v51, 8 }
 0x8e5   :  { %v11480_v46 = vpop.f32.mrf.mxu3 }
 0x8e6   :  { %3293 = vxpose.xlu1.b32.cont [11/16] (narrow) %v11480_v46, 8 }
 0x8ed   :  { %v11483_v32 = vpop.f32.mrf.mxu3 }
 0x8ee   :  { %3294 = vxpose.xlu1.b32.cont [12/16] (narrow) %v11483_v32, 8 }
 0x8f5   :  { %v11486_v12 = vpop.f32.mrf.mxu3 }
 0x8f6   :  { %3295 = vxpose.xlu1.b32.cont [13/16] (narrow) %v11486_v12, 8 }
 0x8fd   :  { %v11489_v62 = vpop.f32.mrf.mxu3 }
 0x8fe   :  { %3296 = vxpose.xlu1.b32.cont [14/16] (narrow) %v11489_v62, 8 }
 0x905   :  { %v11492_v53 = vpop.f32.mrf.mxu3 }
 0x906   :  { %3297 = vxpose.xlu1.b32.cont [15/16] (narrow) %v11492_v53, 8 }
 0x90d   :  { %v11495_v3 = vpop.f32.mrf.mxu3 }
 0x90e   :  { %3298 = vxpose.xlu1.b32.end [16/16] (narrow) %v11495_v3, 8 }
 0x915   :  { %v11498_v50 = vpop.f32.mrf.mxu3 }
 0x916   :  { %3315 = vxpose.xlu2.b32.start.end [1/1] (short) (narrow) %v11498_v50, 8 }
 0x93a   :  { %v11547_v8 = vpop.trf.xlu1 }
 0x93b   :  { %v3453_v28 = vsel %vm11549_vm15, %v11547_v8, -1e+30  ;;  %v3451_v38 = vsel %vm11553_vm4, %v11547_v8, -1e+30 }
 0x9af   :  { %v11569_v9 = vpop.trf.xlu2 }
 0x9b0   :  { %v3454_v45 = vsel %vm11561_vm3, %v11569_v9, -1e+30  ;;  %v3452_v5 = vsel %vm11565_vm7, %v11569_v9, -1e+30  ;;  %v3456_v57 = vsel %vm11592_vm13, %v11569_v9, -1e+30 }
 0x9b1   :  { %v3480_v30 = vsel %vm13993_vm1, %v3454_v45, -inf  ;;  %v3476_v4 = vsel %vm13993_vm1, %v3452_v5, -inf  ;;  %v3458_v14 = vsel %vm11621_vm6, %v11569_v9, -1e+30 }
 0x9b2   :  { %v3481_v37 = vmax.f32 %v3453_v28, %v3480_v30  ;;  %v3477_v49 = vmax.f32 %v3451_v38, %v3476_v4  ;;  %v3372_v30 = vsel %vm3349_vm11, %v11602_v27, %v11597_v40  ;;  %v3455_v28 = vsel %vm11604_vm8, %v11547_v8, -1e+30 }
 0x9b3   :  { %vm3387_vm0 = vcmp.ne.s32.totalorder %v3372_v30, 0  ;;  %v14243_v38 = vmov 0  ;;  %vm11626_vm11 = vcmp.eq.s32.totalorder %v3409_v35, 1  ;;  %v14246_v4 = vmov 0 }
 0x9b4   :  { %3482 = vmax.xlane.f32.xlu2 %v3481_v37  ;;  %3478 = vmax.xlane.f32.xlu0 %v3477_v49  ;;  %v3484_v37 = vsel %vm13993_vm1, %v3456_v57, -inf  ;;  %v3373_v49 = vsel %vm13977_vm10, %v11602_v27, %v11597_v40  ;;  %v14244_v38 = vsel %vm11621_vm6, 4294967295, %v14243_v38  ;;  %v3399_v45 = vsel %vm3387_vm0, 1, %v14218_v25 }
 0x9b5   :  { %14245 = vst [vmem:[#allocation72_spill] sm:$0xff] %v14244_v38  ;;  %v3485_v16 = vmax.f32 %v3455_v28, %v3484_v37  ;;  %v3374_v5 = vrot.slane %v3373_v49, 1  ;;  %v14247_v4 = vsel %vm11626_vm11, 4294967295, %v14246_v4  ;;  %v3420_v57 = vperm.slane %v3399_v45, 1 }
 0x9b6   :  { %14248 = vst [vmem:[#allocation73_spill] sm:$0xff] %v14247_v4  ;;  %v3457_v30 = vsel %vm11626_vm11, %v11547_v8, -1e+30  ;;  %v3488_v20 = vsel %vm13993_vm1, %v3458_v14, -inf  ;;  %v3419_v28 = vperm.slane %v3399_v45, 0  ;;  %v3361_v37 = vsel %vm13984_vm14, %v11521_v19, %v11516_v39 }
 0x9b7   :  { %vm3388_vm10 = vcmp.ne.s32.totalorder %v3374_v5, 0  ;;  %vm11640_vm0 = vcmp.eq.s32.totalorder %v3420_v57, 1  ;;  %v14249_v35 = vmov 0  ;;  %v3489_v49 = vmax.f32 %v3457_v30, %v3488_v20 }
 0x9b8   :  { %v14250_v35 = vsel %vm11640_vm0, 4294967295, %v14249_v35  ;;  %v3362_v38 = vrot.slane %v3361_v37, 4  ;;  %vm11645_vm6 = vcmp.eq.s32.totalorder %v3419_v28, 1  ;;  %v14252_v4 = vmov 0 }
 0x9b9   :  { %14251 = vst [vmem:[#allocation74_spill] sm:$0xff] %v14250_v35  ;;  %v14253_v4 = vsel %vm11645_vm6, 4294967295, %v14252_v4  ;;  %v3468_v45 = vsel %vm11640_vm0, %v11569_v9, -1e+30  ;;  %v3467_v14 = vsel %vm11645_vm6, %v11547_v8, -1e+30 }
 0x9ba   :  { %14254 = vst [vmem:[#allocation75_spill] sm:$0xff] %v14253_v4  ;;  %v3508_v57 = vsel %vm13993_vm1, %v3468_v45, -inf  ;;  %vm3383_vm14 = vcmp.ne.s32.totalorder %v3362_v38, 0  ;;  %v14256_v28 = vmov 0  ;;  %v14259_v4 = vmov 0 }
 0x9bb   :  { %v3509_v37 = vmax.f32 %v3467_v14, %v3508_v57  ;;  %vm14002_vm1 = vcmask 1045509   ;;  %vm14310_vm8 = vcmask 1046534  }
 0x9bc   :  { %3486 = vmax.xlane.f32.xlu0 %v3485_v16  ;;  %v3400_v16 = vsel %vm3388_vm10, 1, %v14218_v25  ;;  %vm14255_vm10 = vcmask 1042434   ;;  %v3364_v57 = vsel %vm14002_vm1, %v11521_v19, %v11516_v39 }
 0x9bd   :  { %v3422_v5 = vperm.slane %v3400_v16, 1  ;;  %v3421_v30 = vperm.slane %v3400_v16, 0  ;;  %v3375_v20 = vsel %vm14255_vm10, %v11602_v27, %v11597_v40  ;;  %vm14262_vm10 = vcmask 31744  }
 0x9be   :  { %v3376_v35 = vrot.slane %v3375_v20, 2 }
 0x9bf   :  { %vm11659_vm11 = vcmp.eq.s32.totalorder %v3422_v5, 1  ;;  %vm11664_vm0 = vcmp.eq.s32.totalorder %v3421_v30, 1  ;;  %v14263_v30 = vmov 0 }
 0x9c0   :  { %v14257_v28 = vsel %vm11659_vm11, 4294967295, %v14256_v28  ;;  %v14260_v4 = vsel %vm11664_vm0, 4294967295, %v14259_v4  ;;  %v3470_v38 = vsel %vm11659_vm11, %v11569_v9, -1e+30  ;;  %v3469_v45 = vsel %vm11664_vm0, %v11547_v8, -1e+30 }
 0x9c1   :  { %14258 = vst [vmem:[#allocation76_spill] sm:$0xff] %v14257_v28  ;;  %v3512_v5 = vsel %vm14262_vm10, %v3470_v38, -inf  ;;  %vm3389_vm6 = vcmp.ne.s32.totalorder %v3376_v35, 0  ;;  %v3365_v28 = vrot.slane %v3364_v57, 5 }
 0x9c2   :  { %14261 = vst [vmem:[#allocation77_spill] sm:$0xff] %v14260_v4  ;;  %v3513_v20 = vmax.f32 %v3469_v45, %v3512_v5  ;;  %v14266_v4 = vmov 0  ;;  %v14270_v45 = vmov 0 }
 0x9c3   :  { %vm3384_vm1 = vcmp.ne.s32.totalorder %v3365_v28, 0 }
 0x9c4   :  { %3490 = vmax.xlane.f32.xlu0 %v3489_v49  ;;  %v3395_v49 = vsel %vm3383_vm14, 1, %v14218_v25 }
 0x9c5   :  { %v3412_v16 = vperm.slane %v3395_v49, 1  ;;  %v3411_v14 = vperm.slane %v3395_v49, 0 }
 0x9c7   :  { %vm11678_vm14 = vcmp.eq.s32.totalorder %v3412_v16, 1  ;;  %vm11683_vm11 = vcmp.eq.s32.totalorder %v3411_v14, 1  ;;  %v3396_v14 = vsel %vm3384_vm1, 1, %v14218_v25 }
 0x9c8   :  { %v14264_v30 = vsel %vm11678_vm14, 4294967295, %v14263_v30  ;;  %v14267_v4 = vsel %vm11683_vm11, 4294967295, %v14266_v4  ;;  %v3460_v35 = vsel %vm11678_vm14, %v11569_v9, -1e+30  ;;  %v3459_v19 = vsel %vm11683_vm11, %v11547_v8, -1e+30 }
 0x9c9   :  { %14265 = vst [vmem:[#allocation78_spill] sm:$0xff] %v14264_v30  ;;  %v3492_v39 = vsel %vm14262_vm10, %v3460_v35, -inf  ;;  %v3413_v35 = vperm.slane %v3396_v14, 0 }
 0x9ca   :  { %14268 = vst [vmem:[#allocation79_spill] sm:$0xff] %v14267_v4  ;;  %v3493_v5 = vmax.f32 %v3459_v19, %v3492_v39 }
 0x9cc   :  { %3510 = vmax.xlane.f32.xlu0 %v3509_v37  ;;  %v3401_v37 = vsel %vm3389_vm6, 1, %v14218_v25  ;;  %vm14269_vm6 = vcmask 1043459  }
 0x9cd   :  { %v3424_v49 = vperm.slane %v3401_v37, 1  ;;  %v3423_v38 = vperm.slane %v3401_v37, 0  ;;  %v3377_v16 = vsel %vm14269_vm6, %v11602_v27, %v11597_v40  ;;  %v3414_v37 = vperm.slane %v3396_v14, 1 }
 0x9ce   :  { %v3378_v57 = vrot.slane %v3377_v16, 3  ;;  %v14279_v16 = vmov 0 }
 0x9cf   :  { %vm11697_vm0 = vcmp.eq.s32.totalorder %v3424_v49, 1  ;;  %vm11702_vm14 = vcmp.eq.s32.totalorder %v3423_v38, 1  ;;  %vm11713_vm1 = vcmp.eq.s32.totalorder %v3414_v37, 1  ;;  %v14276_v49 = vmov 0 }
 0x9d0   :  { %v14271_v45 = vsel %vm11697_vm0, 4294967295, %v14270_v45  ;;  %v3472_v28 = vsel %vm11697_vm0, %v11569_v9, -1e+30  ;;  %v3471_v40 = vsel %vm11702_vm14, %v11547_v8, -1e+30  ;;  %vm3390_vm6 = vcmp.ne.s32.totalorder %v3378_v57, 0 }
 0x9d1   :  { %14272 = vst [vmem:[#allocation80_spill] sm:$0xff] %v14271_v45  ;;  %v3516_v27 = vsel %vm14262_vm10, %v3472_v28, -inf  ;;  %v14277_v49 = vsel %vm11713_vm1, 4294967295, %v14276_v49  ;;  %v3402_v39 = vsel %vm3390_vm6, 1, %v14218_v25  ;;  %v3368_v38 = vrot.slane %v11529_v34, 6 }
 0x9d2   :  { %14278 = vst [vmem:[#allocation82_spill] sm:$0xff] %v14277_v49  ;;  %v3517_v19 = vmax.f32 %v3471_v40, %v3516_v27  ;;  %vm11719_vm0 = vcmp.eq.s32.totalorder %v3413_v35, 1  ;;  %v3426_v57 = vperm.slane %v3402_v39, 1  ;;  %v3425_v37 = vperm.slane %v3402_v39, 0 }
 0x9d3   :  { %v14280_v16 = vsel %vm11719_vm0, 4294967295, %v14279_v16  ;;  %v3461_v14 = vsel %vm11719_vm0, %v11547_v8, -1e+30  ;;  %v14282_v34 = vmov 0  ;;  %v3371_v35 = vrot.slane %v11539_v60, 7 }
 0x9d4   :  { %3514 = vmax.xlane.f32.xlu0 %v3513_v20  ;;  %v14273_v20 = vmov 0  ;;  %14281 = vst [vmem:[#allocation83_spill] sm:$0xff] %v14280_v16  ;;  %vm11730_vm6 = vcmp.eq.s32.totalorder %v3426_v57, 1  ;;  %v14288_v60 = vmov 0  ;;  %v11778_v16 = vpop.f32.mrf.mxu0 }
 0x9d5   :  { %v14274_v20 = vsel %vm11702_vm14, 4294967295, %v14273_v20  ;;  %vm3385_vm14 = vcmp.ne.s32.totalorder %v3368_v38, 0  ;;  %v14283_v34 = vsel %vm11730_vm6, 4294967295, %v14282_v34  ;;  %vm3386_vm0 = vcmp.ne.s32.totalorder %v3371_v35, 0  ;;  %14300 = vst [vmem:[#allocation90_spill] sm:$0xff] %v11778_v16 }
 0x9d6   :  { %14275 = vst [vmem:[#allocation81_spill] sm:$0xff] %v14274_v20  ;;  %v3397_v27 = vsel %vm3385_vm14, 1, %v14218_v25 }
 0x9d7   :  { %14284 = vst [vmem:[#allocation84_spill] sm:$0xff] %v14283_v34  ;;  %v3416_v38 = vperm.slane %v3397_v27, 1 }
 0x9d9   :  { %vm11747_vm14 = vcmp.eq.s32.totalorder %v3416_v38, 1  ;;  %v14294_v38 = vmov 0 }
 0x9da   :  { %v14289_v60 = vsel %vm11747_vm14, 4294967295, %v14288_v60 }
 0x9db   :  { %14290 = vst [vmem:[#allocation86_spill] sm:$0xff] %v14289_v60 }
 0x9dc   :  { %3494 = vmax.xlane.f32.xlu0 %v3493_v5  ;;  %v3462_v5 = vsel %vm11713_vm1, %v11569_v9, -1e+30  ;;  %vm11736_vm1 = vcmp.eq.s32.totalorder %v3425_v37, 1  ;;  %v3398_v37 = vsel %vm3386_vm0, 1, %v14218_v25  ;;  %v11788_v49 = vpop.f32.mrf.mxu0 }
 0x9dd   :  { %v3496_v28 = vsel %vm14262_vm10, %v3462_v5, -inf  ;;  %v3474_v5 = vsel %vm11730_vm6, %v11569_v9, -1e+30  ;;  %v3473_v39 = vsel %vm11736_vm1, %v11547_v8, -1e+30  ;;  %v3418_v34 = vperm.slane %v3398_v37, 1 }
 0x9de   :  { %v3497_v40 = vmax.f32 %v3461_v14, %v3496_v28  ;;  %v3520_v57 = vsel %vm14262_vm10, %v3474_v5, -inf  ;;  %v3415_v14 = vperm.slane %v3397_v27, 0  ;;  %v3417_v5 = vperm.slane %v3398_v37, 0  ;;  %14305 = vst [vmem:[#allocation91_spill] sm:$0xff] %v11788_v49 }
 0x9df   :  { %v3521_v28 = vmax.f32 %v3473_v39, %v3520_v57  ;;  %v14297_v39 = vmov 0  ;;  %vm14309_vm6 = vcmask 1045509  }
 0x9e0   :  { %vm11752_vm11 = vcmp.eq.s32.totalorder %v3415_v14, 1  ;;  %vm11767_vm0 = vcmp.eq.s32.totalorder %v3417_v5, 1 }
 0x9e1   :  { %v3463_v27 = vsel %vm11752_vm11, %v11547_v8, -1e+30  ;;  %v14298_v39 = vsel %vm11767_vm0, 4294967295, %v14297_v39  ;;  %v3465_v14 = vsel %vm11767_vm0, %v11547_v8, -1e+30  ;;  %vm14302_vm0 = vcmask 1042434  }
 0x9e2   :  { %14299 = vst [vmem:[#allocation89_spill] sm:$0xff] %v14298_v39 }
 0x9e4   :  { %3518 = vmax.xlane.f32.xlu0 %v3517_v19  ;;  %v14285_v19 = vmov 0 }
 0x9e5   :  { %v14286_v19 = vsel %vm11736_vm1, 4294967295, %v14285_v19  ;;  %vm11763_vm1 = vcmp.eq.s32.totalorder %v3418_v34, 1 }
 0x9e6   :  { %14287 = vst [vmem:[#allocation85_spill] sm:$0xff] %v14286_v19  ;;  %v3464_v19 = vsel %vm11747_vm14, %v11569_v9, -1e+30  ;;  %v14295_v38 = vsel %vm11763_vm1, 4294967295, %v14294_v38  ;;  %v3466_v57 = vsel %vm11763_vm1, %v11569_v9, -1e+30 }
 0x9e7   :  { %v3500_v35 = vsel %vm14262_vm10, %v3464_v19, -inf  ;;  %14296 = vst [vmem:[#allocation88_spill] sm:$0xff] %v14295_v38  ;;  %v3504_v19 = vsel %vm14262_vm10, %v3466_v57, -inf  ;;  %vm14301_vm10 = vcmask 1041409   ;;  %vm14303_vm1 = vcmask 1043459  }
 0x9e8   :  { %v3501_v25 = vmax.f32 %v3463_v27, %v3500_v35  ;;  %v3505_v34 = vmax.f32 %v3465_v14, %v3504_v19  ;;  %vm14067_vm14 = vcmask 1047559  }
 0x9ec   :  { %3498 = vmax.xlane.f32.xlu0 %v3497_v40  ;;  %v14291_v40 = vmov 0 }
 0x9ed   :  { %v14292_v40 = vsel %vm11752_vm11, 4294967295, %v14291_v40  ;;  %vm14304_vm11 = vcmask 1043456  }
 0x9ee   :  { %14293 = vst [vmem:[#allocation87_spill] sm:$0xff] %v14292_v40 }
 0x9f4   :  { %3522 = vmax.xlane.f32.xlu0 %v3521_v28 }
 0x9fc   :  { %3502 = vmax.xlane.f32.xlu0 %v3501_v25 }
 0xa04   :  { %3506 = vmax.xlane.f32.xlu0 %v3505_v34 }
 0xa27   :  { %v3479_v28 = vpop.xlane.xlu0 %3478  ;;  %v3483_v16 = vpop.xlane.xlu2 %3482 }
 0xa2f   :  { %v3487_v37 = vpop.xlane.xlu0 %3486 }
 0xa37   :  { %v3491_v27 = vpop.xlane.xlu0 %3490 }
 0xa3f   :  { %v3511_v35 = vpop.xlane.xlu0 %3510 }
 0xa40   :  { %v3544_v8 = vperm.slane %v3511_v35, %v10975_v44  ;;  %v3538_v35 = vperm.slane %v3487_v37, %v10975_v44 }
 0xa47   :  { %v3515_v5 = vpop.xlane.xlu0 %3514 }
 0xa48   :  { %v3545_v9 = vperm.slane %v3515_v5, %v10975_v44  ;;  %v3537_v5 = vperm.slane %v3483_v16, %v10975_v44 }
 0xa4a   :  { %v3556_v57 = vsel %vm14301_vm10, %v3545_v9, %v3544_v8  ;;  %v3539_v9 = vperm.slane %v3491_v27, %v10975_v44 }
 0xa4f   :  { %v3495_v25 = vpop.xlane.xlu0 %3494 }
 0xa57   :  { %v3519_v40 = vpop.xlane.xlu0 %3518 }
 0xa58   :  { %v3546_v38 = vperm.slane %v3519_v40, %v10975_v44  ;;  %v3536_v40 = vperm.slane %v3479_v28, %v10975_v44 }
 0xa5a   :  { %v3557_v19 = vsel %vm14302_vm0, %v3546_v38, %v3556_v57  ;;  %v3548_v38 = vsel %vm14301_vm10, %v3537_v5, %v3536_v40  ;;  %v11797_v57 = vpop.f32.mrf.mxu0  ;;  %vm14311_vm10 = vcmask 97280  }
 0xa5b   :  { %14306 = vst [vmem:[#allocation92_spill] sm:$0xff] %v11797_v57 }
 0xa5f   :  { %v3499_v60 = vpop.xlane.xlu0 %3498 }
 0xa60   :  { %v3541_v8 = vperm.slane %v3499_v60, %v10975_v44 }
 0xa62   :  { %v11809_v5 = vpop.f32.mrf.mxu0 }
 0xa63   :  { %14312 = vst [vmem:[#allocation93_spill] sm:$0xff] %v11809_v5 }
 0xa67   :  { %v3523_v39 = vpop.xlane.xlu0 %3522 }
 0xa68   :  { %v3547_v14 = vperm.slane %v3523_v39, %v10975_v44  ;;  %v3540_v39 = vperm.slane %v3495_v25, %v10975_v44 }
 0xa6a   :  { %v3558_v34 = vsel %vm14303_vm1, %v3547_v14, %v3557_v19 }
 0xa6b   :  { %7936 = vmatpush.msk.msra.mxu0 %vm14304_vm11, %v3558_v34  ;;  %vm14307_vm11 = vmmov %vm14302_vm0  ;;  %vm14308_vm0 = vcmask 1044484  }
 0xa6c   :  { %v3549_v14 = vsel %vm14307_vm11, %v3538_v35, %v3548_v38  ;;  %vm14313_vm11 = vmmov %vm14311_vm10 }
 0xa6d   :  { %v3550_v16 = vsel %vm14303_vm1, %v3539_v9, %v3549_v14  ;;  %vm14315_vm1 = vmmov %vm14311_vm10 }
 0xa6e   :  { %v3551_v28 = vsel %vm14308_vm0, %v3540_v39, %v3550_v16  ;;  %vm14320_vm0 = vmmov %vm14315_vm1 }
 0xa6f   :  { %v3503_v20 = vpop.xlane.xlu0 %3502  ;;  %v3552_v27 = vsel %vm14309_vm6, %v3541_v8, %v3551_v28  ;;  %vm14319_vm6 = vmmov %vm14315_vm1 }
 0xa70   :  { %v3542_v19 = vperm.slane %v3503_v20, %v10975_v44  ;;  %v11813_v20 = vpop.f32.mrf.mxu0 }
 0xa71   :  { %14314 = vst [vmem:[#allocation94_spill] sm:$0xff] %v11813_v20 }
 0xa72   :  { %v3553_v25 = vsel %vm14310_vm8, %v3542_v19, %v3552_v27  ;;  %vm14317_vm8 = vmmov %vm14315_vm1 }
 0xa77   :  { %v3507_v34 = vpop.xlane.xlu0 %3506 }
 0xa78   :  { %v3543_v37 = vperm.slane %v3507_v34, %v10975_v44  ;;  %v11817_v40 = vpop.f32.mrf.mxu0 }
 0xa79   :  { %14316 = vst [vmem:[#allocation95_spill] sm:$0xff] %v11817_v40 }
 0xa7a   :  { %v3555_v60 = vsel %vm14067_vm14, %v3543_v37, %v3553_v25  ;;  %vm14404_vm14 = vcmask 261120  }
 0xa7b   :  { %3577 = vmatpush.msra.mxu0 %v3555_v60 }
 0xa7c   :  { %7937 = vmatmul.msk.f32.vlgmr.msra.gmra.mxu0 %vm14311_vm10, %v10981_v0  ;;  %vm14322_vm10 = vmmov %vm14320_vm0 }
 0xa80   :  { %v11821_v35 = vpop.f32.mrf.mxu0 }
 0xa81   :  { %14318 = vst [vmem:[#allocation96_spill] sm:$0xff] %v11821_v35 }
 0xa84   :  { %7938 = vmatmul.msk.f32.gmra.mxu0 %vm14313_vm11, %v11002_v31  ;;  %vm14324_vm11 = vmmov %vm14320_vm0 }
 0xa88   :  { %v11827_v9 = vpop.f32.mrf.mxu0 }
 0xa89   :  { %14321 = vst [vmem:[#allocation97_spill] sm:$0xff] %v11827_v9 }
 0xa8c   :  { %7939 = vmatmul.msk.f32.gmra.mxu0 %vm14315_vm1, %v11020_v11  ;;  %vm14326_vm1 = vmmov %vm14320_vm0 }
 0xa90   :  { %v11831_v39 = vpop.f32.mrf.mxu0 }
 0xa91   :  { %14323 = vst [vmem:[#allocation98_spill] sm:$0xff] %v11831_v39 }
 0xa94   :  { %7940 = vmatmul.msk.f32.gmra.mxu0 %vm14317_vm8, %v11041_v29  ;;  %vm14328_vm8 = vmmov %vm14320_vm0 }
 0xa98   :  { %v11835_v38 = vpop.f32.mrf.mxu0 }
 0xa99   :  { %14325 = vst [vmem:[#allocation99_spill] sm:$0xff] %v11835_v38 }
 0xa9c   :  { %7941 = vmatmul.msk.f32.gmra.mxu0 %vm14319_vm6, %v11060_v2  ;;  %vm14330_vm6 = vmmov %vm14320_vm0 }
 0xaa0   :  { %v11839_v8 = vpop.f32.mrf.mxu0 }
 0xaa1   :  { %14327 = vst [vmem:[#allocation100_spill] sm:$0xff] %v11839_v8 }
 0xaa4   :  { %7942 = vmatmul.msk.f32.gmra.mxu0 %vm14320_vm0, %v11078_v18 }
 0xaa8   :  { %v11843_v14 = vpop.f32.mrf.mxu0 }
 0xaa9   :  { %14329 = vst [vmem:[#allocation101_spill] sm:$0xff] %v11843_v14 }
 0xaac   :  { %7943 = vmatmul.msk.f32.gmra.mxu0 %vm14322_vm10, %v11097_v54  ;;  %vm14332_vm10 = vmmov %vm14320_vm0 }
 0xab0   :  { %v11849_v19 = vpop.f32.mrf.mxu0 }
 0xab1   :  { %14331 = vst [vmem:[#allocation102_spill] sm:$0xff] %v11849_v19 }
 0xab4   :  { %7944 = vmatmul.msk.f32.gmra.mxu0 %vm14324_vm11, %v11107_v24  ;;  %vm14334_vm11 = vmmov %vm14320_vm0 }
 0xab8   :  { %v11853_v16 = vpop.f32.mrf.mxu0 }
 0xab9   :  { %14333 = vst [vmem:[#allocation103_spill] sm:$0xff] %v11853_v16 }
 0xabc   :  { %7945 = vmatmul.msk.f32.gmra.mxu0 %vm14326_vm1, %v11124_v1  ;;  %vm14336_vm1 = vmmov %vm14320_vm0 }
 0xac0   :  { %v11857_v28 = vpop.f32.mrf.mxu0 }
 0xac1   :  { %14335 = vst [vmem:[#allocation104_spill] sm:$0xff] %v11857_v28 }
 0xac4   :  { %7946 = vmatmul.msk.f32.gmra.mxu0 %vm14328_vm8, %v11170_v43  ;;  %vm14338_vm8 = vmmov %vm14320_vm0 }
 0xac8   :  { %v11861_v34 = vpop.f32.mrf.mxu0 }
 0xac9   :  { %14337 = vst [vmem:[#allocation105_spill] sm:$0xff] %v11861_v34 }
 0xacc   :  { %7947 = vmatmul.msk.f32.gmra.mxu0 %vm14330_vm6, %v11212_v33  ;;  %vm14339_vm6 = vmmov %vm14320_vm0 }
 0xad4   :  { %7948 = vmatmul.msk.f32.gmra.mxu0 %vm14320_vm0, %v11237_v6  ;;  %vm14341_vm0 = vcmask 1043456  }
 0xadc   :  { %7949 = vmatmul.msk.f32.gmra.mxu0 %vm14332_vm10, %v11247_v17 }
 0xae4   :  { %7950 = vmatmul.msk.f32.gmra.mxu0 %vm14334_vm11, %v11267_v59  ;;  %vm14345_vm11 = vmmov %vm14336_vm1 }
 0xaec   :  { %7951 = vmatmul.msk.f32.gmra.mxu0 %vm14336_vm1, %v11290_v13 }
 0xaf4   :  { %7952 = vmatmul.msk.f32.gmra.mxu0 %vm14338_vm8, %v11311_v41  ;;  %vm14346_vm8 = vmmov %vm14336_vm1 }
 0xaf9   :  { %v11865_v37 = vpop.f32.mrf.mxu0 }
 0xafc   :  { %7953 = vmatmul.msk.f32.gmra.mxu0 %vm14339_vm6, %v11325_v63  ;;  %vm14347_vm6 = vmmov %vm14336_vm1 }
 0xb01   :  { %v11869_v27 = vpop.f32.mrf.mxu0 }
 0xb09   :  { %v11871_v25 = vpop.f32.mrf.mxu0 }
 0xb11   :  { %v11873_v60 = vpop.f32.mrf.mxu0 }
 0xb19   :  { %v11875_v28 = vpop.f32.mrf.mxu0 }
 0xb21   :  { %v3594_v16 = vpop.f32.mrf.mxu0 }
 0xb29   :  { %v3597_v19 = vpop.f32.mrf.mxu0 }
 0xb31   :  { %v3600_v14 = vpop.f32.mrf.mxu0 }
 0xb39   :  { %v3603_v34 = vpop.f32.mrf.mxu0 }
 0xb41   :  { %v3606_v8 = vpop.f32.mrf.mxu0 }
 0xb49   :  { %v3609_v38 = vpop.f32.mrf.mxu0 }
 0xb4a   :  { %v3640_v21 = vsub.f32 %v11480_v46, %v3609_v38 }
 0xb51   :  { %v3612_v39 = vpop.f32.mrf.mxu0 }
 0xb52   :  { %v3641_v30 = vsub.f32 %v11483_v32, %v3612_v39 }
 0xb54   :  { %v3669_v63 = vmul.f32 1.442695, %v3641_v30  ;;  %v3634_v30 = vsub.f32 %v11462_v61, %v11875_v28 }
 0xb59   :  { %v3615_v9 = vpop.f32.mrf.mxu0 }
 0xb5a   :  { %v3642_v44 = vsub.f32 %v11486_v12, %v3615_v9  ;;  %v3638_v12 = vsub.f32 %v11474_v42, %v3603_v34 }
 0xb5c   :  { %v3671_v56 = vmul.f32 1.442695, %v3642_v44  ;;  %v3637_v44 = vsub.f32 %v11471_v36, %v3600_v14  ;;  %v14340_v36 = vmov 0.0  }
 0xb5d   :  { %v11935_v9 = vsel %vm11557_vm5, 1.0, %v14340_v36  ;;  %vm14344_vm5 = vmmov %vm14341_vm0 }
 0xb5e   :  { %v3661_v42 = vmul.f32 1.442695, %v3637_v44  ;;  %v8937_v44 = vld [vmem:[%s13876_s4 + $0x80] sm:$0xff] }
 0xb61   :  { %v3618_v35 = vpop.f32.mrf.mxu0 }
 0xb62   :  { %v3643_v57 = vsub.f32 %v11489_v62, %v3618_v35 }
 0xb64   :  { %v3673_v7 = vmul.f32 1.442695, %v3643_v57  ;;  %v3633_v57 = vsub.f32 %v11459_v48, %v11873_v60  ;;  %v3631_v48 = vsub.f32 %v11452_v52, %v11869_v27 }
 0xb66   :  { %v3653_v35 = vmul.f32 1.442695, %v3633_v57  ;;  %v3649_v52 = vmul.f32 1.442695, %v3631_v48 }
 0xb69   :  { %v3621_v40 = vpop.f32.mrf.mxu0 }
 0xb6a   :  { %v3644_v20 = vsub.f32 %v11492_v53, %v3621_v40  ;;  %v3639_v53 = vsub.f32 %v11477_v51, %v3606_v8 }
 0xb6c   :  { %v3675_v45 = vmul.f32 1.442695, %v3644_v20  ;;  %v3655_v20 = vmul.f32 1.442695, %v3634_v30 }
 0xb71   :  { %v3624_v5 = vpop.f32.mrf.mxu0 }
 0xb72   :  { %v3645_v49 = vsub.f32 %v11495_v3, %v3624_v5  ;;  %v3632_v5 = vsub.f32 %v11456_v47, %v11871_v25  ;;  %v3630_v47 = vsub.f32 %v11441_v10, %v11865_v37  ;;  %v14068_v37 = vmov 1.0  }
 0xb74   :  { %v3677_v4 = vmul.f32 1.442695, %v3645_v49  ;;  %v3667_v49 = vmul.f32 1.442695, %v3640_v21  ;;  %v3651_v38 = vmul.f32 1.442695, %v3632_v5 }
 0xb75   :  { %v3647_v14 = vmul.f32 1.442695, %v3630_v47 }
 0xb76   :  { %8685 = vpow2.f32 %v3677_v4  ;;  %v3665_v4 = vmul.f32 1.442695, %v3639_v53 }
 0xb77   :  { %8687 = vpow2.f32 %v3675_v45 }
 0xb78   :  { %8689 = vpow2.f32 %v3673_v7  ;;  %v11906_v7 = vsel %vm11505_vm9, 1.0, %v14340_v36  ;;  %vm14342_vm9 = vcmask 31744  }
 0xb79   :  { %v3627_v41 = vpop.f32.mrf.mxu0  ;;  %8691 = vpow2.f32 %v3671_v56  ;;  %vm14343_vm10 = vmmov %vm14342_vm9 }
 0xb7a   :  { %v3646_v62 = vsub.f32 %v11498_v50, %v3627_v41  ;;  %8693 = vpow2.f32 %v3669_v63  ;;  %v3636_v41 = vsub.f32 %v11468_v22, %v3597_v19  ;;  %v3663_v50 = vmul.f32 1.442695, %v3638_v12 }
 0xb7b   :  { %v3635_v63 = vsub.f32 %v11465_v15, %v3594_v16 }
 0xb7c   :  { %v11885_v3 = vpop.eup %8685  ;;  %v3679_v32 = vmul.f32 1.442695, %v3646_v62  ;;  %v3659_v45 = vmul.f32 1.442695, %v3636_v41  ;;  %v8939_v41 = vld [vmem:[%s13876_s4 + $0x70] sm:$0xff] }
 0xb7d   :  { %3690 = vmatpush.msrb.mxu1 %v11885_v3  ;;  %v11889_v46 = vpop.eup %8687  ;;  %v3657_v58 = vmul.f32 1.442695, %v3635_v63  ;;  %v14360_v63 = vld [vmem:[#allocation34_spill] sm:$0xff] }
 0xb7e   :  { %8695 = vpow2.f32 %v3679_v32  ;;  %v11893_v51 = vpop.eup %8689  ;;  %v14358_v32 = vld [vmem:[#allocation31_spill] sm:$0xff] }
 0xb7f   :  { %3691 = vmatpush.msrb.mxu1 %v11889_v46  ;;  %8697 = vpow2.f32 %v3667_v49  ;;  %v11897_v21 = vpop.eup %8691  ;;  %v288_v49 = vld [vmem:[%s13876_s4 + $0x88] sm:$0xff] }
 0xb80   :  { %8699 = vpow2.f32 %v3665_v4  ;;  %v11900_v56 = vpop.eup %8693  ;;  %v8938_v4 = vld [vmem:[%s13876_s4 + $0x78] sm:$0xff] }
 0xb81   :  { %3692 = vmatpush.msrb.mxu1 %v11893_v51  ;;  %8701 = vpow2.f32 %v3663_v50  ;;  %v8940_v50 = vld [vmem:[%s13876_s4 + $0x68] sm:$0xff] }
 0xb82   :  { %8703 = vpow2.f32 %v3661_v42 }
 0xb83   :  { %3693 = vmatpush.msrb.mxu1 %v11897_v21  ;;  %8705 = vpow2.f32 %v3659_v45 }
 0xb84   :  { %v11908_v22 = vpop.eup %8695  ;;  %8707 = vpow2.f32 %v3657_v58 }
 0xb85   :  { %3694 = vmatpush.msrb.mxu1 %v11900_v56  ;;  %7956 = vmatpush.msk.msra.mxu2 %vm14341_vm0, %v11908_v22  ;;  %v11915_v15 = vpop.eup %8697  ;;  %8709 = vpow2.f32 %v3655_v20  ;;  %vm14348_vm0 = vmmov %vm14336_vm1 }
 0xb86   :  { %7957 = vmatmul.msk.f32.vlgmr.msra.gmra.mxu2 %vm14342_vm9, %v11906_v7  ;;  %v11922_v61 = vpop.eup %8699  ;;  %8711 = vpow2.f32 %v3653_v35  ;;  %vm14349_vm9 = vmmov %vm14348_vm0 }
 0xb87   :  { %3695 = vmatpush.msrb.mxu1 %v11915_v15  ;;  %v11927_v40 = vpop.eup %8701  ;;  %8713 = vpow2.f32 %v3651_v38 }
 0xb88   :  { %v11937_v39 = vpop.eup %8703  ;;  %8715 = vpow2.f32 %v3649_v52 }
 0xb89   :  { %3696 = vmatpush.msrb.mxu1 %v11922_v61  ;;  %v11942_v8 = vpop.eup %8705  ;;  %8717 = vpow2.f32 %v3647_v14 }
 0xb8a   :  { %v11947_v55 = vpop.eup %8707 }
 0xb8b   :  { %3697 = vmatpush.msrb.mxu1 %v11927_v40  ;;  %v11950_v10 = vpop.eup %8709 }
 0xb8c   :  { %v11953_v19 = vpop.eup %8711 }
 0xb8d   :  { %3698 = vmatpush.msrb.mxu1 %v11937_v39  ;;  %v11956_v16 = vpop.eup %8713 }
 0xb8e   :  { %7958 = vmatmul.msk.f32.gmra.mxu2 %vm14343_vm10, %v11935_v9  ;;  %v8716_v28 = vpop.eup %8715  ;;  %vm14350_vm10 = vmmov %vm14348_vm0 }
 0xb8f   :  { %3699 = vmatpush.msrb.mxu1 %v11942_v8  ;;  %v8718_v34 = vpop.eup %8717 }
 0xb91   :  { %3700 = vmatpush.msrb.mxu1 %v11947_v55 }
 0xb93   :  { %3701 = vmatpush.msrb.mxu1 %v11950_v10 }
 0xb95   :  { %3702 = vmatpush.msrb.mxu1 %v11953_v19 }
 0xb97   :  { %3703 = vmatpush.msrb.mxu1 %v11956_v16 }
 0xb99   :  { %3704 = vmatpush.msrb.mxu1 %v8716_v28 }
 0xb9b   :  { %3705 = vmatpush.msrb.mxu1 %v8718_v34 }
 0xb9c   :  { %7954 = vmatmul.msk.f32.vlgmr.msrb.gmra.mxu1 %vm11512_vm2, %v14068_v37 }
 0xb9d   :  { %3958 = vmatpush.msra.mxu1 %v288_v49 }
 0xb9f   :  { %4919 = vmatpush.msrb.mxu1 %v8937_v44 }
 0xba1   :  { %4920 = vmatpush.msrb.mxu1 %v8938_v4 }
 0xba3   :  { %4921 = vmatpush.msrb.mxu1 %v8939_v41 }
 0xba4   :  { %7955 = vmatmul.msk.f32.gmra.mxu1 %vm11586_vm12, %v14068_v37 }
 0xba5   :  { %4922 = vmatpush.msrb.mxu1 %v8940_v50 }
 0xc09   :  { %v3730_v27 = vpop.f32.mrf.mxu2 }
 0xc11   :  { %v3733_v60 = vpop.f32.mrf.mxu2 }
 0xc19   :  { %v3707_v25 = vpop.f32.mrf.mxu1 }
 0xc1a   :  { %v3731_v12 = vadd.f32 %v3730_v27, %v3707_v25 }
 0xc21   :  { %v3710_v53 = vpop.f32.mrf.mxu1 }
 0xc22   :  { %v3734_v62 = vadd.f32 %v3733_v60, %v3710_v53 }
 0xc24   :  { %7959 = vmatpush.msk.msrb.mxu3 %vm14344_vm5, %v3734_v62  ;;  %vm14351_vm5 = vmmov %vm14348_vm0 }
 0xc26   :  { %3754 = vmatpush.msrb.mxu3 %v3731_v12 }
 0xc27   :  { %7960 = vmatmul.msk.f32.vlgmr.msrb.gmra.mxu3 %vm14345_vm11, %v10981_v0  ;;  %vm14352_vm11 = vmmov %vm14348_vm0 }
 0xc2f   :  { %7961 = vmatmul.msk.f32.gmra.mxu3 %vm14336_vm1, %v11002_v31  ;;  %vm14353_vm1 = vmmov %vm14348_vm0 }
 0xc37   :  { %7962 = vmatmul.msk.f32.gmra.mxu3 %vm14346_vm8, %v11020_v11  ;;  %vm14354_vm8 = vmmov %vm14348_vm0 }
 0xc3f   :  { %7963 = vmatmul.msk.f32.gmra.mxu3 %vm14347_vm6, %v11041_v29  ;;  %vm14355_vm6 = vmmov %vm14348_vm0 }
 0xc47   :  { %7964 = vmatmul.msk.f32.gmra.mxu3 %vm14348_vm0, %v11060_v2 }
 0xc4f   :  { %7965 = vmatmul.msk.f32.gmra.mxu3 %vm14349_vm9, %v11078_v18  ;;  %vm14356_vm9 = vmmov %vm14348_vm0 }
 0xc57   :  { %7966 = vmatmul.msk.f32.gmra.mxu3 %vm14350_vm10, %v11097_v54  ;;  %vm14357_vm10 = vmmov %vm14348_vm0 }
 0xc5f   :  { %7967 = vmatmul.msk.f32.gmra.mxu3 %vm14351_vm5, %v11107_v24  ;;  %vm14359_vm5 = vmmov %vm14348_vm0 }
 0xc67   :  { %7968 = vmatmul.msk.f32.gmra.mxu3 %vm14352_vm11, %v11124_v1  ;;  %vm14361_vm11 = vmmov %vm14348_vm0 }
 0xc6f   :  { %7969 = vmatmul.msk.f32.gmra.mxu3 %vm14353_vm1, %v11170_v43  ;;  %vm14362_vm1 = vcmask 64512  }
 0xc77   :  { %7970 = vmatmul.msk.f32.gmra.mxu3 %vm14354_vm8, %v11212_v33  ;;  %vm14363_vm8 = vmmov %vm14362_vm1 }
 0xc7f   :  { %7971 = vmatmul.msk.f32.gmra.mxu3 %vm14355_vm6, %v11237_v6  ;;  %vm14364_vm6 = vmmov %vm14362_vm1 }
 0xc87   :  { %7972 = vmatmul.msk.f32.gmra.mxu3 %vm14348_vm0, %v11247_v17  ;;  %vm14365_vm0 = vmmov %vm14362_vm1 }
 0xc8f   :  { %7973 = vmatmul.msk.f32.gmra.mxu3 %vm14356_vm9, %v11267_v59  ;;  %vm14366_vm9 = vmmov %vm14365_vm0 }
 0xc97   :  { %7974 = vmatmul.msk.f32.gmra.mxu3 %vm14357_vm10, %v11290_v13  ;;  %vm14367_vm10 = vmmov %vm14365_vm0 }
 0xc9f   :  { %7975 = vmatmul.msk.f32.gmra.mxu3 %vm14359_vm5, %v14358_v32  ;;  %vm14368_vm5 = vmmov %vm14365_vm0 }
 0xca7   :  { %7976 = vmatmul.msk.f32.gmra.mxu3 %vm14361_vm11, %v14360_v63  ;;  %vm14369_vm11 = vmmov %vm14365_vm0 }
 0xcaa   :  { %v3756_v42 = vpop.f32.mrf.mxu3 }
 0xcab   :  { %8719 = vrcp.f32 %v3756_v42 }
 0xcb1   :  { %v8720_v36 = vpop.eup %8719 }
 0xcb2   :  { %v3824_v30 = vmul.f32 %v8720_v36, %v3756_v42  ;;  %v3759_v45 = vpop.f32.mrf.mxu3 }
 0xcb3   :  { %8721 = vrcp.f32 %v3759_v45 }
 0xcb4   :  { %v3841_v57 = vsub.f32 2.0, %v3824_v30 }
 0xcb6   :  { %v3858_v58 = vmul.f32 %v8720_v36, %v3841_v57 }
 0xcb8   :  { %v3875_v5 = vmul.f32 %v8718_v34, %v3858_v58 }
 0xcb9   :  { %v8722_v20 = vpop.eup %8721 }
 0xcba   :  { %v3825_v48 = vmul.f32 %v8722_v20, %v3759_v45  ;;  %v3762_v35 = vpop.f32.mrf.mxu3  ;;  %7977 = vmatmul.msk.f32.vlgmr.msra.gmra.mxu1 %vm14362_vm1, %v3875_v5  ;;  %vm14370_vm1 = vmmov %vm14365_vm0 }
 0xcbb   :  { %8723 = vrcp.f32 %v3762_v35 }
 0xcbc   :  { %v3842_v47 = vsub.f32 2.0, %v3825_v48 }
 0xcbe   :  { %v3859_v38 = vmul.f32 %v8722_v20, %v3842_v47 }
 0xcc0   :  { %v3876_v52 = vmul.f32 %v8716_v28, %v3859_v38 }
 0xcc1   :  { %v8724_v14 = vpop.eup %8723 }
 0xcc2   :  { %v3826_v27 = vmul.f32 %v8724_v14, %v3762_v35  ;;  %v3765_v25 = vpop.f32.mrf.mxu3  ;;  %7978 = vmatmul.msk.f32.gmra.mxu1 %vm14363_vm8, %v3876_v52  ;;  %vm14371_vm8 = vmmov %vm14365_vm0 }
 0xcc3   :  { %8725 = vrcp.f32 %v3765_v25 }
 0xcc4   :  { %v3843_v60 = vsub.f32 2.0, %v3826_v27 }
 0xcc6   :  { %v3860_v53 = vmul.f32 %v8724_v14, %v3843_v60 }
 0xcc8   :  { %v3877_v62 = vmul.f32 %v11956_v16, %v3860_v53 }
 0xcc9   :  { %v8726_v34 = vpop.eup %8725 }
 0xcca   :  { %v3827_v12 = vmul.f32 %v8726_v34, %v3765_v25  ;;  %v3768_v49 = vpop.f32.mrf.mxu3  ;;  %7979 = vmatmul.msk.f32.gmra.mxu1 %vm14364_vm6, %v3877_v62  ;;  %vm14372_vm6 = vmmov %vm14365_vm0 }
 0xccb   :  { %8727 = vrcp.f32 %v3768_v49 }
 0xccc   :  { %v3844_v44 = vsub.f32 2.0, %v3827_v12 }
 0xcce   :  { %v3861_v4 = vmul.f32 %v8726_v34, %v3844_v44 }
 0xcd0   :  { %v3878_v28 = vmul.f32 %v11953_v19, %v3861_v4 }
 0xcd1   :  { %v8728_v41 = vpop.eup %8727 }
 0xcd2   :  { %v3828_v50 = vmul.f32 %v8728_v41, %v3768_v49  ;;  %v3771_v42 = vpop.f32.mrf.mxu3  ;;  %7980 = vmatmul.msk.f32.gmra.mxu1 %vm14365_vm0, %v3878_v28 }
 0xcd3   :  { %8729 = vrcp.f32 %v3771_v42 }
 0xcd4   :  { %v3845_v36 = vsub.f32 2.0, %v3828_v50 }
 0xcd6   :  { %v3862_v30 = vmul.f32 %v8728_v41, %v3845_v36 }
 0xcd8   :  { %v3879_v16 = vmul.f32 %v11950_v10, %v3862_v30 }
 0xcd9   :  { %v8730_v45 = vpop.eup %8729 }
 0xcda   :  { %v3829_v57 = vmul.f32 %v8730_v45, %v3771_v42  ;;  %v3774_v58 = vpop.f32.mrf.mxu3  ;;  %7981 = vmatmul.msk.f32.gmra.mxu1 %vm14366_vm9, %v3879_v16  ;;  %vm14373_vm9 = vmmov %vm14365_vm0 }
 0xcdb   :  { %8731 = vrcp.f32 %v3774_v58 }
 0xcdc   :  { %v3846_v5 = vsub.f32 2.0, %v3829_v57 }
 0xcde   :  { %v3863_v20 = vmul.f32 %v8730_v45, %v3846_v5 }
 0xce0   :  { %v3880_v19 = vmul.f32 %v11947_v55, %v3863_v20 }
 0xce1   :  { %v8732_v48 = vpop.eup %8731 }
 0xce2   :  { %v3830_v35 = vmul.f32 %v8732_v48, %v3774_v58  ;;  %v3777_v47 = vpop.f32.mrf.mxu3  ;;  %7982 = vmatmul.msk.f32.gmra.mxu1 %vm14367_vm10, %v3880_v19  ;;  %vm14374_vm10 = vmmov %vm14365_vm0 }
 0xce3   :  { %8733 = vrcp.f32 %v3777_v47 }
 0xce4   :  { %v3847_v38 = vsub.f32 2.0, %v3830_v35 }
 0xce6   :  { %v3864_v52 = vmul.f32 %v8732_v48, %v3847_v38 }
 0xce8   :  { %v3881_v10 = vmul.f32 %v11942_v8, %v3864_v52 }
 0xce9   :  { %v8734_v14 = vpop.eup %8733 }
 0xcea   :  { %v3831_v27 = vmul.f32 %v8734_v14, %v3777_v47  ;;  %v3780_v25 = vpop.f32.mrf.mxu3  ;;  %7983 = vmatmul.msk.f32.gmra.mxu1 %vm14368_vm5, %v3881_v10  ;;  %vm14375_vm5 = vmmov %vm14365_vm0 }
 0xceb   :  { %8735 = vrcp.f32 %v3780_v25 }
 0xcec   :  { %v3848_v60 = vsub.f32 2.0, %v3831_v27 }
 0xcee   :  { %v3865_v53 = vmul.f32 %v8734_v14, %v3848_v60 }
 0xcf0   :  { %v3882_v55 = vmul.f32 %v11937_v39, %v3865_v53 }
 0xcf1   :  { %v8736_v62 = vpop.eup %8735 }
 0xcf2   :  { %v3832_v34 = vmul.f32 %v8736_v62, %v3780_v25  ;;  %v3783_v12 = vpop.f32.mrf.mxu3  ;;  %7984 = vmatmul.msk.f32.gmra.mxu1 %vm14369_vm11, %v3882_v55  ;;  %vm14376_vm11 = vmmov %vm14365_vm0 }
 0xcf3   :  { %8737 = vrcp.f32 %v3783_v12 }
 0xcf4   :  { %v3849_v49 = vsub.f32 2.0, %v3832_v34 }
 0xcf6   :  { %v3866_v44 = vmul.f32 %v8736_v62, %v3849_v49 }
 0xcf8   :  { %v3883_v8 = vmul.f32 %v11927_v40, %v3866_v44 }
 0xcf9   :  { %v8738_v4 = vpop.eup %8737 }
 0xcfa   :  { %v3833_v28 = vmul.f32 %v8738_v4, %v3783_v12  ;;  %v3786_v41 = vpop.f32.mrf.mxu3  ;;  %7985 = vmatmul.msk.f32.gmra.mxu1 %vm14370_vm1, %v3883_v8  ;;  %vm14377_vm1 = vmmov %vm14365_vm0 }
 0xcfb   :  { %8739 = vrcp.f32 %v3786_v41 }
 0xcfc   :  { %v3850_v50 = vsub.f32 2.0, %v3833_v28 }
 0xcfe   :  { %v3867_v42 = vmul.f32 %v8738_v4, %v3850_v50 }
 0xd00   :  { %v3884_v39 = vmul.f32 %v11922_v61, %v3867_v42 }
 0xd01   :  { %v8740_v36 = vpop.eup %8739 }
 0xd02   :  { %v3834_v30 = vmul.f32 %v8740_v36, %v3786_v41  ;;  %v3789_v16 = vpop.f32.mrf.mxu3  ;;  %7986 = vmatmul.msk.f32.gmra.mxu1 %vm14371_vm8, %v3884_v39  ;;  %vm14395_vm8 = vcmask 1043456  }
 0xd03   :  { %8741 = vrcp.f32 %v3789_v16 }
 0xd04   :  { %v3851_v45 = vsub.f32 2.0, %v3834_v30 }
 0xd06   :  { %v3868_v57 = vmul.f32 %v8740_v36, %v3851_v45 }
 0xd08   :  { %v3885_v40 = vmul.f32 %v11915_v15, %v3868_v57 }
 0xd09   :  { %v8742_v58 = vpop.eup %8741 }
 0xd0a   :  { %v3835_v5 = vmul.f32 %v8742_v58, %v3789_v16  ;;  %v3792_v20 = vpop.f32.mrf.mxu3  ;;  %7987 = vmatmul.msk.f32.gmra.mxu1 %vm14372_vm6, %v3885_v40  ;;  %vm14396_vm6 = vcmask 31744  }
 0xd0b   :  { %8743 = vrcp.f32 %v3792_v20 }
 0xd0c   :  { %v3852_v19 = vsub.f32 2.0, %v3835_v5 }
 0xd0e   :  { %v3869_v48 = vmul.f32 %v8742_v58, %v3852_v19 }
 0xd10   :  { %v3886_v61 = vmul.f32 %v11900_v56, %v3869_v48 }
 0xd11   :  { %v8744_v35 = vpop.eup %8743 }
 0xd12   :  { %v3836_v47 = vmul.f32 %v8744_v35, %v3792_v20  ;;  %v3795_v38 = vpop.f32.mrf.mxu3  ;;  %7988 = vmatmul.msk.f32.gmra.mxu1 %vm14365_vm0, %v3886_v61  ;;  %vm14397_vm0 = vmmov %vm14396_vm6 }
 0xd13   :  { %8745 = vrcp.f32 %v3795_v38 }
 0xd14   :  { %v3853_v52 = vsub.f32 2.0, %v3836_v47 }
 0xd16   :  { %v3870_v10 = vmul.f32 %v8744_v35, %v3853_v52 }
 0xd18   :  { %v3887_v15 = vmul.f32 %v11897_v21, %v3870_v10 }
 0xd19   :  { %v8746_v14 = vpop.eup %8745 }
 0xd1a   :  { %v3837_v27 = vmul.f32 %v8746_v14, %v3795_v38  ;;  %v3798_v25 = vpop.f32.mrf.mxu3  ;;  %7989 = vmatmul.msk.f32.gmra.mxu1 %vm14373_vm9, %v3887_v15  ;;  %vm14398_vm9 = vcmask 261120  }
 0xd1b   :  { %8747 = vrcp.f32 %v3798_v25 }
 0xd1c   :  { %v3854_v60 = vsub.f32 2.0, %v3837_v27 }
 0xd1e   :  { %v3871_v53 = vmul.f32 %v8746_v14, %v3854_v60 }
 0xd20   :  { %v3888_v56 = vmul.f32 %v11893_v51, %v3871_v53  ;;  %v14379_v53 = vld [vmem:[#allocation55_spill] sm:$0xff] }
 0xd21   :  { %v8748_v55 = vpop.eup %8747 }
 0xd22   :  { %v3838_v62 = vmul.f32 %v8748_v55, %v3798_v25  ;;  %v3801_v34 = vpop.f32.mrf.mxu3  ;;  %7990 = vmatmul.msk.f32.gmra.mxu1 %vm14374_vm10, %v3888_v56  ;;  %v14378_v25 = vld [vmem:[#allocation57_spill] sm:$0xff]  ;;  %vm14399_vm10 = vmmov %vm14398_vm9 }
 0xd23   :  { %8749 = vrcp.f32 %v3801_v34 }
 0xd24   :  { %v3855_v12 = vsub.f32 2.0, %v3838_v62  ;;  %v14380_v62 = vld [vmem:[#allocation53_spill] sm:$0xff] }
 0xd26   :  { %v3872_v49 = vmul.f32 %v8748_v55, %v3855_v12  ;;  %v14381_v12 = vld [vmem:[#allocation51_spill] sm:$0xff] }
 0xd28   :  { %v3889_v21 = vmul.f32 %v11889_v46, %v3872_v49 }
 0xd29   :  { %v8750_v44 = vpop.eup %8749 }
 0xd2a   :  { %v3839_v8 = vmul.f32 %v8750_v44, %v3801_v34  ;;  %v3804_v4 = vpop.f32.mrf.mxu3  ;;  %7991 = vmatmul.msk.f32.gmra.mxu1 %vm14375_vm5, %v3889_v21 }
 0xd2b   :  { %8751 = vrcp.f32 %v3804_v4 }
 0xd2c   :  { %v3856_v28 = vsub.f32 2.0, %v3839_v8 }
 0xd2e   :  { %v3873_v41 = vmul.f32 %v8750_v44, %v3856_v28  ;;  %v14382_v28 = vld [vmem:[#allocation60_spill] sm:$0xff] }
 0xd30   :  { %v3890_v51 = vmul.f32 %v11885_v3, %v3873_v41 }
 0xd31   :  { %v8752_v50 = vpop.eup %8751 }
 0xd32   :  { %v3840_v42 = vmul.f32 %v8752_v50, %v3804_v4  ;;  %7992 = vmatmul.msk.f32.gmra.mxu1 %vm14376_vm11, %v3890_v51  ;;  %v14383_v51 = vld [vmem:[#allocation63_spill] sm:$0xff] }
 0xd34   :  { %v3857_v39 = vsub.f32 2.0, %v3840_v42 }
 0xd36   :  { %v3874_v36 = vmul.f32 %v8752_v50, %v3857_v39 }
 0xd37   :  { %v3960_v30 = vpop.f32.mrf.mxu1 }
 0xd38   :  { %v3891_v16 = vmul.f32 %v11908_v22, %v3874_v36  ;;  %v14384_v36 = vld [vmem:[#allocation43_spill] sm:$0xff] }
 0xd3a   :  { %7993 = vmatmul.msk.f32.gmra.mxu1 %vm14377_vm1, %v3891_v16  ;;  %v14385_v16 = vld [vmem:[#allocation45_spill] sm:$0xff] }
 0xd3f   :  { %v3963_v46 = vpop.f32.mrf.mxu1 }
 0xd47   :  { %v3966_v45 = vpop.f32.mrf.mxu1 }
 0xd4f   :  { %v3969_v57 = vpop.f32.mrf.mxu1 }
 0xd57   :  { %v3972_v40 = vpop.f32.mrf.mxu1 }
 0xd5f   :  { %v3975_v58 = vpop.f32.mrf.mxu1 }
 0xd67   :  { %v3978_v5 = vpop.f32.mrf.mxu1 }
 0xd6f   :  { %v3981_v20 = vpop.f32.mrf.mxu1 }
 0xd77   :  { %v3984_v19 = vpop.f32.mrf.mxu1 }
 0xd78   :  { %4044 = vrot.lane.b32.xlu2 %v3984_v19, %s8985_s28 }
 0xd7f   :  { %v3987_v3 = vpop.f32.mrf.mxu1 }
 0xd80   :  { %4046 = vrot.lane.b32.xlu1 %v3987_v3, %s8985_s28  ;;  %v14387_v3 = vld [vmem:[#allocation47_spill] sm:$0xff] }
 0xd87   :  { %v3990_v48 = vpop.f32.mrf.mxu1 }
 0xd88   :  { %4048 = vrot.lane.b32.xlu0 %v3990_v48, %s8985_s28 }
 0xd8f   :  { %v3993_v22 = vpop.f32.mrf.mxu1 }
 0xd90   :  { %4050 = vrot.lane.b32.xlu0 %v3993_v22, %s8985_s28 }
 0xd97   :  { %v3996_v61 = vpop.f32.mrf.mxu1 }
 0xd98   :  { %4052 = vrot.lane.b32.xlu0 %v3996_v61, %s8985_s28 }
 0xd9f   :  { %v3999_v35 = vpop.f32.mrf.mxu1 }
 0xda0   :  { %4054 = vrot.lane.b32.xlu2 %v3999_v35, %s8985_s28  ;;  %v14388_v35 = vld [vmem:[#allocation41_spill] sm:$0xff] }
 0xda7   :  { %v4002_v47 = vpop.f32.mrf.mxu1 }
 0xda8   :  { %4040 = vrot.lane.b32.xlu2 %v3978_v5, %s8985_s28  ;;  %4056 = vrot.lane.b32.xlu0 %v4002_v47, %s8985_s28  ;;  %v14386_v5 = vld [vmem:[#allocation49_spill] sm:$0xff] }
 0xdaf   :  { %v4005_v38 = vpop.f32.mrf.mxu1 }
 0xdb0   :  { %4036 = vrot.lane.b32.xlu2 %v3972_v40, %s8985_s28  ;;  %4058 = vrot.lane.b32.xlu0 %v4005_v38, %s8985_s28 }
 0xdb7   :  { %v4008_v40 = vpop.f32.mrf.mxu1 }
 0xdb8   :  { %4032 = vrot.lane.b32.xlu2 %v3966_v45, %s8985_s28  ;;  %4042 = vrot.lane.b32.xlu0 %v3981_v20, %s8985_s28 }
 0xdc0   :  { %4028 = vrot.lane.b32.xlu2 %v3960_v30, %s8985_s28  ;;  %4038 = vrot.lane.b32.xlu0 %v3975_v58, %s8985_s28 }
 0xdc8   :  { %4034 = vrot.lane.b32.xlu0 %v3969_v57, %s8985_s28 }
 0xdd0   :  { %4030 = vrot.lane.b32.xlu0 %v3963_v46, %s8985_s28 }
 0xdd2   :  { %v4045_v10 = vpop.permute.xlu2 %4044 }
 0xdd3   :  { %v4087_v48 = vmul.f32 %v4045_v10, %v14387_v3 }
 0xdf2   :  { %v4047_v58 = vpop.permute.xlu1 %4046 }
 0xdf3   :  { %v4088_v20 = vmul.f32 %v4047_v58, %v14386_v5 }
 0xdf5   :  { %v8437_v22 = vpack.i.bf16 %v4087_v48, %v4088_v20 }
 0xdfa   :  { %v4049_v52 = vpop.permute.xlu0 %4048  ;;  %v4055_v14 = vpop.permute.xlu2 %4054 }
 0xdfb   :  { %v4092_v60 = vmul.f32 %v4055_v14, %v14378_v25  ;;  %v4089_v49 = vmul.f32 %v4049_v52, %v14381_v12  ;;  %v14389_v52 = vld [vmem:[#allocation39_spill] sm:$0xff]  ;;  %v14391_v25 = vld [vmem:[#allocation37_spill] sm:$0xff]  ;;  %v14393_v12 = vld [vmem:[#allocation32_spill] sm:$0xff] }
 0xdfc   :  { %v14390_v14 = vld [vmem:[#allocation35_spill] sm:$0xff] }
 0xe02   :  { %v4051_v15 = vpop.permute.xlu0 %4050  ;;  %v4041_v8 = vpop.permute.xlu2 %4040 }
 0xe03   :  { %v4090_v34 = vmul.f32 %v4051_v15, %v14380_v62  ;;  %v4085_v30 = vmul.f32 %v4041_v8, %v14384_v36  ;;  %v14392_v62 = vld [vmem:[#allocation28_spill] sm:$0xff]  ;;  %v14394_v36 = vld [vmem:[#allocation65_spill] sm:$0xff] }
 0xe05   :  { %v8432_v21 = vpack.i.bf16 %v4089_v49, %v4090_v34 }
 0xe0a   :  { %v4053_v27 = vpop.permute.xlu0 %4052  ;;  %v4037_v45 = vpop.permute.xlu2 %4036 }
 0xe0b   :  { %v4091_v56 = vmul.f32 %v4053_v27, %v14379_v53  ;;  %v4083_v15 = vmul.f32 %v4037_v45, %v14389_v52 }
 0xe0d   :  { %v8422_v55 = vpack.i.bf16 %v4091_v56, %v4092_v60 }
 0xe0f   :  { %8423 = vrot.lane.b32.xlu2 %v8422_v55, %s8979_s23 }
 0xe12   :  { %v4033_v61 = vpop.permute.xlu2 %4032 }
 0xe13   :  { %v4081_v27 = vmul.f32 %v4033_v61, %v14390_v14  ;;  %v4213_v14 = vld [vmem:[%s13879_s7 + $0x10] sm:$0xff] }
 0xe17   :  { %8433 = vrot.lane.b32.xlu2 %v8432_v21, %s8979_s23 }
 0xe1a   :  { %v4057_v44 = vpop.permute.xlu0 %4056  ;;  %v4029_v10 = vpop.permute.xlu2 %4028 }
 0xe1b   :  { %v4093_v41 = vmul.f32 %v4057_v44, %v14382_v28  ;;  %v4079_v34 = vmul.f32 %v4029_v10, %v14392_v62 }
 0xe22   :  { %v4059_v4 = vpop.permute.xlu0 %4058 }
 0xe23   :  { %v4094_v50 = vmul.f32 %v4059_v4, %v14383_v51 }
 0xe25   :  { %v8427_v42 = vpack.i.bf16 %v4093_v41, %v4094_v50 }
 0xe27   :  { %8428 = vrot.lane.b32.xlu0 %v8427_v42, %s8979_s23 }
 0xe2a   :  { %v4043_v39 = vpop.permute.xlu0 %4042 }
 0xe2b   :  { %v4086_v46 = vmul.f32 %v4043_v39, %v14385_v16 }
 0xe2d   :  { %v8442_v57 = vpack.i.bf16 %v4085_v30, %v4086_v46 }
 0xe2f   :  { %8443 = vrot.lane.b32.xlu2 %v8442_v57, %s8979_s23  ;;  %4060 = vrot.lane.b32.xlu0 %v4008_v40, %s8985_s28 }
 0xe32   :  { %v4039_v19 = vpop.permute.xlu0 %4038 }
 0xe33   :  { %v4084_v47 = vmul.f32 %v4039_v19, %v14388_v35 }
 0xe35   :  { %v8447_v53 = vpack.i.bf16 %v4083_v15, %v4084_v47  ;;  %v4214_v15 = vld [vmem:[%s13879_s7 + $0x18] sm:$0xff] }
 0xe37   :  { %8438 = vrot.lane.b32.xlu0 %v8437_v22, %s8979_s23 }
 0xe3a   :  { %v4035_v38 = vpop.permute.xlu0 %4034 }
 0xe3b   :  { %v4082_v60 = vmul.f32 %v4035_v38, %v14391_v25  ;;  %v4211_v25 = vld [vmem:[%s13879_s7] sm:$0xff] }
 0xe3d   :  { %v8452_v56 = vpack.i.bf16 %v4081_v27, %v4082_v60  ;;  %v4212_v27 = vld [vmem:[%s13879_s7 + $0x8] sm:$0xff] }
 0xe3f   :  { %8453 = vrot.lane.b32.xlu2 %v8452_v56, %s8979_s23  ;;  %8448 = vrot.lane.b32.xlu0 %v8447_v53, %s8979_s23 }
 0xe42   :  { %v4031_v55 = vpop.permute.xlu0 %4030 }
 0xe43   :  { %v4080_v49 = vmul.f32 %v4031_v55, %v14393_v12  ;;  %v14400_v12 = vld [vmem:[#allocation7_spill] sm:$0xff] }
 0xe45   :  { %v8457_v21 = vpack.i.bf16 %v4079_v34, %v4080_v49 }
 0xe47   :  { %8458 = vrot.lane.b32.xlu0 %v8457_v21, %s8979_s23 }
 0xe69   :  { %v8424_v44 = vpop.permute.xlu2 %8423 }
 0xe6a   :  { %v8425_v41 = vunpack.i.l.bf16 %v8424_v44  ;;  %v8426_v50 = vunpack.i.h.bf16 %v8424_v44  ;;  %v14401_v44 = vld [vmem:[#allocation6_spill] sm:$0xff] }
 0xe71   :  { %v8434_v51 = vpop.permute.xlu2 %8433 }
 0xe72   :  { %v8435_v39 = vunpack.i.l.bf16 %v8434_v51  ;;  %v8436_v16 = vunpack.i.h.bf16 %v8434_v51 }
 0xe89   :  { %v8444_v57 = vpop.permute.xlu2 %8443 }
 0xe8a   :  { %v8445_v58 = vunpack.i.l.bf16 %v8444_v57  ;;  %v8446_v5 = vunpack.i.h.bf16 %v8444_v57 }
 0xe99   :  { %v8429_v8 = vpop.permute.xlu0 %8428  ;;  %v8454_v3 = vpop.permute.xlu2 %8453 }
 0xe9a   :  { %v8430_v4 = vunpack.i.l.bf16 %v8429_v8  ;;  %v8431_v28 = vunpack.i.h.bf16 %v8429_v8  ;;  %v8455_v22 = vunpack.i.l.bf16 %v8454_v3  ;;  %v8456_v61 = vunpack.i.h.bf16 %v8454_v3 }
 0xe9c   :  { %4165 = vmatpush.msrb.mxu2 %v8430_v4  ;;  %v8007_v4 = vld [vmem:[%s13879_s7 + $0x38] sm:$0xff] }
 0xe9e   :  { %4166 = vmatpush.msrb.mxu2 %v8431_v28  ;;  %v8006_v28 = vld [vmem:[%s13879_s7 + $0x30] sm:$0xff] }
 0xea0   :  { %4167 = vmatpush.msrb.mxu2 %v8425_v41  ;;  %v7999_v41 = vld [vmem:[%s13883_s11 + $0x1e] sm:$0x3] }
 0xea1   :  { %v4061_v42 = vpop.permute.xlu0 %4060 }
 0xea2   :  { %v4095_v30 = vmul.f32 %v4061_v42, %v14394_v36  ;;  %4168 = vmatpush.msrb.mxu2 %v8426_v50  ;;  %v4218_v50 = vperm.slane %v7999_v41, 0  ;;  %v8941_v42 = vld [vmem:[%s13883_s11 + $0x1a] sm:$0x3] }
 0xea4   :  { %4169 = vmatpush.msrb.mxu2 %v8435_v39  ;;  %4145 = vrot.lane.b32.xlu2 %v4095_v30, %s8979_s23  ;;  %v2841_v39 = vperm.slane %v8941_v42, 1  ;;  %v14402_v30 = vld [vmem:[#allocation58_spill] sm:$0xff] }
 0xea6   :  { %4170 = vmatpush.msrb.mxu2 %v8436_v16  ;;  %v2891_v16 = vadd.f32 %v14402_v30, %v2841_v39 }
 0xea9   :  { %v8439_v46 = vpop.permute.xlu0 %8438 }
 0xeaa   :  { %v8440_v45 = vunpack.i.l.bf16 %v8439_v46  ;;  %v8441_v40 = vunpack.i.h.bf16 %v8439_v46 }
 0xeac   :  { %4171 = vmatpush.msrb.mxu2 %v8440_v45 }
 0xeae   :  { %4172 = vmatpush.msrb.mxu2 %v8441_v40  ;;  %v14403_v40 = vld [vmem:[#allocation61_spill] sm:$0xff] }
 0xeb0   :  { %4173 = vmatpush.msrb.mxu2 %v8445_v58  ;;  %v2894_v58 = vadd.f32 %v14403_v40, %v2841_v39 }
 0xeb1   :  { %v8449_v20 = vpop.permute.xlu0 %8448 }
 0xeb2   :  { %v8450_v19 = vunpack.i.l.bf16 %v8449_v20  ;;  %4174 = vmatpush.msrb.mxu2 %v8446_v5  ;;  %v8451_v48 = vunpack.i.h.bf16 %v8449_v20 }
 0xeb4   :  { %4175 = vmatpush.msrb.mxu2 %v8450_v19 }
 0xeb6   :  { %4176 = vmatpush.msrb.mxu2 %v8451_v48 }
 0xeb8   :  { %4177 = vmatpush.msrb.mxu2 %v8455_v22 }
 0xeb9   :  { %v8459_v35 = vpop.permute.xlu0 %8458 }
 0xeba   :  { %v8460_v47 = vunpack.i.l.bf16 %v8459_v35  ;;  %4178 = vmatpush.msrb.mxu2 %v8456_v61  ;;  %v8461_v38 = vunpack.i.h.bf16 %v8459_v35  ;;  %v8005_v61 = vld [vmem:[%s13879_s7 + $0x28] sm:$0xff]  ;;  %v8004_v35 = vld [vmem:[%s13879_s7 + $0x20] sm:$0xff] }
 0xebc   :  { %4179 = vmatpush.msrb.mxu2 %v8460_v47 }
 0xebe   :  { %4180 = vmatpush.msrb.mxu2 %v8461_v38 }
 0xebf   :  { %7994 = vmatmul.msk.f32.vlgmr.msrb.gmra.mxu2 %vm11512_vm2, %v14068_v37 }
 0xec7   :  { %7995 = vmatmul.msk.f32.gmra.mxu2 %vm11586_vm12, %v14068_v37 }
 0xefe   :  { %v4146_v52 = vpop.permute.xlu2 %4145 }
 0xeff   :  { %7996 = vmatpush.msk.msra.mxu2 %vm14395_vm8, %v4146_v52 }
 0xf00   :  { %7997 = vmatmul.msk.f32.vlgmr.msra.gmra.mxu2 %vm14396_vm6, %v11906_v7 }
 0xf01   :  { %4238 = vmatpush.msrb.mxu2 %v4214_v15 }
 0xf03   :  { %4239 = vmatpush.msrb.mxu2 %v4213_v14 }
 0xf05   :  { %4240 = vmatpush.msrb.mxu2 %v4212_v27 }
 0xf07   :  { %4241 = vmatpush.msrb.mxu2 %v4211_v25 }
 0xf08   :  { %7998 = vmatmul.msk.f32.gmra.mxu2 %vm14397_vm0, %v11935_v9 }
 0xf09   :  { %4332 = vmatpush.msra.mxu2 %v8007_v4 }
 0xf0b   :  { %4333 = vmatpush.msra.mxu2 %v8006_v28 }
 0xf0d   :  { %4334 = vmatpush.msra.mxu2 %v8005_v61  ;;  %v14408_v61 = vld [vmem:[#allocation5_spill] sm:$0xff] }
 0xf0f   :  { %4335 = vmatpush.msra.mxu2 %v8004_v35 }
 0xf42   :  { %v4182_v60 = vpop.f32.mrf.mxu2 }
 0xf4a   :  { %v4185_v53 = vpop.f32.mrf.mxu2 }
 0xf83   :  { %v4205_v56 = vpop.f32.mrf.mxu2 }
 0xf84   :  { %v12113_v10 = vadd.f32 %v4205_v56, %v4182_v60 }
 0xf86   :  { %4289 = vrot.lane.b32.xlu0 %v12113_v10, %s8979_s23  ;;  %8000 = vmatmul.msk.f32.vlgmr.msrb.gmra.mxu2 %vm14398_vm9, %v12113_v10 }
 0xf8b   :  { %v4208_v55 = vpop.f32.mrf.mxu2 }
 0xf8c   :  { %v12119_v62 = vadd.f32 %v4208_v55, %v4185_v53 }
 0xf8e   :  { %4291 = vrot.lane.b32.xlu2 %v12119_v62, %s8979_s23  ;;  %8001 = vmatmul.msk.f32.gmra.mxu2 %vm14399_vm10, %v12119_v62 }
 0xfe8   :  { %v4292_v34 = vpop.permute.xlu2 %4291 }
 0xfe9   :  { %v4296_v49 = vsub.f32 %v14400_v12, %v4292_v34 }
 0xfeb   :  { %4301 = vrot.lane.b32.xlu2 %v4296_v49, %s8985_s28 }
 0xff8   :  { %v4290_v21 = vpop.permute.xlu0 %4289 }
 0xff9   :  { %v4295_v8 = vsub.f32 %v14401_v44, %v4290_v21 }
 0xffb   :  { %4299 = vrot.lane.b32.xlu0 %v4295_v8, %s8985_s28 }
0x1009   :  { %v4243_v51 = vpop.f32.mrf.mxu2 }
0x100a   :  { %v4244_v36 = vadd.f32 %v4243_v51, %v4218_v50 }
0x100c   :  { %v4249_v45 = vadd.f32 %v4244_v36, %v2891_v16 }
0x100e   :  { %v8002_v5 = vmul.f32 -1.442695, %v4249_v45 }
0x1010   :  { %8753 = vpow2.f32 %v8002_v5 }
0x1011   :  { %v4246_v46 = vpop.f32.mrf.mxu2 }
0x1012   :  { %v4247_v57 = vadd.f32 %v4246_v46, %v4218_v50  ;;  %v8010_v46 = vld [vmem:[%s13883_s11 + $0x20] sm:$0x3] }
0x1013   :  { %v4348_v45 = vperm.slane %v8010_v46, 0  ;;  %v4459_v46 = vld [vmem:[%s13881_s9 + $0x48] sm:$0xff] }
0x1014   :  { %v4250_v20 = vadd.f32 %v4247_v57, %v2894_v58 }
0x1016   :  { %v8003_v19 = vmul.f32 -1.442695, %v4250_v20  ;;  %v8754_v3 = vpop.eup %8753  ;;  %v8943_v20 = vld [vmem:[%s13875_s3 + $0x8] sm:$0xf] }
0x1017   :  { %v4257_v48 = vadd.f32 1.0, %v8754_v3 }
0x1018   :  { %8755 = vpow2.f32 %v8003_v19 }
0x1019   :  { %8757 = vrcp.f32 %v4257_v48  ;;  %v4270_v56 = vand.u32 2147483648, %v4257_v48  ;;  %vm4264_vm11 = vweird.f32 %v4257_v48  ;;  %v4268_v34 = vand.u32 2147483647, %v4257_v48 }
0x101b   :  { %v4271_v49 = vor.u32 1.1754944e-38, %v4270_v56  ;;  %vm4269_vm6 = vcmp.eq.f32.partialorder %v4268_v34, 8.507059e+37  ;;  %v4412_v56 = vld [vmem:[%s13880_s8 + $0x10] sm:$0xff] }
0x101e   :  { %v8756_v22 = vpop.eup %8755 }
0x101f   :  { %v4258_v47 = vadd.f32 1.0, %v8756_v22  ;;  %v8758_v38 = vpop.eup %8757 }
0x1020   :  { %v4260_v52 = vmul.f32 %v8758_v38, %v4257_v48  ;;  %vm4265_vm5 = vweird.f32 %v8758_v38 }
0x1021   :  { %8759 = vrcp.f32 %v4258_v47  ;;  %vm4266_vm1 = vmor %vm4264_vm11, %vm4265_vm5  ;;  %v4285_v44 = vand.u32 2147483648, %v4258_v47  ;;  %vm4279_vm0 = vweird.f32 %v4258_v47  ;;  %v4283_v28 = vand.u32 2147483647, %v4258_v47 }
0x1022   :  { %v4261_v14 = vsub.f32 1.0, %v4260_v52  ;;  %vm14405_vm5 = vmmov %vm14404_vm14  ;;  %vm14407_vm11 = vcmask 257024  }
0x1023   :  { %v4286_v39 = vor.u32 1.1754944e-38, %v4285_v44  ;;  %vm4284_vm10 = vcmp.eq.f32.partialorder %v4283_v28, 8.507059e+37  ;;  %v4465_v44 = vld [vmem:[%s13881_s9 + $0x78] sm:$0xff] }
0x1024   :  { %v4262_v25 = vmul.f32 %v8758_v38, %v4261_v14  ;;  %4466 = vmatpush.msrb.mxu0 %v4465_v44 }
0x1026   :  { %v4263_v53 = vadd.f32 %v8758_v38, %v4262_v25 }
0x1027   :  { %v8760_v15 = vpop.eup %8759 }
0x1028   :  { %v4275_v27 = vmul.f32 %v8760_v15, %v4258_v47  ;;  %v4267_v12 = vsel %vm4266_vm1, %v8758_v38, %v4263_v53  ;;  %vm4280_vm8 = vweird.f32 %v8760_v15  ;;  %vm14409_vm1 = vmmov %vm14405_vm5  ;;  %v4413_v53 = vld [vmem:[%s13880_s8 + $0x18] sm:$0xff] }
0x1029   :  { %v4272_v4 = vsel %vm4269_vm6, %v4271_v49, %v4267_v12  ;;  %vm4281_vm9 = vmor %vm4279_vm0, %vm4280_vm8  ;;  %4437 = vmatpush.msrb.mxu2 %v4413_v53  ;;  %v4410_v12 = vld [vmem:[%s13880_s8] sm:$0xff] }
0x102a   :  { %v4276_v60 = vsub.f32 1.0, %v4275_v27  ;;  %vm14410_vm8 = vmmov %vm14407_vm11 }
0x102b   :  { %4438 = vmatpush.msrb.mxu2 %v4412_v56  ;;  %v4454_v56 = vld [vmem:[%s13881_s9 + $0x20] sm:$0xff] }
0x102c   :  { %v4277_v55 = vmul.f32 %v8760_v15, %v4276_v60 }
0x102e   :  { %v4278_v21 = vadd.f32 %v8760_v15, %v4277_v55  ;;  %v4411_v55 = vld [vmem:[%s13880_s8 + $0x8] sm:$0xff] }
0x102f   :  { %4439 = vmatpush.msrb.mxu2 %v4411_v55 }
0x1030   :  { %v4282_v51 = vsel %vm4281_vm9, %v8760_v15, %v4278_v21 }
0x1031   :  { %v4287_v36 = vsel %vm4284_vm10, %v4286_v39, %v4282_v51  ;;  %4440 = vmatpush.msrb.mxu2 %v4410_v12  ;;  %v4462_v51 = vld [vmem:[%s13881_s9 + $0x60] sm:$0xff]  ;;  %v4461_v39 = vld [vmem:[%s13881_s9 + $0x58] sm:$0xff] }
0x1032   :  { %v4453_v12 = vld [vmem:[%s13881_s9 + $0x18] sm:$0xff] }
0x1045   :  { %v4302_v42 = vpop.permute.xlu2 %4301 }
0x1046   :  { %v4306_v30 = vmul.f32 %v4302_v42, %v4287_v36 }
0x1048   :  { %v4308_v16 = vadd.f32 %v4306_v30, %v12119_v62  ;;  %v4460_v30 = vld [vmem:[%s13881_s9 + $0x50] sm:$0xff] }
0x106d   :  { %v4300_v8 = vpop.permute.xlu0 %4299 }
0x106e   :  { %v4305_v41 = vmul.f32 %v4300_v8, %v4272_v4  ;;  %v4464_v8 = vld [vmem:[%s13881_s9 + $0x70] sm:$0xff]  ;;  %v4463_v4 = vld [vmem:[%s13881_s9 + $0x68] sm:$0xff] }
0x106f   :  { %4467 = vmatpush.msrb.mxu0 %v4464_v8 }
0x1070   :  { %v4307_v50 = vadd.f32 %v4305_v41, %v12113_v10  ;;  %v8942_v10 = vld [vmem:[%s13875_s3] sm:$0xff] }
0x1071   :  { %4468 = vmatpush.msrb.mxu0 %v4463_v4  ;;  %v4452_v4 = vld [vmem:[%s13881_s9 + $0x10] sm:$0xff] }
0x1072   :  { %8008 = vmatmul.msk.f32.vlgmr.msra.gmra.mxu2 %vm14404_vm14, %v4307_v50  ;;  %vm14406_vm14 = vmmov %vm14405_vm5 }
0x1073   :  { %4469 = vmatpush.msrb.mxu0 %v4462_v51 }
0x1075   :  { %4470 = vmatpush.msrb.mxu0 %v4461_v39 }
0x1077   :  { %4471 = vmatpush.msrb.mxu0 %v4460_v30 }
0x1079   :  { %4472 = vmatpush.msrb.mxu0 %v4459_v46  ;;  %v8016_v46 = vld [vmem:[%s13883_s11 + $0x22] sm:$0x3] }
0x107a   :  { %8009 = vmatmul.msk.f32.gmra.mxu2 %vm14405_vm5, %v4308_v16 }
0x10f5   :  { %v4337_v57 = vpop.f32.mrf.mxu2 }
0x10f6   :  { %v4343_v40 = vadd.f32 %v8942_v10, %v4337_v57  ;;  %v4458_v57 = vld [vmem:[%s13881_s9 + $0x40] sm:$0xff]  ;;  %v8011_v10 = vld [vmem:[%s13883_s11 + $0x28] sm:$0x3] }
0x10f7   :  { %4473 = vmatpush.msrb.mxu0 %v4458_v57 }
0x10f8   :  { %v12159_v58 = vadd.f32 %v4348_v45, %v4343_v40 }
0x10fa   :  { %v4356_v5 = vsel %vm14406_vm14, %v12159_v58, 0.0 }
0x10fb   :  { %4357 = vadd.xlane.f32.xlu1 %v4356_v5 }
0x10fd   :  { %v4340_v62 = vpop.f32.mrf.mxu2 }
0x10fe   :  { %v4344_v19 = vadd.f32 %v8943_v20, %v4340_v62  ;;  %v4457_v62 = vld [vmem:[%s13881_s9 + $0x38] sm:$0xff]  ;;  %v8012_v20 = vld [vmem:[%s13883_s11 + $0x2a] sm:$0x3] }
0x10ff   :  { %4474 = vmatpush.msrb.mxu0 %v4457_v62 }
0x1100   :  { %v12166_v3 = vadd.f32 %v4348_v45, %v4344_v19 }
0x1102   :  { %v4359_v48 = vsel %vm14407_vm11, %v12166_v3, 0.0  ;;  %vm14411_vm11 = vmmov %vm14409_vm1 }
0x1103   :  { %4360 = vadd.xlane.f32.xlu0 %v4359_v48 }
0x116e   :  { %v4358_v22 = vpop.xlane.xlu1 %4357 }
0x116f   :  { %v4362_v35 = vmul.f32 %v4358_v22, %v14408_v61  ;;  %v4401_v22 = vperm.slane %v8011_v10, 0 }
0x1171   :  { %v4364_v47 = vsub.f32 %v12159_v58, %v4362_v35  ;;  %v4456_v35 = vld [vmem:[%s13881_s9 + $0x30] sm:$0xff] }
0x1172   :  { %4475 = vmatpush.msrb.mxu0 %v4456_v35 }
0x1173   :  { %v4366_v38 = vmul.f32 %v4364_v47, %v4364_v47 }
0x1175   :  { %v4368_v52 = vsel %vm14409_vm1, %v4366_v38, 0.0 }
0x1176   :  { %4369 = vadd.xlane.f32.xlu2 %v4368_v52  ;;  %v4361_v15 = vpop.xlane.xlu0 %4360 }
0x1177   :  { %v4363_v14 = vmul.f32 %v4361_v15, %v14408_v61  ;;  %v4406_v15 = vperm.slane %v8012_v20, 0 }
0x1179   :  { %v12175_v27 = vsub.f32 %v12166_v3, %v4363_v14 }
0x117b   :  { %v4367_v25 = vmul.f32 %v12175_v27, %v12175_v27 }
0x117d   :  { %v4371_v60 = vsel %vm14410_vm8, %v4367_v25, 0.0  ;;  %v4455_v25 = vld [vmem:[%s13881_s9 + $0x28] sm:$0xff]  ;;  %vm14413_vm8 = vmmov %vm14409_vm1 }
0x117e   :  { %4372 = vadd.xlane.f32.xlu1 %v4371_v60  ;;  %4476 = vmatpush.msrb.mxu0 %v4455_v25 }
0x1180   :  { %4477 = vmatpush.msrb.mxu0 %v4454_v56  ;;  %v14419_v56 = vld [vmem:[#allocation29_spill] sm:$0xff] }
0x1182   :  { %4478 = vmatpush.msrb.mxu0 %v4453_v12  ;;  %v14422_v12 = vld [vmem:[#allocation50_spill] sm:$0xff] }
0x1184   :  { %4479 = vmatpush.msrb.mxu0 %v4452_v4 }
0x11e9   :  { %v4370_v34 = vpop.xlane.xlu2 %4369 }
0x11ea   :  { %v4374_v49 = vmul.f32 %v4370_v34, %v14408_v61 }
0x11ec   :  { %v4376_v21 = vadd.f32 1e-05, %v4374_v49 }
0x11ee   :  { %8761 = vrsqrt.f32 %v4376_v21  ;;  %vm4384_vm0 = vweird.f32 %v4376_v21 }
0x11f1   :  { %v4373_v28 = vpop.xlane.xlu1 %4372 }
0x11f2   :  { %v4375_v41 = vmul.f32 %v4373_v28, %v14408_v61  ;;  %v4451_v28 = vld [vmem:[%s13881_s9 + $0x8] sm:$0xff] }
0x11f3   :  { %4480 = vmatpush.msrb.mxu0 %v4451_v28  ;;  %v8019_v28 = vld [vmem:[%s13877_s5 + $0x40] sm:$0xff] }
0x11f4   :  { %v8762_v50 = vpop.eup %8761  ;;  %v4377_v42 = vadd.f32 1e-05, %v4375_v41  ;;  %v4450_v41 = vld [vmem:[%s13881_s9] sm:$0xff] }
0x11f5   :  { %v4379_v36 = vmul.f32 %v8762_v50, %v4376_v21  ;;  %vm4385_vm6 = vweird.f32 %v8762_v50  ;;  %4481 = vmatpush.msrb.mxu0 %v4450_v41 }
0x11f6   :  { %8763 = vrsqrt.f32 %v4377_v42  ;;  %vm4386_vm9 = vmor %vm4384_vm0, %vm4385_vm6  ;;  %vm4394_vm5 = vweird.f32 %v4377_v42  ;;  %vm14415_vm6 = vcmask 257024  }
0x11f7   :  { %v4380_v16 = vmul.f32 %v8762_v50, %v4379_v36  ;;  %vm14416_vm0 = vmmov %vm14409_vm1 }
0x11f9   :  { %v4381_v45 = vmul.f32 0.5, %v4380_v16 }
0x11fb   :  { %v4382_v40 = vsub.f32 1.5, %v4381_v45  ;;  %v4494_v45 = vperm.slane %v8016_v46, 0  ;;  %v8020_v46 = vld [vmem:[%s13877_s5 + $0x48] sm:$0xff] }
0x11fc   :  { %v8764_v5 = vpop.eup %8763 }
0x11fd   :  { %v4383_v19 = vmul.f32 %v8762_v50, %v4382_v40  ;;  %v4389_v48 = vmul.f32 %v8764_v5, %v4377_v42  ;;  %vm4395_vm10 = vweird.f32 %v8764_v5 }
0x11fe   :  { %vm4396_vm14 = vmor %vm4394_vm5, %vm4395_vm10 }
0x11ff   :  { %v4387_v38 = vsel %vm4386_vm9, %v8762_v50, %v4383_v19  ;;  %v4390_v52 = vmul.f32 %v8764_v5, %v4389_v48  ;;  %vm14417_vm9 = vmmov %vm14415_vm6 }
0x1200   :  { %v4398_v14 = vmul.f32 %v4387_v38, %v4364_v47 }
0x1201   :  { %v4391_v60 = vmul.f32 0.5, %v4390_v52 }
0x1202   :  { %v4403_v53 = vmul.f32 %v4401_v22, %v4398_v14 }
0x1203   :  { %v4392_v55 = vsub.f32 1.5, %v4391_v60 }
0x1204   :  { %v4408_v34 = vadd.f32 %v4406_v15, %v4403_v53  ;;  %v14418_v53 = vld [vmem:[#allocation25_spill] sm:$0xff] }
0x1205   :  { %v4393_v47 = vmul.f32 %v8764_v5, %v4392_v55  ;;  %v14420_v55 = vld [vmem:[#allocation38_spill] sm:$0xff] }
0x1206   :  { %8014 = vmatmul.msk.f32.vlgmr.msrb.gmra.mxu2 %vm14411_vm11, %v4408_v34  ;;  %v14421_v34 = vld [vmem:[#allocation44_spill] sm:$0xff] }
0x1207   :  { %v4397_v49 = vsel %vm4396_vm14, %v8764_v5, %v4393_v47  ;;  %v14423_v47 = vld [vmem:[#allocation56_spill] sm:$0xff] }
0x1208   :  { %v4399_v21 = vmul.f32 %v4397_v49, %v12175_v27  ;;  %v8013_v27 = vld [vmem:[%s13883_s11 + $0x1c] sm:$0x3] }
0x1209   :  { %v4417_v51 = vperm.slane %v8013_v27, 0  ;;  %v14424_v49 = vld [vmem:[#allocation64_spill] sm:$0xff] }
0x120a   :  { %v4404_v44 = vmul.f32 %v4401_v22, %v4399_v21  ;;  %v8025_v21 = vld [vmem:[%s13877_s5 + $0x70] sm:$0xff] }
0x120b   :  { %4590 = vmatpush.msra.mxu2 %v8025_v21 }
0x120c   :  { %v4409_v8 = vadd.f32 %v4406_v15, %v4404_v44  ;;  %v8023_v44 = vld [vmem:[%s13877_s5 + $0x60] sm:$0xff] }
0x120d   :  { %4591 = vmatpush.msra.mxu2 %v8023_v44 }
0x120e   :  { %8015 = vmatmul.msk.f32.gmra.mxu2 %vm14409_vm1, %v4409_v8  ;;  %v8021_v8 = vld [vmem:[%s13877_s5 + $0x50] sm:$0xff] }
0x120f   :  { %4592 = vmatpush.msra.mxu2 %v8021_v8 }
0x1211   :  { %4593 = vmatpush.msra.mxu2 %v8019_v28 }
0x1289   :  { %v4442_v50 = vpop.f32.mrf.mxu2 }
0x128a   :  { %v4443_v42 = vadd.f32 %v4442_v50, %v4417_v51  ;;  %v8024_v50 = vld [vmem:[%s13877_s5 + $0x68] sm:$0xff] }
0x128c   :  { %v4448_v39 = vmax.f32 %v4443_v42, 0.0  ;;  %v8022_v42 = vld [vmem:[%s13877_s5 + $0x58] sm:$0xff] }
0x128e   :  { %4482 = vmatmul.f32.vlgmr.msrb.gmra.mxu0 %v4448_v39 }
0x1291   :  { %v4445_v36 = vpop.f32.mrf.mxu2 }
0x1292   :  { %v4446_v30 = vadd.f32 %v4445_v36, %v4417_v51  ;;  %v8026_v51 = vld [vmem:[%s13877_s5 + $0x78] sm:$0xff] }
0x1293   :  { %4613 = vmatpush.msrb.mxu2 %v8026_v51  ;;  %v14434_v51 = vld [vmem:[#allocation33_spill] sm:$0xff] }
0x1294   :  { %v4449_v16 = vmax.f32 %v4446_v30, 0.0 }
0x1295   :  { %4614 = vmatpush.msrb.mxu2 %v8024_v50  ;;  %v14436_v50 = vld [vmem:[#allocation48_spill] sm:$0xff] }
0x1296   :  { %4485 = vmatmul.f32.gmra.mxu0 %v4449_v16 }
0x1297   :  { %4615 = vmatpush.msrb.mxu2 %v8022_v42  ;;  %v14437_v42 = vld [vmem:[#allocation40_spill] sm:$0xff] }
0x1299   :  { %4616 = vmatpush.msrb.mxu2 %v8020_v46  ;;  %v14445_v46 = vld [vmem:[#allocation59_spill] sm:$0xff] }
0x130b   :  { %v4483_v57 = vpop.f32.mrf.mxu0 }
0x130c   :  { %v4489_v10 = vadd.f32 %v4483_v57, %v12159_v58 }
0x130e   :  { %v12258_v40 = vadd.f32 %v4494_v45, %v4489_v10 }
0x1310   :  { %14412 = vst [vmem:[#allocation57_spill] sm:$0xff] %v12258_v40  ;;  %v4502_v5 = vsel %vm14413_vm8, %v12258_v40, 0.0 }
0x1311   :  { %4503 = vadd.xlane.f32.xlu0 %v4502_v5  ;;  %v8017_v5 = vld [vmem:[%s13883_s11 + $0x36] sm:$0x3] }
0x1313   :  { %v4486_v62 = vpop.f32.mrf.mxu0 }
0x1314   :  { %v4490_v20 = vadd.f32 %v4486_v62, %v12166_v3 }
0x1316   :  { %v12263_v19 = vadd.f32 %v4494_v45, %v4490_v20 }
0x1318   :  { %14414 = vst [vmem:[#allocation55_spill] sm:$0xff] %v12263_v19  ;;  %v4505_v48 = vsel %vm14415_vm6, %v12263_v19, 0.0  ;;  %vm14425_vm6 = vmmov %vm14416_vm0 }
0x1319   :  { %4506 = vadd.xlane.f32.xlu2 %v4505_v48  ;;  %v8018_v48 = vld [vmem:[%s13883_s11 + $0x38] sm:$0x3] }
0x1384   :  { %v4504_v22 = vpop.xlane.xlu0 %4503 }
0x1385   :  { %v4508_v35 = vmul.f32 %v4504_v22, %v14408_v61 }
0x1387   :  { %v4510_v58 = vsub.f32 %v12258_v40, %v4508_v35 }
0x1389   :  { %v4512_v38 = vmul.f32 %v4510_v58, %v4510_v58 }
0x138b   :  { %v4514_v52 = vsel %vm14416_vm0, %v4512_v38, 0.0  ;;  %v4547_v38 = vperm.slane %v8017_v5, 0  ;;  %v14458_v5 = vld [vmem:[#allocation10_spill] sm:$0xff] }
0x138c   :  { %v4507_v15 = vpop.xlane.xlu2 %4506  ;;  %4515 = vadd.xlane.f32.xlu1 %v4514_v52 }
0x138d   :  { %v4509_v14 = vmul.f32 %v4507_v15, %v14408_v61 }
0x138f   :  { %v12272_v3 = vsub.f32 %v12263_v19, %v4509_v14  ;;  %v4552_v14 = vperm.slane %v8018_v48, 0  ;;  %v14466_v48 = vld [vmem:[#allocation13_spill] sm:$0xff] }
0x1391   :  { %v4513_v25 = vmul.f32 %v12272_v3, %v12272_v3 }
0x1393   :  { %v4517_v60 = vsel %vm14417_vm9, %v4513_v25, 0.0  ;;  %vm14426_vm9 = vmmov %vm14416_vm0 }
0x1394   :  { %4518 = vadd.xlane.f32.xlu0 %v4517_v60 }
0x13a8   :  { %4718 = vrot.lane.b32.xlu0 %v14418_v53, %s8986_s1 }
0x13b0   :  { %4720 = vrot.lane.b32.xlu0 %v14419_v56, %s8986_s1 }
0x13b8   :  { %4726 = vrot.lane.b32.xlu0 %v14420_v55, %s8986_s1 }
0x13c0   :  { %4732 = vrot.lane.b32.xlu0 %v14421_v34, %s8986_s1 }
0x13c8   :  { %4738 = vrot.lane.b32.xlu0 %v14422_v12, %s8986_s1 }
0x13d0   :  { %4744 = vrot.lane.b32.xlu0 %v14423_v47, %s8986_s1 }
0x13d8   :  { %4750 = vrot.lane.b32.xlu0 %v14424_v49, %s8986_s1 }
0x13ff   :  { %v4516_v4 = vpop.xlane.xlu1 %4515 }
0x1400   :  { %v4520_v41 = vmul.f32 %v4516_v4, %v14408_v61 }
0x1402   :  { %v4522_v27 = vadd.f32 1e-05, %v4520_v41  ;;  %v14430_v41 = vld [vmem:[#allocation36_spill] sm:$0xff] }
0x1404   :  { %8765 = vrsqrt.f32 %v4522_v27  ;;  %vm4530_vm5 = vweird.f32 %v4522_v27 }
0x1407   :  { %v4519_v39 = vpop.xlane.xlu0 %4518 }
0x1408   :  { %v4521_v36 = vmul.f32 %v4519_v39, %v14408_v61  ;;  %v14439_v39 = vld [vmem:[#allocation54_spill] sm:$0xff] }
0x140a   :  { %v8766_v30 = vpop.eup %8765  ;;  %v4523_v16 = vadd.f32 1e-05, %v4521_v36  ;;  %v14440_v36 = vld [vmem:[#allocation46_spill] sm:$0xff] }
0x140b   :  { %v4525_v45 = vmul.f32 %v8766_v30, %v4522_v27  ;;  %vm4531_vm10 = vweird.f32 %v8766_v30  ;;  %v14433_v27 = vld [vmem:[#allocation42_spill] sm:$0xff] }
0x140c   :  { %8767 = vrsqrt.f32 %v4523_v16  ;;  %vm4532_vm14 = vmor %vm4530_vm5, %vm4531_vm10  ;;  %vm4540_vm1 = vweird.f32 %v4523_v16  ;;  %vm14431_vm5 = vcmask 1043456  }
0x140d   :  { %v4526_v57 = vmul.f32 %v8766_v30, %v4525_v45  ;;  %vm14427_vm10 = vmmov %vm14416_vm0 }
0x140f   :  { %v4527_v10 = vmul.f32 0.5, %v4526_v57 }
0x1411   :  { %v4528_v62 = vsub.f32 1.5, %v4527_v10  ;;  %v14455_v10 = vld [vmem:[#allocation9_spill] sm:$0xff] }
0x1412   :  { %v8768_v20 = vpop.eup %8767 }
0x1413   :  { %v4529_v22 = vmul.f32 %v8766_v30, %v4528_v62  ;;  %v4535_v35 = vmul.f32 %v8768_v20, %v4523_v16  ;;  %vm4541_vm11 = vweird.f32 %v8768_v20  ;;  %v14443_v16 = vld [vmem:[#allocation52_spill] sm:$0xff]  ;;  %v14461_v62 = vld [vmem:[#allocation11_spill] sm:$0xff] }
0x1414   :  { %vm4542_vm8 = vmor %vm4540_vm1, %vm4541_vm11 }
0x1415   :  { %v4533_v52 = vsel %vm4532_vm14, %v8766_v30, %v4529_v22  ;;  %v4536_v15 = vmul.f32 %v8768_v20, %v4535_v35  ;;  %vm14432_vm14 = vcmask 97280   ;;  %v14442_v30 = vld [vmem:[#allocation62_spill] sm:$0xff]  ;;  %v14469_v35 = vld [vmem:[#allocation15_spill] sm:$0xff] }
0x1416   :  { %v4544_v25 = vmul.f32 %v4533_v52, %v4510_v58  ;;  %v8027_v58 = vld [vmem:[%s13883_s11 + $0x2c] sm:$0x3]  ;;  %vm14435_vm11 = vmmov %vm14432_vm14  ;;  %v14473_v52 = vld [vmem:[#allocation17_spill] sm:$0xff] }
0x1417   :  { %v4537_v60 = vmul.f32 0.5, %v4536_v15  ;;  %v4568_v44 = vperm.slane %v8027_v58, 0  ;;  %vm14438_vm1 = vmmov %vm14435_vm11  ;;  %v14468_v22 = vld [vmem:[#allocation14_spill] sm:$0xff] }
0x1418   :  { %v4549_v53 = vmul.f32 %v4547_v38, %v4544_v25  ;;  %v14475_v15 = vld [vmem:[#allocation18_spill] sm:$0xff]  ;;  %v14479_v25 = vld [vmem:[#allocation20_spill] sm:$0xff] }
0x1419   :  { %v4538_v56 = vsub.f32 1.5, %v4537_v60  ;;  %v14481_v60 = vld [vmem:[#allocation21_spill] sm:$0xff] }
0x141a   :  { %v4554_v55 = vadd.f32 %v4552_v14, %v4549_v53 }
0x141b   :  { %v4539_v34 = vmul.f32 %v8768_v20, %v4538_v56  ;;  %v14483_v56 = vld [vmem:[#allocation22_spill] sm:$0xff] }
0x141c   :  { %8028 = vmatmul.msk.f32.vlgmr.msra.gmra.mxu2 %vm14425_vm6, %v4554_v55  ;;  %vm14444_vm6 = vmmov %vm14438_vm1 }
0x141d   :  { %v4543_v12 = vsel %vm4542_vm8, %v8768_v20, %v4539_v34  ;;  %vm14441_vm8 = vmmov %vm14438_vm1  ;;  %v14464_v20 = vld [vmem:[#allocation12_spill] sm:$0xff] }
0x141e   :  { %v4545_v47 = vmul.f32 %v4543_v12, %v12272_v3  ;;  %v14485_v34 = vld [vmem:[#allocation24_spill] sm:$0xff]  ;;  %v14486_v12 = vld [vmem:[#allocation26_spill] sm:$0xff] }
0x1420   :  { %v4550_v49 = vmul.f32 %v4547_v38, %v4545_v47  ;;  %v14471_v38 = vld [vmem:[#allocation16_spill] sm:$0xff] }
0x1422   :  { %v4555_v21 = vadd.f32 %v4552_v14, %v4550_v49  ;;  %v14477_v14 = vld [vmem:[#allocation19_spill] sm:$0xff]  ;;  %v14488_v49 = vld [vmem:[#allocation30_spill] sm:$0xff] }
0x1424   :  { %8029 = vmatmul.msk.f32.gmra.mxu2 %vm14416_vm0, %v4555_v21  ;;  %vm14446_vm0 = vmmov %vm14438_vm1 }
0x142c   :  { %8030 = vmatmul.msk.f32.vlgmr.msrb.gmra.mxu2 %vm14426_vm9, %v4554_v55  ;;  %vm14447_vm9 = vmmov %vm14446_vm0 }
0x1434   :  { %8031 = vmatmul.msk.f32.gmra.mxu2 %vm14427_vm10, %v4555_v21  ;;  %vm14448_vm10 = vmmov %vm14446_vm0  ;;  %v4719_v21 = vpop.permute.xlu0 %4718 }
0x149f   :  { %v4595_v8 = vpop.f32.mrf.mxu2 }
0x14a0   :  { %v12331_v4 = vadd.f32 %v4595_v8, %v4568_v44 }
0x14a2   :  { %14428 = vst [vmem:[#allocation53_spill] sm:$0xff] %v12331_v4  ;;  %4696 = vrot.lane.b32.xlu1 %v12331_v4, %s8979_s23 }
0x14a7   :  { %v4598_v3 = vpop.f32.mrf.mxu2 }
0x14a8   :  { %v12335_v28 = vadd.f32 %v4598_v3, %v4568_v44 }
0x14aa   :  { %14429 = vst [vmem:[#allocation51_spill] sm:$0xff] %v12335_v28  ;;  %4724 = vrot.lane.b32.xlu1 %v14430_v41, %s8986_s1  ;;  %4698 = vrot.lane.b32.xlu2 %v12335_v28, %s8979_s23  ;;  %v4721_v41 = vpop.permute.xlu0 %4720 }
0x14ab   :  { %8032 = vmatpush.msk.msra.mxu0 %vm14431_vm5, %v12335_v28  ;;  %vm14449_vm5 = vmmov %vm14446_vm0  ;;  %v14533_v28 = vld [vmem:[#allocation72_spill] sm:$0xff] }
0x14ad   :  { %4642 = vmatpush.msra.mxu0 %v12331_v4 }
0x14ae   :  { %8033 = vmatmul.msk.f32.vlgmr.msra.gmra.mxu0 %vm14432_vm14, %v10981_v0  ;;  %vm14450_vm14 = vmmov %vm14446_vm0 }
0x14b2   :  { %4730 = vrot.lane.b32.xlu1 %v14433_v27, %s8986_s1  ;;  %4722 = vrot.lane.b32.xlu2 %v14434_v51, %s8986_s1 }
0x14b6   :  { %8034 = vmatmul.msk.f32.gmra.mxu0 %vm14435_vm11, %v11002_v31  ;;  %vm14451_vm11 = vmmov %vm14446_vm0 }
0x14ba   :  { %4736 = vrot.lane.b32.xlu1 %v14436_v50, %s8986_s1  ;;  %4728 = vrot.lane.b32.xlu2 %v14437_v42, %s8986_s1 }
0x14be   :  { %8035 = vmatmul.msk.f32.gmra.mxu0 %vm14438_vm1, %v11020_v11  ;;  %vm14452_vm1 = vcmask 1043456  }
0x14c2   :  { %4742 = vrot.lane.b32.xlu1 %v14439_v39, %s8986_s1  ;;  %4734 = vrot.lane.b32.xlu2 %v14440_v36, %s8986_s1 }
0x14c6   :  { %8036 = vmatmul.msk.f32.gmra.mxu0 %vm14441_vm8, %v11041_v29  ;;  %vm14453_vm8 = vmmov %vm14446_vm0 }
0x14ca   :  { %4748 = vrot.lane.b32.xlu1 %v14442_v30, %s8986_s1  ;;  %4740 = vrot.lane.b32.xlu2 %v14443_v16, %s8986_s1 }
0x14ce   :  { %8037 = vmatmul.msk.f32.gmra.mxu0 %vm14444_vm6, %v11060_v2  ;;  %vm14454_vm6 = vmmov %vm14446_vm0 }
0x14d2   :  { %4746 = vrot.lane.b32.xlu2 %v14445_v46, %s8986_s1 }
0x14d6   :  { %8038 = vmatmul.msk.f32.gmra.mxu0 %vm14446_vm0, %v11078_v18 }
0x14de   :  { %8039 = vmatmul.msk.f32.gmra.mxu0 %vm14447_vm9, %v11097_v54  ;;  %vm14456_vm9 = vmmov %vm14446_vm0 }
0x14e6   :  { %8040 = vmatmul.msk.f32.gmra.mxu0 %vm14448_vm10, %v11107_v24  ;;  %vm14457_vm10 = vmmov %vm14446_vm0 }
0x14ee   :  { %8041 = vmatmul.msk.f32.gmra.mxu0 %vm14449_vm5, %v11124_v1  ;;  %vm14459_vm5 = vmmov %vm14446_vm0 }
0x14f6   :  { %8042 = vmatmul.msk.f32.gmra.mxu0 %vm14450_vm14, %v11170_v43  ;;  %vm14460_vm14 = vmmov %vm14446_vm0 }
0x14fe   :  { %8043 = vmatmul.msk.f32.gmra.mxu0 %vm14451_vm11, %v11212_v33  ;;  %vm14462_vm11 = vmmov %vm14446_vm0 }
0x1504   :  { %v4699_v45 = vpop.permute.xlu2 %4698 }
0x1505   :  { %8050 = vmatpush.msk.msra.mxu3 %vm14452_vm1, %v4699_v45  ;;  %vm14463_vm1 = vmmov %vm14446_vm0 }
0x1506   :  { %8044 = vmatmul.msk.f32.gmra.mxu0 %vm14453_vm8, %v11237_v6  ;;  %vm14465_vm8 = vmmov %vm14446_vm0 }
0x150c   :  { %v4723_v39 = vpop.permute.xlu2 %4722 }
0x150e   :  { %8045 = vmatmul.msk.f32.gmra.mxu0 %vm14454_vm6, %v11247_v17  ;;  %vm14467_vm6 = vmmov %vm14446_vm0 }
0x1514   :  { %v4697_v57 = vpop.permute.xlu1 %4696 }
0x1515   :  { %4786 = vmatpush.msra.mxu3 %v4697_v57 }
0x1516   :  { %8046 = vmatmul.msk.f32.gmra.mxu0 %vm14446_vm0, %v11267_v59  ;;  %8051 = vmatmul.msk.f32.vlgmr.msra.gmra.mxu3 %vm14456_vm9, %v14455_v10  ;;  %vm14470_vm9 = vmmov %vm14446_vm0 }
0x151c   :  { %v4725_v45 = vpop.permute.xlu1 %4724 }
0x151e   :  { %8047 = vmatmul.msk.f32.gmra.mxu0 %vm14457_vm10, %v11290_v13  ;;  %8052 = vmatmul.msk.f32.gmra.mxu3 %vm14459_vm5, %v14458_v5  ;;  %vm14472_vm10 = vmmov %vm14446_vm0 }
0x151f   :  { %vm14474_vm5 = vmmov %vm14446_vm0 }
0x1526   :  { %8048 = vmatmul.msk.f32.gmra.mxu0 %vm14460_vm14, %v14358_v32  ;;  %8053 = vmatmul.msk.f32.gmra.mxu3 %vm14462_vm11, %v14461_v62  ;;  %vm14476_vm14 = vmmov %vm14446_vm0 }
0x1527   :  { %vm14478_vm11 = vmmov %vm14446_vm0 }
0x152b   :  { %v4644_v53 = vpop.f32.mrf.mxu0 }
0x152e   :  { %8049 = vmatmul.msk.f32.gmra.mxu0 %vm14463_vm1, %v14360_v63  ;;  %8054 = vmatmul.msk.f32.gmra.mxu3 %vm14465_vm8, %v14464_v20  ;;  %vm14480_vm1 = vmmov %vm14446_vm0 }
0x152f   :  { %vm14482_vm8 = vmmov %vm14446_vm0 }
0x1533   :  { %v4647_v55 = vpop.f32.mrf.mxu0 }
0x1536   :  { %8055 = vmatmul.msk.f32.gmra.mxu3 %vm14467_vm6, %v14466_v48  ;;  %vm14484_vm6 = vmmov %vm14446_vm0 }
0x153b   :  { %v4650_v47 = vpop.f32.mrf.mxu0 }
0x153e   :  { %8056 = vmatmul.msk.f32.gmra.mxu3 %vm14446_vm0, %v14468_v22 }
0x1543   :  { %v4653_v58 = vpop.f32.mrf.mxu0 }
0x1546   :  { %8057 = vmatmul.msk.f32.gmra.mxu3 %vm14470_vm9, %v14469_v35  ;;  %vm14487_vm9 = vmmov %vm14446_vm0 }
0x154b   :  { %v4656_v50 = vpop.f32.mrf.mxu0 }
0x154e   :  { %8058 = vmatmul.msk.f32.gmra.mxu3 %vm14472_vm10, %v14471_v38  ;;  %vm14489_vm10 = vmmov %vm14446_vm0 }
0x1553   :  { %v4659_v46 = vpop.f32.mrf.mxu0 }
0x1556   :  { %8059 = vmatmul.msk.f32.gmra.mxu3 %vm14474_vm5, %v14473_v52  ;;  %vm14491_vm5 = vcmask 261120  }
0x155e   :  { %8060 = vmatmul.msk.f32.gmra.mxu3 %vm14476_vm14, %v14475_v15  ;;  %vm14493_vm14 = vmmov %vm14491_vm5 }
0x1566   :  { %8061 = vmatmul.msk.f32.gmra.mxu3 %vm14478_vm11, %v14477_v14  ;;  %vm14495_vm11 = vmmov %vm14491_vm5 }
0x156e   :  { %8062 = vmatmul.msk.f32.gmra.mxu3 %vm14480_vm1, %v14479_v25  ;;  %vm14497_vm1 = vmmov %vm14491_vm5 }
0x1576   :  { %8063 = vmatmul.msk.f32.gmra.mxu3 %vm14482_vm8, %v14481_v60  ;;  %vm14499_vm8 = vmmov %vm14497_vm1 }
0x157e   :  { %8064 = vmatmul.msk.f32.gmra.mxu3 %vm14484_vm6, %v14483_v56  ;;  %vm14501_vm6 = vmmov %vm14497_vm1 }
0x1586   :  { %8065 = vmatmul.msk.f32.gmra.mxu3 %vm14446_vm0, %v14485_v34  ;;  %vm14503_vm0 = vmmov %vm14497_vm1 }
0x158e   :  { %8066 = vmatmul.msk.f32.gmra.mxu3 %vm14487_vm9, %v14486_v12  ;;  %vm14505_vm9 = vmmov %vm14503_vm0 }
0x1596   :  { %8067 = vmatmul.msk.f32.gmra.mxu3 %vm14489_vm10, %v14488_v49  ;;  %vm14507_vm10 = vmmov %vm14503_vm0 }
0x1599   :  { %v4788_v44 = vpop.f32.mrf.mxu3 }
0x159a   :  { %v12431_v8 = vadd.f32 %v4788_v44, %v4719_v21  ;;  %v4727_v44 = vpop.permute.xlu0 %4726 }
0x159c   :  { %14490 = vst [vmem:[#allocation60_spill] sm:$0xff] %v12431_v8  ;;  %v4839_v3 = vmul.f32 %v12431_v8, %v4644_v53 }
0x159e   :  { %8068 = vmatmul.msk.f32.vlgmr.msrb.gmra.mxu1 %vm14491_vm5, %v4839_v3  ;;  %vm14509_vm5 = vmmov %vm14503_vm0 }
0x15a1   :  { %v4791_v27 = vpop.f32.mrf.mxu3 }
0x15a2   :  { %v12435_v51 = vadd.f32 %v4791_v27, %v4721_v41 }
0x15a4   :  { %14492 = vst [vmem:[#allocation63_spill] sm:$0xff] %v12435_v51  ;;  %v4840_v42 = vmul.f32 %v12435_v51, %v4647_v55  ;;  %v4662_v55 = vpop.f32.mrf.mxu0 }
0x15a6   :  { %8069 = vmatmul.msk.f32.gmra.mxu1 %vm14493_vm14, %v4840_v42  ;;  %vm14511_vm14 = vmmov %vm14503_vm0 }
0x15a9   :  { %v4794_v36 = vpop.f32.mrf.mxu3 }
0x15aa   :  { %v12439_v30 = vadd.f32 %v4794_v36, %v4723_v39 }
0x15ac   :  { %14494 = vst [vmem:[#allocation43_spill] sm:$0xff] %v12439_v30  ;;  %v4841_v16 = vmul.f32 %v12439_v30, %v4650_v47  ;;  %v4729_v47 = vpop.permute.xlu2 %4728  ;;  %v4665_v42 = vpop.f32.mrf.mxu0 }
0x15ae   :  { %8070 = vmatmul.msk.f32.gmra.mxu1 %vm14495_vm11, %v4841_v16  ;;  %vm14513_vm11 = vmmov %vm14503_vm0 }
0x15b1   :  { %v4797_v57 = vpop.f32.mrf.mxu3 }
0x15b2   :  { %v12443_v53 = vadd.f32 %v4797_v57, %v4725_v45 }
0x15b4   :  { %14496 = vst [vmem:[#allocation45_spill] sm:$0xff] %v12443_v53  ;;  %v4842_v21 = vmul.f32 %v12443_v53, %v4653_v58  ;;  %v4731_v58 = vpop.permute.xlu1 %4730 }
0x15b6   :  { %8071 = vmatmul.msk.f32.gmra.mxu1 %vm14497_vm1, %v4842_v21  ;;  %v4668_v21 = vpop.f32.mrf.mxu0  ;;  %vm14515_vm1 = vmmov %vm14503_vm0 }
0x15b9   :  { %v4800_v3 = vpop.f32.mrf.mxu3 }
0x15ba   :  { %v12447_v41 = vadd.f32 %v4800_v3, %v4727_v44 }
0x15bc   :  { %14498 = vst [vmem:[#allocation49_spill] sm:$0xff] %v12447_v41  ;;  %v4843_v27 = vmul.f32 %v12447_v41, %v4656_v50  ;;  %v4733_v50 = vpop.permute.xlu0 %4732 }
0x15be   :  { %8072 = vmatmul.msk.f32.gmra.mxu1 %vm14499_vm8, %v4843_v27  ;;  %vm14517_vm8 = vmmov %vm14503_vm0 }
0x15c1   :  { %v4803_v39 = vpop.f32.mrf.mxu3 }
0x15c2   :  { %v12451_v36 = vadd.f32 %v4803_v39, %v4729_v47  ;;  %v4671_v39 = vpop.f32.mrf.mxu0 }
0x15c4   :  { %14500 = vst [vmem:[#allocation47_spill] sm:$0xff] %v12451_v36  ;;  %v4844_v16 = vmul.f32 %v12451_v36, %v4659_v46  ;;  %v4735_v46 = vpop.permute.xlu2 %4734 }
0x15c6   :  { %8073 = vmatmul.msk.f32.gmra.mxu1 %vm14501_vm6, %v4844_v16  ;;  %vm14519_vm6 = vmmov %vm14503_vm0 }
0x15c9   :  { %v4806_v45 = vpop.f32.mrf.mxu3 }
0x15ca   :  { %v12455_v57 = vadd.f32 %v4806_v45, %v4731_v58  ;;  %v4737_v45 = vpop.permute.xlu1 %4736 }
0x15cc   :  { %14502 = vst [vmem:[#allocation41_spill] sm:$0xff] %v12455_v57  ;;  %v4845_v44 = vmul.f32 %v12455_v57, %v4662_v55  ;;  %v4674_v55 = vpop.f32.mrf.mxu0 }
0x15ce   :  { %8074 = vmatmul.msk.f32.gmra.mxu1 %vm14503_vm0, %v4845_v44 }
0x15d1   :  { %v4809_v3 = vpop.f32.mrf.mxu3 }
0x15d2   :  { %v12459_v27 = vadd.f32 %v4809_v3, %v4733_v50 }
0x15d4   :  { %14504 = vst [vmem:[#allocation39_spill] sm:$0xff] %v12459_v27  ;;  %v4846_v47 = vmul.f32 %v12459_v27, %v4665_v42  ;;  %v4739_v42 = vpop.permute.xlu0 %4738  ;;  %v4677_v3 = vpop.f32.mrf.mxu0  ;;  %v14530_v27 = vld [vmem:[#allocation71_spill] sm:$0xff] }
0x15d6   :  { %8075 = vmatmul.msk.f32.gmra.mxu1 %vm14505_vm9, %v4846_v47  ;;  %vm14522_vm9 = vmmov %vm14503_vm0 }
0x15d9   :  { %v4812_v16 = vpop.f32.mrf.mxu3 }
0x15da   :  { %v12463_v37 = vadd.f32 %v4812_v16, %v4735_v46 }
0x15dc   :  { %14506 = vst [vmem:[#allocation35_spill] sm:$0xff] %v12463_v37  ;;  %v4847_v58 = vmul.f32 %v12463_v37, %v4668_v21  ;;  %v4741_v21 = vpop.permute.xlu2 %4740  ;;  %v4680_v34 = vpop.f32.mrf.mxu0 }
0x15de   :  { %8076 = vmatmul.msk.f32.gmra.mxu1 %vm14507_vm10, %v4847_v58  ;;  %vm14527_vm10 = vcmask 31744  }
0x15e1   :  { %v4815_v44 = vpop.f32.mrf.mxu3 }
0x15e2   :  { %v12467_v49 = vadd.f32 %v4815_v44, %v4737_v45 }
0x15e4   :  { %14508 = vst [vmem:[#allocation37_spill] sm:$0xff] %v12467_v49  ;;  %v4848_v50 = vmul.f32 %v12467_v49, %v4671_v39  ;;  %v4743_v39 = vpop.permute.xlu1 %4742 }
0x15e6   :  { %8077 = vmatmul.msk.f32.gmra.mxu1 %vm14509_vm5, %v4848_v50  ;;  %vm14528_vm5 = vmmov %vm14527_vm10 }
0x15e9   :  { %v4818_v47 = vpop.f32.mrf.mxu3 }
0x15ea   :  { %v12471_v12 = vadd.f32 %v4818_v47, %v4739_v42  ;;  %v4683_v47 = vpop.f32.mrf.mxu0 }
0x15ec   :  { %14510 = vst [vmem:[#allocation28_spill] sm:$0xff] %v12471_v12  ;;  %v4849_v46 = vmul.f32 %v12471_v12, %v4674_v55  ;;  %v4745_v55 = vpop.permute.xlu0 %4744 }
0x15ee   :  { %8078 = vmatmul.msk.f32.gmra.mxu1 %vm14511_vm14, %v4849_v46  ;;  %vm14531_vm14 = vnez %v14530_v27 }
0x15f1   :  { %v4821_v16 = vpop.f32.mrf.mxu3 }
0x15f2   :  { %v12475_v58 = vadd.f32 %v4821_v16, %v4741_v21  ;;  %v4747_v16 = vpop.permute.xlu2 %4746 }
0x15f4   :  { %14512 = vst [vmem:[#allocation32_spill] sm:$0xff] %v12475_v58  ;;  %v4850_v45 = vmul.f32 %v12475_v58, %v4677_v3  ;;  %v4686_v3 = vpop.f32.mrf.mxu0 }
0x15f6   :  { %8079 = vmatmul.msk.f32.gmra.mxu1 %vm14513_vm11, %v4850_v45  ;;  %vm14532_vm11 = vmmov %vm14528_vm5 }
0x15f9   :  { %v4824_v44 = vpop.f32.mrf.mxu3 }
0x15fa   :  { %v12479_v50 = vadd.f32 %v4824_v44, %v4743_v39 }
0x15fc   :  { %14514 = vst [vmem:[#allocation65_spill] sm:$0xff] %v12479_v50  ;;  %v4851_v42 = vmul.f32 %v12479_v50, %v4680_v34  ;;  %v4749_v34 = vpop.permute.xlu1 %4748  ;;  %v4689_v44 = vpop.f32.mrf.mxu0 }
0x15fe   :  { %8080 = vmatmul.msk.f32.gmra.mxu1 %vm14515_vm1, %v4851_v42  ;;  %vm14534_vm1 = vnez %v14533_v28  ;;  %v14545_v28 = vld [vmem:[#allocation77_spill] sm:$0xff] }
0x1601   :  { %v4827_v46 = vpop.f32.mrf.mxu3 }
0x1602   :  { %v12483_v56 = vadd.f32 %v4827_v46, %v4745_v55 }
0x1604   :  { %14516 = vst [vmem:[#allocation7_spill] sm:$0xff] %v12483_v56  ;;  %v4852_v21 = vmul.f32 %v12483_v56, %v4683_v47  ;;  %v4751_v47 = vpop.permute.xlu0 %4750  ;;  %v4692_v14 = vpop.f32.mrf.mxu0 }
0x1606   :  { %8081 = vmatmul.msk.f32.gmra.mxu1 %vm14517_vm8, %v4852_v21 }
0x1609   :  { %v4830_v45 = vpop.f32.mrf.mxu3 }
0x160a   :  { %v12487_v60 = vadd.f32 %v4830_v45, %v4747_v16 }
0x160c   :  { %14518 = vst [vmem:[#allocation6_spill] sm:$0xff] %v12487_v60  ;;  %v4853_v39 = vmul.f32 %v12487_v60, %v4686_v3 }
0x160e   :  { %8082 = vmatmul.msk.f32.gmra.mxu1 %vm14519_vm6, %v4853_v39  ;;  %vm14537_vm6 = vmmov %vm14528_vm5 }
0x1611   :  { %v4833_v42 = vpop.f32.mrf.mxu3 }
0x1612   :  { %v12491_v25 = vadd.f32 %v4833_v42, %v4749_v34 }
0x1614   :  { %14520 = vst [vmem:[#allocation58_spill] sm:$0xff] %v12491_v25  ;;  %v4854_v55 = vmul.f32 %v12491_v25, %v4689_v44 }
0x1616   :  { %8083 = vmatmul.msk.f32.gmra.mxu1 %vm14503_vm0, %v4854_v55 }
0x1619   :  { %v4836_v46 = vpop.f32.mrf.mxu3 }
0x161a   :  { %v12495_v21 = vadd.f32 %v4836_v46, %v4751_v47 }
0x161b   :  { %v12497_v16 = vpop.f32.mrf.mxu1 }
0x161c   :  { %14521 = vst [vmem:[#allocation61_spill] sm:$0xff] %v12495_v21  ;;  %v4855_v3 = vmul.f32 %v12495_v21, %v4692_v14  ;;  %4975 = vxpose.xlu1.b32.start [1/16] (narrow) %v12497_v16, 8 }
0x161e   :  { %8084 = vmatmul.msk.f32.gmra.mxu1 %vm14522_vm9, %v4855_v3 }
0x1623   :  { %v12502_v45 = vpop.f32.mrf.mxu1 }
0x1624   :  { %4976 = vxpose.xlu1.b32.cont [2/16] (narrow) %v12502_v45, 8 }
0x162b   :  { %v12505_v39 = vpop.f32.mrf.mxu1 }
0x162c   :  { %4977 = vxpose.xlu1.b32.cont [3/16] (narrow) %v12505_v39, 8 }
0x1633   :  { %v12508_v34 = vpop.f32.mrf.mxu1 }
0x1634   :  { %4978 = vxpose.xlu1.b32.cont [4/16] (narrow) %v12508_v34, 8 }
0x163b   :  { %v12511_v44 = vpop.f32.mrf.mxu1 }
0x163c   :  { %4979 = vxpose.xlu1.b32.cont [5/16] (narrow) %v12511_v44, 8 }
0x1643   :  { %v12514_v14 = vpop.f32.mrf.mxu1 }
0x1644   :  { %4980 = vxpose.xlu1.b32.cont [6/16] (narrow) %v12514_v14, 8 }
0x164b   :  { %v12517_v42 = vpop.f32.mrf.mxu1 }
0x164c   :  { %4981 = vxpose.xlu1.b32.cont [7/16] (narrow) %v12517_v42, 8 }
0x1653   :  { %v12520_v55 = vpop.f32.mrf.mxu1 }
0x1654   :  { %4982 = vxpose.xlu1.b32.cont [8/16] (narrow) %v12520_v55, 8 }
0x165b   :  { %v12523_v47 = vpop.f32.mrf.mxu1 }
0x165c   :  { %4983 = vxpose.xlu1.b32.cont [9/16] (narrow) %v12523_v47, 8 }
0x1663   :  { %v12526_v46 = vpop.f32.mrf.mxu1 }
0x1664   :  { %4984 = vxpose.xlu1.b32.cont [10/16] (narrow) %v12526_v46, 8 }
0x166b   :  { %v12529_v3 = vpop.f32.mrf.mxu1 }
0x166c   :  { %4985 = vxpose.xlu1.b32.cont [11/16] (narrow) %v12529_v3, 8 }
0x1673   :  { %v12532_v15 = vpop.f32.mrf.mxu1 }
0x1674   :  { %4986 = vxpose.xlu1.b32.cont [12/16] (narrow) %v12532_v15, 8 }
0x167b   :  { %v12535_v52 = vpop.f32.mrf.mxu1 }
0x167c   :  { %4987 = vxpose.xlu1.b32.cont [13/16] (narrow) %v12535_v52, 8 }
0x1683   :  { %v12538_v38 = vpop.f32.mrf.mxu1 }
0x1684   :  { %4988 = vxpose.xlu1.b32.cont [14/16] (narrow) %v12538_v38, 8 }
0x168b   :  { %v12541_v35 = vpop.f32.mrf.mxu1 }
0x168c   :  { %4989 = vxpose.xlu1.b32.cont [15/16] (narrow) %v12541_v35, 8 }
0x1693   :  { %v12544_v22 = vpop.f32.mrf.mxu1 }
0x1694   :  { %4990 = vxpose.xlu1.b32.end [16/16] (narrow) %v12544_v22, 8 }
0x169b   :  { %v12547_v48 = vpop.f32.mrf.mxu1 }
0x169c   :  { %5007 = vxpose.xlu2.b32.start.end [1/1] (short) (narrow) %v12547_v48, 8 }
0x16c0   :  { %v4991_v20 = vpop.trf.xlu1 }
0x16c1   :  { %v5041_v10 = vsel %vm11549_vm15, %v4991_v20, -1e+30  ;;  %v5039_v19 = vsel %vm11553_vm4, %v4991_v20, -1e+30  ;;  %v5043_v61 = vsel %vm14531_vm14, %v4991_v20, -1e+30 }
0x1735   :  { %v5023_v62 = vpop.trf.xlu2 }
0x1736   :  { %v5042_v4 = vsel %vm11561_vm3, %v5023_v62, -1e+30  ;;  %v5040_v8 = vsel %vm11565_vm7, %v5023_v62, -1e+30  ;;  %v5044_v5 = vsel %vm11592_vm13, %v5023_v62, -1e+30 }
0x1737   :  { %v5067_v51 = vsel %vm14527_vm10, %v5042_v4, -inf  ;;  %v5063_v30 = vsel %vm14528_vm5, %v5040_v8, -inf  ;;  %v5071_v40 = vsel %vm14532_vm11, %v5044_v5, -inf  ;;  %v5046_v41 = vsel %vm14534_vm1, %v5023_v62, -1e+30  ;;  %v14535_v4 = vld [vmem:[#allocation73_spill] sm:$0xff]  ;;  %vm14542_vm10 = vmmov %vm14528_vm5 }
0x1738   :  { %v5068_v53 = vmax.f32 %v5041_v10, %v5067_v51  ;;  %v5064_v21 = vmax.f32 %v5039_v19, %v5063_v30  ;;  %v5072_v36 = vmax.f32 %v5043_v61, %v5071_v40  ;;  %vm14536_vm8 = vnez %v14535_v4  ;;  %v14538_v51 = vld [vmem:[#allocation74_spill] sm:$0xff]  ;;  %v14543_v40 = vld [vmem:[#allocation76_spill] sm:$0xff] }
0x1739   :  { %v5045_v8 = vsel %vm14536_vm8, %v4991_v20, -1e+30  ;;  %v5075_v19 = vsel %vm14537_vm6, %v5046_v41, -inf  ;;  %vm14539_vm0 = vnez %v14538_v51  ;;  %vm14544_vm5 = vnez %v14543_v40  ;;  %vm14547_vm8 = vmmov %vm14537_vm6  ;;  %v14550_v51 = vld [vmem:[#allocation79_spill] sm:$0xff]  ;;  %v14555_v40 = vld [vmem:[#allocation81_spill] sm:$0xff] }
0x173a   :  { %5069 = vmax.xlane.f32.xlu2 %v5068_v53  ;;  %5065 = vmax.xlane.f32.xlu0 %v5064_v21  ;;  %v5076_v10 = vmax.f32 %v5045_v8, %v5075_v19  ;;  %v5056_v30 = vsel %vm14539_vm0, %v5023_v62, -1e+30  ;;  %v14540_v53 = vld [vmem:[#allocation75_spill] sm:$0xff]  ;;  %vm14546_vm11 = vnez %v14545_v28  ;;  %v14548_v19 = vld [vmem:[#allocation78_spill] sm:$0xff]  ;;  %vm14551_vm0 = vnez %v14550_v51 }
0x173b   :  { %vm14541_vm9 = vnez %v14540_v53  ;;  %v5095_v5 = vsel %vm14542_vm10, %v5056_v30, -inf  ;;  %v5057_v4 = vsel %vm14546_vm11, %v4991_v20, -1e+30  ;;  %vm14549_vm6 = vnez %v14548_v19  ;;  %vm14557_vm11 = vmmov %vm14547_vm8  ;;  %v14560_v19 = vld [vmem:[#allocation83_spill] sm:$0xff] }
0x173c   :  { %v5055_v21 = vsel %vm14541_vm9, %v4991_v20, -1e+30  ;;  %v5047_v53 = vsel %vm14551_vm0, %v4991_v20, -1e+30  ;;  %vm14552_vm9 = vmmov %vm14547_vm8 }
0x173d   :  { %v5096_v61 = vmax.f32 %v5055_v21, %v5095_v5  ;;  %v14553_v5 = vld [vmem:[#allocation80_spill] sm:$0xff]  ;;  %vm14562_vm0 = vmmov %vm14552_vm9 }
0x173e   :  { %vm14554_vm10 = vnez %v14553_v5  ;;  %v14565_v5 = vld [vmem:[#allocation85_spill] sm:$0xff] }
0x1742   :  { %5073 = vmax.xlane.f32.xlu0 %v5072_v36  ;;  %v5058_v36 = vsel %vm14544_vm5, %v5023_v62, -1e+30  ;;  %vm14556_vm5 = vnez %v14555_v40 }
0x1743   :  { %v5099_v41 = vsel %vm14547_vm8, %v5058_v36, -inf  ;;  %v5059_v28 = vsel %vm14556_vm5, %v4991_v20, -1e+30  ;;  %vm14567_vm5 = vmmov %vm14562_vm0 }
0x1744   :  { %v5100_v8 = vmax.f32 %v5057_v4, %v5099_v41  ;;  %v14558_v41 = vld [vmem:[#allocation82_spill] sm:$0xff] }
0x1745   :  { %vm14559_vm8 = vnez %v14558_v41  ;;  %v14570_v41 = vld [vmem:[#allocation87_spill] sm:$0xff] }
0x174a   :  { %5077 = vmax.xlane.f32.xlu0 %v5076_v10  ;;  %v5048_v10 = vsel %vm14549_vm6, %v5023_v62, -1e+30  ;;  %vm14561_vm6 = vnez %v14560_v19 }
0x174b   :  { %v5079_v30 = vsel %vm14552_vm9, %v5048_v10, -inf  ;;  %v5049_v51 = vsel %vm14561_vm6, %v4991_v20, -1e+30  ;;  %vm14572_vm6 = vmmov %vm14562_vm0 }
0x174c   :  { %v5080_v21 = vmax.f32 %v5047_v53, %v5079_v30  ;;  %v14563_v30 = vld [vmem:[#allocation84_spill] sm:$0xff] }
0x174d   :  { %vm14564_vm9 = vnez %v14563_v30  ;;  %v14575_v30 = vld [vmem:[#allocation89_spill] sm:$0xff] }
0x1752   :  { %5097 = vmax.xlane.f32.xlu0 %v5096_v61  ;;  %v5060_v61 = vsel %vm14554_vm10, %v5023_v62, -1e+30  ;;  %vm14566_vm10 = vnez %v14565_v5 }
0x1753   :  { %v5103_v36 = vsel %vm14557_vm11, %v5060_v61, -inf  ;;  %v5061_v40 = vsel %vm14566_vm10, %v4991_v20, -1e+30  ;;  %vm14577_vm10 = vmmov %vm14567_vm5 }
0x1754   :  { %v5104_v4 = vmax.f32 %v5059_v28, %v5103_v36  ;;  %v14568_v36 = vld [vmem:[#allocation86_spill] sm:$0xff] }
0x1755   :  { %vm14569_vm11 = vnez %v14568_v36  ;;  %v14578_v36 = vld [vmem:[#allocation8_spill] sm:$0xff] }
0x175a   :  { %5101 = vmax.xlane.f32.xlu0 %v5100_v8  ;;  %v5050_v8 = vsel %vm14559_vm8, %v5023_v62, -1e+30  ;;  %vm14571_vm8 = vnez %v14570_v41 }
0x175b   :  { %v5083_v10 = vsel %vm14562_vm0, %v5050_v8, -inf  ;;  %v5051_v19 = vsel %vm14571_vm8, %v4991_v20, -1e+30  ;;  %vm14587_vm8 = vcmask 1045509  }
0x175c   :  { %v5084_v53 = vmax.f32 %v5049_v51, %v5083_v10  ;;  %v14573_v10 = vld [vmem:[#allocation88_spill] sm:$0xff] }
0x175d   :  { %vm14574_vm0 = vnez %v14573_v10 }
0x1762   :  { %5081 = vmax.xlane.f32.xlu0 %v5080_v21  ;;  %v5062_v21 = vsel %vm14564_vm9, %v5023_v62, -1e+30  ;;  %vm14576_vm9 = vnez %v14575_v30 }
0x1763   :  { %v5107_v61 = vsel %vm14567_vm5, %v5062_v21, -inf  ;;  %v5053_v5 = vsel %vm14576_vm9, %v4991_v20, -1e+30  ;;  %vm14579_vm5 = vcmask 1041409   ;;  %vm14584_vm9 = vcmask 1043456  }
0x1764   :  { %v5108_v28 = vmax.f32 %v5061_v40, %v5107_v61 }
0x176a   :  { %5105 = vmax.xlane.f32.xlu0 %v5104_v4  ;;  %v5052_v4 = vsel %vm14569_vm11, %v5023_v62, -1e+30 }
0x176b   :  { %v5087_v8 = vsel %vm14572_vm6, %v5052_v4, -inf  ;;  %vm14580_vm6 = vcmask 1042434  }
0x176c   :  { %v5088_v51 = vmax.f32 %v5051_v19, %v5087_v8 }
0x1772   :  { %5085 = vmax.xlane.f32.xlu0 %v5084_v53  ;;  %v5054_v53 = vsel %vm14574_vm0, %v5023_v62, -1e+30 }
0x1773   :  { %v5091_v21 = vsel %vm14577_vm10, %v5054_v53, -inf  ;;  %vm14581_vm10 = vmmov %vm14579_vm5 }
0x1774   :  { %v5092_v40 = vmax.f32 %v5053_v5, %v5091_v21 }
0x177a   :  { %5109 = vmax.xlane.f32.xlu0 %v5108_v28 }
0x1782   :  { %5089 = vmax.xlane.f32.xlu0 %v5088_v51 }
0x178a   :  { %5093 = vmax.xlane.f32.xlu0 %v5092_v40 }
0x17ad   :  { %v5066_v61 = vpop.xlane.xlu0 %5065  ;;  %v5070_v28 = vpop.xlane.xlu2 %5069 }
0x17ae   :  { %v5124_v27 = vperm.slane %v5070_v28, %v14578_v36  ;;  %v5123_v41 = vperm.slane %v5066_v61, %v14578_v36 }
0x17b0   :  { %v5135_v4 = vsel %vm14579_vm5, %v5124_v27, %v5123_v41  ;;  %vm14582_vm5 = vmmov %vm14580_vm6 }
0x17b5   :  { %v5074_v57 = vpop.xlane.xlu0 %5073 }
0x17b6   :  { %v5125_v19 = vperm.slane %v5074_v57, %v14578_v36 }
0x17b8   :  { %v5136_v62 = vsel %vm14580_vm6, %v5125_v19, %v5135_v4  ;;  %vm14583_vm6 = vcmask 1043459  }
0x17b9   :  { %vm14585_vm0 = vmmov %vm14583_vm6 }
0x17bd   :  { %v5078_v8 = vpop.xlane.xlu0 %5077 }
0x17be   :  { %v5126_v4 = vperm.slane %v5078_v8, %v14578_v36 }
0x17c0   :  { %v5137_v12 = vsel %vm14585_vm0, %v5126_v4, %v5136_v62 }
0x17c5   :  { %v5098_v51 = vpop.xlane.xlu0 %5097 }
0x17c6   :  { %v5131_v28 = vperm.slane %v5098_v51, %v14578_v36 }
0x17cd   :  { %v5102_v20 = vpop.xlane.xlu0 %5101 }
0x17ce   :  { %v5132_v21 = vperm.slane %v5102_v20, %v14578_v36 }
0x17d0   :  { %v5142_v10 = vsel %vm14581_vm10, %v5132_v21, %v5131_v28  ;;  %vm14586_vm10 = vcmask 1044484  }
0x17d5   :  { %v5082_v30 = vpop.xlane.xlu0 %5081 }
0x17d6   :  { %v5127_v20 = vperm.slane %v5082_v30, %v14578_v36  ;;  %v8944_v30 = vld [vmem:[%s13876_s4 + $0x88] sm:$0xff] }
0x17d8   :  { %v5138_v21 = vsel %vm14586_vm10, %v5127_v20, %v5137_v12  ;;  %v12666_v12 = vpop.f32.mrf.mxu2 }
0x17d9   :  { %14604 = vst [vmem:[#allocation25_spill] sm:$0xff] %v12666_v12 }
0x17dd   :  { %v5106_v53 = vpop.xlane.xlu0 %5105 }
0x17de   :  { %v5133_v40 = vperm.slane %v5106_v53, %v14578_v36 }
0x17e0   :  { %v5143_v27 = vsel %vm14582_vm5, %v5133_v40, %v5142_v10  ;;  %vm14588_vm5 = vcmask 1046534   ;;  %v12670_v62 = vpop.f32.mrf.mxu2 }
0x17e1   :  { %14605 = vst [vmem:[#allocation29_spill] sm:$0xff] %v12670_v62 }
0x17e5   :  { %v5086_v5 = vpop.xlane.xlu0 %5085 }
0x17e6   :  { %v5128_v53 = vperm.slane %v5086_v5, %v14578_v36 }
0x17e8   :  { %v5139_v10 = vsel %vm14587_vm8, %v5128_v53, %v5138_v21 }
0x17ed   :  { %v5110_v61 = vpop.xlane.xlu0 %5109 }
0x17ee   :  { %v5134_v57 = vperm.slane %v5110_v61, %v14578_v36 }
0x17f0   :  { %v5144_v41 = vsel %vm14583_vm6, %v5134_v57, %v5143_v27  ;;  %vm14590_vm6 = vcmask 97280  }
0x17f1   :  { %8085 = vmatpush.msk.msra.mxu2 %vm14584_vm9, %v5144_v41  ;;  %vm14589_vm9 = vcmask 1047559   ;;  %vm14591_vm0 = vmmov %vm14590_vm6 }
0x17f2   :  { %vm14592_vm8 = vmmov %vm14591_vm0 }
0x17f3   :  { %vm14593_vm10 = vmmov %vm14591_vm0 }
0x17f4   :  { %vm14597_vm11 = vmmov %vm14591_vm0 }
0x17f5   :  { %v5090_v19 = vpop.xlane.xlu0 %5089 }
0x17f6   :  { %v5129_v51 = vperm.slane %v5090_v19, %v14578_v36 }
0x17f8   :  { %v5140_v61 = vsel %vm14588_vm5, %v5129_v51, %v5139_v10  ;;  %vm14594_vm5 = vmmov %vm14591_vm0 }
0x17fd   :  { %v5094_v28 = vpop.xlane.xlu0 %5093 }
0x17fe   :  { %v5130_v40 = vperm.slane %v5094_v28, %v14578_v36 }
0x1800   :  { %v5141_v57 = vsel %vm14589_vm9, %v5130_v40, %v5140_v61  ;;  %vm14595_vm9 = vmmov %vm14591_vm0 }
0x1801   :  { %5163 = vmatpush.msra.mxu2 %v5141_v57 }
0x1802   :  { %8086 = vmatmul.msk.f32.vlgmr.msra.gmra.mxu2 %vm14590_vm6, %v10981_v0  ;;  %vm14596_vm6 = vmmov %vm14591_vm0 }
0x1803   :  { %5538 = vmatpush.msrb.mxu2 %v8944_v30 }
0x180a   :  { %8087 = vmatmul.msk.f32.gmra.mxu2 %vm14591_vm0, %v11002_v31 }
0x1812   :  { %8088 = vmatmul.msk.f32.gmra.mxu2 %vm14592_vm8, %v11020_v11  ;;  %vm14598_vm8 = vmmov %vm14591_vm0 }
0x181a   :  { %8089 = vmatmul.msk.f32.gmra.mxu2 %vm14593_vm10, %v11041_v29  ;;  %vm14599_vm10 = vmmov %vm14591_vm0 }
0x1822   :  { %8090 = vmatmul.msk.f32.gmra.mxu2 %vm14594_vm5, %v11060_v2  ;;  %vm14600_vm5 = vmmov %vm14591_vm0 }
0x182a   :  { %8091 = vmatmul.msk.f32.gmra.mxu2 %vm14595_vm9, %v11078_v18  ;;  %vm14601_vm9 = vmmov %vm14591_vm0 }
0x1832   :  { %8092 = vmatmul.msk.f32.gmra.mxu2 %vm14596_vm6, %v11097_v54  ;;  %vm14602_vm6 = vmmov %vm14591_vm0 }
0x183a   :  { %8093 = vmatmul.msk.f32.gmra.mxu2 %vm14597_vm11, %v11107_v24  ;;  %vm14603_vm11 = vmmov %vm14591_vm0 }
0x1842   :  { %8094 = vmatmul.msk.f32.gmra.mxu2 %vm14591_vm0, %v11124_v1 }
0x184a   :  { %8095 = vmatmul.msk.f32.gmra.mxu2 %vm14598_vm8, %v11170_v43  ;;  %vm14606_vm8 = vmmov %vm14591_vm0 }
0x1852   :  { %8096 = vmatmul.msk.f32.gmra.mxu2 %vm14599_vm10, %v11212_v33  ;;  %vm14607_vm10 = vcmask 1043456  }
0x185a   :  { %8097 = vmatmul.msk.f32.gmra.mxu2 %vm14600_vm5, %v11237_v6  ;;  %vm14608_vm5 = vcmask 31744  }
0x1862   :  { %8098 = vmatmul.msk.f32.gmra.mxu2 %vm14601_vm9, %v11247_v17  ;;  %vm14609_vm9 = vmmov %vm14608_vm5 }
0x186a   :  { %8099 = vmatmul.msk.f32.gmra.mxu2 %vm14602_vm6, %v11267_v59  ;;  %vm14611_vm6 = vmmov %vm14607_vm10 }
0x1872   :  { %8100 = vmatmul.msk.f32.gmra.mxu2 %vm14603_vm11, %v11290_v13  ;;  %vm14612_vm11 = vmmov %vm14591_vm0 }
0x187a   :  { %8101 = vmatmul.msk.f32.gmra.mxu2 %vm14591_vm0, %v14358_v32 }
0x1882   :  { %8102 = vmatmul.msk.f32.gmra.mxu2 %vm14606_vm8, %v14360_v63  ;;  %vm14613_vm8 = vmmov %vm14591_vm0 }
0x1885   :  { %v12674_v8 = vpop.f32.mrf.mxu2 }
0x188d   :  { %v12676_v5 = vpop.f32.mrf.mxu2 }
0x1895   :  { %v12678_v27 = vpop.f32.mrf.mxu2 }
0x189d   :  { %v12680_v41 = vpop.f32.mrf.mxu2 }
0x18a5   :  { %v12682_v19 = vpop.f32.mrf.mxu2 }
0x18ad   :  { %v5180_v4 = vpop.f32.mrf.mxu2 }
0x18b5   :  { %v5183_v20 = vpop.f32.mrf.mxu2 }
0x18bd   :  { %v5186_v53 = vpop.f32.mrf.mxu2 }
0x18c5   :  { %v5189_v51 = vpop.f32.mrf.mxu2 }
0x18cd   :  { %v5192_v21 = vpop.f32.mrf.mxu2 }
0x18d5   :  { %v5195_v28 = vpop.f32.mrf.mxu2 }
0x18d6   :  { %v5226_v50 = vsub.f32 %v12529_v3, %v5195_v28 }
0x18dd   :  { %v5198_v10 = vpop.f32.mrf.mxu2 }
0x18de   :  { %v5227_v49 = vsub.f32 %v12532_v15, %v5198_v10  ;;  %v14610_v10 = vmov 1.0  }
0x18e0   :  { %v5255_v63 = vmul.f32 1.442695, %v5227_v49 }
0x18e5   :  { %v5201_v40 = vpop.f32.mrf.mxu2 }
0x18e6   :  { %v5228_v58 = vsub.f32 %v12535_v52, %v5201_v40  ;;  %v5224_v52 = vsub.f32 %v12523_v47, %v5189_v51  ;;  %v5220_v47 = vsub.f32 %v12511_v44, %v12682_v19 }
0x18e8   :  { %v5257_v56 = vmul.f32 1.442695, %v5228_v58 }
0x18ed   :  { %v5204_v61 = vpop.f32.mrf.mxu2 }
0x18ee   :  { %v5229_v62 = vsub.f32 %v12538_v38, %v5204_v61 }
0x18f0   :  { %v5259_v37 = vmul.f32 1.442695, %v5229_v62  ;;  %v5241_v62 = vmul.f32 1.442695, %v5220_v47 }
0x18f5   :  { %v5207_v57 = vpop.f32.mrf.mxu2 }
0x18f6   :  { %v5230_v30 = vsub.f32 %v12541_v35, %v5207_v57  ;;  %v5225_v35 = vsub.f32 %v12526_v46, %v5192_v21 }
0x18f8   :  { %v5261_v25 = vmul.f32 1.442695, %v5230_v30  ;;  %v5251_v49 = vmul.f32 1.442695, %v5225_v35 }
0x18fd   :  { %v5210_v36 = vpop.f32.mrf.mxu2 }
0x18fe   :  { %v5231_v12 = vsub.f32 %v12544_v22, %v5210_v36  ;;  %v5253_v36 = vmul.f32 1.442695, %v5226_v50 }
0x1900   :  { %v5263_v60 = vmul.f32 1.442695, %v5231_v12  ;;  %v5218_v12 = vsub.f32 %v12505_v39, %v12678_v27 }
0x1902   :  { %8769 = vpow2.f32 %v5263_v60 }
0x1903   :  { %8771 = vpow2.f32 %v5261_v25  ;;  %v5223_v25 = vsub.f32 %v12520_v55, %v5186_v53  ;;  %v5237_v53 = vmul.f32 1.442695, %v5218_v12 }
0x1904   :  { %8773 = vpow2.f32 %v5259_v37 }
0x1905   :  { %v5213_v32 = vpop.f32.mrf.mxu2  ;;  %8775 = vpow2.f32 %v5257_v56  ;;  %v5247_v58 = vmul.f32 1.442695, %v5223_v25  ;;  %v8948_v25 = vld [vmem:[%s13876_s4 + $0x68] sm:$0xff] }
0x1906   :  { %v5232_v38 = vsub.f32 %v12547_v48, %v5213_v32  ;;  %8777 = vpow2.f32 %v5255_v63  ;;  %v5222_v32 = vsub.f32 %v12517_v42, %v5183_v20  ;;  %v5249_v48 = vmul.f32 1.442695, %v5224_v52  ;;  %v8945_v52 = vld [vmem:[%s13876_s4 + $0x80] sm:$0xff] }
0x1907   :  { %v5221_v63 = vsub.f32 %v12514_v14, %v5180_v4  ;;  %v5219_v14 = vsub.f32 %v12508_v34, %v12680_v41  ;;  %v5217_v34 = vsub.f32 %v12502_v45, %v12676_v5  ;;  %v5216_v20 = vsub.f32 %v12497_v16, %v12674_v8 }
0x1908   :  { %v12692_v22 = vpop.eup %8769  ;;  %v5265_v15 = vmul.f32 1.442695, %v5232_v38  ;;  %v5245_v42 = vmul.f32 1.442695, %v5222_v32 }
0x1909   :  { %5270 = vmatpush.msrb.mxu0 %v12692_v22  ;;  %v12696_v60 = vpop.eup %8771  ;;  %v5243_v3 = vmul.f32 1.442695, %v5221_v63  ;;  %v5239_v41 = vmul.f32 1.442695, %v5219_v14  ;;  %v5235_v27 = vmul.f32 1.442695, %v5217_v34 }
0x190a   :  { %8779 = vpow2.f32 %v5265_v15  ;;  %v12700_v37 = vpop.eup %8773  ;;  %v5233_v5 = vmul.f32 1.442695, %v5216_v20  ;;  %v8947_v15 = vld [vmem:[%s13876_s4 + $0x70] sm:$0xff] }
0x190b   :  { %5271 = vmatpush.msrb.mxu0 %v12696_v60  ;;  %8781 = vpow2.f32 %v5253_v36  ;;  %v12704_v56 = vpop.eup %8775  ;;  %v8946_v36 = vld [vmem:[%s13876_s4 + $0x78] sm:$0xff] }
0x190c   :  { %8783 = vpow2.f32 %v5251_v49  ;;  %v12707_v50 = vpop.eup %8777  ;;  %v14625_v49 = vld [vmem:[#allocation31_spill] sm:$0xff] }
0x190d   :  { %5272 = vmatpush.msrb.mxu0 %v12700_v37  ;;  %8785 = vpow2.f32 %v5249_v48  ;;  %v14626_v48 = vld [vmem:[#allocation34_spill] sm:$0xff] }
0x190e   :  { %8787 = vpow2.f32 %v5247_v58 }
0x190f   :  { %5273 = vmatpush.msrb.mxu0 %v12704_v56  ;;  %8789 = vpow2.f32 %v5245_v42 }
0x1910   :  { %v12710_v55 = vpop.eup %8779  ;;  %8791 = vpow2.f32 %v5243_v3 }
0x1911   :  { %5274 = vmatpush.msrb.mxu0 %v12707_v50  ;;  %8105 = vmatpush.msk.msrb.mxu3 %vm14607_vm10, %v12710_v55  ;;  %v12717_v46 = vpop.eup %8781  ;;  %8793 = vpow2.f32 %v5241_v62  ;;  %vm14614_vm10 = vmmov %vm14591_vm0 }
0x1912   :  { %8106 = vmatmul.msk.f32.vlgmr.msrb.gmra.mxu3 %vm14608_vm5, %v11906_v7  ;;  %v12724_v44 = vpop.eup %8783  ;;  %8795 = vpow2.f32 %v5239_v41  ;;  %vm14615_vm5 = vmmov %vm14591_vm0 }
0x1913   :  { %5275 = vmatpush.msrb.mxu0 %v12717_v46  ;;  %v12729_v19 = vpop.eup %8785  ;;  %8797 = vpow2.f32 %v5237_v53 }
0x1914   :  { %v12734_v4 = vpop.eup %8787  ;;  %8799 = vpow2.f32 %v5235_v27 }
0x1915   :  { %5276 = vmatpush.msrb.mxu0 %v12724_v44  ;;  %v12739_v39 = vpop.eup %8789  ;;  %8801 = vpow2.f32 %v5233_v5 }
0x1916   :  { %v12744_v45 = vpop.eup %8791 }
0x1917   :  { %5277 = vmatpush.msrb.mxu0 %v12729_v19  ;;  %v12747_v16 = vpop.eup %8793 }
0x1918   :  { %v12750_v8 = vpop.eup %8795 }
0x1919   :  { %5278 = vmatpush.msrb.mxu0 %v12734_v4  ;;  %v12753_v51 = vpop.eup %8797 }
0x191a   :  { %8107 = vmatmul.msk.f32.gmra.mxu3 %vm14609_vm9, %v11935_v9  ;;  %v8800_v21 = vpop.eup %8799  ;;  %vm14616_vm9 = vmmov %vm14591_vm0 }
0x191b   :  { %5279 = vmatpush.msrb.mxu0 %v12739_v39  ;;  %v8802_v28 = vpop.eup %8801 }
0x191d   :  { %5280 = vmatpush.msrb.mxu0 %v12744_v45 }
0x191f   :  { %5281 = vmatpush.msrb.mxu0 %v12747_v16 }
0x1921   :  { %5282 = vmatpush.msrb.mxu0 %v12750_v8 }
0x1923   :  { %5283 = vmatpush.msrb.mxu0 %v12753_v51 }
0x1925   :  { %5284 = vmatpush.msrb.mxu0 %v8800_v21 }
0x1927   :  { %5285 = vmatpush.msrb.mxu0 %v8802_v28 }
0x1928   :  { %8103 = vmatmul.msk.f32.vlgmr.msrb.gmra.mxu0 %vm11512_vm2, %v14610_v10 }
0x1930   :  { %8104 = vmatmul.msk.f32.gmra.mxu0 %vm11586_vm12, %v14610_v10 }
0x1995   :  { %v5310_v40 = vpop.f32.mrf.mxu3 }
0x199d   :  { %v5313_v57 = vpop.f32.mrf.mxu3 }
0x19a5   :  { %v5287_v61 = vpop.f32.mrf.mxu0 }
0x19a6   :  { %v5311_v38 = vadd.f32 %v5310_v40, %v5287_v61 }
0x19ad   :  { %v5290_v30 = vpop.f32.mrf.mxu0 }
0x19ae   :  { %v5314_v35 = vadd.f32 %v5313_v57, %v5290_v30 }
0x19b0   :  { %8108 = vmatpush.msk.msra.mxu1 %vm14611_vm6, %v5314_v35  ;;  %vm14617_vm6 = vmmov %vm14591_vm0 }
0x19b2   :  { %5334 = vmatpush.msra.mxu1 %v5311_v38 }
0x19b3   :  { %8109 = vmatmul.msk.f32.vlgmr.msra.gmra.mxu1 %vm14612_vm11, %v10981_v0  ;;  %vm14618_vm11 = vmmov %vm14591_vm0 }
0x19b4   :  { %6434 = vmatpush.msrb.mxu1 %v8945_v52 }
0x19b6   :  { %6435 = vmatpush.msrb.mxu1 %v8946_v36 }
0x19b8   :  { %6436 = vmatpush.msrb.mxu1 %v8947_v15 }
0x19ba   :  { %6437 = vmatpush.msrb.mxu1 %v8948_v25 }
0x19bb   :  { %8110 = vmatmul.msk.f32.gmra.mxu1 %vm14591_vm0, %v11002_v31 }
0x19c3   :  { %8111 = vmatmul.msk.f32.gmra.mxu1 %vm14613_vm8, %v11020_v11  ;;  %vm14619_vm8 = vmmov %vm14591_vm0 }
0x19cb   :  { %8112 = vmatmul.msk.f32.gmra.mxu1 %vm14614_vm10, %v11041_v29  ;;  %vm14620_vm10 = vmmov %vm14591_vm0 }
0x19d3   :  { %8113 = vmatmul.msk.f32.gmra.mxu1 %vm14615_vm5, %v11060_v2  ;;  %vm14621_vm5 = vmmov %vm14591_vm0 }
0x19db   :  { %8114 = vmatmul.msk.f32.gmra.mxu1 %vm14616_vm9, %v11078_v18  ;;  %vm14622_vm9 = vmmov %vm14591_vm0 }
0x19e3   :  { %8115 = vmatmul.msk.f32.gmra.mxu1 %vm14617_vm6, %v11097_v54  ;;  %vm14623_vm6 = vmmov %vm14591_vm0 }
0x19eb   :  { %8116 = vmatmul.msk.f32.gmra.mxu1 %vm14618_vm11, %v11107_v24  ;;  %vm14624_vm11 = vmmov %vm14591_vm0 }
0x19f3   :  { %8117 = vmatmul.msk.f32.gmra.mxu1 %vm14591_vm0, %v11124_v1 }
0x19fb   :  { %8118 = vmatmul.msk.f32.gmra.mxu1 %vm14619_vm8, %v11170_v43  ;;  %vm14627_vm8 = vmmov %vm14591_vm0 }
0x1a03   :  { %8119 = vmatmul.msk.f32.gmra.mxu1 %vm14620_vm10, %v11212_v33  ;;  %vm14628_vm10 = vcmask 64512  }
0x1a0b   :  { %8120 = vmatmul.msk.f32.gmra.mxu1 %vm14621_vm5, %v11237_v6  ;;  %vm14629_vm5 = vmmov %vm14628_vm10 }
0x1a13   :  { %8121 = vmatmul.msk.f32.gmra.mxu1 %vm14622_vm9, %v11247_v17  ;;  %vm14630_vm9 = vmmov %vm14629_vm5 }
0x1a1b   :  { %8122 = vmatmul.msk.f32.gmra.mxu1 %vm14623_vm6, %v11267_v59  ;;  %vm14631_vm6 = vmmov %vm14629_vm5 }
0x1a23   :  { %8123 = vmatmul.msk.f32.gmra.mxu1 %vm14624_vm11, %v11290_v13  ;;  %vm14632_vm11 = vmmov %vm14629_vm5 }
0x1a2b   :  { %8124 = vmatmul.msk.f32.gmra.mxu1 %vm14591_vm0, %v14625_v49  ;;  %vm14633_vm0 = vmmov %vm14629_vm5 }
0x1a30   :  { %v5336_v32 = vpop.f32.mrf.mxu1 }
0x1a31   :  { %8803 = vrcp.f32 %v5336_v32 }
0x1a33   :  { %8125 = vmatmul.msk.f32.gmra.mxu1 %vm14627_vm8, %v14626_v48  ;;  %vm14634_vm8 = vmmov %vm14633_vm0 }
0x1a37   :  { %v8804_v63 = vpop.eup %8803 }
0x1a38   :  { %v5404_v58 = vmul.f32 %v8804_v63, %v5336_v32  ;;  %v5339_v47 = vpop.f32.mrf.mxu1 }
0x1a39   :  { %8805 = vrcp.f32 %v5339_v47 }
0x1a3a   :  { %v5421_v42 = vsub.f32 2.0, %v5404_v58 }
0x1a3c   :  { %v5438_v14 = vmul.f32 %v8804_v63, %v5421_v42 }
0x1a3e   :  { %v5455_v3 = vmul.f32 %v8802_v28, %v5438_v14 }
0x1a3f   :  { %v8806_v12 = vpop.eup %8805 }
0x1a40   :  { %v5405_v62 = vmul.f32 %v8806_v12, %v5339_v47  ;;  %v5342_v34 = vpop.f32.mrf.mxu1  ;;  %8126 = vmatmul.msk.f32.vlgmr.msrb.gmra.mxu2 %vm14628_vm10, %v5455_v3  ;;  %vm14635_vm10 = vmmov %vm14633_vm0 }
0x1a41   :  { %8807 = vrcp.f32 %v5342_v34 }
0x1a42   :  { %v5422_v41 = vsub.f32 2.0, %v5405_v62 }
0x1a44   :  { %v5439_v20 = vmul.f32 %v8806_v12, %v5422_v41 }
0x1a46   :  { %v5456_v53 = vmul.f32 %v8800_v21, %v5439_v20 }
0x1a47   :  { %v8808_v27 = vpop.eup %8807 }
0x1a48   :  { %v5406_v5 = vmul.f32 %v8808_v27, %v5342_v34  ;;  %v5345_v40 = vpop.f32.mrf.mxu1  ;;  %8127 = vmatmul.msk.f32.gmra.mxu2 %vm14629_vm5, %v5456_v53  ;;  %vm14636_vm5 = vmmov %vm14633_vm0 }
0x1a49   :  { %8809 = vrcp.f32 %v5345_v40 }
0x1a4a   :  { %v5423_v61 = vsub.f32 2.0, %v5406_v5 }
0x1a4c   :  { %v5440_v57 = vmul.f32 %v8808_v27, %v5423_v61 }
0x1a4e   :  { %v5457_v30 = vmul.f32 %v12753_v51, %v5440_v57 }
0x1a4f   :  { %v8810_v28 = vpop.eup %8809 }
0x1a50   :  { %v5407_v35 = vmul.f32 %v8810_v28, %v5345_v40  ;;  %v5348_v38 = vpop.f32.mrf.mxu1  ;;  %8128 = vmatmul.msk.f32.gmra.mxu2 %vm14630_vm9, %v5457_v30  ;;  %vm14637_vm9 = vmmov %vm14633_vm0 }
0x1a51   :  { %8811 = vrcp.f32 %v5348_v38 }
0x1a52   :  { %v5424_v52 = vsub.f32 2.0, %v5407_v35 }
0x1a54   :  { %v5441_v36 = vmul.f32 %v8810_v28, %v5424_v52 }
0x1a56   :  { %v5458_v21 = vmul.f32 %v12750_v8, %v5441_v36 }
0x1a57   :  { %v8812_v15 = vpop.eup %8811 }
0x1a58   :  { %v5408_v25 = vmul.f32 %v8812_v15, %v5348_v38  ;;  %v5351_v32 = vpop.f32.mrf.mxu1  ;;  %8129 = vmatmul.msk.f32.gmra.mxu2 %vm14631_vm6, %v5458_v21  ;;  %vm14638_vm6 = vmmov %vm14633_vm0 }
0x1a59   :  { %8813 = vrcp.f32 %v5351_v32 }
0x1a5a   :  { %v5425_v63 = vsub.f32 2.0, %v5408_v25 }
0x1a5c   :  { %v5442_v58 = vmul.f32 %v8812_v15, %v5425_v63 }
0x1a5e   :  { %v5459_v51 = vmul.f32 %v12747_v16, %v5442_v58 }
0x1a5f   :  { %v8814_v47 = vpop.eup %8813 }
0x1a60   :  { %v5409_v42 = vmul.f32 %v8814_v47, %v5351_v32  ;;  %v5354_v14 = vpop.f32.mrf.mxu1  ;;  %8130 = vmatmul.msk.f32.gmra.mxu2 %vm14632_vm11, %v5459_v51  ;;  %vm14639_vm11 = vmmov %vm14633_vm0 }
0x1a61   :  { %8815 = vrcp.f32 %v5354_v14 }
0x1a62   :  { %v5426_v3 = vsub.f32 2.0, %v5409_v42 }
0x1a64   :  { %v5443_v12 = vmul.f32 %v8814_v47, %v5426_v3 }
0x1a66   :  { %v5460_v8 = vmul.f32 %v12744_v45, %v5443_v12 }
0x1a67   :  { %v8816_v62 = vpop.eup %8815 }
0x1a68   :  { %v5410_v34 = vmul.f32 %v8816_v62, %v5354_v14  ;;  %v5357_v41 = vpop.f32.mrf.mxu1  ;;  %8131 = vmatmul.msk.f32.gmra.mxu2 %vm14633_vm0, %v5460_v8 }
0x1a69   :  { %8817 = vrcp.f32 %v5357_v41 }
0x1a6a   :  { %v5427_v20 = vsub.f32 2.0, %v5410_v34 }
0x1a6c   :  { %v5444_v53 = vmul.f32 %v8816_v62, %v5427_v20 }
0x1a6e   :  { %v5461_v16 = vmul.f32 %v12739_v39, %v5444_v53 }
0x1a6f   :  { %v8818_v27 = vpop.eup %8817 }
0x1a70   :  { %v5411_v5 = vmul.f32 %v8818_v27, %v5357_v41  ;;  %v5360_v40 = vpop.f32.mrf.mxu1  ;;  %8132 = vmatmul.msk.f32.gmra.mxu2 %vm14634_vm8, %v5461_v16  ;;  %vm14640_vm8 = vmmov %vm14633_vm0 }
0x1a71   :  { %8819 = vrcp.f32 %v5360_v40 }
0x1a72   :  { %v5428_v61 = vsub.f32 2.0, %v5411_v5 }
0x1a74   :  { %v5445_v57 = vmul.f32 %v8818_v27, %v5428_v61 }
0x1a76   :  { %v5462_v45 = vmul.f32 %v12734_v4, %v5445_v57 }
0x1a77   :  { %v8820_v30 = vpop.eup %8819 }
0x1a78   :  { %v5412_v28 = vmul.f32 %v8820_v30, %v5360_v40  ;;  %v5363_v35 = vpop.f32.mrf.mxu1  ;;  %8133 = vmatmul.msk.f32.gmra.mxu2 %vm14635_vm10, %v5462_v45  ;;  %vm14641_vm10 = vmmov %vm14633_vm0 }
0x1a79   :  { %8821 = vrcp.f32 %v5363_v35 }
0x1a7a   :  { %v5429_v38 = vsub.f32 2.0, %v5412_v28 }
0x1a7c   :  { %v5446_v52 = vmul.f32 %v8820_v30, %v5429_v38 }
0x1a7e   :  { %v5463_v39 = vmul.f32 %v12729_v19, %v5446_v52 }
0x1a7f   :  { %v8822_v36 = vpop.eup %8821 }
0x1a80   :  { %v5413_v21 = vmul.f32 %v8822_v36, %v5363_v35  ;;  %v5366_v15 = vpop.f32.mrf.mxu1  ;;  %8134 = vmatmul.msk.f32.gmra.mxu2 %vm14636_vm5, %v5463_v39  ;;  %vm14642_vm5 = vmmov %vm14633_vm0 }
0x1a81   :  { %8823 = vrcp.f32 %v5366_v15 }
0x1a82   :  { %v5430_v25 = vsub.f32 2.0, %v5413_v21 }
0x1a84   :  { %v5447_v32 = vmul.f32 %v8822_v36, %v5430_v25 }
0x1a86   :  { %v5464_v4 = vmul.f32 %v12724_v44, %v5447_v32 }
0x1a87   :  { %v8824_v63 = vpop.eup %8823 }
0x1a88   :  { %v5414_v58 = vmul.f32 %v8824_v63, %v5366_v15  ;;  %v5369_v51 = vpop.f32.mrf.mxu1  ;;  %8135 = vmatmul.msk.f32.gmra.mxu2 %vm14637_vm9, %v5464_v4  ;;  %vm14643_vm9 = vmmov %vm14633_vm0 }
0x1a89   :  { %8825 = vrcp.f32 %v5369_v51 }
0x1a8a   :  { %v5431_v47 = vsub.f32 2.0, %v5414_v58 }
0x1a8c   :  { %v5448_v42 = vmul.f32 %v8824_v63, %v5431_v47 }
0x1a8e   :  { %v5465_v19 = vmul.f32 %v12717_v46, %v5448_v42 }
0x1a8f   :  { %v8826_v14 = vpop.eup %8825 }
0x1a90   :  { %v5415_v3 = vmul.f32 %v8826_v14, %v5369_v51  ;;  %v5372_v12 = vpop.f32.mrf.mxu1  ;;  %8136 = vmatmul.msk.f32.gmra.mxu2 %vm14638_vm6, %v5465_v19  ;;  %vm14661_vm6 = vcmask 1043456  }
0x1a91   :  { %8827 = vrcp.f32 %v5372_v12 }
0x1a92   :  { %v5432_v8 = vsub.f32 2.0, %v5415_v3 }
0x1a94   :  { %v5449_v62 = vmul.f32 %v8826_v14, %v5432_v8 }
0x1a96   :  { %v5466_v44 = vmul.f32 %v12707_v50, %v5449_v62 }
0x1a97   :  { %v8828_v34 = vpop.eup %8827 }
0x1a98   :  { %v5416_v41 = vmul.f32 %v8828_v34, %v5372_v12  ;;  %v5375_v20 = vpop.f32.mrf.mxu1  ;;  %8137 = vmatmul.msk.f32.gmra.mxu2 %vm14639_vm11, %v5466_v44  ;;  %vm14662_vm11 = vcmask 31744  }
0x1a99   :  { %8829 = vrcp.f32 %v5375_v20 }
0x1a9a   :  { %v5433_v53 = vsub.f32 2.0, %v5416_v41 }
0x1a9c   :  { %v5450_v16 = vmul.f32 %v8828_v34, %v5433_v53 }
0x1a9e   :  { %v5467_v46 = vmul.f32 %v12704_v56, %v5450_v16 }
0x1a9f   :  { %v8830_v27 = vpop.eup %8829 }
0x1aa0   :  { %v5417_v5 = vmul.f32 %v8830_v27, %v5375_v20  ;;  %v5378_v40 = vpop.f32.mrf.mxu1  ;;  %8138 = vmatmul.msk.f32.gmra.mxu2 %vm14633_vm0, %v5467_v46  ;;  %vm14663_vm0 = vmmov %vm14662_vm11 }
0x1aa1   :  { %8831 = vrcp.f32 %v5378_v40 }
0x1aa2   :  { %v5434_v61 = vsub.f32 2.0, %v5417_v5 }
0x1aa4   :  { %v5451_v57 = vmul.f32 %v8830_v27, %v5434_v61 }
0x1aa6   :  { %v5468_v50 = vmul.f32 %v12700_v37, %v5451_v57 }
0x1aa7   :  { %v8832_v45 = vpop.eup %8831 }
0x1aa8   :  { %v5418_v30 = vmul.f32 %v8832_v45, %v5378_v40  ;;  %v5381_v28 = vpop.f32.mrf.mxu1  ;;  %8139 = vmatmul.msk.f32.gmra.mxu2 %vm14640_vm8, %v5468_v50  ;;  %v14644_v50 = vld [vmem:[#allocation7_spill] sm:$0xff]  ;;  %vm14664_vm8 = vcmask 261120  }
0x1aa9   :  { %8833 = vrcp.f32 %v5381_v28 }
0x1aaa   :  { %v5435_v35 = vsub.f32 2.0, %v5418_v30  ;;  %v14645_v30 = vld [vmem:[#allocation65_spill] sm:$0xff] }
0x1aac   :  { %v5452_v38 = vmul.f32 %v8832_v45, %v5435_v35 }
0x1aae   :  { %v5469_v56 = vmul.f32 %v12696_v60, %v5452_v38 }
0x1aaf   :  { %v8834_v52 = vpop.eup %8833 }
0x1ab0   :  { %v5419_v39 = vmul.f32 %v8834_v52, %v5381_v28  ;;  %v5384_v36 = vpop.f32.mrf.mxu1  ;;  %8140 = vmatmul.msk.f32.gmra.mxu2 %vm14641_vm10, %v5469_v56  ;;  %v14646_v56 = vld [vmem:[#allocation35_spill] sm:$0xff]  ;;  %vm14665_vm10 = vmmov %vm14664_vm8 }
0x1ab1   :  { %8835 = vrcp.f32 %v5384_v36 }
0x1ab2   :  { %v5436_v21 = vsub.f32 2.0, %v5419_v39  ;;  %v14647_v39 = vld [vmem:[#allocation37_spill] sm:$0xff] }
0x1ab4   :  { %v5453_v15 = vmul.f32 %v8834_v52, %v5436_v21 }
0x1ab6   :  { %v5470_v37 = vmul.f32 %v12692_v22, %v5453_v15 }
0x1ab7   :  { %v8836_v25 = vpop.eup %8835 }
0x1ab8   :  { %v5420_v32 = vmul.f32 %v8836_v25, %v5384_v36  ;;  %8141 = vmatmul.msk.f32.gmra.mxu2 %vm14642_vm5, %v5470_v37 }
0x1aba   :  { %v5437_v4 = vsub.f32 2.0, %v5420_v32 }
0x1abc   :  { %v5454_v63 = vmul.f32 %v8836_v25, %v5437_v4  ;;  %v14648_v25 = vld [vmem:[#allocation6_spill] sm:$0xff] }
0x1abd   :  { %v14649_v4 = vld [vmem:[#allocation58_spill] sm:$0xff] }
0x1abe   :  { %v5471_v58 = vmul.f32 %v12710_v55, %v5454_v63 }
0x1ac0   :  { %8142 = vmatmul.msk.f32.gmra.mxu2 %vm14643_vm9, %v5471_v58 }
0x1ac3   :  { %v5540_v60 = vpop.f32.mrf.mxu2 }
0x1acb   :  { %v5543_v51 = vpop.f32.mrf.mxu2 }
0x1ad3   :  { %v5546_v47 = vpop.f32.mrf.mxu2 }
0x1adb   :  { %v5549_v42 = vpop.f32.mrf.mxu2 }
0x1ae3   :  { %v5552_v19 = vpop.f32.mrf.mxu2 }
0x1aeb   :  { %v5555_v14 = vpop.f32.mrf.mxu2 }
0x1af3   :  { %v5558_v3 = vpop.f32.mrf.mxu2 }
0x1af4   :  { %5620 = vrot.lane.b32.xlu2 %v5558_v3, %s8985_s28  ;;  %v14652_v3 = vld [vmem:[#allocation49_spill] sm:$0xff] }
0x1afb   :  { %v5561_v22 = vpop.f32.mrf.mxu2 }
0x1afc   :  { %5622 = vrot.lane.b32.xlu0 %v5561_v22, %s8985_s28 }
0x1b03   :  { %v5564_v12 = vpop.f32.mrf.mxu2 }
0x1b04   :  { %5624 = vrot.lane.b32.xlu1 %v5564_v12, %s8985_s28  ;;  %v14653_v12 = vld [vmem:[#allocation47_spill] sm:$0xff] }
0x1b0b   :  { %v5567_v8 = vpop.f32.mrf.mxu2 }
0x1b0c   :  { %5626 = vrot.lane.b32.xlu2 %v5567_v8, %s8985_s28 }
0x1b13   :  { %v5570_v55 = vpop.f32.mrf.mxu2 }
0x1b14   :  { %5628 = vrot.lane.b32.xlu0 %v5570_v55, %s8985_s28 }
0x1b1b   :  { %v5573_v62 = vpop.f32.mrf.mxu2 }
0x1b1c   :  { %5630 = vrot.lane.b32.xlu0 %v5573_v62, %s8985_s28 }
0x1b23   :  { %v5576_v44 = vpop.f32.mrf.mxu2 }
0x1b24   :  { %5632 = vrot.lane.b32.xlu0 %v5576_v44, %s8985_s28  ;;  %v14654_v44 = vld [vmem:[#allocation39_spill] sm:$0xff] }
0x1b2b   :  { %v5579_v34 = vpop.f32.mrf.mxu2 }
0x1b2c   :  { %5634 = vrot.lane.b32.xlu2 %v5579_v34, %s8985_s28 }
0x1b33   :  { %v5582_v41 = vpop.f32.mrf.mxu2 }
0x1b34   :  { %5616 = vrot.lane.b32.xlu2 %v5552_v19, %s8985_s28  ;;  %5636 = vrot.lane.b32.xlu0 %v5582_v41, %s8985_s28  ;;  %v14651_v19 = vld [vmem:[#allocation28_spill] sm:$0xff] }
0x1b3b   :  { %v5585_v20 = vpop.f32.mrf.mxu2 }
0x1b3c   :  { %5638 = vrot.lane.b32.xlu0 %v5585_v20, %s8985_s28 }
0x1b43   :  { %v5588_v53 = vpop.f32.mrf.mxu2 }
0x1b44   :  { %5618 = vrot.lane.b32.xlu0 %v5555_v14, %s8985_s28  ;;  %5640 = vrot.lane.b32.xlu2 %v5588_v53, %s8985_s28  ;;  %v14655_v53 = vld [vmem:[#allocation41_spill] sm:$0xff] }
0x1b4c   :  { %5614 = vrot.lane.b32.xlu0 %v5549_v42, %s8985_s28  ;;  %5610 = vrot.lane.b32.xlu2 %v5543_v51, %s8985_s28  ;;  %v14650_v51 = vld [vmem:[#allocation32_spill] sm:$0xff] }
0x1b4e   :  { %v5621_v46 = vpop.permute.xlu2 %5620 }
0x1b54   :  { %5612 = vrot.lane.b32.xlu0 %v5546_v47, %s8985_s28 }
0x1b5c   :  { %5608 = vrot.lane.b32.xlu0 %v5540_v60, %s8985_s28 }
0x1b66   :  { %v5627_v5 = vpop.permute.xlu2 %5626 }
0x1b67   :  { %v5668_v36 = vmul.f32 %v5627_v5, %v14647_v39  ;;  %v5665_v5 = vmul.f32 %v5621_v46, %v14655_v53  ;;  %v14660_v46 = vld [vmem:[#allocation60_spill] sm:$0xff] }
0x1b68   :  { %v8151_v53 = vld [vmem:[%s13879_s7 + $0x58] sm:$0xff] }
0x1b6e   :  { %v5623_v16 = vpop.permute.xlu0 %5622 }
0x1b6f   :  { %v5666_v34 = vmul.f32 %v5623_v16, %v14654_v44 }
0x1b76   :  { %v5625_v38 = vpop.permute.xlu1 %5624 }
0x1b77   :  { %v5667_v52 = vmul.f32 %v5625_v38, %v14646_v56  ;;  %v14659_v56 = vld [vmem:[#allocation63_spill] sm:$0xff] }
0x1b79   :  { %v8477_v21 = vpack.i.bf16 %v5667_v52, %v5668_v36 }
0x1b86   :  { %v5629_v27 = vpop.permute.xlu0 %5628  ;;  %v5635_v61 = vpop.permute.xlu2 %5634 }
0x1b87   :  { %v5672_v45 = vmul.f32 %v5635_v61, %v14644_v50  ;;  %v5669_v14 = vmul.f32 %v5629_v27, %v14651_v19  ;;  %v14656_v61 = vld [vmem:[#allocation61_spill] sm:$0xff] }
0x1b88   :  { %v14657_v50 = vld [vmem:[#allocation45_spill] sm:$0xff] }
0x1b8e   :  { %v5631_v40 = vpop.permute.xlu0 %5630  ;;  %v5617_v60 = vpop.permute.xlu2 %5616 }
0x1b8f   :  { %v5670_v47 = vmul.f32 %v5631_v40, %v14650_v51  ;;  %v5663_v22 = vmul.f32 %v5617_v60, %v14652_v3  ;;  %v8482_v40 = vpack.i.bf16 %v5665_v5, %v5666_v34 }
0x1b91   :  { %v8472_v55 = vpack.i.bf16 %v5669_v14, %v5670_v47 }
0x1b96   :  { %v5633_v57 = vpop.permute.xlu0 %5632 }
0x1b97   :  { %v5671_v28 = vmul.f32 %v5633_v57, %v14645_v30  ;;  %v14658_v30 = vld [vmem:[#allocation43_spill] sm:$0xff] }
0x1b99   :  { %v8462_v35 = vpack.i.bf16 %v5671_v28, %v5672_v45 }
0x1b9b   :  { %8463 = vrot.lane.b32.xlu0 %v8462_v35, %s8979_s23 }
0x1b9e   :  { %v5641_v41 = vpop.permute.xlu2 %5640 }
0x1b9f   :  { %v5675_v57 = vmul.f32 %v5641_v41, %v14656_v61  ;;  %v8149_v61 = vld [vmem:[%s13879_s7 + $0x48] sm:$0xff] }
0x1ba3   :  { %8478 = vrot.lane.b32.xlu0 %v8477_v21, %s8979_s23 }
0x1ba6   :  { %v5637_v15 = vpop.permute.xlu0 %5636  ;;  %v5611_v16 = vpop.permute.xlu2 %5610 }
0x1ba7   :  { %v5673_v32 = vmul.f32 %v5637_v15, %v14648_v25  ;;  %v5660_v52 = vmul.f32 %v5611_v16, %v14659_v56 }
0x1bae   :  { %v5639_v37 = vpop.permute.xlu0 %5638 }
0x1baf   :  { %v5674_v63 = vmul.f32 %v5639_v37, %v14649_v4 }
0x1bb1   :  { %v8467_v58 = vpack.i.bf16 %v5673_v32, %v5674_v63 }
0x1bb3   :  { %8468 = vrot.lane.b32.xlu2 %v8467_v58, %s8979_s23 }
0x1bb6   :  { %v5619_v42 = vpop.permute.xlu0 %5618 }
0x1bb7   :  { %v5664_v8 = vmul.f32 %v5619_v42, %v14653_v12 }
0x1bb9   :  { %v8487_v62 = vpack.i.bf16 %v5663_v22, %v5664_v8 }
0x1bbb   :  { %8488 = vrot.lane.b32.xlu0 %v8487_v62, %s8979_s23  ;;  %8473 = vrot.lane.b32.xlu2 %v8472_v55, %s8979_s23 }
0x1bbe   :  { %v5615_v20 = vpop.permute.xlu0 %5614 }
0x1bbf   :  { %v5662_v45 = vmul.f32 %v5615_v20, %v14657_v50 }
0x1bc3   :  { %8483 = vrot.lane.b32.xlu2 %v8482_v40, %s8979_s23  ;;  %5725 = vrot.lane.b32.xlu0 %v5675_v57, %s8979_s23  ;;  %v8150_v40 = vld [vmem:[%s13879_s7 + $0x50] sm:$0xff]  ;;  %v8148_v57 = vld [vmem:[%s13879_s7 + $0x40] sm:$0xff] }
0x1bc6   :  { %v5613_v27 = vpop.permute.xlu0 %5612 }
0x1bc7   :  { %v5661_v28 = vmul.f32 %v5613_v27, %v14658_v30 }
0x1bc9   :  { %v8492_v35 = vpack.i.bf16 %v5661_v28, %v5662_v45 }
0x1bcb   :  { %8493 = vrot.lane.b32.xlu2 %v8492_v35, %s8979_s23 }
0x1bce   :  { %v5609_v38 = vpop.permute.xlu0 %5608 }
0x1bcf   :  { %v5659_v39 = vmul.f32 %v5609_v38, %v14660_v46  ;;  %v14666_v38 = vld [vmem:[#allocation51_spill] sm:$0xff]  ;;  %v14667_v46 = vld [vmem:[#allocation53_spill] sm:$0xff] }
0x1bd1   :  { %v8497_v36 = vpack.i.bf16 %v5659_v39, %v5660_v52 }
0x1bd3   :  { %8498 = vrot.lane.b32.xlu2 %v8497_v36, %s8979_s23  ;;  %v8160_v36 = vld [vmem:[%s13879_s7 + $0x78] sm:$0xff] }
0x1c0d   :  { %v8464_v21 = vpop.permute.xlu0 %8463  ;;  %v8469_v15 = vpop.permute.xlu2 %8468 }
0x1c0e   :  { %v8470_v37 = vunpack.i.l.bf16 %v8469_v15  ;;  %v8471_v25 = vunpack.i.h.bf16 %v8469_v15  ;;  %v8465_v32 = vunpack.i.l.bf16 %v8464_v21  ;;  %v8466_v4 = vunpack.i.h.bf16 %v8464_v21  ;;  %v8159_v21 = vld [vmem:[%s13879_s7 + $0x70] sm:$0xff] }
0x1c0f   :  { %v8152_v15 = vld [vmem:[%s13883_s11 + $0x30] sm:$0x3] }
0x1c10   :  { %5745 = vmatpush.msra.mxu0 %v8470_v37  ;;  %8378 = vmatpush.msra.mxu2 %v8470_v37 }
0x1c12   :  { %5746 = vmatpush.msra.mxu0 %v8471_v25  ;;  %8379 = vmatpush.msra.mxu2 %v8471_v25  ;;  %v5799_v25 = vperm.slane %v8152_v15, 0 }
0x1c14   :  { %5747 = vmatpush.msra.mxu0 %v8465_v32  ;;  %8380 = vmatpush.msra.mxu2 %v8465_v32  ;;  %v8949_v32 = vld [vmem:[%s13883_s11 + $0x2c] sm:$0x3] }
0x1c15   :  { %v8474_v63 = vpop.permute.xlu2 %8473  ;;  %v8479_v60 = vpop.permute.xlu0 %8478 }
0x1c16   :  { %v8475_v58 = vunpack.i.l.bf16 %v8474_v63  ;;  %5748 = vmatpush.msra.mxu0 %v8466_v4  ;;  %8381 = vmatpush.msra.mxu2 %v8466_v4  ;;  %v8476_v51 = vunpack.i.h.bf16 %v8474_v63  ;;  %v8480_v47 = vunpack.i.l.bf16 %v8479_v60  ;;  %v8481_v42 = vunpack.i.h.bf16 %v8479_v60 }
0x1c17   :  { %v4569_v4 = vperm.slane %v8949_v32, 1 }
0x1c18   :  { %5749 = vmatpush.msra.mxu0 %v8475_v58  ;;  %8382 = vmatpush.msra.mxu2 %v8475_v58  ;;  %v14668_v58 = vld [vmem:[#allocation25_spill] sm:$0xff] }
0x1c19   :  { %v4619_v60 = vadd.f32 %v14668_v58, %v4569_v4 }
0x1c1a   :  { %5750 = vmatpush.msra.mxu0 %v8476_v51  ;;  %8383 = vmatpush.msra.mxu2 %v8476_v51 }
0x1c1c   :  { %5751 = vmatpush.msra.mxu0 %v8480_v47  ;;  %8384 = vmatpush.msra.mxu2 %v8480_v47 }
0x1c1d   :  { %v8484_v19 = vpop.permute.xlu2 %8483 }
0x1c1e   :  { %v8485_v14 = vunpack.i.l.bf16 %v8484_v19  ;;  %5752 = vmatpush.msra.mxu0 %v8481_v42  ;;  %8385 = vmatpush.msra.mxu2 %v8481_v42  ;;  %v8486_v3 = vunpack.i.h.bf16 %v8484_v19  ;;  %v14669_v19 = vld [vmem:[#allocation29_spill] sm:$0xff] }
0x1c20   :  { %5753 = vmatpush.msra.mxu0 %v8485_v14  ;;  %8386 = vmatpush.msra.mxu2 %v8485_v14  ;;  %v4622_v14 = vadd.f32 %v14669_v19, %v4569_v4  ;;  %v14672_v19 = vld [vmem:[#allocation57_spill] sm:$0xff] }
0x1c22   :  { %5754 = vmatpush.msra.mxu0 %v8486_v3  ;;  %8387 = vmatpush.msra.mxu2 %v8486_v3 }
0x1c25   :  { %v8494_v22 = vpop.permute.xlu2 %8493 }
0x1c26   :  { %v8495_v62 = vunpack.i.l.bf16 %v8494_v22  ;;  %v8496_v34 = vunpack.i.h.bf16 %v8494_v22 }
0x1c2d   :  { %v8489_v12 = vpop.permute.xlu0 %8488  ;;  %v8499_v44 = vpop.permute.xlu2 %8498 }
0x1c2e   :  { %v8490_v8 = vunpack.i.l.bf16 %v8489_v12  ;;  %v8491_v55 = vunpack.i.h.bf16 %v8489_v12  ;;  %v8500_v20 = vunpack.i.l.bf16 %v8499_v44  ;;  %v8501_v5 = vunpack.i.h.bf16 %v8499_v44  ;;  %v8158_v44 = vld [vmem:[%s13879_s7 + $0x68] sm:$0xff] }
0x1c30   :  { %5755 = vmatpush.msra.mxu0 %v8490_v8  ;;  %8388 = vmatpush.msra.mxu2 %v8490_v8 }
0x1c32   :  { %5756 = vmatpush.msra.mxu0 %v8491_v55  ;;  %8389 = vmatpush.msra.mxu2 %v8491_v55 }
0x1c34   :  { %5757 = vmatpush.msra.mxu0 %v8495_v62  ;;  %8390 = vmatpush.msra.mxu2 %v8495_v62 }
0x1c35   :  { %v5726_v41 = vpop.permute.xlu0 %5725 }
0x1c36   :  { %5758 = vmatpush.msra.mxu0 %v8496_v34  ;;  %8391 = vmatpush.msra.mxu2 %v8496_v34  ;;  %v8157_v34 = vld [vmem:[%s13879_s7 + $0x60] sm:$0xff] }
0x1c37   :  { %8145 = vmatpush.msk.msra.mxu3 %vm14661_vm6, %v5726_v41 }
0x1c38   :  { %8146 = vmatmul.msk.f32.vlgmr.msra.gmra.mxu3 %vm14662_vm11, %v11906_v7  ;;  %5759 = vmatpush.msra.mxu0 %v8500_v20 }
0x1c39   :  { %8392 = vmatpush.msra.mxu2 %v8500_v20  ;;  %5819 = vmatpush.msrb.mxu3 %v8151_v53 }
0x1c3a   :  { %5760 = vmatpush.msra.mxu0 %v8501_v5 }
0x1c3b   :  { %8393 = vmatpush.msra.mxu2 %v8501_v5  ;;  %8143 = vmatmul.msk.f32.vlgmr.msra.gmra.mxu0 %vm11512_vm2, %v14610_v10  ;;  %vm14670_vm2 = vcmask 261120  }
0x1c3c   :  { %8144 = vmatmul.msk.f32.vlgmr.msra.gmra.mxu2 %vm11586_vm12, %v14610_v10  ;;  %5820 = vmatpush.msrb.mxu3 %v8150_v40 }
0x1c3d   :  { %5913 = vmatpush.msrb.mxu0 %v8160_v36 }
0x1c3e   :  { %5821 = vmatpush.msrb.mxu3 %v8149_v61 }
0x1c3f   :  { %5914 = vmatpush.msrb.mxu0 %v8159_v21 }
0x1c40   :  { %8147 = vmatmul.msk.f32.gmra.mxu3 %vm14663_vm0, %v11935_v9 }
0x1c41   :  { %5822 = vmatpush.msrb.mxu3 %v8148_v57  ;;  %5915 = vmatpush.msrb.mxu0 %v8158_v44  ;;  %v14676_v44 = vld [vmem:[#allocation5_spill] sm:$0xff] }
0x1c43   :  { %5916 = vmatpush.msrb.mxu0 %v8157_v34 }
0x1cb8   :  { %v5762_v27 = vpop.f32.mrf.mxu0 }
0x1cbb   :  { %v5785_v50 = vpop.f32.mrf.mxu3 }
0x1cbc   :  { %v12907_v45 = vadd.f32 %v5785_v50, %v5762_v27 }
0x1cbe   :  { %5870 = vrot.lane.b32.xlu0 %v12907_v45, %s8979_s23  ;;  %8153 = vmatmul.msk.f32.vlgmr.msrb.gmra.mxu3 %vm14664_vm8, %v12907_v45 }
0x1cbf   :  { %v5765_v30 = vpop.f32.mrf.mxu2 }
0x1cc3   :  { %v5788_v28 = vpop.f32.mrf.mxu3 }
0x1cc4   :  { %v12913_v35 = vadd.f32 %v5788_v28, %v5765_v30 }
0x1cc6   :  { %5872 = vrot.lane.b32.xlu2 %v12913_v35, %s8979_s23  ;;  %8154 = vmatmul.msk.f32.gmra.mxu3 %vm14665_vm10, %v12913_v35 }
0x1d20   :  { %v5873_v16 = vpop.permute.xlu2 %5872 }
0x1d21   :  { %v5877_v56 = vsub.f32 %v14666_v38, %v5873_v16 }
0x1d23   :  { %5882 = vrot.lane.b32.xlu2 %v5877_v56, %s8985_s28 }
0x1d30   :  { %v5871_v52 = vpop.permute.xlu0 %5870 }
0x1d31   :  { %v5876_v39 = vsub.f32 %v14667_v46, %v5871_v52 }
0x1d33   :  { %5880 = vrot.lane.b32.xlu0 %v5876_v39, %s8985_s28 }
0x1d41   :  { %v5824_v37 = vpop.f32.mrf.mxu3 }
0x1d42   :  { %v5825_v63 = vadd.f32 %v5824_v37, %v5799_v25 }
0x1d44   :  { %v5830_v47 = vadd.f32 %v5825_v63, %v4619_v60 }
0x1d46   :  { %v8155_v3 = vmul.f32 -1.442695, %v5830_v47 }
0x1d48   :  { %8837 = vpow2.f32 %v8155_v3 }
0x1d49   :  { %v5827_v51 = vpop.f32.mrf.mxu3 }
0x1d4a   :  { %v5828_v42 = vadd.f32 %v5827_v51, %v5799_v25  ;;  %v8163_v51 = vld [vmem:[%s13883_s11 + $0x32] sm:$0x3] }
0x1d4b   :  { %v5929_v47 = vperm.slane %v8163_v51, 0  ;;  %v8182_v51 = vld [vmem:[%s13881_s9 + $0xc8] sm:$0xff] }
0x1d4c   :  { %v5831_v22 = vadd.f32 %v5828_v42, %v4622_v14 }
0x1d4e   :  { %v8156_v12 = vmul.f32 -1.442695, %v5831_v22  ;;  %v8838_v8 = vpop.eup %8837 }
0x1d4f   :  { %v5838_v55 = vadd.f32 1.0, %v8838_v8 }
0x1d50   :  { %8839 = vpow2.f32 %v8156_v12  ;;  %v14674_v12 = vld [vmem:[#allocation55_spill] sm:$0xff] }
0x1d51   :  { %8841 = vrcp.f32 %v5838_v55  ;;  %v5851_v30 = vand.u32 2147483648, %v5838_v55  ;;  %vm5845_vm9 = vweird.f32 %v5838_v55  ;;  %v5849_v16 = vand.u32 2147483647, %v5838_v55 }
0x1d53   :  { %v5852_v56 = vor.u32 1.1754944e-38, %v5851_v30  ;;  %vm5850_vm0 = vcmp.eq.f32.partialorder %v5849_v16, 8.507059e+37  ;;  %v8168_v30 = vld [vmem:[%s13880_s8 + $0x30] sm:$0xff]  ;;  %v8166_v16 = vld [vmem:[%s13880_s8 + $0x20] sm:$0xff] }
0x1d56   :  { %v8840_v62 = vpop.eup %8839 }
0x1d57   :  { %v5839_v41 = vadd.f32 1.0, %v8840_v62  ;;  %v8842_v20 = vpop.eup %8841 }
0x1d58   :  { %v5841_v53 = vmul.f32 %v8842_v20, %v5838_v55  ;;  %vm5846_vm5 = vweird.f32 %v8842_v20 }
0x1d59   :  { %8843 = vrcp.f32 %v5839_v41  ;;  %vm5847_vm6 = vmor %vm5845_vm9, %vm5846_vm5  ;;  %v5866_v46 = vand.u32 2147483648, %v5839_v41  ;;  %vm5860_vm8 = vweird.f32 %v5839_v41  ;;  %v5864_v21 = vand.u32 2147483647, %v5839_v41 }
0x1d5a   :  { %v5842_v40 = vsub.f32 1.0, %v5841_v53  ;;  %vm14671_vm5 = vmmov %vm14670_vm2 }
0x1d5b   :  { %v5867_v4 = vor.u32 1.1754944e-38, %v5866_v46  ;;  %vm5865_vm12 = vcmp.eq.f32.partialorder %v5864_v21, 8.507059e+37  ;;  %vm14673_vm9 = vmmov %vm14670_vm2  ;;  %v8188_v46 = vld [vmem:[%s13881_s9 + $0xf8] sm:$0xff] }
0x1d5c   :  { %v5843_v57 = vmul.f32 %v8842_v20, %v5842_v40  ;;  %6049 = vmatpush.msra.mxu0 %v8188_v46 }
0x1d5e   :  { %v5844_v50 = vadd.f32 %v8842_v20, %v5843_v57 }
0x1d5f   :  { %v8844_v5 = vpop.eup %8843 }
0x1d60   :  { %v5856_v61 = vmul.f32 %v8844_v5, %v5839_v41  ;;  %v5848_v38 = vsel %vm5847_vm6, %v8842_v20, %v5844_v50  ;;  %vm5861_vm11 = vweird.f32 %v8844_v5  ;;  %v8169_v50 = vld [vmem:[%s13880_s8 + $0x38] sm:$0xff] }
0x1d61   :  { %v5853_v36 = vsel %vm5850_vm0, %v5852_v56, %v5848_v38  ;;  %vm5862_vm10 = vmor %vm5860_vm8, %vm5861_vm11  ;;  %6019 = vmatpush.msra.mxu3 %v8169_v50 }
0x1d62   :  { %v5857_v27 = vsub.f32 1.0, %v5856_v61 }
0x1d63   :  { %6020 = vmatpush.msra.mxu3 %v8168_v30  ;;  %v8177_v30 = vld [vmem:[%s13881_s9 + $0xa0] sm:$0xff] }
0x1d64   :  { %v5858_v28 = vmul.f32 %v8844_v5, %v5857_v27 }
0x1d66   :  { %v5859_v52 = vadd.f32 %v8844_v5, %v5858_v28  ;;  %v8167_v28 = vld [vmem:[%s13880_s8 + $0x28] sm:$0xff] }
0x1d67   :  { %6021 = vmatpush.msra.mxu3 %v8167_v28 }
0x1d68   :  { %v5863_v37 = vsel %vm5862_vm10, %v8844_v5, %v5859_v52 }
0x1d69   :  { %v5868_v63 = vsel %vm5865_vm12, %v5867_v4, %v5863_v37  ;;  %vm14675_vm12 = vcmask 257024   ;;  %6022 = vmatpush.msra.mxu3 %v8166_v16  ;;  %v8185_v37 = vld [vmem:[%s13881_s9 + $0xe0] sm:$0xff]  ;;  %v8184_v4 = vld [vmem:[%s13881_s9 + $0xd8] sm:$0xff] }
0x1d6a   :  { %vm14677_vm6 = vmmov %vm14675_vm12 }
0x1d7d   :  { %v5883_v32 = vpop.permute.xlu2 %5882 }
0x1d7e   :  { %v5887_v58 = vmul.f32 %v5883_v32, %v5868_v63 }
0x1d80   :  { %v5889_v60 = vadd.f32 %v5887_v58, %v12913_v35  ;;  %v8183_v58 = vld [vmem:[%s13881_s9 + $0xd0] sm:$0xff] }
0x1da5   :  { %v5881_v39 = vpop.permute.xlu0 %5880 }
0x1da6   :  { %v5886_v15 = vmul.f32 %v5881_v39, %v5853_v36  ;;  %v8187_v39 = vld [vmem:[%s13881_s9 + $0xf0] sm:$0xff]  ;;  %v8186_v36 = vld [vmem:[%s13881_s9 + $0xe8] sm:$0xff] }
0x1da7   :  { %6050 = vmatpush.msra.mxu0 %v8187_v39 }
0x1da8   :  { %v5888_v25 = vadd.f32 %v5886_v15, %v12907_v45 }
0x1da9   :  { %6051 = vmatpush.msra.mxu0 %v8186_v36  ;;  %v8175_v36 = vld [vmem:[%s13881_s9 + $0x90] sm:$0xff] }
0x1daa   :  { %8161 = vmatmul.msk.f32.vlgmr.msrb.gmra.mxu0 %vm14670_vm2, %v5888_v25 }
0x1dab   :  { %6052 = vmatpush.msra.mxu0 %v8185_v37 }
0x1dad   :  { %6053 = vmatpush.msra.mxu0 %v8184_v4 }
0x1daf   :  { %6054 = vmatpush.msra.mxu0 %v8183_v58 }
0x1db1   :  { %6055 = vmatpush.msra.mxu0 %v8182_v51  ;;  %v8189_v51 = vld [vmem:[%s13883_s11 + $0x34] sm:$0x3] }
0x1db2   :  { %8162 = vmatmul.msk.f32.gmra.mxu0 %vm14671_vm5, %v5889_v60 }
0x1e27   :  { %v5918_v42 = vpop.f32.mrf.mxu0 }
0x1e28   :  { %v5924_v14 = vadd.f32 %v5918_v42, %v14672_v19  ;;  %v8181_v42 = vld [vmem:[%s13881_s9 + $0xc0] sm:$0xff]  ;;  %v8164_v19 = vld [vmem:[%s13883_s11 + $0x3a] sm:$0x3] }
0x1e29   :  { %6056 = vmatpush.msra.mxu0 %v8181_v42 }
0x1e2a   :  { %v12951_v45 = vadd.f32 %v5929_v47, %v5924_v14 }
0x1e2c   :  { %v5937_v3 = vsel %vm14673_vm9, %v12951_v45, 0.0 }
0x1e2d   :  { %5938 = vadd.xlane.f32.xlu1 %v5937_v3 }
0x1e2f   :  { %v5921_v22 = vpop.f32.mrf.mxu0 }
0x1e30   :  { %v5925_v8 = vadd.f32 %v5921_v22, %v14674_v12  ;;  %v8180_v22 = vld [vmem:[%s13881_s9 + $0xb8] sm:$0xff] }
0x1e31   :  { %v8165_v12 = vld [vmem:[%s13883_s11 + $0x3c] sm:$0x3]  ;;  %6057 = vmatpush.msra.mxu0 %v8180_v22 }
0x1e32   :  { %v12956_v35 = vadd.f32 %v5929_v47, %v5925_v8 }
0x1e34   :  { %v5940_v55 = vsel %vm14675_vm12, %v12956_v35, 0.0  ;;  %vm14678_vm12 = vmmov %vm14670_vm2 }
0x1e35   :  { %5941 = vadd.xlane.f32.xlu0 %v5940_v55 }
0x1ea0   :  { %v5939_v62 = vpop.xlane.xlu1 %5938 }
0x1ea1   :  { %v5943_v34 = vmul.f32 %v5939_v62, %v14676_v44  ;;  %v5982_v62 = vperm.slane %v8164_v19, 0 }
0x1ea3   :  { %v5945_v41 = vsub.f32 %v12951_v45, %v5943_v34  ;;  %v8179_v34 = vld [vmem:[%s13881_s9 + $0xb0] sm:$0xff] }
0x1ea4   :  { %6058 = vmatpush.msra.mxu0 %v8179_v34 }
0x1ea5   :  { %v5947_v20 = vmul.f32 %v5945_v41, %v5945_v41 }
0x1ea7   :  { %v5949_v53 = vsel %vm14670_vm2, %v5947_v20, 0.0 }
0x1ea8   :  { %5950 = vadd.xlane.f32.xlu2 %v5949_v53  ;;  %v5942_v5 = vpop.xlane.xlu0 %5941 }
0x1ea9   :  { %v5944_v40 = vmul.f32 %v5942_v5, %v14676_v44  ;;  %v5987_v5 = vperm.slane %v8165_v12, 0 }
0x1eab   :  { %v12965_v61 = vsub.f32 %v12956_v35, %v5944_v40 }
0x1ead   :  { %v5948_v57 = vmul.f32 %v12965_v61, %v12965_v61 }
0x1eaf   :  { %v5952_v27 = vsel %vm14677_vm6, %v5948_v57, 0.0  ;;  %v8178_v57 = vld [vmem:[%s13881_s9 + $0xa8] sm:$0xff]  ;;  %vm14680_vm6 = vmmov %vm14670_vm2 }
0x1eb0   :  { %5953 = vadd.xlane.f32.xlu1 %v5952_v27  ;;  %6059 = vmatpush.msra.mxu0 %v8178_v57 }
0x1eb2   :  { %6060 = vmatpush.msra.mxu0 %v8177_v30  ;;  %v8196_v30 = vld [vmem:[%s13877_s5 + $0xa0] sm:$0xff] }
0x1f1b   :  { %v5951_v38 = vpop.xlane.xlu2 %5950 }
0x1f1c   :  { %v5955_v56 = vmul.f32 %v5951_v38, %v14676_v44  ;;  %v8176_v38 = vld [vmem:[%s13881_s9 + $0x98] sm:$0xff] }
0x1f1d   :  { %6061 = vmatpush.msra.mxu0 %v8176_v38 }
0x1f1e   :  { %v5957_v52 = vadd.f32 1e-05, %v5955_v56 }
0x1f1f   :  { %6062 = vmatpush.msra.mxu0 %v8175_v36 }
0x1f20   :  { %8845 = vrsqrt.f32 %v5957_v52  ;;  %vm5965_vm0 = vweird.f32 %v5957_v52 }
0x1f23   :  { %v5954_v21 = vpop.xlane.xlu1 %5953 }
0x1f24   :  { %v5956_v15 = vmul.f32 %v5954_v21, %v14676_v44  ;;  %v8174_v21 = vld [vmem:[%s13881_s9 + $0x88] sm:$0xff] }
0x1f25   :  { %6063 = vmatpush.msra.mxu0 %v8174_v21 }
0x1f26   :  { %v8846_v25 = vpop.eup %8845  ;;  %v5958_v32 = vadd.f32 1e-05, %v5956_v15  ;;  %v8173_v15 = vld [vmem:[%s13881_s9 + $0x80] sm:$0xff] }
0x1f27   :  { %v5960_v63 = vmul.f32 %v8846_v25, %v5957_v52  ;;  %vm5966_vm11 = vweird.f32 %v8846_v25  ;;  %6064 = vmatpush.msra.mxu0 %v8173_v15  ;;  %v8193_v15 = vld [vmem:[%s13877_s5 + $0x88] sm:$0xff] }
0x1f28   :  { %8847 = vrsqrt.f32 %v5958_v32  ;;  %vm5967_vm8 = vmor %vm5965_vm0, %vm5966_vm11  ;;  %vm5975_vm5 = vweird.f32 %v5958_v32  ;;  %vm14682_vm11 = vcmask 257024  }
0x1f29   :  { %v5961_v60 = vmul.f32 %v8846_v25, %v5960_v63  ;;  %vm14683_vm0 = vmmov %vm14670_vm2 }
0x1f2b   :  { %v5962_v47 = vmul.f32 0.5, %v5961_v60 }
0x1f2d   :  { %v5963_v14 = vsub.f32 1.5, %v5962_v47  ;;  %v6077_v47 = vperm.slane %v8189_v51, 0  ;;  %v8191_v51 = vld [vmem:[%s13883_s11 + $0x4a] sm:$0x3] }
0x1f2e   :  { %v8848_v3 = vpop.eup %8847 }
0x1f2f   :  { %v5964_v8 = vmul.f32 %v8846_v25, %v5963_v14  ;;  %v5970_v55 = vmul.f32 %v8848_v3, %v5958_v32  ;;  %vm5976_vm10 = vweird.f32 %v8848_v3 }
0x1f30   :  { %vm5977_vm9 = vmor %vm5975_vm5, %vm5976_vm10 }
0x1f31   :  { %v5968_v20 = vsel %vm5967_vm8, %v8846_v25, %v5964_v8  ;;  %v5971_v53 = vmul.f32 %v8848_v3, %v5970_v55  ;;  %vm14684_vm8 = vmmov %vm14682_vm11 }
0x1f32   :  { %v5979_v40 = vmul.f32 %v5968_v20, %v5945_v41 }
0x1f33   :  { %v5972_v27 = vmul.f32 0.5, %v5971_v53 }
0x1f34   :  { %v5984_v50 = vmul.f32 %v5982_v62, %v5979_v40 }
0x1f35   :  { %v5973_v28 = vsub.f32 1.5, %v5972_v27 }
0x1f36   :  { %v5989_v16 = vadd.f32 %v5987_v5, %v5984_v50  ;;  %v8198_v50 = vld [vmem:[%s13877_s5 + $0xb0] sm:$0xff] }
0x1f37   :  { %v5974_v41 = vmul.f32 %v8848_v3, %v5973_v28  ;;  %6173 = vmatpush.msrb.mxu3 %v8198_v50  ;;  %v8194_v28 = vld [vmem:[%s13877_s5 + $0x90] sm:$0xff] }
0x1f38   :  { %8171 = vmatmul.msk.f32.vlgmr.msra.gmra.mxu3 %vm14678_vm12, %v5989_v16  ;;  %v8192_v16 = vld [vmem:[%s13877_s5 + $0x80] sm:$0xff] }
0x1f39   :  { %v5978_v56 = vsel %vm5977_vm9, %v8848_v3, %v5974_v41  ;;  %6174 = vmatpush.msrb.mxu3 %v8196_v30 }
0x1f3a   :  { %v5980_v52 = vmul.f32 %v5978_v56, %v12965_v61  ;;  %v8170_v61 = vld [vmem:[%s13883_s11 + $0x2e] sm:$0x3] }
0x1f3b   :  { %v5999_v37 = vperm.slane %v8170_v61, 0  ;;  %6175 = vmatpush.msrb.mxu3 %v8194_v28 }
0x1f3c   :  { %v5985_v46 = vmul.f32 %v5982_v62, %v5980_v52  ;;  %v8199_v52 = vld [vmem:[%s13877_s5 + $0xb8] sm:$0xff] }
0x1f3d   :  { %6176 = vmatpush.msrb.mxu3 %v8192_v16 }
0x1f3e   :  { %v5990_v39 = vadd.f32 %v5987_v5, %v5985_v46  ;;  %v8197_v46 = vld [vmem:[%s13877_s5 + $0xa8] sm:$0xff] }
0x1f3f   :  { %6196 = vmatpush.msra.mxu3 %v8199_v52  ;;  %v14705_v52 = vld [vmem:[#allocation9_spill] sm:$0xff] }
0x1f40   :  { %8172 = vmatmul.msk.f32.gmra.mxu3 %vm14670_vm2, %v5990_v39  ;;  %v8195_v39 = vld [vmem:[%s13877_s5 + $0x98] sm:$0xff] }
0x1f41   :  { %6197 = vmatpush.msra.mxu3 %v8197_v46  ;;  %v14708_v46 = vld [vmem:[#allocation10_spill] sm:$0xff] }
0x1f43   :  { %6198 = vmatpush.msra.mxu3 %v8195_v39  ;;  %v14711_v39 = vld [vmem:[#allocation11_spill] sm:$0xff] }
0x1f45   :  { %6199 = vmatpush.msra.mxu3 %v8193_v15  ;;  %v14718_v15 = vld [vmem:[#allocation14_spill] sm:$0xff] }
0x1fbb   :  { %v6024_v25 = vpop.f32.mrf.mxu3 }
0x1fbc   :  { %v6025_v32 = vadd.f32 %v6024_v25, %v5999_v37 }
0x1fbe   :  { %v6030_v4 = vmax.f32 %v6025_v32, 0.0 }
0x1fc0   :  { %6065 = vmatmul.f32.vlgmr.msra.gmra.mxu0 %v6030_v4 }
0x1fc3   :  { %v6027_v63 = vpop.f32.mrf.mxu3 }
0x1fc4   :  { %v6028_v58 = vadd.f32 %v6027_v63, %v5999_v37  ;;  %v8190_v63 = vld [vmem:[%s13883_s11 + $0x48] sm:$0x3] }
0x1fc6   :  { %v6031_v60 = vmax.f32 %v6028_v58, 0.0 }
0x1fc8   :  { %6068 = vmatmul.f32.gmra.mxu0 %v6031_v60 }
0x203d   :  { %v6066_v42 = vpop.f32.mrf.mxu0 }
0x203e   :  { %v6072_v19 = vadd.f32 %v6066_v42, %v12951_v45 }
0x2040   :  { %v13048_v14 = vadd.f32 %v6077_v47, %v6072_v19  ;;  %v6130_v19 = vperm.slane %v8190_v63, 0  ;;  %v14729_v63 = vld [vmem:[#allocation20_spill] sm:$0xff] }
0x2042   :  { %14679 = vst [vmem:[#allocation38_spill] sm:$0xff] %v13048_v14  ;;  %v6085_v3 = vsel %vm14680_vm6, %v13048_v14, 0.0 }
0x2043   :  { %6086 = vadd.xlane.f32.xlu0 %v6085_v3 }
0x2045   :  { %v6069_v22 = vpop.f32.mrf.mxu0 }
0x2046   :  { %v6073_v12 = vadd.f32 %v6069_v22, %v12956_v35 }
0x2048   :  { %v13053_v8 = vadd.f32 %v6077_v47, %v6073_v12  ;;  %v6135_v12 = vperm.slane %v8191_v51, 0  ;;  %v14733_v51 = vld [vmem:[#allocation22_spill] sm:$0xff] }
0x204a   :  { %14681 = vst [vmem:[#allocation44_spill] sm:$0xff] %v13053_v8  ;;  %v6088_v55 = vsel %vm14682_vm11, %v13053_v8, 0.0  ;;  %vm14685_vm11 = vmmov %vm14683_vm0 }
0x204b   :  { %6089 = vadd.xlane.f32.xlu2 %v6088_v55 }
0x20b6   :  { %v6087_v62 = vpop.xlane.xlu0 %6086 }
0x20b7   :  { %v6091_v34 = vmul.f32 %v6087_v62, %v14676_v44 }
0x20b9   :  { %v6093_v45 = vsub.f32 %v13048_v14, %v6091_v34 }
0x20bb   :  { %v6095_v20 = vmul.f32 %v6093_v45, %v6093_v45 }
0x20bd   :  { %v6097_v53 = vsel %vm14683_vm0, %v6095_v20, 0.0 }
0x20be   :  { %v6090_v5 = vpop.xlane.xlu2 %6089  ;;  %6098 = vadd.xlane.f32.xlu1 %v6097_v53 }
0x20bf   :  { %v6092_v40 = vmul.f32 %v6090_v5, %v14676_v44 }
0x20c1   :  { %v6094_v35 = vsub.f32 %v13053_v8, %v6092_v40 }
0x20c3   :  { %v6096_v57 = vmul.f32 %v6094_v35, %v6094_v35 }
0x20c5   :  { %v6100_v27 = vsel %vm14684_vm8, %v6096_v57, 0.0  ;;  %vm14686_vm8 = vmmov %vm14683_vm0 }
0x20c6   :  { %6101 = vadd.xlane.f32.xlu0 %v6100_v27 }
0x2131   :  { %v6099_v38 = vpop.xlane.xlu1 %6098 }
0x2132   :  { %v6103_v41 = vmul.f32 %v6099_v38, %v14676_v44 }
0x2134   :  { %v6105_v56 = vadd.f32 1e-05, %v6103_v41 }
0x2136   :  { %8849 = vrsqrt.f32 %v6105_v56  ;;  %vm6113_vm5 = vweird.f32 %v6105_v56 }
0x2139   :  { %v6102_v36 = vpop.xlane.xlu0 %6101 }
0x213a   :  { %v6104_v21 = vmul.f32 %v6102_v36, %v14676_v44  ;;  %v14714_v36 = vld [vmem:[#allocation12_spill] sm:$0xff] }
0x213c   :  { %v8850_v61 = vpop.eup %8849  ;;  %v6106_v37 = vadd.f32 1e-05, %v6104_v21  ;;  %v14716_v21 = vld [vmem:[#allocation13_spill] sm:$0xff] }
0x213d   :  { %v6108_v25 = vmul.f32 %v8850_v61, %v6105_v56  ;;  %vm6114_vm10 = vweird.f32 %v8850_v61 }
0x213e   :  { %8851 = vrsqrt.f32 %v6106_v37  ;;  %vm6115_vm9 = vmor %vm6113_vm5, %vm6114_vm10  ;;  %vm6123_vm2 = vweird.f32 %v6106_v37  ;;  %vm14690_vm5 = vcmask 1043456  }
0x213f   :  { %v6109_v32 = vmul.f32 %v8850_v61, %v6108_v25  ;;  %vm14687_vm10 = vmmov %vm14683_vm0  ;;  %v14723_v25 = vld [vmem:[#allocation17_spill] sm:$0xff] }
0x2141   :  { %v6110_v4 = vmul.f32 0.5, %v6109_v32  ;;  %v14725_v32 = vld [vmem:[#allocation18_spill] sm:$0xff] }
0x2143   :  { %v6111_v58 = vsub.f32 1.5, %v6110_v4  ;;  %v14727_v4 = vld [vmem:[#allocation19_spill] sm:$0xff] }
0x2144   :  { %v8852_v60 = vpop.eup %8851 }
0x2145   :  { %v6112_v47 = vmul.f32 %v8850_v61, %v6111_v58  ;;  %v6118_v42 = vmul.f32 %v8852_v60, %v6106_v37  ;;  %vm6124_vm12 = vweird.f32 %v8852_v60  ;;  %v14721_v37 = vld [vmem:[#allocation16_spill] sm:$0xff]  ;;  %v14731_v58 = vld [vmem:[#allocation21_spill] sm:$0xff] }
0x2146   :  { %vm6125_vm6 = vmor %vm6123_vm2, %vm6124_vm12 }
0x2147   :  { %v6116_v3 = vsel %vm6115_vm9, %v8850_v61, %v6112_v47  ;;  %v6119_v22 = vmul.f32 %v8852_v60, %v6118_v42  ;;  %vm14691_vm9 = vcmask 97280   ;;  %v14719_v61 = vld [vmem:[#allocation15_spill] sm:$0xff]  ;;  %v14735_v42 = vld [vmem:[#allocation24_spill] sm:$0xff] }
0x2148   :  { %v6127_v55 = vmul.f32 %v6116_v3, %v6093_v45  ;;  %v8200_v45 = vld [vmem:[%s13883_s11 + $0x3e] sm:$0x3]  ;;  %vm14692_vm12 = vmmov %vm14691_vm9  ;;  %v14737_v3 = vld [vmem:[#allocation26_spill] sm:$0xff] }
0x2149   :  { %v6120_v62 = vmul.f32 0.5, %v6119_v22  ;;  %v6151_v30 = vperm.slane %v8200_v45, 0  ;;  %vm14693_vm2 = vmmov %vm14691_vm9 }
0x214a   :  { %v6132_v34 = vmul.f32 %v6130_v19, %v6127_v55  ;;  %v8950_v55 = vld [vmem:[%s13883_s11 + $0x12] sm:$0x3] }
0x214b   :  { %v6121_v20 = vsub.f32 1.5, %v6120_v62  ;;  %v13187_v62 = vperm.slane %v8950_v55, 1 }
0x214c   :  { %v6137_v53 = vadd.f32 %v6135_v12, %v6132_v34  ;;  %v14740_v34 = vld [vmem:[#allocation30_spill] sm:$0xff] }
0x214d   :  { %v6122_v5 = vmul.f32 %v8852_v60, %v6121_v20  ;;  %v14742_v20 = vld [vmem:[#allocation90_spill] sm:$0xff] }
0x214e   :  { %8201 = vmatmul.msk.f32.vlgmr.msrb.gmra.mxu3 %vm14685_vm11, %v6137_v53  ;;  %vm14695_vm11 = vmmov %vm14693_vm2 }
0x214f   :  { %v6126_v40 = vsel %vm6125_vm6, %v8852_v60, %v6122_v5  ;;  %vm14694_vm6 = vmmov %vm14693_vm2 }
0x2150   :  { %v6128_v57 = vmul.f32 %v6126_v40, %v6094_v35 }
0x2152   :  { %v6133_v27 = vmul.f32 %v6130_v19, %v6128_v57 }
0x2154   :  { %v6138_v50 = vadd.f32 %v6135_v12, %v6133_v27 }
0x2156   :  { %8202 = vmatmul.msk.f32.gmra.mxu3 %vm14683_vm0, %v6138_v50  ;;  %vm14696_vm0 = vmmov %vm14693_vm2 }
0x215e   :  { %8203 = vmatmul.msk.f32.vlgmr.msra.gmra.mxu3 %vm14686_vm8, %v6137_v53  ;;  %vm14697_vm8 = vmmov %vm14696_vm0  ;;  %v2719_v53 = vadd.f32 %v14742_v20, %v13187_v62 }
0x2166   :  { %8204 = vmatmul.msk.f32.gmra.mxu3 %vm14687_vm10, %v6138_v50  ;;  %vm14698_vm10 = vmmov %vm14696_vm0  ;;  %v14745_v50 = vld [vmem:[#allocation91_spill] sm:$0xff] }
0x2167   :  { %v2722_v45 = vadd.f32 %v14745_v50, %v13187_v62 }
0x21d1   :  { %v6178_v28 = vpop.f32.mrf.mxu3 }
0x21d2   :  { %v13102_v16 = vadd.f32 %v6178_v28, %v6151_v30 }
0x21d4   :  { %14688 = vst [vmem:[#allocation50_spill] sm:$0xff] %v13102_v16  ;;  %6279 = vrot.lane.b32.xlu1 %v13102_v16, %s8979_s23 }
0x21d9   :  { %v6181_v35 = vpop.f32.mrf.mxu3 }
0x21da   :  { %v13106_v38 = vadd.f32 %v6181_v35, %v6151_v30 }
0x21dc   :  { %14689 = vst [vmem:[#allocation56_spill] sm:$0xff] %v13106_v38  ;;  %6281 = vrot.lane.b32.xlu2 %v13106_v38, %s8979_s23  ;;  %8205 = vmatpush.msk.msrb.mxu0 %vm14690_vm5, %v13106_v38  ;;  %vm14699_vm5 = vmmov %vm14696_vm0 }
0x21de   :  { %6225 = vmatpush.msrb.mxu0 %v13102_v16 }
0x21df   :  { %8206 = vmatmul.msk.f32.vlgmr.msrb.gmra.mxu0 %vm14691_vm9, %v10981_v0  ;;  %vm14700_vm9 = vmmov %vm14696_vm0 }
0x21e1   :  { %v13178_v19 = vpop.f32.mrf.mxu3 }
0x21e2   :  { %14736 = vst [vmem:[#allocation64_spill] sm:$0xff] %v13178_v19 }
0x21e7   :  { %8207 = vmatmul.msk.f32.gmra.mxu0 %vm14692_vm12, %v11002_v31  ;;  %vm14701_vm12 = vmmov %vm14696_vm0 }
0x21e9   :  { %v13182_v12 = vpop.f32.mrf.mxu3 }
0x21ea   :  { %14739 = vst [vmem:[#allocation36_spill] sm:$0xff] %v13182_v12 }
0x21ef   :  { %8208 = vmatmul.msk.f32.gmra.mxu0 %vm14693_vm2, %v11020_v11  ;;  %vm14702_vm2 = vmmov %vm14696_vm0 }
0x21f7   :  { %8209 = vmatmul.msk.f32.gmra.mxu0 %vm14694_vm6, %v11041_v29  ;;  %vm14703_vm6 = vcmask 1043456  }
0x21ff   :  { %8210 = vmatmul.msk.f32.gmra.mxu0 %vm14695_vm11, %v11060_v2  ;;  %vm14704_vm11 = vmmov %vm14696_vm0 }
0x2207   :  { %8211 = vmatmul.msk.f32.gmra.mxu0 %vm14696_vm0, %v11078_v18 }
0x220f   :  { %8212 = vmatmul.msk.f32.gmra.mxu0 %vm14697_vm8, %v11097_v54  ;;  %vm14706_vm8 = vmmov %vm14696_vm0 }
0x2217   :  { %8213 = vmatmul.msk.f32.gmra.mxu0 %vm14698_vm10, %v11107_v24  ;;  %vm14707_vm10 = vmmov %vm14696_vm0 }
0x221f   :  { %8214 = vmatmul.msk.f32.gmra.mxu0 %vm14699_vm5, %v11124_v1  ;;  %vm14709_vm5 = vmmov %vm14696_vm0 }
0x2227   :  { %8215 = vmatmul.msk.f32.gmra.mxu0 %vm14700_vm9, %v11170_v43  ;;  %vm14710_vm9 = vmmov %vm14696_vm0 }
0x222f   :  { %8216 = vmatmul.msk.f32.gmra.mxu0 %vm14701_vm12, %v11212_v33  ;;  %vm14712_vm12 = vmmov %vm14696_vm0 }
0x2236   :  { %v6282_v41 = vpop.permute.xlu2 %6281 }
0x2237   :  { %8217 = vmatmul.msk.f32.gmra.mxu0 %vm14702_vm2, %v11237_v6  ;;  %8223 = vmatpush.msk.msrb.mxu3 %vm14703_vm6, %v6282_v41  ;;  %vm14713_vm2 = vmmov %vm14696_vm0 }
0x2238   :  { %vm14715_vm6 = vmmov %vm14696_vm0 }
0x223f   :  { %8218 = vmatmul.msk.f32.gmra.mxu0 %vm14704_vm11, %v11247_v17  ;;  %vm14717_vm11 = vmmov %vm14696_vm0 }
0x2246   :  { %v6280_v56 = vpop.permute.xlu1 %6279 }
0x2247   :  { %8219 = vmatmul.msk.f32.gmra.mxu0 %vm14696_vm0, %v11267_v59  ;;  %6301 = vmatpush.msrb.mxu3 %v6280_v56  ;;  %v14748_v56 = vld [vmem:[#allocation92_spill] sm:$0xff] }
0x2248   :  { %8224 = vmatmul.msk.f32.vlgmr.msrb.gmra.mxu3 %vm14706_vm8, %v14705_v52  ;;  %vm14720_vm8 = vmmov %vm14696_vm0  ;;  %v2725_v52 = vadd.f32 %v14748_v56, %v13187_v62 }
0x224f   :  { %8220 = vmatmul.msk.f32.gmra.mxu0 %vm14707_vm10, %v11290_v13  ;;  %vm14722_vm10 = vmmov %vm14696_vm0 }
0x2250   :  { %8225 = vmatmul.msk.f32.gmra.mxu3 %vm14709_vm5, %v14708_v46  ;;  %vm14724_vm5 = vmmov %vm14696_vm0 }
0x2257   :  { %8221 = vmatmul.msk.f32.gmra.mxu0 %vm14710_vm9, %v14625_v49  ;;  %vm14726_vm9 = vmmov %vm14696_vm0 }
0x2258   :  { %8226 = vmatmul.msk.f32.gmra.mxu3 %vm14712_vm12, %v14711_v39  ;;  %vm14728_vm12 = vmmov %vm14696_vm0 }
0x225c   :  { %v6227_v60 = vpop.f32.mrf.mxu0 }
0x225f   :  { %8222 = vmatmul.msk.f32.gmra.mxu0 %vm14713_vm2, %v14626_v48  ;;  %vm14730_vm2 = vmmov %vm14696_vm0 }
0x2260   :  { %8227 = vmatmul.msk.f32.gmra.mxu3 %vm14715_vm6, %v14714_v36  ;;  %vm14732_vm6 = vmmov %vm14696_vm0 }
0x2264   :  { %v6230_v47 = vpop.f32.mrf.mxu0 }
0x2268   :  { %8228 = vmatmul.msk.f32.gmra.mxu3 %vm14717_vm11, %v14716_v21  ;;  %vm14734_vm11 = vmmov %vm14696_vm0 }
0x226c   :  { %v6233_v22 = vpop.f32.mrf.mxu0 }
0x2270   :  { %8229 = vmatmul.msk.f32.gmra.mxu3 %vm14696_vm0, %v14718_v15  ;;  %v14751_v15 = vld [vmem:[#allocation93_spill] sm:$0xff] }
0x2274   :  { %v6236_v5 = vpop.f32.mrf.mxu0 }
0x2278   :  { %8230 = vmatmul.msk.f32.gmra.mxu3 %vm14720_vm8, %v14719_v61  ;;  %vm14738_vm8 = vmmov %vm14696_vm0  ;;  %v2728_v61 = vadd.f32 %v14751_v15, %v13187_v62 }
0x227c   :  { %v6239_v35 = vpop.f32.mrf.mxu0 }
0x2280   :  { %8231 = vmatmul.msk.f32.gmra.mxu3 %vm14722_vm10, %v14721_v37  ;;  %vm14741_vm10 = vmmov %vm14696_vm0 }
0x2284   :  { %v6242_v21 = vpop.f32.mrf.mxu0 }
0x2288   :  { %8232 = vmatmul.msk.f32.gmra.mxu3 %vm14724_vm5, %v14723_v25  ;;  %vm14744_vm5 = vcmask 261120  }
0x2290   :  { %8233 = vmatmul.msk.f32.gmra.mxu3 %vm14726_vm9, %v14725_v32  ;;  %vm14747_vm9 = vmmov %vm14744_vm5 }
0x2298   :  { %8234 = vmatmul.msk.f32.gmra.mxu3 %vm14728_vm12, %v14727_v4  ;;  %vm14750_vm12 = vmmov %vm14744_vm5  ;;  %v6245_v4 = vpop.f32.mrf.mxu0 }
0x22a0   :  { %8235 = vmatmul.msk.f32.gmra.mxu3 %vm14730_vm2, %v14729_v63  ;;  %vm14753_vm2 = vmmov %vm14744_vm5  ;;  %v14754_v63 = vld [vmem:[#allocation94_spill] sm:$0xff] }
0x22a8   :  { %8236 = vmatmul.msk.f32.gmra.mxu3 %vm14732_vm6, %v14731_v58  ;;  %v2731_v58 = vadd.f32 %v14754_v63, %v13187_v62  ;;  %vm14756_vm6 = vmmov %vm14753_vm2 }
0x22b0   :  { %8237 = vmatmul.msk.f32.gmra.mxu3 %vm14734_vm11, %v14733_v51  ;;  %vm14759_vm11 = vmmov %vm14753_vm2 }
0x22b8   :  { %8238 = vmatmul.msk.f32.gmra.mxu3 %vm14696_vm0, %v14735_v42  ;;  %v14757_v42 = vld [vmem:[#allocation95_spill] sm:$0xff]  ;;  %vm14762_vm0 = vmmov %vm14753_vm2 }
0x22c0   :  { %8239 = vmatmul.msk.f32.gmra.mxu3 %vm14738_vm8, %v14737_v3  ;;  %v2734_v3 = vadd.f32 %v14757_v42, %v13187_v62  ;;  %vm14765_vm8 = vmmov %vm14762_vm0  ;;  %v14772_v42 = vld [vmem:[#allocation100_spill] sm:$0xff] }
0x22c8   :  { %8240 = vmatmul.msk.f32.gmra.mxu3 %vm14741_vm10, %v14740_v34  ;;  %vm14768_vm10 = vmmov %vm14762_vm0 }
0x22cb   :  { %v6303_v40 = vpop.f32.mrf.mxu3 }
0x22cc   :  { %v13193_v57 = vadd.f32 %v6303_v40, %v2719_v53  ;;  %v14760_v53 = vld [vmem:[#allocation96_spill] sm:$0xff] }
0x22ce   :  { %14743 = vst [vmem:[#allocation42_spill] sm:$0xff] %v13193_v57  ;;  %v6354_v27 = vmul.f32 %v13193_v57, %v6227_v60 }
0x22d0   :  { %8241 = vmatmul.msk.f32.vlgmr.msrb.gmra.mxu1 %vm14744_vm5, %v6354_v27  ;;  %vm14771_vm5 = vmmov %vm14762_vm0 }
0x22d3   :  { %v6306_v30 = vpop.f32.mrf.mxu3 }
0x22d4   :  { %v13199_v28 = vadd.f32 %v6306_v30, %v2722_v45  ;;  %v14763_v30 = vld [vmem:[#allocation97_spill] sm:$0xff] }
0x22d6   :  { %14746 = vst [vmem:[#allocation33_spill] sm:$0xff] %v13199_v28  ;;  %v6355_v41 = vmul.f32 %v13199_v28, %v6230_v47 }
0x22d8   :  { %8242 = vmatmul.msk.f32.gmra.mxu1 %vm14747_vm9, %v6355_v41  ;;  %vm14774_vm9 = vmmov %vm14762_vm0 }
0x22db   :  { %v6309_v46 = vpop.f32.mrf.mxu3 }
0x22dc   :  { %v13205_v39 = vadd.f32 %v6309_v46, %v2725_v52 }
0x22de   :  { %14749 = vst [vmem:[#allocation48_spill] sm:$0xff] %v13205_v39  ;;  %v6356_v36 = vmul.f32 %v13205_v39, %v6233_v22  ;;  %v6248_v22 = vpop.f32.mrf.mxu0 }
0x22e0   :  { %8243 = vmatmul.msk.f32.gmra.mxu1 %vm14750_vm12, %v6356_v36  ;;  %v14766_v36 = vld [vmem:[#allocation98_spill] sm:$0xff]  ;;  %vm14777_vm12 = vmmov %vm14762_vm0 }
0x22e3   :  { %v6312_v37 = vpop.f32.mrf.mxu3 }
0x22e4   :  { %v13211_v25 = vadd.f32 %v6312_v37, %v2728_v61 }
0x22e6   :  { %14752 = vst [vmem:[#allocation40_spill] sm:$0xff] %v13211_v25  ;;  %v6357_v32 = vmul.f32 %v13211_v25, %v6236_v5  ;;  %v2737_v5 = vadd.f32 %v14760_v53, %v13187_v62  ;;  %v6251_v50 = vpop.f32.mrf.mxu0 }
0x22e8   :  { %8244 = vmatmul.msk.f32.gmra.mxu1 %vm14753_vm2, %v6357_v32  ;;  %vm14780_vm2 = vmmov %vm14762_vm0 }
0x22eb   :  { %v6315_v60 = vpop.f32.mrf.mxu3 }
0x22ec   :  { %v13217_v51 = vadd.f32 %v6315_v60, %v2731_v58 }
0x22ee   :  { %14755 = vst [vmem:[#allocation54_spill] sm:$0xff] %v13217_v51  ;;  %v6358_v47 = vmul.f32 %v13217_v51, %v6239_v35  ;;  %v2740_v35 = vadd.f32 %v14763_v30, %v13187_v62  ;;  %v6254_v46 = vpop.f32.mrf.mxu0 }
0x22f0   :  { %8245 = vmatmul.msk.f32.gmra.mxu1 %vm14756_vm6, %v6358_v47  ;;  %vm14783_vm6 = vmmov %vm14762_vm0 }
0x22f3   :  { %v6318_v55 = vpop.f32.mrf.mxu3 }
0x22f4   :  { %v13223_v34 = vadd.f32 %v6318_v55, %v2734_v3  ;;  %v2749_v3 = vadd.f32 %v14772_v42, %v13187_v62  ;;  %v14784_v42 = vld [vmem:[#allocation104_spill] sm:$0xff] }
0x22f6   :  { %14758 = vst [vmem:[#allocation46_spill] sm:$0xff] %v13223_v34  ;;  %v6359_v20 = vmul.f32 %v13223_v34, %v6242_v21  ;;  %v2743_v21 = vadd.f32 %v14766_v36, %v13187_v62  ;;  %v6257_v32 = vpop.f32.mrf.mxu0 }
0x22f8   :  { %8246 = vmatmul.msk.f32.gmra.mxu1 %vm14759_vm11, %v6359_v20  ;;  %vm14786_vm11 = vmmov %vm14762_vm0 }
0x22fb   :  { %v6321_v40 = vpop.f32.mrf.mxu3 }
0x22fc   :  { %v13229_v27 = vadd.f32 %v6321_v40, %v2737_v5  ;;  %v14775_v5 = vld [vmem:[#allocation101_spill] sm:$0xff] }
0x22fd   :  { %v2752_v40 = vadd.f32 %v14775_v5, %v13187_v62  ;;  %v14787_v5 = vld [vmem:[#allocation105_spill] sm:$0xff] }
0x22fe   :  { %14761 = vst [vmem:[#allocation62_spill] sm:$0xff] %v13229_v27  ;;  %v6360_v45 = vmul.f32 %v13229_v27, %v6245_v4  ;;  %v14769_v4 = vld [vmem:[#allocation99_spill] sm:$0xff] }
0x22ff   :  { %v2746_v63 = vadd.f32 %v14769_v4, %v13187_v62 }
0x2300   :  { %8247 = vmatmul.msk.f32.gmra.mxu1 %vm14762_vm0, %v6360_v45 }
0x2303   :  { %v6324_v41 = vpop.f32.mrf.mxu3 }
0x2304   :  { %v13235_v56 = vadd.f32 %v6324_v41, %v2740_v35  ;;  %v14778_v41 = vld [vmem:[#allocation102_spill] sm:$0xff] }
0x2306   :  { %14764 = vst [vmem:[#allocation52_spill] sm:$0xff] %v13235_v56  ;;  %v6361_v52 = vmul.f32 %v13235_v56, %v6248_v22  ;;  %v6260_v22 = vpop.f32.mrf.mxu0 }
0x2308   :  { %8248 = vmatmul.msk.f32.gmra.mxu1 %vm14765_vm8, %v6361_v52  ;;  %v2755_v52 = vadd.f32 %v14778_v41, %v13187_v62  ;;  %vm14791_vm8 = vmmov %vm14762_vm0 }
0x230b   :  { %v6327_v15 = vpop.f32.mrf.mxu3 }
0x230c   :  { %v13241_v61 = vadd.f32 %v6327_v15, %v2743_v21 }
0x230e   :  { %14767 = vst [vmem:[#allocation59_spill] sm:$0xff] %v13241_v61  ;;  %v6362_v37 = vmul.f32 %v13241_v61, %v6251_v50  ;;  %v6263_v30 = vpop.f32.mrf.mxu0 }
0x2310   :  { %8249 = vmatmul.msk.f32.gmra.mxu1 %vm14768_vm10, %v6362_v37  ;;  %v14781_v37 = vld [vmem:[#allocation103_spill] sm:$0xff]  ;;  %vm14797_vm10 = vcmask 31744  }
0x2313   :  { %v6330_v58 = vpop.f32.mrf.mxu3 }
0x2314   :  { %v13247_v60 = vadd.f32 %v6330_v58, %v2746_v63 }
0x2316   :  { %14770 = vst [vmem:[#allocation7_spill] sm:$0xff] %v13247_v60  ;;  %v6363_v47 = vmul.f32 %v13247_v60, %v6254_v46  ;;  %v6266_v15 = vpop.f32.mrf.mxu0 }
0x2318   :  { %8250 = vmatmul.msk.f32.gmra.mxu1 %vm14771_vm5, %v6363_v47  ;;  %vm14798_vm5 = vmmov %vm14797_vm10 }
0x231b   :  { %v6333_v55 = vpop.f32.mrf.mxu3 }
0x231c   :  { %v13253_v20 = vadd.f32 %v6333_v55, %v2749_v3  ;;  %v2761_v3 = vadd.f32 %v14784_v42, %v13187_v62 }
0x231e   :  { %14773 = vst [vmem:[#allocation65_spill] sm:$0xff] %v13253_v20  ;;  %v6364_v53 = vmul.f32 %v13253_v20, %v6257_v32  ;;  %v2758_v32 = vadd.f32 %v14781_v37, %v13187_v62  ;;  %v6269_v47 = vpop.f32.mrf.mxu0 }
0x2320   :  { %8251 = vmatmul.msk.f32.gmra.mxu1 %vm14774_vm9, %v6364_v53 }
0x2323   :  { %v6336_v50 = vpop.f32.mrf.mxu3 }
0x2324   :  { %v13259_v45 = vadd.f32 %v6336_v50, %v2752_v40  ;;  %v2764_v40 = vadd.f32 %v14787_v5, %v13187_v62 }
0x2326   :  { %14776 = vst [vmem:[#allocation35_spill] sm:$0xff] %v13259_v45  ;;  %v6365_v35 = vmul.f32 %v13259_v45, %v6260_v22  ;;  %v6272_v50 = vpop.f32.mrf.mxu0 }
0x2328   :  { %8252 = vmatmul.msk.f32.gmra.mxu1 %vm14777_vm12, %v6365_v35 }
0x232b   :  { %v6339_v46 = vpop.f32.mrf.mxu3 }
0x232c   :  { %v13265_v36 = vadd.f32 %v6339_v46, %v2755_v52  ;;  %v14789_v52 = vld [vmem:[#allocation23_spill] sm:$0xff] }
0x232d   :  { %v2767_v46 = vadd.f32 %v14789_v52, %v13187_v62 }
0x232e   :  { %14779 = vst [vmem:[#allocation37_spill] sm:$0xff] %v13265_v36  ;;  %v6366_v21 = vmul.f32 %v13265_v36, %v6263_v30  ;;  %v6275_v37 = vpop.f32.mrf.mxu0 }
0x2330   :  { %8253 = vmatmul.msk.f32.gmra.mxu1 %vm14780_vm2, %v6366_v21 }
0x2333   :  { %v6342_v4 = vpop.f32.mrf.mxu3 }
0x2334   :  { %v13271_v63 = vadd.f32 %v6342_v4, %v2758_v32 }
0x2336   :  { %14782 = vst [vmem:[#allocation6_spill] sm:$0xff] %v13271_v63  ;;  %v6367_v58 = vmul.f32 %v13271_v63, %v6266_v15 }
0x2338   :  { %8254 = vmatmul.msk.f32.gmra.mxu1 %vm14783_vm6, %v6367_v58 }
0x233b   :  { %v6345_v22 = vpop.f32.mrf.mxu3 }
0x233c   :  { %v13277_v55 = vadd.f32 %v6345_v22, %v2761_v3 }
0x233e   :  { %14785 = vst [vmem:[#allocation58_spill] sm:$0xff] %v13277_v55  ;;  %v6368_v53 = vmul.f32 %v13277_v55, %v6269_v47 }
0x2340   :  { %8255 = vmatmul.msk.f32.gmra.mxu1 %vm14786_vm11, %v6368_v53 }
0x2343   :  { %v6348_v30 = vpop.f32.mrf.mxu3 }
0x2344   :  { %v13283_v35 = vadd.f32 %v6348_v30, %v2764_v40 }
0x2346   :  { %14788 = vst [vmem:[#allocation32_spill] sm:$0xff] %v13283_v35  ;;  %v6369_v41 = vmul.f32 %v13283_v35, %v6272_v50 }
0x2348   :  { %8256 = vmatmul.msk.f32.gmra.mxu1 %vm14762_vm0, %v6369_v41 }
0x234b   :  { %v6351_v21 = vpop.f32.mrf.mxu3 }
0x234c   :  { %v13289_v15 = vadd.f32 %v6351_v21, %v2767_v46 }
0x234d   :  { %v13291_v32 = vpop.f32.mrf.mxu1 }
0x234e   :  { %14790 = vst [vmem:[#allocation28_spill] sm:$0xff] %v13289_v15  ;;  %v6370_v4 = vmul.f32 %v13289_v15, %v6275_v37  ;;  %6490 = vxpose.xlu2.b32.start [1/16] (narrow) %v13291_v32, 8 }
0x2350   :  { %8257 = vmatmul.msk.f32.gmra.mxu1 %vm14791_vm8, %v6370_v4  ;;  %v14792_v4 = vmov 1  }
0x2355   :  { %v13296_v58 = vpop.f32.mrf.mxu1 }
0x2356   :  { %6491 = vxpose.xlu2.b32.cont [2/16] (narrow) %v13296_v58, 8 }
0x235d   :  { %v13299_v47 = vpop.f32.mrf.mxu1 }
0x235e   :  { %6492 = vxpose.xlu2.b32.cont [3/16] (narrow) %v13299_v47, 8 }
0x2365   :  { %v13302_v62 = vpop.f32.mrf.mxu1 }
0x2366   :  { %6493 = vxpose.xlu2.b32.cont [4/16] (narrow) %v13302_v62, 8 }
0x236d   :  { %v13305_v42 = vpop.f32.mrf.mxu1 }
0x236e   :  { %6494 = vxpose.xlu2.b32.cont [5/16] (narrow) %v13305_v42, 8 }
0x2375   :  { %v13308_v3 = vpop.f32.mrf.mxu1 }
0x2376   :  { %6495 = vxpose.xlu2.b32.cont [6/16] (narrow) %v13308_v3, 8 }
0x237d   :  { %v13311_v22 = vpop.f32.mrf.mxu1 }
0x237e   :  { %6496 = vxpose.xlu2.b32.cont [7/16] (narrow) %v13311_v22, 8 }
0x2385   :  { %v13314_v53 = vpop.f32.mrf.mxu1 }
0x2386   :  { %6497 = vxpose.xlu2.b32.cont [8/16] (narrow) %v13314_v53, 8 }
0x238d   :  { %v13317_v5 = vpop.f32.mrf.mxu1 }
0x238e   :  { %6498 = vxpose.xlu2.b32.cont [9/16] (narrow) %v13317_v5, 8 }
0x2395   :  { %v13320_v40 = vpop.f32.mrf.mxu1 }
0x2396   :  { %6499 = vxpose.xlu2.b32.cont [10/16] (narrow) %v13320_v40, 8 }
0x239d   :  { %v13323_v50 = vpop.f32.mrf.mxu1 }
0x239e   :  { %6500 = vxpose.xlu2.b32.cont [11/16] (narrow) %v13323_v50, 8 }
0x23a5   :  { %v13326_v30 = vpop.f32.mrf.mxu1 }
0x23a6   :  { %6501 = vxpose.xlu2.b32.cont [12/16] (narrow) %v13326_v30, 8 }
0x23ad   :  { %v13329_v41 = vpop.f32.mrf.mxu1 }
0x23ae   :  { %6502 = vxpose.xlu2.b32.cont [13/16] (narrow) %v13329_v41, 8 }
0x23b5   :  { %v13332_v52 = vpop.f32.mrf.mxu1 }
0x23b6   :  { %6503 = vxpose.xlu2.b32.cont [14/16] (narrow) %v13332_v52, 8 }
0x23bd   :  { %v13335_v46 = vpop.f32.mrf.mxu1 }
0x23be   :  { %6504 = vxpose.xlu2.b32.cont [15/16] (narrow) %v13335_v46, 8 }
0x23c5   :  { %v13338_v21 = vpop.f32.mrf.mxu1 }
0x23c6   :  { %6505 = vxpose.xlu2.b32.end [16/16] (narrow) %v13338_v21, 8 }
0x23cd   :  { %v13341_v37 = vpop.f32.mrf.mxu1 }
0x23ce   :  { %6522 = vxpose.xlu0.b32.start.end [1/1] (short) (narrow) %v13341_v37, 8 }
0x23e7   :  { %v6506_v44 = vpop.trf.xlu2 }
0x23e8   :  { %v6554_v12 = vsel %vm11553_vm4, %v6506_v44, -1e+30  ;;  %v6556_v38 = vsel %vm11549_vm15, %v6506_v44, -1e+30  ;;  %v6558_v19 = vsel %vm14531_vm14, %v6506_v44, -1e+30  ;;  %vm14801_vm15 = vmmov %vm14798_vm5 }
0x23e9   :  { %vm14805_vm4 = vmmov %vm14798_vm5 }
0x23ea   :  { %vm14810_vm14 = vmmov %vm14805_vm4 }
0x23eb   :  { %vm14815_vm12 = vmmov %vm14805_vm4 }
0x23ec   :  { %vm14820_vm11 = vmmov %vm14805_vm4 }
0x2435   :  { %8542 = vset.pattern.permute.xlu0 %v14792_v4 }
0x2472   :  { %v6538_v8 = vpop.trf.xlu0 }
0x2473   :  { %v6555_v28 = vsel %vm11565_vm7, %v6538_v8, -1e+30  ;;  %v6557_v15 = vsel %vm11561_vm3, %v6538_v8, -1e+30  ;;  %v6559_v14 = vsel %vm11592_vm13, %v6538_v8, -1e+30 }
0x2474   :  { %v6578_v25 = vsel %vm14797_vm10, %v6555_v28, -inf  ;;  %v6582_v39 = vsel %vm14798_vm5, %v6557_v15, -inf  ;;  %v6586_v16 = vsel %vm14801_vm15, %v6559_v14, -inf  ;;  %v6561_v45 = vsel %vm14534_vm1, %v6538_v8, -1e+30  ;;  %v14803_v28 = vld [vmem:[#allocation73_spill] sm:$0xff]  ;;  %vm14825_vm10 = vmmov %vm14805_vm4 }
0x2475   :  { %v6579_v51 = vmax.f32 %v6554_v12, %v6578_v25  ;;  %v6583_v4 = vmax.f32 %v6556_v38, %v6582_v39  ;;  %v6587_v27 = vmax.f32 %v6558_v19, %v6586_v16  ;;  %vm14804_vm3 = vnez %v14803_v28  ;;  %v14806_v39 = vld [vmem:[#allocation74_spill] sm:$0xff]  ;;  %v14813_v19 = vld [vmem:[#allocation77_spill] sm:$0xff] }
0x2476   :  { %v6560_v15 = vsel %vm14804_vm3, %v6506_v44, -1e+30  ;;  %v6590_v38 = vsel %vm14805_vm4, %v6561_v45, -inf  ;;  %vm14807_vm7 = vnez %v14806_v39  ;;  %vm14814_vm1 = vnez %v14813_v19  ;;  %v14816_v28 = vld [vmem:[#allocation78_spill] sm:$0xff]  ;;  %vm14830_vm3 = vmmov %vm14805_vm4 }
0x2477   :  { %6580 = vmax.xlane.f32.xlu1 %v6579_v51  ;;  %6584 = vmax.xlane.f32.xlu0 %v6583_v4  ;;  %v6591_v12 = vmax.f32 %v6560_v15, %v6590_v38  ;;  %v6571_v25 = vsel %vm14807_vm7, %v6538_v8, -1e+30  ;;  %v14808_v51 = vld [vmem:[#allocation75_spill] sm:$0xff]  ;;  %v6572_v16 = vsel %vm14814_vm1, %v6506_v44, -1e+30  ;;  %vm14817_vm2 = vnez %v14816_v28  ;;  %v14826_v19 = vld [vmem:[#allocation82_spill] sm:$0xff]  ;;  %vm14840_vm1 = vmmov %vm14830_vm3 }
0x2478   :  { %vm14809_vm13 = vnez %v14808_v51  ;;  %v6610_v56 = vsel %vm14810_vm14, %v6571_v25, -inf  ;;  %v6563_v15 = vsel %vm14817_vm2, %v6538_v8, -1e+30  ;;  %v14818_v38 = vld [vmem:[#allocation79_spill] sm:$0xff]  ;;  %v14821_v51 = vld [vmem:[#allocation80_spill] sm:$0xff]  ;;  %vm14827_vm5 = vnez %v14826_v19 }
0x2479   :  { %v6570_v34 = vsel %vm14809_vm13, %v6506_v44, -1e+30  ;;  %vm14819_vm6 = vnez %v14818_v38  ;;  %v6594_v39 = vsel %vm14820_vm11, %v6563_v15, -inf  ;;  %vm14822_vm0 = vnez %v14821_v51  ;;  %v14831_v38 = vld [vmem:[#allocation84_spill] sm:$0xff]  ;;  %vm14835_vm13 = vmmov %vm14830_vm3 }
0x247a   :  { %v6611_v4 = vmax.f32 %v6570_v34, %v6610_v56  ;;  %v6575_v34 = vsel %vm14822_vm0, %v6538_v8, -1e+30  ;;  %v14823_v56 = vld [vmem:[#allocation81_spill] sm:$0xff]  ;;  %vm14832_vm4 = vnez %v14831_v38  ;;  %vm14847_vm11 = vcmask 1041409  }
0x247b   :  { %vm14824_vm8 = vnez %v14823_v56  ;;  %v14836_v56 = vld [vmem:[#allocation86_spill] sm:$0xff]  ;;  %vm14848_vm0 = vcmask 1042434  }
0x247c   :  { %vm14837_vm14 = vnez %v14836_v56 }
0x247f   :  { %6588 = vmax.xlane.f32.xlu1 %v6587_v27  ;;  %v14811_v27 = vld [vmem:[#allocation76_spill] sm:$0xff] }
0x2480   :  { %vm14812_vm9 = vnez %v14811_v27  ;;  %v6618_v27 = vsel %vm14825_vm10, %v6575_v34, -inf  ;;  %vm14850_vm10 = vmmov %vm14848_vm0 }
0x2481   :  { %v6573_v14 = vsel %vm14812_vm9, %v6538_v8, -1e+30 }
0x2482   :  { %v6614_v45 = vsel %vm14815_vm12, %v6573_v14, -inf }
0x2483   :  { %v6615_v57 = vmax.f32 %v6572_v16, %v6614_v45  ;;  %v6565_v16 = vsel %vm14827_vm5, %v6538_v8, -1e+30  ;;  %v14828_v45 = vld [vmem:[#allocation83_spill] sm:$0xff]  ;;  %vm14851_vm5 = vcmask 1043459  }
0x2484   :  { %vm14829_vm15 = vnez %v14828_v45  ;;  %v6598_v28 = vsel %vm14830_vm3, %v6565_v16, -inf  ;;  %v14841_v45 = vld [vmem:[#allocation88_spill] sm:$0xff]  ;;  %vm14853_vm3 = vmmov %vm14851_vm5 }
0x2485   :  { %vm14842_vm12 = vnez %v14841_v45 }
0x2487   :  { %6592 = vmax.xlane.f32.xlu1 %v6591_v12  ;;  %v6562_v12 = vsel %vm14819_vm6, %v6506_v44, -1e+30  ;;  %vm14845_vm6 = vmmov %vm14840_vm1 }
0x2488   :  { %v6595_v25 = vmax.f32 %v6562_v12, %v6594_v39  ;;  %v6577_v12 = vsel %vm14832_vm4, %v6538_v8, -1e+30  ;;  %v14833_v39 = vld [vmem:[#allocation85_spill] sm:$0xff]  ;;  %vm14854_vm4 = vcmask 1044484  }
0x2489   :  { %vm14834_vm7 = vnez %v14833_v39  ;;  %v6622_v51 = vsel %vm14835_vm13, %v6577_v12, -inf  ;;  %vm14856_vm13 = vcmask 1046534  }
0x248f   :  { %6612 = vmax.xlane.f32.xlu1 %v6611_v4  ;;  %v6574_v4 = vsel %vm14824_vm8, %v6506_v44, -1e+30  ;;  %vm14849_vm8 = vmmov %vm14847_vm11 }
0x2490   :  { %v6619_v14 = vmax.f32 %v6574_v4, %v6618_v27  ;;  %v6567_v4 = vsel %vm14837_vm14, %v6538_v8, -1e+30  ;;  %v14838_v27 = vld [vmem:[#allocation87_spill] sm:$0xff]  ;;  %vm14857_vm14 = vcmask 1047559  }
0x2491   :  { %vm14839_vm9 = vnez %v14838_v27  ;;  %v6602_v19 = vsel %vm14840_vm1, %v6567_v4, -inf }
0x2497   :  { %6616 = vmax.xlane.f32.xlu1 %v6615_v57  ;;  %v6564_v57 = vsel %vm14829_vm15, %v6506_v44, -1e+30  ;;  %vm14852_vm15 = vcmask 1043456  }
0x2498   :  { %v6599_v15 = vmax.f32 %v6564_v57, %v6598_v28  ;;  %v6569_v57 = vsel %vm14842_vm12, %v6538_v8, -1e+30  ;;  %v14843_v28 = vld [vmem:[#allocation89_spill] sm:$0xff] }
0x2499   :  { %vm14844_vm2 = vnez %v14843_v28  ;;  %v6606_v38 = vsel %vm14845_vm6, %v6569_v57, -inf }
0x249f   :  { %6596 = vmax.xlane.f32.xlu1 %v6595_v25  ;;  %v6576_v25 = vsel %vm14834_vm7, %v6506_v44, -1e+30  ;;  %vm14855_vm7 = vcmask 1045509  }
0x24a0   :  { %v6623_v34 = vmax.f32 %v6576_v25, %v6622_v51  ;;  %v14846_v51 = vld [vmem:[#allocation8_spill] sm:$0xff] }
0x24a7   :  { %6620 = vmax.xlane.f32.xlu1 %v6619_v14  ;;  %v6566_v14 = vsel %vm14839_vm9, %v6506_v44, -1e+30  ;;  %vm14858_vm9 = vcmask 97280  }
0x24a8   :  { %v6603_v16 = vmax.f32 %v6566_v14, %v6602_v19  ;;  %vm14859_vm1 = vmmov %vm14858_vm9 }
0x24a9   :  { %vm14860_vm12 = vmmov %vm14859_vm1 }
0x24aa   :  { %vm14862_vm6 = vmmov %vm14859_vm1 }
0x24af   :  { %6600 = vmax.xlane.f32.xlu1 %v6599_v15  ;;  %v6568_v15 = vsel %vm14844_vm2, %v6506_v44, -1e+30  ;;  %vm14861_vm2 = vmmov %vm14859_vm1 }
0x24b0   :  { %v6607_v12 = vmax.f32 %v6568_v15, %v6606_v38 }
0x24b7   :  { %6624 = vmax.xlane.f32.xlu1 %v6623_v34 }
0x24bf   :  { %6604 = vmax.xlane.f32.xlu1 %v6603_v16 }
0x24c7   :  { %6608 = vmax.xlane.f32.xlu1 %v6607_v12 }
0x24ea   :  { %v6581_v39 = vpop.xlane.xlu1 %6580  ;;  %v6585_v25 = vpop.xlane.xlu0 %6584 }
0x24eb   :  { %v6638_v34 = vperm.slane %v6581_v39, %v14846_v51  ;;  %v6639_v56 = vperm.slane %v6585_v25, %v14846_v51 }
0x24ed   :  { %v6650_v14 = vsel %vm14847_vm11, %v6639_v56, %v6638_v34  ;;  %vm14863_vm11 = vmmov %vm14859_vm1 }
0x24f2   :  { %v6589_v27 = vpop.xlane.xlu1 %6588 }
0x24f3   :  { %v6640_v4 = vperm.slane %v6589_v27, %v14846_v51 }
0x24f5   :  { %v6651_v8 = vsel %vm14848_vm0, %v6640_v4, %v6650_v14  ;;  %vm14864_vm0 = vmmov %vm14859_vm1 }
0x24fa   :  { %v6593_v19 = vpop.xlane.xlu1 %6592 }
0x24fb   :  { %v6641_v14 = vperm.slane %v6593_v19, %v14846_v51 }
0x24fd   :  { %v6652_v20 = vsel %vm14853_vm3, %v6641_v14, %v6651_v8  ;;  %vm14869_vm3 = vmmov %vm14864_vm0 }
0x2502   :  { %v6613_v16 = vpop.xlane.xlu1 %6612 }
0x2503   :  { %v6646_v12 = vperm.slane %v6613_v16, %v14846_v51 }
0x250a   :  { %v6617_v44 = vpop.xlane.xlu1 %6616 }
0x250b   :  { %v6647_v15 = vperm.slane %v6617_v44, %v14846_v51 }
0x250d   :  { %v6657_v25 = vsel %vm14849_vm8, %v6647_v15, %v6646_v12  ;;  %vm14865_vm8 = vmmov %vm14864_vm0 }
0x2512   :  { %v6597_v45 = vpop.xlane.xlu1 %6596 }
0x2513   :  { %v6642_v44 = vperm.slane %v6597_v45, %v14846_v51 }
0x2515   :  { %v6653_v15 = vsel %vm14854_vm4, %v6642_v44, %v6652_v20  ;;  %vm14870_vm4 = vmmov %vm14864_vm0 }
0x251a   :  { %v6621_v57 = vpop.xlane.xlu1 %6620 }
0x251b   :  { %v6648_v38 = vperm.slane %v6621_v57, %v14846_v51 }
0x251d   :  { %v6658_v34 = vsel %vm14850_vm10, %v6648_v38, %v6657_v25  ;;  %vm14866_vm10 = vmmov %vm14864_vm0 }
0x2522   :  { %v6601_v28 = vpop.xlane.xlu1 %6600 }
0x2523   :  { %v6643_v57 = vperm.slane %v6601_v28, %v14846_v51 }
0x2525   :  { %v6654_v38 = vsel %vm14855_vm7, %v6643_v57, %v6653_v15  ;;  %vm14871_vm7 = vmmov %vm14864_vm0 }
0x252a   :  { %v6625_v39 = vpop.xlane.xlu1 %6624 }
0x252b   :  { %v6649_v27 = vperm.slane %v6625_v39, %v14846_v51 }
0x252d   :  { %v6659_v56 = vsel %vm14851_vm5, %v6649_v27, %v6658_v34  ;;  %vm14867_vm5 = vmmov %vm14864_vm0 }
0x252e   :  { %8258 = vmatpush.msk.msrb.mxu2 %vm14852_vm15, %v6659_v56  ;;  %vm14868_vm15 = vmmov %vm14864_vm0 }
0x2532   :  { %v6605_v4 = vpop.xlane.xlu1 %6604 }
0x2533   :  { %v6644_v16 = vperm.slane %v6605_v4, %v14846_v51 }
0x2535   :  { %v6655_v25 = vsel %vm14856_vm13, %v6644_v16, %v6654_v38  ;;  %vm14872_vm13 = vmmov %vm14864_vm0 }
0x253a   :  { %v6609_v12 = vpop.xlane.xlu1 %6608 }
0x253b   :  { %v6645_v39 = vperm.slane %v6609_v12, %v14846_v51 }
0x253d   :  { %v6656_v27 = vsel %vm14857_vm14, %v6645_v39, %v6655_v25  ;;  %vm14873_vm14 = vmmov %vm14864_vm0 }
0x253e   :  { %6678 = vmatpush.msrb.mxu2 %v6656_v27 }
0x253f   :  { %8259 = vmatmul.msk.f32.vlgmr.msrb.gmra.mxu2 %vm14858_vm9, %v10981_v0  ;;  %vm14874_vm9 = vmmov %vm14864_vm0 }
0x2547   :  { %8260 = vmatmul.msk.f32.gmra.mxu2 %vm14859_vm1, %v11002_v31  ;;  %vm14875_vm1 = vcmask 1043456  }
0x254f   :  { %8261 = vmatmul.msk.f32.gmra.mxu2 %vm14860_vm12, %v11020_v11  ;;  %vm14876_vm12 = vcmask 31744  }
0x2557   :  { %8262 = vmatmul.msk.f32.gmra.mxu2 %vm14861_vm2, %v11041_v29  ;;  %vm14877_vm2 = vmmov %vm14876_vm12 }
0x255f   :  { %8263 = vmatmul.msk.f32.gmra.mxu2 %vm14862_vm6, %v11060_v2  ;;  %vm14878_vm6 = vnez %v14220_v23 }
0x2567   :  { %8264 = vmatmul.msk.f32.gmra.mxu2 %vm14863_vm11, %v11078_v18  ;;  %vm14879_vm11 = vnez %v14236_v26 }
0x256f   :  { %8265 = vmatmul.msk.f32.gmra.mxu2 %vm14864_vm0, %v11097_v54  ;;  %vm14880_vm0 = vmmov %vm14875_vm1 }
0x2577   :  { %8266 = vmatmul.msk.f32.gmra.mxu2 %vm14865_vm8, %v11107_v24  ;;  %vm14881_vm8 = vmmov %vm14869_vm3 }
0x257f   :  { %8267 = vmatmul.msk.f32.gmra.mxu2 %vm14866_vm10, %v11124_v1  ;;  %vm14882_vm10 = vmmov %vm14869_vm3 }
0x2587   :  { %8268 = vmatmul.msk.f32.gmra.mxu2 %vm14867_vm5, %v11170_v43  ;;  %vm14883_vm5 = vmmov %vm14869_vm3 }
0x258f   :  { %8269 = vmatmul.msk.f32.gmra.mxu2 %vm14868_vm15, %v11212_v33  ;;  %vm14884_vm15 = vmmov %vm14869_vm3 }
0x2597   :  { %8270 = vmatmul.msk.f32.gmra.mxu2 %vm14869_vm3, %v11237_v6 }
0x259f   :  { %8271 = vmatmul.msk.f32.gmra.mxu2 %vm14870_vm4, %v11247_v17  ;;  %vm14885_vm4 = vmmov %vm14869_vm3 }
0x25a7   :  { %8272 = vmatmul.msk.f32.gmra.mxu2 %vm14871_vm7, %v11267_v59  ;;  %vm14886_vm7 = vmmov %vm14869_vm3 }
0x25af   :  { %8273 = vmatmul.msk.f32.gmra.mxu2 %vm14872_vm13, %v11290_v13  ;;  %vm14887_vm13 = vmmov %vm14869_vm3 }
0x25b7   :  { %8274 = vmatmul.msk.f32.gmra.mxu2 %vm14873_vm14, %v14625_v49  ;;  %vm14888_vm14 = vmmov %vm14869_vm3 }
0x25bf   :  { %8275 = vmatmul.msk.f32.gmra.mxu2 %vm14874_vm9, %v14626_v48  ;;  %vm14889_vm9 = vmmov %vm14869_vm3 }
0x25c2   :  { %v13462_v20 = vpop.f32.mrf.mxu2 }
0x25ca   :  { %v13464_v51 = vpop.f32.mrf.mxu2 }
0x25d2   :  { %v13466_v8 = vpop.f32.mrf.mxu2 }
0x25da   :  { %v13468_v19 = vpop.f32.mrf.mxu2 }
0x25e2   :  { %v13470_v45 = vpop.f32.mrf.mxu2 }
0x25ea   :  { %v6695_v28 = vpop.f32.mrf.mxu2 }
0x25f2   :  { %v6698_v34 = vpop.f32.mrf.mxu2 }
0x25fa   :  { %v6701_v56 = vpop.f32.mrf.mxu2 }
0x2602   :  { %v6704_v4 = vpop.f32.mrf.mxu2 }
0x260a   :  { %v6707_v14 = vpop.f32.mrf.mxu2 }
0x2612   :  { %v6710_v44 = vpop.f32.mrf.mxu2 }
0x2613   :  { %v6741_v36 = vsub.f32 %v13323_v50, %v6710_v44 }
0x261a   :  { %v6713_v57 = vpop.f32.mrf.mxu2 }
0x261b   :  { %v6742_v61 = vsub.f32 %v13326_v30, %v6713_v57 }
0x261d   :  { %v6770_v49 = vmul.f32 1.442695, %v6742_v61  ;;  %v6738_v61 = vsub.f32 %v13314_v53, %v6701_v56 }
0x2622   :  { %v6716_v16 = vpop.f32.mrf.mxu2 }
0x2623   :  { %v6743_v35 = vsub.f32 %v13329_v41, %v6716_v16  ;;  %v6739_v41 = vsub.f32 %v13317_v5, %v6704_v4  ;;  %v6768_v16 = vmul.f32 1.442695, %v6741_v36  ;;  %v6762_v36 = vmul.f32 1.442695, %v6738_v61 }
0x2625   :  { %v6772_v48 = vmul.f32 1.442695, %v6743_v35  ;;  %v6764_v35 = vmul.f32 1.442695, %v6739_v41 }
0x262a   :  { %v6719_v15 = vpop.f32.mrf.mxu2 }
0x262b   :  { %v6744_v25 = vsub.f32 %v13332_v52, %v6719_v15 }
0x262d   :  { %v6774_v63 = vmul.f32 1.442695, %v6744_v25 }
0x2632   :  { %v6722_v12 = vpop.f32.mrf.mxu2 }
0x2633   :  { %v6745_v38 = vsub.f32 %v13335_v46, %v6722_v12  ;;  %v6740_v46 = vsub.f32 %v13320_v40, %v6707_v14  ;;  %v6735_v40 = vsub.f32 %v13305_v42, %v13470_v45  ;;  %v8951_v42 = vld [vmem:[%s13876_s4 + $0x88] sm:$0xff]  ;;  %v6731_v14 = vsub.f32 %v13291_v32, %v13462_v20 }
0x2635   :  { %v6776_v55 = vmul.f32 1.442695, %v6745_v38 }
0x263a   :  { %v6725_v39 = vpop.f32.mrf.mxu2 }
0x263b   :  { %v6746_v27 = vsub.f32 %v13338_v21, %v6725_v39 }
0x263d   :  { %v6778_v60 = vmul.f32 1.442695, %v6746_v27 }
0x263f   :  { %8853 = vpow2.f32 %v6778_v60 }
0x2640   :  { %8855 = vpow2.f32 %v6776_v55  ;;  %v6766_v55 = vmul.f32 1.442695, %v6740_v46 }
0x2641   :  { %8857 = vpow2.f32 %v6774_v63 }
0x2642   :  { %v6728_v13 = vpop.f32.mrf.mxu2  ;;  %8859 = vpow2.f32 %v6772_v48 }
0x2643   :  { %v6747_v52 = vsub.f32 %v13341_v37, %v6728_v13  ;;  %8861 = vpow2.f32 %v6770_v49  ;;  %v6737_v13 = vsub.f32 %v13311_v22, %v6698_v34  ;;  %v6736_v49 = vsub.f32 %v13308_v3, %v6695_v28 }
0x2644   :  { %v6734_v3 = vsub.f32 %v13302_v62, %v13468_v19  ;;  %v6733_v28 = vsub.f32 %v13299_v47, %v13466_v8  ;;  %v6756_v34 = vmul.f32 1.442695, %v6735_v40  ;;  %v6732_v19 = vsub.f32 %v13296_v58, %v13464_v51 }
0x2645   :  { %v13480_v21 = vpop.eup %8853  ;;  %v6780_v30 = vmul.f32 1.442695, %v6747_v52  ;;  %v6760_v22 = vmul.f32 1.442695, %v6737_v13  ;;  %v6758_v37 = vmul.f32 1.442695, %v6736_v49 }
0x2646   :  { %6785 = vmatpush.msra.mxu0 %v13480_v21  ;;  %v13484_v60 = vpop.eup %8855  ;;  %v6754_v56 = vmul.f32 1.442695, %v6734_v3  ;;  %v6752_v44 = vmul.f32 1.442695, %v6733_v28  ;;  %v6750_v8 = vmul.f32 1.442695, %v6732_v19 }
0x2647   :  { %8863 = vpow2.f32 %v6780_v30  ;;  %v13488_v63 = vpop.eup %8857  ;;  %v6748_v51 = vmul.f32 1.442695, %v6731_v14 }
0x2648   :  { %6786 = vmatpush.msra.mxu0 %v13484_v60  ;;  %8865 = vpow2.f32 %v6768_v16  ;;  %v13492_v48 = vpop.eup %8859 }
0x2649   :  { %8867 = vpow2.f32 %v6766_v55  ;;  %v13495_v5 = vpop.eup %8861 }
0x264a   :  { %6787 = vmatpush.msra.mxu0 %v13488_v63  ;;  %8869 = vpow2.f32 %v6764_v35 }
0x264b   :  { %8871 = vpow2.f32 %v6762_v36 }
0x264c   :  { %6788 = vmatpush.msra.mxu0 %v13492_v48  ;;  %8873 = vpow2.f32 %v6760_v22 }
0x264d   :  { %v13498_v53 = vpop.eup %8863  ;;  %8875 = vpow2.f32 %v6758_v37 }
0x264e   :  { %6789 = vmatpush.msra.mxu0 %v13495_v5  ;;  %8278 = vmatpush.msk.msra.mxu3 %vm14875_vm1, %v13498_v53  ;;  %v13505_v50 = vpop.eup %8865  ;;  %8877 = vpow2.f32 %v6756_v34  ;;  %vm14890_vm1 = vmmov %vm14869_vm3 }
0x264f   :  { %8279 = vmatmul.msk.f32.vlgmr.msra.gmra.mxu3 %vm14876_vm12, %v11906_v7  ;;  %v13515_v45 = vpop.eup %8867  ;;  %8879 = vpow2.f32 %v6754_v56  ;;  %vm14891_vm12 = vmmov %vm14890_vm1 }
0x2650   :  { %6790 = vmatpush.msra.mxu0 %v13505_v50  ;;  %7053 = vmatpush.msrb.mxu3 %v8951_v42  ;;  %v13520_v62 = vpop.eup %8869  ;;  %8881 = vpow2.f32 %v6752_v44 }
0x2651   :  { %v13525_v4 = vpop.eup %8871  ;;  %8883 = vpow2.f32 %v6750_v8 }
0x2652   :  { %6791 = vmatpush.msra.mxu0 %v13515_v45  ;;  %v13530_v47 = vpop.eup %8873  ;;  %8885 = vpow2.f32 %v6748_v51 }
0x2653   :  { %v13535_v58 = vpop.eup %8875 }
0x2654   :  { %6792 = vmatpush.msra.mxu0 %v13520_v62  ;;  %v13538_v32 = vpop.eup %8877 }
0x2655   :  { %v13541_v20 = vpop.eup %8879 }
0x2656   :  { %6793 = vmatpush.msra.mxu0 %v13525_v4  ;;  %v8882_v57 = vpop.eup %8881 }
0x2657   :  { %8280 = vmatmul.msk.f32.gmra.mxu3 %vm14877_vm2, %v11935_v9  ;;  %v8884_v15 = vpop.eup %8883  ;;  %vm14892_vm2 = vmmov %vm14890_vm1 }
0x2658   :  { %6794 = vmatpush.msra.mxu0 %v13530_v47  ;;  %v8886_v12 = vpop.eup %8885 }
0x265a   :  { %6795 = vmatpush.msra.mxu0 %v13535_v58 }
0x265c   :  { %6796 = vmatpush.msra.mxu0 %v13538_v32 }
0x265e   :  { %6797 = vmatpush.msra.mxu0 %v13541_v20 }
0x2660   :  { %6798 = vmatpush.msra.mxu0 %v8882_v57 }
0x2662   :  { %6799 = vmatpush.msra.mxu0 %v8884_v15 }
0x2664   :  { %6800 = vmatpush.msra.mxu0 %v8886_v12 }
0x2665   :  { %8276 = vmatmul.msk.f32.vlgmr.msra.gmra.mxu0 %vm14878_vm6, %v14610_v10 }
0x266d   :  { %8277 = vmatmul.msk.f32.gmra.mxu0 %vm14879_vm11, %v14610_v10 }
0x26d2   :  { %v6825_v38 = vpop.f32.mrf.mxu3 }
0x26da   :  { %v6828_v25 = vpop.f32.mrf.mxu3 }
0x26e2   :  { %v6802_v39 = vpop.f32.mrf.mxu0 }
0x26e3   :  { %v6826_v52 = vadd.f32 %v6825_v38, %v6802_v39 }
0x26ea   :  { %v6805_v27 = vpop.f32.mrf.mxu0 }
0x26eb   :  { %v6829_v46 = vadd.f32 %v6828_v25, %v6805_v27 }
0x26ed   :  { %8281 = vmatpush.msk.msrb.mxu0 %vm14880_vm0, %v6829_v46  ;;  %vm14893_vm0 = vmmov %vm14890_vm1 }
0x26ef   :  { %6849 = vmatpush.msrb.mxu0 %v6826_v52 }
0x26f0   :  { %8282 = vmatmul.msk.f32.vlgmr.msrb.gmra.mxu0 %vm14881_vm8, %v10981_v0  ;;  %v14894_v0 = vld [vmem:[#allocation27_spill] sm:$0xff]  ;;  %vm14895_vm8 = vmmov %vm14893_vm0 }
0x26f8   :  { %8283 = vmatmul.msk.f32.gmra.mxu0 %vm14882_vm10, %v11002_v31  ;;  %v14896_v31 = vld [vmem:[#allocation31_spill] sm:$0xff]  ;;  %vm14897_vm10 = vmmov %vm14893_vm0 }
0x2700   :  { %8284 = vmatmul.msk.f32.gmra.mxu0 %vm14883_vm5, %v11020_v11  ;;  %vm14899_vm5 = vmmov %vm14893_vm0 }
0x2708   :  { %8285 = vmatmul.msk.f32.gmra.mxu0 %vm14884_vm15, %v11041_v29  ;;  %v14898_v29 = vld [vmem:[#allocation34_spill] sm:$0xff]  ;;  %vm14900_vm15 = vcmask 64512  }
0x2710   :  { %8286 = vmatmul.msk.f32.gmra.mxu0 %vm14869_vm3, %v11060_v2  ;;  %vm14901_vm3 = vmmov %vm14900_vm15 }
0x2718   :  { %8287 = vmatmul.msk.f32.gmra.mxu0 %vm14885_vm4, %v11078_v18  ;;  %vm14902_vm4 = vmmov %vm14901_vm3 }
0x2720   :  { %8288 = vmatmul.msk.f32.gmra.mxu0 %vm14886_vm7, %v11097_v54  ;;  %vm14903_vm7 = vmmov %vm14901_vm3 }
0x2728   :  { %8289 = vmatmul.msk.f32.gmra.mxu0 %vm14887_vm13, %v11107_v24  ;;  %vm14904_vm13 = vmmov %vm14901_vm3 }
0x2730   :  { %8290 = vmatmul.msk.f32.gmra.mxu0 %vm14888_vm14, %v11124_v1  ;;  %vm14905_vm14 = vmmov %vm14901_vm3 }
0x2738   :  { %8291 = vmatmul.msk.f32.gmra.mxu0 %vm14889_vm9, %v11170_v43  ;;  %vm14906_vm9 = vmmov %vm14901_vm3 }
0x2740   :  { %8292 = vmatmul.msk.f32.gmra.mxu0 %vm14890_vm1, %v11212_v33  ;;  %vm14907_vm1 = vmmov %vm14901_vm3 }
0x2748   :  { %8293 = vmatmul.msk.f32.gmra.mxu0 %vm14891_vm12, %v11237_v6  ;;  %vm14908_vm12 = vmmov %vm14907_vm1 }
0x2750   :  { %8294 = vmatmul.msk.f32.gmra.mxu0 %vm14892_vm2, %v11247_v17  ;;  %vm14909_vm2 = vmmov %vm14907_vm1 }
0x2758   :  { %8295 = vmatmul.msk.f32.gmra.mxu0 %vm14893_vm0, %v11267_v59  ;;  %vm14910_vm0 = vmmov %vm14907_vm1 }
0x2760   :  { %8296 = vmatmul.msk.f32.gmra.mxu0 %vm14895_vm8, %v14894_v0  ;;  %vm14911_vm8 = vmmov %vm14910_vm0 }
0x2768   :  { %8297 = vmatmul.msk.f32.gmra.mxu0 %vm14897_vm10, %v14896_v31  ;;  %vm14912_vm10 = vmmov %vm14910_vm0 }
0x276d   :  { %v6851_v11 = vpop.f32.mrf.mxu0 }
0x276e   :  { %8887 = vrcp.f32 %v6851_v11 }
0x2770   :  { %8298 = vmatmul.msk.f32.gmra.mxu0 %vm14899_vm5, %v14898_v29  ;;  %vm14913_vm5 = vmmov %vm14910_vm0 }
0x2774   :  { %v8888_v2 = vpop.eup %8887 }
0x2775   :  { %v6919_v18 = vmul.f32 %v8888_v2, %v6851_v11  ;;  %v6854_v54 = vpop.f32.mrf.mxu0 }
0x2776   :  { %8889 = vrcp.f32 %v6854_v54 }
0x2777   :  { %v6936_v24 = vsub.f32 2.0, %v6919_v18 }
0x2779   :  { %v6953_v1 = vmul.f32 %v8888_v2, %v6936_v24 }
0x277b   :  { %v6970_v43 = vmul.f32 %v8886_v12, %v6953_v1 }
0x277c   :  { %v8890_v33 = vpop.eup %8889 }
0x277d   :  { %v6920_v6 = vmul.f32 %v8890_v33, %v6854_v54  ;;  %v6857_v17 = vpop.f32.mrf.mxu0  ;;  %8299 = vmatmul.msk.f32.vlgmr.msrb.gmra.mxu3 %vm14900_vm15, %v6970_v43  ;;  %vm14914_vm15 = vmmov %vm14910_vm0 }
0x277e   :  { %8891 = vrcp.f32 %v6857_v17 }
0x277f   :  { %v6937_v59 = vsub.f32 2.0, %v6920_v6 }
0x2781   :  { %v6954_v41 = vmul.f32 %v8890_v33, %v6937_v59 }
0x2783   :  { %v6971_v16 = vmul.f32 %v8884_v15, %v6954_v41 }
0x2784   :  { %v8892_v30 = vpop.eup %8891 }
0x2785   :  { %v6921_v61 = vmul.f32 %v8892_v30, %v6857_v17  ;;  %v6860_v55 = vpop.f32.mrf.mxu0  ;;  %8300 = vmatmul.msk.f32.gmra.mxu3 %vm14901_vm3, %v6971_v16  ;;  %vm14915_vm3 = vmmov %vm14910_vm0 }
0x2786   :  { %8893 = vrcp.f32 %v6860_v55 }
0x2787   :  { %v6938_v13 = vsub.f32 2.0, %v6921_v61 }
0x2789   :  { %v6955_v35 = vmul.f32 %v8892_v30, %v6938_v13 }
0x278b   :  { %v6972_v49 = vmul.f32 %v8882_v57, %v6955_v35 }
0x278c   :  { %v8894_v36 = vpop.eup %8893 }
0x278d   :  { %v6922_v40 = vmul.f32 %v8894_v36, %v6860_v55  ;;  %v6863_v22 = vpop.f32.mrf.mxu0  ;;  %8301 = vmatmul.msk.f32.gmra.mxu3 %vm14902_vm4, %v6972_v49  ;;  %vm14916_vm4 = vmmov %vm14910_vm0 }
0x278e   :  { %8895 = vrcp.f32 %v6863_v22 }
0x278f   :  { %v6939_v3 = vsub.f32 2.0, %v6922_v40 }
0x2791   :  { %v6956_v37 = vmul.f32 %v8894_v36, %v6939_v3 }
0x2793   :  { %v6973_v42 = vmul.f32 %v13541_v20, %v6956_v37 }
0x2794   :  { %v8896_v28 = vpop.eup %8895 }
0x2795   :  { %v6923_v34 = vmul.f32 %v8896_v28, %v6863_v22  ;;  %v6866_v19 = vpop.f32.mrf.mxu0  ;;  %8302 = vmatmul.msk.f32.gmra.mxu3 %vm14903_vm7, %v6973_v42  ;;  %vm14934_vm7 = vcmask 1043456  }
0x2796   :  { %8897 = vrcp.f32 %v6866_v19 }
0x2797   :  { %v6940_v56 = vsub.f32 2.0, %v6923_v34 }
0x2799   :  { %v6957_v14 = vmul.f32 %v8896_v28, %v6940_v56 }
0x279b   :  { %v6974_v44 = vmul.f32 %v13538_v32, %v6957_v14 }
0x279c   :  { %v8898_v8 = vpop.eup %8897 }
0x279d   :  { %v6924_v51 = vmul.f32 %v8898_v8, %v6866_v19  ;;  %v6869_v57 = vpop.f32.mrf.mxu0  ;;  %8303 = vmatmul.msk.f32.gmra.mxu3 %vm14904_vm13, %v6974_v44  ;;  %vm14935_vm13 = vcmask 31744  }
0x279e   :  { %8899 = vrcp.f32 %v6869_v57 }
0x279f   :  { %v6941_v15 = vsub.f32 2.0, %v6924_v51 }
0x27a1   :  { %v6958_v12 = vmul.f32 %v8898_v8, %v6941_v15 }
0x27a3   :  { %v6975_v20 = vmul.f32 %v13535_v58, %v6958_v12 }
0x27a4   :  { %v8900_v38 = vpop.eup %8899 }
0x27a5   :  { %v6925_v39 = vmul.f32 %v8900_v38, %v6869_v57  ;;  %v6872_v25 = vpop.f32.mrf.mxu0  ;;  %8304 = vmatmul.msk.f32.gmra.mxu3 %vm14905_vm14, %v6975_v20  ;;  %vm14936_vm14 = vmmov %vm14935_vm13 }
0x27a6   :  { %8901 = vrcp.f32 %v6872_v25 }
0x27a7   :  { %v6942_v27 = vsub.f32 2.0, %v6925_v39 }
0x27a9   :  { %v6959_v46 = vmul.f32 %v8900_v38, %v6942_v27 }
0x27ab   :  { %v6976_v32 = vmul.f32 %v13530_v47, %v6959_v46 }
0x27ac   :  { %v8902_v52 = vpop.eup %8901 }
0x27ad   :  { %v6926_v0 = vmul.f32 %v8902_v52, %v6872_v25  ;;  %v6875_v31 = vpop.f32.mrf.mxu0  ;;  %8305 = vmatmul.msk.f32.gmra.mxu3 %vm14906_vm9, %v6976_v32 }
0x27ae   :  { %8903 = vrcp.f32 %v6875_v31 }
0x27af   :  { %v6943_v11 = vsub.f32 2.0, %v6926_v0 }
0x27b1   :  { %v6960_v29 = vmul.f32 %v8902_v52, %v6943_v11 }
0x27b3   :  { %v6977_v58 = vmul.f32 %v13525_v4, %v6960_v29 }
0x27b4   :  { %v8904_v2 = vpop.eup %8903 }
0x27b5   :  { %v6927_v18 = vmul.f32 %v8904_v2, %v6875_v31  ;;  %v6878_v54 = vpop.f32.mrf.mxu0  ;;  %8306 = vmatmul.msk.f32.gmra.mxu3 %vm14907_vm1, %v6977_v58 }
0x27b6   :  { %8905 = vrcp.f32 %v6878_v54 }
0x27b7   :  { %v6944_v24 = vsub.f32 2.0, %v6927_v18 }
0x27b9   :  { %v6961_v1 = vmul.f32 %v8904_v2, %v6944_v24 }
0x27bb   :  { %v6978_v47 = vmul.f32 %v13520_v62, %v6961_v1 }
0x27bc   :  { %v8906_v43 = vpop.eup %8905 }
0x27bd   :  { %v6928_v33 = vmul.f32 %v8906_v43, %v6878_v54  ;;  %v6881_v6 = vpop.f32.mrf.mxu0  ;;  %8307 = vmatmul.msk.f32.gmra.mxu3 %vm14908_vm12, %v6978_v47 }
0x27be   :  { %8907 = vrcp.f32 %v6881_v6 }
0x27bf   :  { %v6945_v17 = vsub.f32 2.0, %v6928_v33 }
0x27c1   :  { %v6962_v59 = vmul.f32 %v8906_v43, %v6945_v17 }
0x27c3   :  { %v6979_v4 = vmul.f32 %v13515_v45, %v6962_v59 }
0x27c4   :  { %v8908_v41 = vpop.eup %8907 }
0x27c5   :  { %v6929_v16 = vmul.f32 %v8908_v41, %v6881_v6  ;;  %v6884_v30 = vpop.f32.mrf.mxu0  ;;  %8308 = vmatmul.msk.f32.gmra.mxu3 %vm14909_vm2, %v6979_v4 }
0x27c6   :  { %8909 = vrcp.f32 %v6884_v30 }
0x27c7   :  { %v6946_v61 = vsub.f32 2.0, %v6929_v16 }
0x27c9   :  { %v6963_v55 = vmul.f32 %v8908_v41, %v6946_v61 }
0x27cb   :  { %v6980_v62 = vmul.f32 %v13505_v50, %v6963_v55 }
0x27cc   :  { %v8910_v13 = vpop.eup %8909 }
0x27cd   :  { %v6930_v35 = vmul.f32 %v8910_v13, %v6884_v30  ;;  %v6887_v49 = vpop.f32.mrf.mxu0  ;;  %8309 = vmatmul.msk.f32.gmra.mxu3 %vm14910_vm0, %v6980_v62  ;;  %v14917_v62 = vld [vmem:[#allocation37_spill] sm:$0xff] }
0x27ce   :  { %8911 = vrcp.f32 %v6887_v49 }
0x27cf   :  { %v6947_v36 = vsub.f32 2.0, %v6930_v35  ;;  %v14918_v35 = vld [vmem:[#allocation6_spill] sm:$0xff] }
0x27d1   :  { %v6964_v40 = vmul.f32 %v8910_v13, %v6947_v36 }
0x27d3   :  { %v6981_v45 = vmul.f32 %v13495_v5, %v6964_v40  ;;  %v14919_v40 = vld [vmem:[#allocation59_spill] sm:$0xff] }
0x27d4   :  { %v8912_v22 = vpop.eup %8911 }
0x27d5   :  { %v6931_v3 = vmul.f32 %v8912_v22, %v6887_v49  ;;  %v6890_v37 = vpop.f32.mrf.mxu0  ;;  %8310 = vmatmul.msk.f32.gmra.mxu3 %vm14911_vm8, %v6981_v45 }
0x27d6   :  { %8913 = vrcp.f32 %v6890_v37 }
0x27d7   :  { %v6948_v42 = vsub.f32 2.0, %v6931_v3  ;;  %v14920_v3 = vld [vmem:[#allocation7_spill] sm:$0xff] }
0x27d9   :  { %v6965_v28 = vmul.f32 %v8912_v22, %v6948_v42 }
0x27db   :  { %v6982_v50 = vmul.f32 %v13492_v48, %v6965_v28 }
0x27dc   :  { %v8914_v34 = vpop.eup %8913 }
0x27dd   :  { %v6932_v19 = vmul.f32 %v8914_v34, %v6890_v37  ;;  %v6893_v56 = vpop.f32.mrf.mxu0  ;;  %8311 = vmatmul.msk.f32.gmra.mxu3 %vm14912_vm10, %v6982_v50 }
0x27de   :  { %8915 = vrcp.f32 %v6893_v56 }
0x27df   :  { %v6949_v14 = vsub.f32 2.0, %v6932_v19 }
0x27e1   :  { %v6966_v44 = vmul.f32 %v8914_v34, %v6949_v14  ;;  %v14921_v34 = vld [vmem:[#allocation58_spill] sm:$0xff] }
0x27e3   :  { %v6983_v5 = vmul.f32 %v13488_v63, %v6966_v44 }
0x27e4   :  { %v8916_v8 = vpop.eup %8915 }
0x27e5   :  { %v6933_v51 = vmul.f32 %v8916_v8, %v6893_v56  ;;  %v6896_v57 = vpop.f32.mrf.mxu0  ;;  %8312 = vmatmul.msk.f32.gmra.mxu3 %vm14913_vm5, %v6983_v5  ;;  %v14922_v56 = vld [vmem:[#allocation32_spill] sm:$0xff] }
0x27e6   :  { %8917 = vrcp.f32 %v6896_v57 }
0x27e7   :  { %v6950_v15 = vsub.f32 2.0, %v6933_v51 }
0x27e9   :  { %v6967_v12 = vmul.f32 %v8916_v8, %v6950_v15  ;;  %v14923_v8 = vld [vmem:[#allocation65_spill] sm:$0xff]  ;;  %v14924_v15 = vld [vmem:[#allocation35_spill] sm:$0xff] }
0x27eb   :  { %v6984_v48 = vmul.f32 %v13484_v60, %v6967_v12 }
0x27ec   :  { %v8918_v20 = vpop.eup %8917 }
0x27ed   :  { %v6934_v38 = vmul.f32 %v8918_v20, %v6896_v57  ;;  %v6899_v39 = vpop.f32.mrf.mxu0  ;;  %8313 = vmatmul.msk.f32.gmra.mxu3 %vm14914_vm15, %v6984_v48 }
0x27ee   :  { %8919 = vrcp.f32 %v6899_v39 }
0x27ef   :  { %v6951_v25 = vsub.f32 2.0, %v6934_v38  ;;  %v14925_v38 = vld [vmem:[#allocation62_spill] sm:$0xff] }
0x27f1   :  { %v6968_v27 = vmul.f32 %v8918_v20, %v6951_v25 }
0x27f3   :  { %v6985_v63 = vmul.f32 %v13480_v21, %v6968_v27  ;;  %v14926_v27 = vld [vmem:[#allocation52_spill] sm:$0xff] }
0x27f4   :  { %v8920_v46 = vpop.eup %8919 }
0x27f5   :  { %v6935_v32 = vmul.f32 %v8920_v46, %v6899_v39  ;;  %8314 = vmatmul.msk.f32.gmra.mxu3 %vm14915_vm3, %v6985_v63 }
0x27f7   :  { %v6952_v52 = vsub.f32 2.0, %v6935_v32 }
0x27f9   :  { %v6969_v0 = vmul.f32 %v8920_v46, %v6952_v52  ;;  %v14927_v46 = vld [vmem:[#allocation46_spill] sm:$0xff] }
0x27fa   :  { %v14928_v52 = vld [vmem:[#allocation54_spill] sm:$0xff] }
0x27fb   :  { %v6986_v31 = vmul.f32 %v13498_v53, %v6969_v0 }
0x27fd   :  { %8315 = vmatmul.msk.f32.gmra.mxu3 %vm14916_vm4, %v6986_v31 }
0x2800   :  { %v7055_v60 = vpop.f32.mrf.mxu3 }
0x2808   :  { %v7058_v11 = vpop.f32.mrf.mxu3 }
0x2810   :  { %v7061_v29 = vpop.f32.mrf.mxu3 }
0x2818   :  { %v7064_v58 = vpop.f32.mrf.mxu3 }
0x2820   :  { %v7067_v2 = vpop.f32.mrf.mxu3 }
0x2828   :  { %v7070_v18 = vpop.f32.mrf.mxu3 }
0x2830   :  { %v7073_v54 = vpop.f32.mrf.mxu3 }
0x2838   :  { %v7076_v24 = vpop.f32.mrf.mxu3 }
0x2840   :  { %v7079_v1 = vpop.f32.mrf.mxu3 }
0x2848   :  { %v7082_v21 = vpop.f32.mrf.mxu3 }
0x2849   :  { %7141 = vrot.lane.b32.xlu0 %v7082_v21, %s8985_s28 }
0x2850   :  { %v7085_v47 = vpop.f32.mrf.mxu3 }
0x2851   :  { %7137 = vrot.lane.b32.xlu0 %v7076_v24, %s8985_s28  ;;  %7143 = vrot.lane.b32.xlu1 %v7085_v47, %s8985_s28 }
0x2858   :  { %v7088_v53 = vpop.f32.mrf.mxu3 }
0x2859   :  { %7139 = vrot.lane.b32.xlu1 %v7079_v1, %s8985_s28  ;;  %7145 = vrot.lane.b32.xlu2 %v7088_v53, %s8985_s28  ;;  %v14931_v1 = vld [vmem:[#allocation28_spill] sm:$0xff] }
0x2860   :  { %v7091_v43 = vpop.f32.mrf.mxu3 }
0x2861   :  { %7147 = vrot.lane.b32.xlu0 %v7091_v43, %s8985_s28  ;;  %v14932_v43 = vld [vmem:[#allocation42_spill] sm:$0xff] }
0x2868   :  { %v7094_v33 = vpop.f32.mrf.mxu3 }
0x2869   :  { %7149 = vrot.lane.b32.xlu1 %v7094_v33, %s8985_s28 }
0x2870   :  { %v7097_v6 = vpop.f32.mrf.mxu3 }
0x2871   :  { %7151 = vrot.lane.b32.xlu0 %v7097_v6, %s8985_s28  ;;  %v14933_v6 = vld [vmem:[#allocation33_spill] sm:$0xff] }
0x2878   :  { %v7100_v17 = vpop.f32.mrf.mxu3 }
0x2879   :  { %7133 = vrot.lane.b32.xlu0 %v7070_v18, %s8985_s28  ;;  %7153 = vrot.lane.b32.xlu1 %v7100_v17, %s8985_s28  ;;  %v14930_v18 = vld [vmem:[#allocation40_spill] sm:$0xff] }
0x2880   :  { %v7103_v59 = vpop.f32.mrf.mxu3 }
0x2881   :  { %7129 = vrot.lane.b32.xlu0 %v7064_v58, %s8985_s28  ;;  %7135 = vrot.lane.b32.xlu1 %v7073_v54, %s8985_s28 }
0x2889   :  { %7127 = vrot.lane.b32.xlu0 %v7061_v29, %s8985_s28  ;;  %7131 = vrot.lane.b32.xlu1 %v7067_v2, %s8985_s28  ;;  %v14929_v29 = vld [vmem:[#allocation48_spill] sm:$0xff] }
0x2891   :  { %7123 = vrot.lane.b32.xlu0 %v7055_v60, %s8985_s28  ;;  %7155 = vrot.lane.b32.xlu1 %v7103_v59, %s8985_s28 }
0x2899   :  { %7125 = vrot.lane.b32.xlu1 %v7058_v11, %s8985_s28 }
0x28b3   :  { %v7146_v5 = vpop.permute.xlu2 %7145 }
0x28b4   :  { %v7185_v12 = vmul.f32 %v7146_v5, %v14924_v15 }
0x28bb   :  { %v7142_v4 = vpop.permute.xlu0 %7141 }
0x28bc   :  { %v7183_v37 = vmul.f32 %v7142_v4, %v14920_v3 }
0x28c3   :  { %v7144_v41 = vpop.permute.xlu1 %7143  ;;  %v7138_v16 = vpop.permute.xlu0 %7137 }
0x28c4   :  { %v7184_v51 = vmul.f32 %v7144_v41, %v14923_v8  ;;  %v7181_v63 = vmul.f32 %v7138_v16, %v14926_v27  ;;  %v8324_v8 = vld [vmem:[%s13879_s7 + $0x98] sm:$0xff] }
0x28c6   :  { %v8512_v20 = vpack.i.bf16 %v7184_v51, %v7185_v12  ;;  %v8321_v51 = vld [vmem:[%s13879_s7 + $0x80] sm:$0xff] }
0x28cb   :  { %v7140_v30 = vpop.permute.xlu1 %7139 }
0x28cc   :  { %v7182_v45 = vmul.f32 %v7140_v30, %v14919_v40 }
0x28ce   :  { %v8517_v42 = vpack.i.bf16 %v7182_v45, %v7183_v37 }
0x28d3   :  { %v7148_v61 = vpop.permute.xlu0 %7147 }
0x28d4   :  { %v7186_v13 = vmul.f32 %v7148_v61, %v14917_v62 }
0x28db   :  { %v7150_v55 = vpop.permute.xlu1 %7149 }
0x28dc   :  { %v7187_v49 = vmul.f32 %v7150_v55, %v14918_v35 }
0x28de   :  { %v8502_v36 = vpack.i.bf16 %v7186_v13, %v7187_v49 }
0x28e0   :  { %8503 = vrot.lane.b32.xlu0 %v8502_v36, %s8979_s23 }
0x28e3   :  { %v7152_v22 = vpop.permute.xlu0 %7151 }
0x28e4   :  { %v7188_v19 = vmul.f32 %v7152_v22, %v14921_v34 }
0x28e8   :  { %8518 = vrot.lane.b32.xlu0 %v8517_v42, %s8979_s23 }
0x28eb   :  { %v7134_v28 = vpop.permute.xlu0 %7133  ;;  %v7154_v50 = vpop.permute.xlu1 %7153 }
0x28ec   :  { %v7189_v14 = vmul.f32 %v7154_v50, %v14922_v56  ;;  %v7179_v32 = vmul.f32 %v7134_v28, %v14927_v46 }
0x28ee   :  { %v8507_v44 = vpack.i.bf16 %v7188_v19, %v7189_v14 }
0x28f0   :  { %8508 = vrot.lane.b32.xlu1 %v8507_v44, %s8979_s23 }
0x28f3   :  { %v7136_v57 = vpop.permute.xlu1 %7135  ;;  %v7130_v48 = vpop.permute.xlu0 %7129 }
0x28f4   :  { %v7180_v39 = vmul.f32 %v7136_v57, %v14925_v38  ;;  %v7177_v54 = vmul.f32 %v7130_v48, %v14930_v18 }
0x28f6   :  { %v8522_v31 = vpack.i.bf16 %v7180_v39, %v7181_v63  ;;  %v8333_v39 = vld [vmem:[%s13879_s7 + $0xb8] sm:$0xff] }
0x28f7   :  { %v14940_v63 = vld [vmem:[#allocation56_spill] sm:$0xff] }
0x28f8   :  { %8513 = vrot.lane.b32.xlu1 %v8512_v20, %s8979_s23  ;;  %v14939_v20 = vld [vmem:[#allocation50_spill] sm:$0xff] }
0x28fb   :  { %v7132_v25 = vpop.permute.xlu1 %7131  ;;  %v7128_v11 = vpop.permute.xlu0 %7127 }
0x28fc   :  { %v7178_v0 = vmul.f32 %v7132_v25, %v14928_v52  ;;  %v7176_v58 = vmul.f32 %v7128_v11, %v14929_v29  ;;  %v8332_v25 = vld [vmem:[%s13879_s7 + $0xb0] sm:$0xff]  ;;  %v14941_v29 = vld [vmem:[#allocation64_spill] sm:$0xff] }
0x28fe   :  { %v8527_v60 = vpack.i.bf16 %v7178_v0, %v7179_v32  ;;  %v8532_v24 = vpack.i.bf16 %v7176_v58, %v7177_v54  ;;  %v8325_v32 = vld [vmem:[%s13883_s11 + $0x42] sm:$0x3] }
0x28ff   :  { %v7314_v0 = vperm.slane %v8325_v32, 0 }
0x2900   :  { %8528 = vrot.lane.b32.xlu0 %v8527_v60, %s8979_s23  ;;  %8523 = vrot.lane.b32.xlu1 %v8522_v31, %s8979_s23  ;;  %v8952_v31 = vld [vmem:[%s13883_s11 + $0x3e] sm:$0x3] }
0x2901   :  { %v6152_v60 = vperm.slane %v8952_v31, 1 }
0x2903   :  { %v7156_v2 = vpop.permute.xlu1 %7155  ;;  %v7124_v47 = vpop.permute.xlu0 %7123  ;;  %v6202_v58 = vadd.f32 %v14941_v29, %v6152_v60 }
0x2904   :  { %v7190_v21 = vmul.f32 %v7156_v2, %v14931_v1  ;;  %v7174_v33 = vmul.f32 %v7124_v47, %v14932_v43  ;;  %v14942_v1 = vld [vmem:[#allocation36_spill] sm:$0xff] }
0x2908   :  { %8533 = vrot.lane.b32.xlu1 %v8532_v24, %s8979_s23  ;;  %7240 = vrot.lane.b32.xlu0 %v7190_v21, %s8979_s23  ;;  %v6205_v21 = vadd.f32 %v14942_v1, %v6152_v60 }
0x290b   :  { %v7126_v53 = vpop.permute.xlu1 %7125 }
0x290c   :  { %v7175_v17 = vmul.f32 %v7126_v53, %v14933_v6  ;;  %v8331_v6 = vld [vmem:[%s13879_s7 + $0xa8] sm:$0xff] }
0x290e   :  { %v8537_v59 = vpack.i.bf16 %v7174_v33, %v7175_v17  ;;  %v8330_v17 = vld [vmem:[%s13879_s7 + $0xa0] sm:$0xff] }
0x2910   :  { %8538 = vrot.lane.b32.xlu1 %v8537_v59, %s8979_s23 }
0x2952   :  { %v8504_v4 = vpop.permute.xlu0 %8503 }
0x2953   :  { %v8505_v61 = vunpack.i.l.bf16 %v8504_v4  ;;  %v8506_v55 = vunpack.i.h.bf16 %v8504_v4 }
0x295a   :  { %v8519_v62 = vpop.permute.xlu0 %8518 }
0x295b   :  { %v8520_v36 = vunpack.i.l.bf16 %v8519_v62  ;;  %v8521_v40 = vunpack.i.h.bf16 %v8519_v62 }
0x2962   :  { %v8509_v41 = vpop.permute.xlu1 %8508 }
0x2963   :  { %v8510_v16 = vunpack.i.l.bf16 %v8509_v41  ;;  %v8511_v30 = vunpack.i.h.bf16 %v8509_v41 }
0x2965   :  { %7260 = vmatpush.msra.mxu1 %v8510_v16 }
0x2967   :  { %7261 = vmatpush.msra.mxu1 %v8511_v30 }
0x2969   :  { %7262 = vmatpush.msra.mxu1 %v8505_v61 }
0x296a   :  { %v8514_v13 = vpop.permute.xlu1 %8513 }
0x296b   :  { %v8515_v35 = vunpack.i.l.bf16 %v8514_v13  ;;  %7263 = vmatpush.msra.mxu1 %v8506_v55  ;;  %v8516_v49 = vunpack.i.h.bf16 %v8514_v13 }
0x296d   :  { %7264 = vmatpush.msra.mxu1 %v8515_v35 }
0x296f   :  { %7265 = vmatpush.msra.mxu1 %v8516_v49 }
0x2971   :  { %7266 = vmatpush.msra.mxu1 %v8520_v36 }
0x2972   :  { %v8529_v45 = vpop.permute.xlu0 %8528  ;;  %v8524_v22 = vpop.permute.xlu1 %8523 }
0x2973   :  { %v8525_v3 = vunpack.i.l.bf16 %v8524_v22  ;;  %7267 = vmatpush.msra.mxu1 %v8521_v40  ;;  %v8526_v37 = vunpack.i.h.bf16 %v8524_v22  ;;  %v8530_v42 = vunpack.i.l.bf16 %v8529_v45  ;;  %v8531_v28 = vunpack.i.h.bf16 %v8529_v45 }
0x2975   :  { %7268 = vmatpush.msra.mxu1 %v8525_v3 }
0x2977   :  { %7269 = vmatpush.msra.mxu1 %v8526_v37 }
0x2979   :  { %7270 = vmatpush.msra.mxu1 %v8530_v42 }
0x297a   :  { %v7241_v50 = vpop.permute.xlu0 %7240  ;;  %v8534_v34 = vpop.permute.xlu1 %8533 }
0x297b   :  { %v8535_v19 = vunpack.i.l.bf16 %v8534_v34  ;;  %7271 = vmatpush.msra.mxu1 %v8531_v28  ;;  %8318 = vmatpush.msk.msra.mxu2 %vm14934_vm7, %v7241_v50  ;;  %v8536_v56 = vunpack.i.h.bf16 %v8534_v34  ;;  %vm14948_vm7 = vcmask 257024  }
0x297c   :  { %8319 = vmatmul.msk.f32.vlgmr.msra.gmra.mxu2 %vm14935_vm13, %v11906_v7  ;;  %v8323_v7 = vld [vmem:[%s13879_s7 + $0x90] sm:$0xff] }
0x297d   :  { %7272 = vmatpush.msra.mxu1 %v8535_v19  ;;  %7428 = vmatpush.msrb.mxu2 %v8333_v39 }
0x297f   :  { %7273 = vmatpush.msra.mxu1 %v8536_v56  ;;  %7429 = vmatpush.msrb.mxu2 %v8332_v25 }
0x2981   :  { %7430 = vmatpush.msrb.mxu2 %v8331_v6 }
0x2982   :  { %v8539_v14 = vpop.permute.xlu1 %8538 }
0x2983   :  { %v8540_v44 = vunpack.i.l.bf16 %v8539_v14  ;;  %v8541_v5 = vunpack.i.h.bf16 %v8539_v14  ;;  %7431 = vmatpush.msrb.mxu2 %v8330_v17  ;;  %v8358_v17 = vld [vmem:[%s13881_s9 + $0x160] sm:$0xff] }
0x2984   :  { %8320 = vmatmul.msk.f32.gmra.mxu2 %vm14936_vm14, %v11935_v9  ;;  %v8322_v9 = vld [vmem:[%s13879_s7 + $0x88] sm:$0xff]  ;;  %vm14951_vm14 = vmmov %vm14948_vm7 }
0x2985   :  { %7274 = vmatpush.msra.mxu1 %v8540_v44 }
0x2987   :  { %7275 = vmatpush.msra.mxu1 %v8541_v5 }
0x2988   :  { %8316 = vmatmul.msk.f32.vlgmr.msra.gmra.mxu1 %vm14878_vm6, %v14610_v10  ;;  %vm14937_vm6 = vcmask 261120  }
0x2989   :  { %7334 = vmatpush.msrb.mxu1 %v8324_v8  ;;  %vm14943_vm5 = vmmov %vm14937_vm6 }
0x298a   :  { %vm14944_vm3 = vmmov %vm14943_vm5 }
0x298b   :  { %7335 = vmatpush.msrb.mxu1 %v8323_v7  ;;  %vm14946_vm4 = vmmov %vm14944_vm3 }
0x298c   :  { %vm14950_vm13 = vmmov %vm14944_vm3 }
0x298d   :  { %7336 = vmatpush.msrb.mxu1 %v8322_v9  ;;  %v8336_v9 = vld [vmem:[%s13883_s11 + $0x44] sm:$0x3] }
0x298f   :  { %7337 = vmatpush.msrb.mxu1 %v8321_v51  ;;  %v7444_v51 = vperm.slane %v8336_v9, 0  ;;  %v8349_v9 = vld [vmem:[%s13881_s9 + $0x118] sm:$0xff] }
0x2990   :  { %8317 = vmatmul.msk.f32.gmra.mxu1 %vm14879_vm11, %v14610_v10  ;;  %vm14938_vm11 = vmmov %vm14937_vm6 }
0x29ff   :  { %v7300_v23 = vpop.f32.mrf.mxu2 }
0x2a05   :  { %v7277_v57 = vpop.f32.mrf.mxu1 }
0x2a06   :  { %v13682_v15 = vadd.f32 %v7300_v23, %v7277_v57  ;;  %v14945_v57 = vld [vmem:[#allocation38_spill] sm:$0xff] }
0x2a07   :  { %v7303_v26 = vpop.f32.mrf.mxu2 }
0x2a08   :  { %7385 = vrot.lane.b32.xlu0 %v13682_v15, %s8979_s23  ;;  %8326 = vmatmul.msk.f32.vlgmr.msrb.gmra.mxu1 %vm14937_vm6, %v13682_v15 }
0x2a0d   :  { %v7280_v10 = vpop.f32.mrf.mxu1 }
0x2a0e   :  { %v13688_v12 = vadd.f32 %v7303_v26, %v7280_v10 }
0x2a10   :  { %7387 = vrot.lane.b32.xlu1 %v13688_v12, %s8979_s23  ;;  %8327 = vmatmul.msk.f32.gmra.mxu1 %vm14938_vm11, %v13688_v12 }
0x2a7a   :  { %v7386_v48 = vpop.permute.xlu0 %7385 }
0x2a7b   :  { %v7391_v38 = vsub.f32 %v14939_v20, %v7386_v48  ;;  %v14947_v20 = vld [vmem:[#allocation44_spill] sm:$0xff] }
0x2a7d   :  { %7395 = vrot.lane.b32.xlu0 %v7391_v38, %s8985_s28 }
0x2a82   :  { %v7388_v27 = vpop.permute.xlu1 %7387 }
0x2a83   :  { %v7392_v46 = vsub.f32 %v14940_v63, %v7388_v27  ;;  %v14949_v27 = vld [vmem:[#allocation5_spill] sm:$0xff] }
0x2a85   :  { %7397 = vrot.lane.b32.xlu1 %v7392_v46, %s8985_s28  ;;  %v7339_v52 = vpop.f32.mrf.mxu1 }
0x2a86   :  { %v7340_v11 = vadd.f32 %v7339_v52, %v7314_v0 }
0x2a88   :  { %v7345_v2 = vadd.f32 %v7340_v11, %v6202_v58  ;;  %v8342_v58 = vld [vmem:[%s13880_s8 + $0x58] sm:$0xff] }
0x2a89   :  { %7534 = vmatpush.msra.mxu1 %v8342_v58 }
0x2a8a   :  { %v8328_v54 = vmul.f32 -1.442695, %v7345_v2  ;;  %v8341_v2 = vld [vmem:[%s13880_s8 + $0x50] sm:$0xff] }
0x2a8b   :  { %7535 = vmatpush.msra.mxu1 %v8341_v2 }
0x2a8c   :  { %8921 = vpow2.f32 %v8328_v54 }
0x2a8d   :  { %v7342_v18 = vpop.f32.mrf.mxu1 }
0x2a8e   :  { %v7343_v24 = vadd.f32 %v7342_v18, %v7314_v0  ;;  %v8340_v18 = vld [vmem:[%s13880_s8 + $0x48] sm:$0xff] }
0x2a8f   :  { %7536 = vmatpush.msra.mxu1 %v8340_v18 }
0x2a90   :  { %v7346_v47 = vadd.f32 %v7343_v24, %v6205_v21  ;;  %v8339_v24 = vld [vmem:[%s13880_s8 + $0x40] sm:$0xff]  ;;  %s8987_s8 = smov [#allocation2]  }
0x2a91   :  { %7537 = vmatpush.msra.mxu1 %v8339_v24  ;;  %s7729_s6 = sshll.u32 %s8987_s8, 4  ;;  %s7730_s6 = int_to_ptr.vmem [resolvable:$true] %s7729_s6 }
0x2a92   :  { %v8329_v53 = vmul.f32 -1.442695, %v7346_v47  ;;  %v8922_v43 = vpop.eup %8921  ;;  %v8361_v47 = vld [vmem:[%s13881_s9 + $0x178] sm:$0xff] }
0x2a93   :  { %v7353_v33 = vadd.f32 1.0, %v8922_v43  ;;  %7564 = vmatpush.msra.mxu2 %v8361_v47  ;;  %v8359_v43 = vld [vmem:[%s13881_s9 + $0x168] sm:$0xff] }
0x2a94   :  { %8923 = vpow2.f32 %v8329_v53  ;;  %v8360_v53 = vld [vmem:[%s13881_s9 + $0x170] sm:$0xff] }
0x2a95   :  { %8925 = vrcp.f32 %v7353_v33  ;;  %v7366_v49 = vand.u32 2147483648, %v7353_v33  ;;  %vm7360_vm1 = vweird.f32 %v7353_v33  ;;  %v7364_v36 = vand.u32 2147483647, %v7353_v33  ;;  %7565 = vmatpush.msra.mxu2 %v8360_v53 }
0x2a97   :  { %v7367_v22 = vor.u32 1.1754944e-38, %v7366_v49  ;;  %vm7365_vm2 = vcmp.eq.f32.partialorder %v7364_v36, 8.507059e+37  ;;  %7566 = vmatpush.msra.mxu2 %v8359_v43 }
0x2a99   :  { %7567 = vmatpush.msra.mxu2 %v8358_v17 }
0x2a9a   :  { %v8924_v59 = vpop.eup %8923 }
0x2a9b   :  { %v7354_v4 = vadd.f32 1.0, %v8924_v59  ;;  %v8926_v41 = vpop.eup %8925 }
0x2a9c   :  { %v7356_v16 = vmul.f32 %v8926_v41, %v7353_v33  ;;  %vm7361_vm9 = vweird.f32 %v8926_v41 }
0x2a9d   :  { %8927 = vrcp.f32 %v7354_v4  ;;  %vm7362_vm12 = vmor %vm7360_vm1, %vm7361_vm9  ;;  %v7381_v50 = vand.u32 2147483648, %v7354_v4  ;;  %vm7375_vm8 = vweird.f32 %v7354_v4  ;;  %v7379_v19 = vand.u32 2147483647, %v7354_v4 }
0x2a9e   :  { %v7357_v30 = vsub.f32 1.0, %v7356_v16 }
0x2a9f   :  { %v7382_v14 = vor.u32 1.1754944e-38, %v7381_v50  ;;  %vm7380_vm15 = vcmp.eq.f32.partialorder %v7379_v19, 8.507059e+37 }
0x2aa0   :  { %v7358_v55 = vmul.f32 %v8926_v41, %v7357_v30  ;;  %v8356_v30 = vld [vmem:[%s13881_s9 + $0x150] sm:$0xff] }
0x2aa2   :  { %v7359_v13 = vadd.f32 %v8926_v41, %v7358_v55  ;;  %v8355_v55 = vld [vmem:[%s13881_s9 + $0x148] sm:$0xff] }
0x2aa3   :  { %v8928_v61 = vpop.eup %8927 }
0x2aa4   :  { %v7371_v62 = vmul.f32 %v8928_v61, %v7354_v4  ;;  %v7363_v40 = vsel %vm7362_vm12, %v8926_v41, %v7359_v13  ;;  %vm7376_vm0 = vweird.f32 %v8928_v61  ;;  %v8357_v41 = vld [vmem:[%s13881_s9 + $0x158] sm:$0xff]  ;;  %v8354_v13 = vld [vmem:[%s13881_s9 + $0x140] sm:$0xff] }
0x2aa5   :  { %v7368_v37 = vsel %vm7365_vm2, %v7367_v22, %v7363_v40  ;;  %vm7377_vm10 = vmor %vm7375_vm8, %vm7376_vm0  ;;  %7568 = vmatpush.msra.mxu2 %v8357_v41  ;;  %v8353_v40 = vld [vmem:[%s13881_s9 + $0x138] sm:$0xff] }
0x2aa6   :  { %v7372_v35 = vsub.f32 1.0, %v7371_v62  ;;  %vm14952_vm0 = vmmov %vm14944_vm3 }
0x2aa7   :  { %7569 = vmatpush.msra.mxu2 %v8356_v30  ;;  %vm14953_vm8 = vmmov %vm14952_vm0  ;;  %v7656_v30 = vld [vmem:[%s13882_s10 + $0x10] sm:$0xff] }
0x2aa8   :  { %v7373_v45 = vmul.f32 %v8928_v61, %v7372_v35  ;;  %v8337_v35 = vld [vmem:[%s13883_s11 + $0x4c] sm:$0x3] }
0x2aa9   :  { %7570 = vmatpush.msra.mxu2 %v8355_v55  ;;  %v7654_v55 = vld [vmem:[%s13882_s10] sm:$0xff] }
0x2aaa   :  { %v7374_v28 = vadd.f32 %v8928_v61, %v7373_v45  ;;  %v8338_v45 = vld [vmem:[%s13883_s11 + $0x4e] sm:$0x3] }
0x2aab   :  { %7571 = vmatpush.msra.mxu2 %v8354_v13 }
0x2aac   :  { %v7378_v56 = vsel %vm7377_vm10, %v8928_v61, %v7374_v28  ;;  %vm14954_vm10 = vmmov %vm14952_vm0 }
0x2aad   :  { %v7383_v5 = vsel %vm7380_vm15, %v7382_v14, %v7378_v56  ;;  %7572 = vmatpush.msra.mxu2 %v8353_v40  ;;  %v8351_v56 = vld [vmem:[%s13881_s9 + $0x128] sm:$0xff]  ;;  %vm14956_vm15 = vmmov %vm14952_vm0 }
0x2aef   :  { %v7396_v3 = vpop.permute.xlu0 %7395 }
0x2af0   :  { %v7401_v42 = vmul.f32 %v7396_v3, %v7368_v37  ;;  %v7497_v37 = vperm.slane %v8337_v35, 0  ;;  %v7661_v35 = vld [vmem:[%s13882_s10 + $0x38] sm:$0xff] }
0x2af2   :  { %v7403_v34 = vadd.f32 %v7401_v42, %v13682_v15  ;;  %v8352_v42 = vld [vmem:[%s13881_s9 + $0x130] sm:$0xff] }
0x2af3   :  { %7573 = vmatpush.msra.mxu2 %v8352_v42 }
0x2af4   :  { %8334 = vmatmul.msk.f32.vlgmr.msrb.gmra.mxu2 %vm14943_vm5, %v7403_v34  ;;  %v7502_v34 = vperm.slane %v8338_v45, 0  ;;  %vm14955_vm5 = vmmov %vm14948_vm7 }
0x2af5   :  { %7574 = vmatpush.msra.mxu2 %v8351_v56 }
0x2af7   :  { %v7398_v44 = vpop.permute.xlu1 %7397 }
0x2af8   :  { %v7402_v8 = vmul.f32 %v7398_v44, %v7383_v5  ;;  %v8350_v5 = vld [vmem:[%s13881_s9 + $0x120] sm:$0xff] }
0x2af9   :  { %7575 = vmatpush.msra.mxu2 %v8350_v5 }
0x2afa   :  { %v7404_v7 = vadd.f32 %v7402_v8, %v13688_v12 }
0x2afb   :  { %7576 = vmatpush.msra.mxu2 %v8349_v9 }
0x2afc   :  { %8335 = vmatmul.msk.f32.gmra.mxu2 %vm14944_vm3, %v7404_v7  ;;  %vm14957_vm3 = vmmov %vm14955_vm5 }
0x2b77   :  { %v7433_v23 = vpop.f32.mrf.mxu2 }
0x2b78   :  { %v7439_v15 = vadd.f32 %v7433_v23, %v14945_v57 }
0x2b7a   :  { %v13726_v26 = vadd.f32 %v7444_v51, %v7439_v15 }
0x2b7c   :  { %v7452_v10 = vsel %vm14946_vm4, %v13726_v26, 0.0 }
0x2b7d   :  { %7453 = vadd.xlane.f32.xlu0 %v7452_v10 }
0x2b7f   :  { %v7436_v48 = vpop.f32.mrf.mxu2 }
0x2b80   :  { %v7440_v38 = vadd.f32 %v7436_v48, %v14947_v20  ;;  %v8348_v48 = vld [vmem:[%s13881_s9 + $0x110] sm:$0xff]  ;;  %v8347_v20 = vld [vmem:[%s13881_s9 + $0x108] sm:$0xff] }
0x2b81   :  { %7577 = vmatpush.msra.mxu2 %v8348_v48 }
0x2b82   :  { %v13731_v12 = vadd.f32 %v7444_v51, %v7440_v38  ;;  %v8346_v38 = vld [vmem:[%s13881_s9 + $0x100] sm:$0xff] }
0x2b83   :  { %7578 = vmatpush.msra.mxu2 %v8347_v20 }
0x2b84   :  { %v7455_v39 = vsel %vm14948_vm7, %v13731_v12, 0.0 }
0x2b85   :  { %7456 = vadd.xlane.f32.xlu2 %v7455_v39  ;;  %7579 = vmatpush.msra.mxu2 %v8346_v38  ;;  %v8343_v39 = vld [vmem:[%s13883_s11 + $0x40] sm:$0x3] }
0x2bf0   :  { %v7454_v25 = vpop.xlane.xlu0 %7453 }
0x2bf1   :  { %v7458_v63 = vmul.f32 %v7454_v25, %v14949_v27  ;;  %v7514_v25 = vperm.slane %v8343_v39, 0 }
0x2bf3   :  { %v7460_v46 = vsub.f32 %v13726_v26, %v7458_v63 }
0x2bf5   :  { %v7462_v32 = vmul.f32 %v7460_v46, %v7460_v46 }
0x2bf7   :  { %v7464_v52 = vsel %vm14950_vm13, %v7462_v32, 0.0 }
0x2bf8   :  { %7465 = vadd.xlane.f32.xlu1 %v7464_v52  ;;  %v7457_v0 = vpop.xlane.xlu2 %7456 }
0x2bf9   :  { %v7459_v31 = vmul.f32 %v7457_v0, %v14949_v27 }
0x2bfb   :  { %v13740_v60 = vsub.f32 %v13731_v12, %v7459_v31 }
0x2bfd   :  { %v7463_v11 = vmul.f32 %v13740_v60, %v13740_v60 }
0x2bff   :  { %v7467_v29 = vsel %vm14951_vm14, %v7463_v11, 0.0 }
0x2c00   :  { %7468 = vadd.xlane.f32.xlu0 %v7467_v29 }
0x2c6b   :  { %v7466_v54 = vpop.xlane.xlu1 %7465 }
0x2c6c   :  { %v7470_v1 = vmul.f32 %v7466_v54, %v14949_v27 }
0x2c6e   :  { %v7472_v21 = vadd.f32 1e-05, %v7470_v1 }
0x2c70   :  { %8929 = vrsqrt.f32 %v7472_v21  ;;  %vm7480_vm11 = vweird.f32 %v7472_v21 }
0x2c73   :  { %v7469_v33 = vpop.xlane.xlu0 %7468 }
0x2c74   :  { %v7471_v6 = vmul.f32 %v7469_v33, %v14949_v27 }
0x2c76   :  { %v8930_v59 = vpop.eup %8929  ;;  %v7473_v4 = vadd.f32 1e-05, %v7471_v6 }
0x2c77   :  { %v7475_v16 = vmul.f32 %v8930_v59, %v7472_v21  ;;  %vm7481_vm6 = vweird.f32 %v8930_v59 }
0x2c78   :  { %8931 = vrsqrt.f32 %v7473_v4  ;;  %vm7482_vm9 = vmor %vm7480_vm11, %vm7481_vm6  ;;  %vm7490_vm12 = vweird.f32 %v7473_v4 }
0x2c79   :  { %v7476_v61 = vmul.f32 %v8930_v59, %v7475_v16  ;;  %v7658_v16 = vld [vmem:[%s13882_s10 + $0x20] sm:$0xff] }
0x2c7b   :  { %v7477_v62 = vmul.f32 0.5, %v7476_v61 }
0x2c7d   :  { %v7478_v49 = vsub.f32 1.5, %v7477_v62 }
0x2c7e   :  { %v8932_v36 = vpop.eup %8931 }
0x2c7f   :  { %v7479_v22 = vmul.f32 %v8930_v59, %v7478_v49  ;;  %v7485_v3 = vmul.f32 %v8932_v36, %v7473_v4  ;;  %vm7491_vm1 = vweird.f32 %v8932_v36  ;;  %v7659_v49 = vld [vmem:[%s13882_s10 + $0x28] sm:$0xff] }
0x2c80   :  { %vm7492_vm2 = vmor %vm7490_vm12, %vm7491_vm1 }
0x2c81   :  { %v7483_v28 = vsel %vm7482_vm9, %v8930_v59, %v7479_v22  ;;  %v7486_v50 = vmul.f32 %v8932_v36, %v7485_v3  ;;  %v7655_v22 = vld [vmem:[%s13882_s10 + $0x8] sm:$0xff]  ;;  %vm14958_vm9 = vmmov %vm14952_vm0 }
0x2c82   :  { %v7494_v19 = vmul.f32 %v7483_v28, %v7460_v46  ;;  %vm14959_vm1 = vmmov %vm14952_vm0 }
0x2c83   :  { %v7487_v14 = vmul.f32 0.5, %v7486_v50  ;;  %vm14960_vm12 = vmmov %vm14952_vm0 }
0x2c84   :  { %v7499_v44 = vmul.f32 %v7497_v37, %v7494_v19 }
0x2c85   :  { %v7488_v8 = vsub.f32 1.5, %v7487_v14 }
0x2c86   :  { %v7504_v7 = vadd.f32 %v7502_v34, %v7499_v44 }
0x2c87   :  { %v7489_v51 = vmul.f32 %v8932_v36, %v7488_v8 }
0x2c88   :  { %8344 = vmatmul.msk.f32.vlgmr.msra.gmra.mxu1 %vm14952_vm0, %v7504_v7 }
0x2c89   :  { %v7493_v23 = vsel %vm7492_vm2, %v8932_v36, %v7489_v51  ;;  %v7657_v36 = vld [vmem:[%s13882_s10 + $0x18] sm:$0xff]  ;;  %vm14961_vm2 = vmmov %vm14952_vm0 }
0x2c8a   :  { %v7495_v57 = vmul.f32 %v7493_v23, %v13740_v60  ;;  %v8362_v60 = vld [vmem:[%s13883_s11 + $0x46] sm:$0x3] }
0x2c8b   :  { %v7592_v11 = vperm.slane %v8362_v60, 0 }
0x2c8c   :  { %v7500_v15 = vmul.f32 %v7497_v37, %v7495_v57 }
0x2c8e   :  { %v7505_v10 = vadd.f32 %v7502_v34, %v7500_v15  ;;  %v8363_v34 = vld [vmem:[%s13883_s11 + $0x14] sm:$0x3] }
0x2c8f   :  { %v7645_v5 = vperm.slane %v8363_v34, 0 }
0x2c90   :  { %8345 = vmatmul.msk.f32.gmra.mxu1 %vm14953_vm8, %v7505_v10 }
0x2d05   :  { %v7539_v63 = vpop.f32.mrf.mxu1 }
0x2d06   :  { %v7540_v46 = vadd.f32 %v7539_v63, %v7514_v25  ;;  %v8365_v63 = vld [vmem:[%s13883_s11 + $0x18] sm:$0x3] }
0x2d07   :  { %v7666_v60 = vperm.slane %v8365_v63, 1 }
0x2d08   :  { %v7545_v32 = vmax.f32 %v7540_v46, 0.0  ;;  %v7665_v46 = vperm.slane %v8365_v63, 0 }
0x2d0a   :  { %7580 = vmatmul.f32.vlgmr.msra.gmra.mxu2 %v7545_v32 }
0x2d0d   :  { %v7542_v52 = vpop.f32.mrf.mxu1 }
0x2d0e   :  { %v7543_v0 = vadd.f32 %v7542_v52, %v7514_v25 }
0x2d10   :  { %v7546_v31 = vmax.f32 %v7543_v0, 0.0 }
0x2d12   :  { %7583 = vmatmul.f32.gmra.mxu2 %v7546_v31 }
0x2d8d   :  { %v7581_v29 = vpop.f32.mrf.mxu2 }
0x2d8e   :  { %v7587_v58 = vadd.f32 %v7581_v29, %v13726_v26 }
0x2d90   :  { %v7594_v2 = vadd.f32 %v7592_v11, %v7587_v58 }
0x2d92   :  { %v7600_v18 = vsel %vm14954_vm10, %v7594_v2, 0.0 }
0x2d93   :  { %7601 = vadd.xlane.f32.xlu2 %v7600_v18 }
0x2d95   :  { %v7584_v54 = vpop.f32.mrf.mxu2 }
0x2d96   :  { %v7588_v24 = vadd.f32 %v7584_v54, %v13731_v12  ;;  %v7660_v12 = vld [vmem:[%s13882_s10 + $0x30] sm:$0xff] }
0x2d97   :  { %7687 = vmatpush.msrb.mxu1 %v7660_v12 }
0x2d98   :  { %v7595_v1 = vadd.f32 %v7592_v11, %v7588_v24 }
0x2d99   :  { %7688 = vmatpush.msrb.mxu1 %v7658_v16 }
0x2d9a   :  { %v7603_v21 = vsel %vm14955_vm5, %v7595_v1, 0.0 }
0x2d9b   :  { %7604 = vadd.xlane.f32.xlu1 %v7603_v21  ;;  %7689 = vmatpush.msrb.mxu1 %v7656_v30 }
0x2d9d   :  { %7690 = vmatpush.msrb.mxu1 %v7654_v55 }
0x2d9f   :  { %7710 = vmatpush.msra.mxu1 %v7661_v35 }
0x2da1   :  { %7711 = vmatpush.msra.mxu1 %v7659_v49 }
0x2da3   :  { %7712 = vmatpush.msra.mxu1 %v7657_v36 }
0x2da5   :  { %7713 = vmatpush.msra.mxu1 %v7655_v22 }
0x2e06   :  { %v7602_v47 = vpop.xlane.xlu2 %7601 }
0x2e07   :  { %v7606_v53 = vmul.f32 %v7602_v47, %v14949_v27 }
0x2e09   :  { %v7608_v43 = vsub.f32 %v7594_v2, %v7606_v53 }
0x2e0b   :  { %v7610_v33 = vmul.f32 %v7608_v43, %v7608_v43 }
0x2e0d   :  { %v7612_v6 = vsel %vm14956_vm15, %v7610_v33, 0.0 }
0x2e0e   :  { %v7605_v17 = vpop.xlane.xlu1 %7604  ;;  %7613 = vadd.xlane.f32.xlu0 %v7612_v6 }
0x2e0f   :  { %v7607_v26 = vmul.f32 %v7605_v17, %v14949_v27 }
0x2e11   :  { %v7609_v59 = vsub.f32 %v7595_v1, %v7607_v26 }
0x2e13   :  { %v7611_v4 = vmul.f32 %v7609_v59, %v7609_v59 }
0x2e15   :  { %v7615_v41 = vsel %vm14957_vm3, %v7611_v4, 0.0 }
0x2e16   :  { %7616 = vadd.xlane.f32.xlu2 %v7615_v41 }
0x2e81   :  { %v7614_v61 = vpop.xlane.xlu0 %7613 }
0x2e82   :  { %v7618_v62 = vmul.f32 %v7614_v61, %v14949_v27 }
0x2e84   :  { %v7620_v13 = vadd.f32 1e-05, %v7618_v62 }
0x2e86   :  { %8933 = vrsqrt.f32 %v7620_v13  ;;  %vm7628_vm7 = vweird.f32 %v7620_v13 }
0x2e89   :  { %v7617_v40 = vpop.xlane.xlu2 %7616 }
0x2e8a   :  { %v7619_v45 = vmul.f32 %v7617_v40, %v14949_v27  ;;  %v8364_v27 = vld [vmem:[%s13883_s11 + $0x16] sm:$0x3]  ;;  %s8988_s11 = smov 256  }
0x2e8b   :  { %v7650_v9 = vperm.slane %v8364_v27, 0 }
0x2e8c   :  { %v8934_v3 = vpop.eup %8933  ;;  %v7621_v37 = vadd.f32 1e-05, %v7619_v45 }
0x2e8d   :  { %v7623_v42 = vmul.f32 %v8934_v3, %v7620_v13  ;;  %vm7629_vm4 = vweird.f32 %v8934_v3 }
0x2e8e   :  { %8935 = vrsqrt.f32 %v7621_v37  ;;  %vm7630_vm13 = vmor %vm7628_vm7, %vm7629_vm4  ;;  %vm7638_vm6 = vweird.f32 %v7621_v37 }
0x2e8f   :  { %v7624_v28 = vmul.f32 %v8934_v3, %v7623_v42 }
0x2e91   :  { %v7625_v50 = vmul.f32 0.5, %v7624_v28 }
0x2e93   :  { %v7626_v19 = vsub.f32 1.5, %v7625_v50 }
0x2e94   :  { %v8936_v56 = vpop.eup %8935 }
0x2e95   :  { %v7627_v14 = vmul.f32 %v8934_v3, %v7626_v19  ;;  %v7633_v44 = vmul.f32 %v8936_v56, %v7621_v37  ;;  %vm7639_vm14 = vweird.f32 %v8936_v56 }
0x2e96   :  { %vm7640_vm11 = vmor %vm7638_vm6, %vm7639_vm14 }
0x2e97   :  { %v7631_v8 = vsel %vm7630_vm13, %v8934_v3, %v7627_v14  ;;  %v7634_v7 = vmul.f32 %v8936_v56, %v7633_v44 }
0x2e98   :  { %v7642_v51 = vmul.f32 %v7631_v8, %v7608_v43 }
0x2e99   :  { %v7635_v23 = vmul.f32 0.5, %v7634_v7 }
0x2e9a   :  { %v7647_v57 = vmul.f32 %v7645_v5, %v7642_v51 }
0x2e9b   :  { %v7636_v15 = vsub.f32 1.5, %v7635_v23 }
0x2e9c   :  { %v7652_v10 = vadd.f32 %v7650_v9, %v7647_v57 }
0x2e9d   :  { %v7637_v48 = vmul.f32 %v8936_v56, %v7636_v15 }
0x2e9e   :  { %8366 = vmatmul.msk.f32.vlgmr.msrb.gmra.mxu1 %vm14958_vm9, %v7652_v10 }
0x2e9f   :  { %v7641_v20 = vsel %vm7640_vm11, %v8936_v56, %v7637_v48 }
0x2ea0   :  { %v7643_v38 = vmul.f32 %v7641_v20, %v7609_v59 }
0x2ea2   :  { %v7648_v39 = vmul.f32 %v7645_v5, %v7643_v38 }
0x2ea4   :  { %v7653_v25 = vadd.f32 %v7650_v9, %v7648_v39 }
0x2ea6   :  { %8367 = vmatmul.msk.f32.gmra.mxu1 %vm14959_vm1, %v7653_v25 }
0x2eae   :  { %8368 = vmatmul.msk.f32.vlgmr.msra.gmra.mxu1 %vm14960_vm12, %v7652_v10 }
0x2eb6   :  { %8369 = vmatmul.msk.f32.gmra.mxu1 %vm14961_vm2, %v7653_v25 }
0x2f1b   :  { %v7692_v32 = vpop.f32.mrf.mxu1 }
0x2f1c   :  { %v7693_v52 = vadd.f32 %v7692_v32, %v7665_v46 }
0x2f1e   :  { %7721 = vst [vmem:[#allocation2] sm:$0xff] %v7693_v52 }
0x2f23   :  { %v7695_v0 = vpop.f32.mrf.mxu1 }
0x2f24   :  { %v7696_v31 = vadd.f32 %v7695_v0, %v7665_v46 }
0x2f26   :  { %7723 = vst [vmem:[#allocation2 + $0x10] sm:$0xf] %v7696_v31 }
0x2f2b   :  { %v7715_v11 = vpop.f32.mrf.mxu1 }
0x2f2c   :  { %v7716_v29 = vadd.f32 %v7715_v11, %v7666_v60 }
0x2f2e   :  { %7722 = vst [vmem:[#allocation2 + $0x8] sm:$0xff] %v7716_v29 }
0x2f33   :  { %v7718_v58 = vpop.f32.mrf.mxu1 }
0x2f34   :  { %v7719_v2 = vadd.f32 %v7718_v58, %v7666_v60 }
0x2f36   :  { %7724 = vst [vmem:[#allocation2 + $0x18] sm:$0xf] %v7719_v2 }
0x2f37   :  { %7737 = dma.vmem_to_hbm [thread:$0]  %s7730_s6, 512, %s7732_s14, [#allocation3], %s8988_s11, %s8988_s11, %s8989_s15  }
0x2f38   :  { %8977 = dma.done.wait [#allocation3], 512  }
0x2f39   :  { %8978 = vsyncadd [#allocation3], 4294966784 }
0x2f3a   :  { %7742 = vsyncpa [#allocation3], 1 }

</bundles_post_ra>
